<compile_context>
chip_gen: v7x
topology: tpu7x:2x2x1
jax: 0.10.0
libtpu: 0.0.40
codegen_flags: <defaults>
</compile_context>

<pallas_src>
import functools

import jax
import jax.numpy as jnp
import numpy as np
from jax.experimental import pallas as pl
from jax.experimental.pallas import tpu as pltpu

_BN_EPS = 1e-5
_MXU_DTYPE = jnp.bfloat16
_VMEM_LIMIT = 32 * 1024 * 1024


# ----------------------------- in-kernel helpers ----------------------------
def _zero_pad_hw(x, top, bottom, left, right):
    """Zero-pad a [H, W, C] value spatially, in-register (concat with zeros)."""
    h, w, c = x.shape
    dt = x.dtype
    x = jnp.concatenate(
        [jnp.zeros((top, w, c), dt), x, jnp.zeros((bottom, w, c), dt)], axis=0)
    hp = x.shape[0]
    x = jnp.concatenate(
        [jnp.zeros((hp, left, c), dt), x, jnp.zeros((hp, right, c), dt)], axis=1)
    return x


def _decimate_hw(x, stride):
    """[stride*ho, stride*wo, c] -> [ho, wo, c] using unit-stride ops only."""
    if stride == 1:
        return x
    sho, swo, c = x.shape
    ho, wo = sho // stride, swo // stride
    x = x.reshape(ho, stride, swo, c)[:, 0, :, :]   # keep every stride-th row
    x = x.reshape(ho, wo, stride, c)[:, :, 0, :]    # keep every stride-th col
    return x


def _im2col_3x3(xpad, ho, wo, stride):
    """[Hp, Wp, Cin] (already zero-padded) -> [ho*wo, 9*Cin] patch matrix.

    Tap ordering matches a row-major flatten of HWIO weights to [9*Cin, Cout],
    so a whole 3x3 conv becomes a single large-K MXU matmul.
    """
    cin = xpad.shape[-1]
    slabs = []
    for kh in range(3):
        for kw in range(3):
            sl = xpad[kh:kh + stride * ho, kw:kw + stride * wo, :]
            sl = _decimate_hw(sl, stride)
            slabs.append(sl.reshape(ho * wo, cin))
    return jnp.concatenate(slabs, axis=-1)


def _colsum_stats(y):
    """[M, C] f32 -> [2, C]: per-channel (sum, sum of squares)."""
    return jnp.concatenate(
        [jnp.sum(y, axis=0, keepdims=True),
         jnp.sum(y * y, axis=0, keepdims=True)], axis=0)


# --------------------------------- kernels ----------------------------------
def _stage1_kernel(*refs, stride, extra_h, extra_w, ho, wo, has_shortcut):
    """conv1 (+ optional 1x1 projection shortcut) + batch-stat accumulation."""
    if has_shortcut:
        x_ref, w1_ref, ws_ref, o1_ref, st1_ref, s_ref, sts_ref = refs
    else:
        x_ref, w1_ref, o1_ref, st1_ref = refs

    m = ho * wo
    # padding=1 halo built in-register (plus bottom/right slack so strided taps
    # stay in bounds).
    xpad = _zero_pad_hw(x_ref[...], 1, 1 + extra_h, 1, 1 + extra_w)

    patches = _im2col_3x3(xpad, ho, wo, stride)                   # [m, 9*cin]
    o1 = jnp.dot(patches.astype(_MXU_DTYPE), w1_ref[...],
                 preferred_element_type=jnp.float32)              # [m, cout]

    @pl.when(pl.program_id(0) == 0)
    def _init_stats():
        st1_ref[...] = jnp.zeros_like(st1_ref)
        if has_shortcut:
            sts_ref[...] = jnp.zeros_like(sts_ref)

    o1_ref[...] = o1
    st1_ref[...] += _colsum_stats(o1)

    if has_shortcut:
        # 1x1 strided projection conv: center tap of the padded grid.
        xs = _decimate_hw(xpad[1:1 + stride * ho, 1:1 + stride * wo, :], stride)
        s = jnp.dot(xs.reshape(m, xs.shape[-1]).astype(_MXU_DTYPE), ws_ref[...],
                    preferred_element_type=jnp.float32)
        s_ref[...] = s
        sts_ref[...] += _colsum_stats(s)


def _stage2_kernel(o1_ref, sc1_ref, sh1_ref, w2_ref, o2_ref, st2_ref, *, ho, wo):
    """bn1 (batch-stat affine) + ReLU + conv2 + batch-stat accumulation."""
    cout = o1_ref.shape[-1]
    h1 = jnp.maximum(o1_ref[...] * sc1_ref[...] + sh1_ref[...], 0.0)   # f32
    h1p = _zero_pad_hw(h1.reshape(ho, wo, cout), 1, 1, 1, 1)
    patches = _im2col_3x3(h1p, ho, wo, 1)                          # [m, 9*cout]
    o2 = jnp.dot(patches.astype(_MXU_DTYPE), w2_ref[...],
                 preferred_element_type=jnp.float32)

    @pl.when(pl.program_id(0) == 0)
    def _init_stats():
        st2_ref[...] = jnp.zeros_like(st2_ref)

    o2_ref[...] = o2
    st2_ref[...] += _colsum_stats(o2)


def _stage3_kernel(*refs, has_shortcut):
    """bn2 + shortcut (projection-bn or identity) + residual add + ReLU."""
    if has_shortcut:
        o2_ref, sc2_ref, sh2_ref, s_ref, scs_ref, shs_ref, out_ref = refs
        shortcut = s_ref[...] * scs_ref[...] + shs_ref[...]
    else:
        o2_ref, sc2_ref, sh2_ref, x_ref, out_ref = refs
        h, w, c = x_ref.shape
        shortcut = x_ref[...].reshape(h * w, c)
    out_ref[...] = jnp.maximum(
        o2_ref[...] * sc2_ref[...] + sh2_ref[...] + shortcut, 0.0)


# --------------------------------- wrapper ----------------------------------
def _bn_affine(stats, gamma, beta, count):
    """Fold full-batch statistics + (gamma, beta) into per-channel scale/shift."""
    mean = stats[0] / count
    var = stats[1] / count - mean * mean            # biased variance
    scale = gamma * jax.lax.rsqrt(var + _BN_EPS)
    shift = beta - mean * scale
    return scale.reshape(1, -1), shift.reshape(1, -1)


def _full_spec(shape):
    nd = len(shape)
    return pl.BlockSpec(shape, lambda i: (0,) * nd)


@functools.partial(jax.jit, static_argnames=("stride",))
def basic_block_forward(x_nchw, params, stride=1):
    """Pallas implementation of BasicBlock.forward. x_nchw: [N, Cin, H, W]."""
    x = jnp.transpose(x_nchw, (0, 2, 3, 1)).astype(jnp.float32)   # NHWC
    n, h, w, cin = x.shape
    cout = params["w1"].shape[-1]
    ho = (h + 2 - 3) // stride + 1
    wo = (w + 2 - 3) // stride + 1
    m = ho * wo
    m_total = float(n * m)
    has_shortcut = (stride != 1) or (cin != cout)
    extra_h = max(0, stride * ho - h)
    extra_w = max(0, stride * wo - w)

    # Weights flattened for im2col matmuls; bf16 halves DMA/VMEM and doubles
    # MXU throughput (accumulation stays f32).
    w1 = params["w1"].reshape(9 * cin, cout).astype(_MXU_DTYPE)
    w2 = params["w2"].reshape(9 * cout, cout).astype(_MXU_DTYPE)

    cp_arbitrary = pltpu.CompilerParams(
        dimension_semantics=("arbitrary",), vmem_limit_bytes=_VMEM_LIMIT)
    cp_parallel = pltpu.CompilerParams(
        dimension_semantics=("parallel",), vmem_limit_bytes=_VMEM_LIMIT)

    x_spec = pl.BlockSpec((None, h, w, cin), lambda i: (i, 0, 0, 0))
    img_spec = pl.BlockSpec((None, m, cout), lambda i: (i, 0, 0))
    stats_spec = pl.BlockSpec((2, cout), lambda i: (0, 0))   # resident accumulator
    conv_shape = jax.ShapeDtypeStruct((n, m, cout), jnp.float32)
    stats_shape = jax.ShapeDtypeStruct((2, cout), jnp.float32)

    # -------- stage 1: conv1 (+ optional shortcut conv) + batch stats --------
    k1 = functools.partial(_stage1_kernel, stride=stride, extra_h=extra_h,
                           extra_w=extra_w, ho=ho, wo=wo,
                           has_shortcut=has_shortcut)
    if has_shortcut:
        ws = params["ws"].reshape(cin, cout).astype(_MXU_DTYPE)
        o1, st1, s, sts = pl.pallas_call(
            k1,
            grid=(n,),
            in_specs=[x_spec, _full_spec(w1.shape), _full_spec(ws.shape)],
            out_specs=[img_spec, stats_spec, img_spec, stats_spec],
            out_shape=[conv_shape, stats_shape, conv_shape, stats_shape],
            compiler_params=cp_arbitrary,
        )(x, w1, ws)
    else:
        o1, st1 = pl.pallas_call(
            k1,
            grid=(n,),
            in_specs=[x_spec, _full_spec(w1.shape)],
            out_specs=[img_spec, stats_spec],
            out_shape=[conv_shape, stats_shape],
            compiler_params=cp_arbitrary,
        )(x, w1)

    # -------- stage 2: bn1 + relu + conv2 + batch stats -----------------------
    sc1, sh1 = _bn_affine(st1, params["g1"], params["b1"], m_total)
    k2 = functools.partial(_stage2_kernel, ho=ho, wo=wo)
    o2, st2 = pl.pallas_call(
        k2,
        grid=(n,),
        in_specs=[img_spec, _full_spec((1, cout)), _full_spec((1, cout)),
                  _full_spec(w2.shape)],
        out_specs=[img_spec, stats_spec],
        out_shape=[conv_shape, stats_shape],
        compiler_params=cp_arbitrary,
    )(o1, sc1, sh1, w2)

    # -------- stage 3: bn2 + shortcut + residual add + relu -------------------
    sc2, sh2 = _bn_affine(st2, params["g2"], params["b2"], m_total)
    k3 = functools.partial(_stage3_kernel, has_shortcut=has_shortcut)
    if has_shortcut:
        scs, shs = _bn_affine(sts, params["gs"], params["bs"], m_total)
        out2d = pl.pallas_call(
            k3,
            grid=(n,),
            in_specs=[img_spec, _full_spec((1, cout)), _full_spec((1, cout)),
                      img_spec, _full_spec((1, cout)), _full_spec((1, cout))],
            out_specs=img_spec,
            out_shape=conv_shape,
            compiler_params=cp_parallel,
        )(o2, sc2, sh2, s, scs, shs)
    else:
        out2d = pl.pallas_call(
            k3,
            grid=(n,),
            in_specs=[img_spec, _full_spec((1, cout)), _full_spec((1, cout)),
                      x_spec],
            out_specs=img_spec,
            out_shape=conv_shape,
            compiler_params=cp_parallel,
        )(o2, sc2, sh2, x)

    out_nhwc = out2d.reshape(n, ho, wo, cout)
    return jnp.transpose(out_nhwc, (0, 3, 1, 2))   # back to NCHW


# ----------------------------- pure-JAX reference ---------------------------
def _bn_ref(x, g, b):
    mean = jnp.mean(x, axis=(0, 1, 2), keepdims=True)
    var = jnp.mean((x - mean) ** 2, axis=(0, 1, 2), keepdims=True)
    return (x - mean) * jax.lax.rsqrt(var + _BN_EPS) * g + b


def basic_block_reference(x_nchw, params, stride=1):
    x = jnp.transpose(x_nchw, (0, 2, 3, 1)).astype(jnp.float32)
    cin = x.shape[-1]
    cout = params["w1"].shape[-1]
    dn = ("NHWC", "HWIO", "NHWC")

    def conv(inp, wgt, s, pad):
        return jax.lax.conv_general_dilated(inp, wgt, (s, s), pad,
                                            dimension_numbers=dn)

    out = conv(x, params["w1"], stride, ((1, 1), (1, 1)))
    out = jnp.maximum(_bn_ref(out, params["g1"], params["b1"]), 0.0)
    out = conv(out, params["w2"], 1, ((1, 1), (1, 1)))
    out = _bn_ref(out, params["g2"], params["b2"])
    if stride != 1 or cin != cout:
        sc = conv(x, params["ws"], stride, ((0, 0), (0, 0)))
        sc = _bn_ref(sc, params["gs"], params["bs"])
    else:
        sc = x
    out = jnp.maximum(out + sc, 0.0)
    return jnp.transpose(out, (0, 3, 1, 2))


# ----------------------------------- demo ------------------------------------
if __name__ == "__main__":
    def make_params(key, cin, cout, has_shortcut):
        ks = jax.random.split(key, 9)
        p = {
            "w1": jax.random.normal(ks[0], (3, 3, cin, cout), jnp.float32) * 0.1,
            "g1": jax.random.uniform(ks[1], (cout,), jnp.float32, 0.5, 1.5),
            "b1": jax.random.normal(ks[2], (cout,), jnp.float32) * 0.1,
            "w2": jax.random.normal(ks[3], (3, 3, cout, cout), jnp.float32) * 0.1,
            "g2": jax.random.uniform(ks[4], (cout,), jnp.float32, 0.5, 1.5),
            "b2": jax.random.normal(ks[5], (cout,), jnp.float32) * 0.1,
        }
        if has_shortcut:
            p["ws"] = jax.random.normal(ks[6], (1, 1, cin, cout), jnp.float32) * 0.1
            p["gs"] = jax.random.uniform(ks[7], (cout,), jnp.float32, 0.5, 1.5)
            p["bs"] = jax.random.normal(ks[8], (cout,), jnp.float32) * 0.1
        return p

    key = jax.random.PRNGKey(0)
    # (name, N, in_planes, planes, H, W, stride)
    cases = [
        ("projection-shortcut", 2, 4, 8, 16, 16, 1),
        ("identity-shortcut",   2, 8, 8, 16, 16, 1),
    ]
    for i, (name, n, cin, cout, h, w, stride) in enumerate(cases):
        kp, kx = jax.random.split(jax.random.fold_in(key, i))
        has_sc = (stride != 1) or (cin != cout)
        params = make_params(kp, cin, cout, has_sc)
        x = jax.random.normal(kx, (n, cin, h, w), jnp.float32)

        out = jax.block_until_ready(basic_block_forward(x, params, stride=stride))
        ref = jax.block_until_ready(basic_block_reference(x, params, stride=stride))

        ho = (h + 2 - 3) // stride + 1
        wo = (w + 2 - 3) // stride + 1
        assert out.shape == (n, cout, ho, wo), out.shape
        # bf16 MXU operands (f32 accumulation) vs. the f32 reference -> loosened
        # tolerance.
        np.testing.assert_allclose(np.asarray(out), np.asarray(ref),
                                   rtol=5e-2, atol=5e-2,
                                   err_msg=f"mismatch for case {name}")
    print("KERNEL_OK")
</pallas_src>

<mosaic_0001>
module attributes {stable_mosaic.version = 11 : i64} {
  func.func @_stage1_kernel(%arg0: i32, %arg1: memref<1x16x16x4xf32, #tpu.memory_space<vmem>>, %arg2: memref<36x8xbf16, #tpu.memory_space<vmem>>, %arg3: memref<4x8xbf16, #tpu.memory_space<vmem>>, %arg4: memref<1x256x8xf32, #tpu.memory_space<vmem>>, %arg5: memref<2x8xf32, #tpu.memory_space<vmem>>, %arg6: memref<1x256x8xf32, #tpu.memory_space<vmem>>, %arg7: memref<2x8xf32, #tpu.memory_space<vmem>>) attributes {dimension_semantics = [#tpu.dimension_semantics<arbitrary>], iteration_bounds = array<i64: 2>, scalar_prefetch = 0 : i64, scratch_operands = 0 : i64, tpu.core_type = #tpu.core_type<tc>, window_params = [{transform_indices = @transform_0, window_bounds = array<i64: 1, 16, 16, 4>}, {pipeline_mode = #tpu.pipeline_mode<synchronous>, transform_indices = @transform_1, window_bounds = array<i64: 36, 8>}, {pipeline_mode = #tpu.pipeline_mode<synchronous>, transform_indices = @transform_2, window_bounds = array<i64: 4, 8>}, {transform_indices = @transform_3, window_bounds = array<i64: 1, 256, 8>}, {pipeline_mode = #tpu.pipeline_mode<synchronous>, transform_indices = @transform_4, window_bounds = array<i64: 2, 8>}, {transform_indices = @transform_5, window_bounds = array<i64: 1, 256, 8>}, {pipeline_mode = #tpu.pipeline_mode<synchronous>, transform_indices = @transform_6, window_bounds = array<i64: 2, 8>}]} {
    %c0 = arith.constant 0 : index
    %c0_0 = arith.constant 0 : index
    %c0_1 = arith.constant 0 : index
    %c0_2 = arith.constant 0 : index
    %0 = vector.load %arg1[%c0, %c0_0, %c0_1, %c0_2] : memref<1x16x16x4xf32, #tpu.memory_space<vmem>>, vector<1x16x16x4xf32>
    %1 = vector.shape_cast %0 : vector<1x16x16x4xf32> to vector<16x16x4xf32>
    %cst = arith.constant 0.000000e+00 : f32
    %2 = vector.broadcast %cst : f32 to vector<1x16x4xf32>
    %cst_3 = arith.constant 0.000000e+00 : f32
    %3 = vector.broadcast %cst_3 : f32 to vector<1x16x4xf32>
    %4 = tpu.concatenate %2, %1, %3 in 0 : vector<1x16x4xf32>, vector<16x16x4xf32>, vector<1x16x4xf32> -> vector<18x16x4xf32>
    %cst_4 = arith.constant 0.000000e+00 : f32
    %5 = vector.broadcast %cst_4 : f32 to vector<18x1x4xf32>
    %cst_5 = arith.constant 0.000000e+00 : f32
    %6 = vector.broadcast %cst_5 : f32 to vector<18x1x4xf32>
    %7 = tpu.concatenate %5, %4, %6 in 1 : vector<18x1x4xf32>, vector<18x16x4xf32>, vector<18x1x4xf32> -> vector<18x18x4xf32>
    %8 = vector.extract_strided_slice %7 {offsets = [0, 0, 0], sizes = [16, 16, 4], strides = [1, 1, 1]} : vector<18x18x4xf32> to vector<16x16x4xf32>
    %9 = vector.shape_cast %8 : vector<16x16x4xf32> to vector<256x4xf32>
    %10 = vector.extract_strided_slice %7 {offsets = [0, 1, 0], sizes = [16, 16, 4], strides = [1, 1, 1]} : vector<18x18x4xf32> to vector<16x16x4xf32>
    %11 = vector.shape_cast %10 : vector<16x16x4xf32> to vector<256x4xf32>
    %12 = vector.extract_strided_slice %7 {offsets = [0, 2, 0], sizes = [16, 16, 4], strides = [1, 1, 1]} : vector<18x18x4xf32> to vector<16x16x4xf32>
    %13 = vector.shape_cast %12 : vector<16x16x4xf32> to vector<256x4xf32>
    %14 = vector.extract_strided_slice %7 {offsets = [1, 0, 0], sizes = [16, 16, 4], strides = [1, 1, 1]} : vector<18x18x4xf32> to vector<16x16x4xf32>
    %15 = vector.shape_cast %14 : vector<16x16x4xf32> to vector<256x4xf32>
    %16 = vector.extract_strided_slice %7 {offsets = [1, 1, 0], sizes = [16, 16, 4], strides = [1, 1, 1]} : vector<18x18x4xf32> to vector<16x16x4xf32>
    %17 = vector.shape_cast %16 : vector<16x16x4xf32> to vector<256x4xf32>
    %18 = vector.extract_strided_slice %7 {offsets = [1, 2, 0], sizes = [16, 16, 4], strides = [1, 1, 1]} : vector<18x18x4xf32> to vector<16x16x4xf32>
    %19 = vector.shape_cast %18 : vector<16x16x4xf32> to vector<256x4xf32>
    %20 = vector.extract_strided_slice %7 {offsets = [2, 0, 0], sizes = [16, 16, 4], strides = [1, 1, 1]} : vector<18x18x4xf32> to vector<16x16x4xf32>
    %21 = vector.shape_cast %20 : vector<16x16x4xf32> to vector<256x4xf32>
    %22 = vector.extract_strided_slice %7 {offsets = [2, 1, 0], sizes = [16, 16, 4], strides = [1, 1, 1]} : vector<18x18x4xf32> to vector<16x16x4xf32>
    %23 = vector.shape_cast %22 : vector<16x16x4xf32> to vector<256x4xf32>
    %24 = vector.extract_strided_slice %7 {offsets = [2, 2, 0], sizes = [16, 16, 4], strides = [1, 1, 1]} : vector<18x18x4xf32> to vector<16x16x4xf32>
    %25 = vector.shape_cast %24 : vector<16x16x4xf32> to vector<256x4xf32>
    %26 = tpu.concatenate %9, %11, %13, %15, %17, %19, %21, %23, %25 in 1 : vector<256x4xf32>, vector<256x4xf32>, vector<256x4xf32>, vector<256x4xf32>, vector<256x4xf32>, vector<256x4xf32>, vector<256x4xf32>, vector<256x4xf32>, vector<256x4xf32> -> vector<256x36xf32>
    %27 = arith.truncf %26 : vector<256x36xf32> to vector<256x36xbf16>
    %c0_6 = arith.constant 0 : index
    %c0_7 = arith.constant 0 : index
    %28 = vector.load %arg2[%c0_6, %c0_7] : memref<36x8xbf16, #tpu.memory_space<vmem>>, vector<36x8xbf16>
    %cst_8 = arith.constant dense<0.000000e+00> : vector<256x8xf32>
    %29 = tpu.matmul %27, %28, %cst_8 {dimension_numbers = #tpu.dot_dimension_numbers<[1], [0], [0], [1], [0, 0, 1, 1], [], []>} : vector<256x36xbf16>, vector<36x8xbf16>, vector<256x8xf32> -> vector<256x8xf32>
    %c0_i32 = arith.constant 0 : i32
    %30 = arith.cmpi eq, %arg0, %c0_i32 : i32
    %31 = arith.extui %30 : i1 to i32
    %c0_i32_9 = arith.constant 0 : i32
    %32 = arith.cmpi ne, %31, %c0_i32_9 : i32
    scf.if %32 {
      %cst_31 = arith.constant 0.000000e+00 : f32
      %62 = vector.broadcast %cst_31 : f32 to vector<2x8xf32>
      %c0_32 = arith.constant 0 : index
      %c0_33 = arith.constant 0 : index
      %63 = vector.load %arg5[%c0_32, %c0_33] : memref<2x8xf32, #tpu.memory_space<vmem>>, vector<2x8xf32>
      tpu.vector_store %arg5[%c0_32, %c0_33], %62 {strides = array<i32>} : memref<2x8xf32, #tpu.memory_space<vmem>>, vector<2x8xf32>,
      %cst_34 = arith.constant 0.000000e+00 : f32
      %64 = vector.broadcast %cst_34 : f32 to vector<2x8xf32>
      %c0_35 = arith.constant 0 : index
      %c0_36 = arith.constant 0 : index
      %65 = vector.load %arg7[%c0_35, %c0_36] : memref<2x8xf32, #tpu.memory_space<vmem>>, vector<2x8xf32>
      tpu.vector_store %arg7[%c0_35, %c0_36], %64 {strides = array<i32>} : memref<2x8xf32, #tpu.memory_space<vmem>>, vector<2x8xf32>,
    } else {
    }
    %c0_10 = arith.constant 0 : index
    %c0_11 = arith.constant 0 : index
    %c0_12 = arith.constant 0 : index
    %33 = vector.load %arg4[%c0_10, %c0_11, %c0_12] : memref<1x256x8xf32, #tpu.memory_space<vmem>>, vector<1x256x8xf32>
    %34 = vector.shape_cast %33 : vector<1x256x8xf32> to vector<256x8xf32>
    %35 = vector.shape_cast %29 : vector<256x8xf32> to vector<1x256x8xf32>
    tpu.vector_store %arg4[%c0_10, %c0_11, %c0_12], %35 {strides = array<i32>} : memref<1x256x8xf32, #tpu.memory_space<vmem>>, vector<1x256x8xf32>,
    %c0_13 = arith.constant 0 : index
    %c0_14 = arith.constant 0 : index
    %36 = vector.load %arg5[%c0_13, %c0_14] : memref<2x8xf32, #tpu.memory_space<vmem>>, vector<2x8xf32>
    %cst_15 = arith.constant dense<0.000000e+00> : vector<8xf32>
    %37 = vector.multi_reduction <add>, %29, %cst_15 [0] : vector<256x8xf32> to vector<8xf32>
    %38 = vector.shape_cast %37 : vector<8xf32> to vector<1x8xf32>
    %39 = arith.mulf %29, %29 : vector<256x8xf32>
    %cst_16 = arith.constant dense<0.000000e+00> : vector<8xf32>
    %40 = vector.multi_reduction <add>, %39, %cst_16 [0] : vector<256x8xf32> to vector<8xf32>
    %41 = vector.shape_cast %40 : vector<8xf32> to vector<1x8xf32>
    %42 = tpu.concatenate %38, %41 in 0 : vector<1x8xf32>, vector<1x8xf32> -> vector<2x8xf32>
    %43 = arith.addf %36, %42 : vector<2x8xf32>
    %c0_17 = arith.constant 0 : index
    %c0_18 = arith.constant 0 : index
    %44 = vector.load %arg5[%c0_17, %c0_18] : memref<2x8xf32, #tpu.memory_space<vmem>>, vector<2x8xf32>
    tpu.vector_store %arg5[%c0_17, %c0_18], %43 {strides = array<i32>} : memref<2x8xf32, #tpu.memory_space<vmem>>, vector<2x8xf32>,
    %45 = vector.extract_strided_slice %7 {offsets = [1, 1, 0], sizes = [16, 16, 4], strides = [1, 1, 1]} : vector<18x18x4xf32> to vector<16x16x4xf32>
    %46 = vector.shape_cast %45 : vector<16x16x4xf32> to vector<256x4xf32>
    %47 = arith.truncf %46 : vector<256x4xf32> to vector<256x4xbf16>
    %c0_19 = arith.constant 0 : index
    %c0_20 = arith.constant 0 : index
    %48 = vector.load %arg3[%c0_19, %c0_20] : memref<4x8xbf16, #tpu.memory_space<vmem>>, vector<4x8xbf16>
    %cst_21 = arith.constant dense<0.000000e+00> : vector<256x8xf32>
    %49 = tpu.matmul %47, %48, %cst_21 {dimension_numbers = #tpu.dot_dimension_numbers<[1], [0], [0], [1], [0, 0, 1, 1], [], []>} : vector<256x4xbf16>, vector<4x8xbf16>, vector<256x8xf32> -> vector<256x8xf32>
    %c0_22 = arith.constant 0 : index
    %c0_23 = arith.constant 0 : index
    %c0_24 = arith.constant 0 : index
    %50 = vector.load %arg6[%c0_22, %c0_23, %c0_24] : memref<1x256x8xf32, #tpu.memory_space<vmem>>, vector<1x256x8xf32>
    %51 = vector.shape_cast %50 : vector<1x256x8xf32> to vector<256x8xf32>
    %52 = vector.shape_cast %49 : vector<256x8xf32> to vector<1x256x8xf32>
    tpu.vector_store %arg6[%c0_22, %c0_23, %c0_24], %52 {strides = array<i32>} : memref<1x256x8xf32, #tpu.memory_space<vmem>>, vector<1x256x8xf32>,
    %c0_25 = arith.constant 0 : index
    %c0_26 = arith.constant 0 : index
    %53 = vector.load %arg7[%c0_25, %c0_26] : memref<2x8xf32, #tpu.memory_space<vmem>>, vector<2x8xf32>
    %cst_27 = arith.constant dense<0.000000e+00> : vector<8xf32>
    %54 = vector.multi_reduction <add>, %49, %cst_27 [0] : vector<256x8xf32> to vector<8xf32>
    %55 = vector.shape_cast %54 : vector<8xf32> to vector<1x8xf32>
    %56 = arith.mulf %49, %49 : vector<256x8xf32>
    %cst_28 = arith.constant dense<0.000000e+00> : vector<8xf32>
    %57 = vector.multi_reduction <add>, %56, %cst_28 [0] : vector<256x8xf32> to vector<8xf32>
    %58 = vector.shape_cast %57 : vector<8xf32> to vector<1x8xf32>
    %59 = tpu.concatenate %55, %58 in 0 : vector<1x8xf32>, vector<1x8xf32> -> vector<2x8xf32>
    %60 = arith.addf %53, %59 : vector<2x8xf32>
    %c0_29 = arith.constant 0 : index
    %c0_30 = arith.constant 0 : index
    %61 = vector.load %arg7[%c0_29, %c0_30] : memref<2x8xf32, #tpu.memory_space<vmem>>, vector<2x8xf32>
    tpu.vector_store %arg7[%c0_29, %c0_30], %60 {strides = array<i32>} : memref<2x8xf32, #tpu.memory_space<vmem>>, vector<2x8xf32>,
    return
  }
  func.func @transform_0(%arg0: i32) -> (i32, i32, i32, i32) {
    %c0_i32 = arith.constant 0 : i32
    %c0_i32_0 = arith.constant 0 : i32
    %c0_i32_1 = arith.constant 0 : i32
    %c0_i32_2 = arith.constant 0 : i32
    return %arg0, %c0_i32, %c0_i32_0, %c0_i32_1 : i32, i32, i32, i32
  }
  func.func @transform_1(%arg0: i32) -> (i32, i32) {
    %c0_i32 = arith.constant 0 : i32
    %c0_i32_0 = arith.constant 0 : i32
    %c0_i32_1 = arith.constant 0 : i32
    return %c0_i32, %c0_i32_0 : i32, i32
  }
  func.func @transform_2(%arg0: i32) -> (i32, i32) {
    %c0_i32 = arith.constant 0 : i32
    %c0_i32_0 = arith.constant 0 : i32
    %c0_i32_1 = arith.constant 0 : i32
    return %c0_i32, %c0_i32_0 : i32, i32
  }
  func.func @transform_3(%arg0: i32) -> (i32, i32, i32) {
    %c0_i32 = arith.constant 0 : i32
    %c0_i32_0 = arith.constant 0 : i32
    %c0_i32_1 = arith.constant 0 : i32
    return %arg0, %c0_i32, %c0_i32_0 : i32, i32, i32
  }
  func.func @transform_4(%arg0: i32) -> (i32, i32) {
    %c0_i32 = arith.constant 0 : i32
    %c0_i32_0 = arith.constant 0 : i32
    %c0_i32_1 = arith.constant 0 : i32
    return %c0_i32, %c0_i32_0 : i32, i32
  }
  func.func @transform_5(%arg0: i32) -> (i32, i32, i32) {
    %c0_i32 = arith.constant 0 : i32
    %c0_i32_0 = arith.constant 0 : i32
    %c0_i32_1 = arith.constant 0 : i32
    return %arg0, %c0_i32, %c0_i32_0 : i32, i32, i32
  }
  func.func @transform_6(%arg0: i32) -> (i32, i32) {
    %c0_i32 = arith.constant 0 : i32
    %c0_i32_0 = arith.constant 0 : i32
    %c0_i32_1 = arith.constant 0 : i32
    return %c0_i32, %c0_i32_0 : i32, i32
  }
}

module attributes {stable_mosaic.version = 11 : i64} {
  func.func @_stage2_kernel(%arg0: i32, %arg1: memref<1x256x8xf32, #tpu.memory_space<vmem>>, %arg2: memref<1x8xf32, #tpu.memory_space<vmem>>, %arg3: memref<1x8xf32, #tpu.memory_space<vmem>>, %arg4: memref<72x8xbf16, #tpu.memory_space<vmem>>, %arg5: memref<1x256x8xf32, #tpu.memory_space<vmem>>, %arg6: memref<2x8xf32, #tpu.memory_space<vmem>>) attributes {dimension_semantics = [#tpu.dimension_semantics<arbitrary>], iteration_bounds = array<i64: 2>, scalar_prefetch = 0 : i64, scratch_operands = 0 : i64, tpu.core_type = #tpu.core_type<tc>, window_params = [{transform_indices = @transform_0, window_bounds = array<i64: 1, 256, 8>}, {pipeline_mode = #tpu.pipeline_mode<synchronous>, transform_indices = @transform_1, window_bounds = array<i64: 1, 8>}, {pipeline_mode = #tpu.pipeline_mode<synchronous>, transform_indices = @transform_2, window_bounds = array<i64: 1, 8>}, {pipeline_mode = #tpu.pipeline_mode<synchronous>, transform_indices = @transform_3, window_bounds = array<i64: 72, 8>}, {transform_indices = @transform_4, window_bounds = array<i64: 1, 256, 8>}, {pipeline_mode = #tpu.pipeline_mode<synchronous>, transform_indices = @transform_5, window_bounds = array<i64: 2, 8>}]} {
    %c0 = arith.constant 0 : index
    %c0_0 = arith.constant 0 : index
    %c0_1 = arith.constant 0 : index
    %0 = vector.load %arg1[%c0, %c0_0, %c0_1] : memref<1x256x8xf32, #tpu.memory_space<vmem>>, vector<1x256x8xf32>
    %1 = vector.shape_cast %0 : vector<1x256x8xf32> to vector<256x8xf32>
    %c0_2 = arith.constant 0 : index
    %c0_3 = arith.constant 0 : index
    %2 = vector.load %arg2[%c0_2, %c0_3] : memref<1x8xf32, #tpu.memory_space<vmem>>, vector<1x8xf32>
    %3 = vector.broadcast %2 : vector<1x8xf32> to vector<256x8xf32>
    %4 = arith.mulf %1, %3 : vector<256x8xf32>
    %c0_4 = arith.constant 0 : index
    %c0_5 = arith.constant 0 : index
    %5 = vector.load %arg3[%c0_4, %c0_5] : memref<1x8xf32, #tpu.memory_space<vmem>>, vector<1x8xf32>
    %6 = vector.broadcast %5 : vector<1x8xf32> to vector<256x8xf32>
    %7 = arith.addf %4, %6 : vector<256x8xf32>
    %cst = arith.constant 0.000000e+00 : f32
    %8 = vector.broadcast %cst : f32 to vector<256x8xf32>
    %9 = arith.maximumf %7, %8 : vector<256x8xf32>
    %10 = vector.shape_cast %9 : vector<256x8xf32> to vector<16x16x8xf32>
    %cst_6 = arith.constant 0.000000e+00 : f32
    %11 = vector.broadcast %cst_6 : f32 to vector<1x16x8xf32>
    %cst_7 = arith.constant 0.000000e+00 : f32
    %12 = vector.broadcast %cst_7 : f32 to vector<1x16x8xf32>
    %13 = tpu.concatenate %11, %10, %12 in 0 : vector<1x16x8xf32>, vector<16x16x8xf32>, vector<1x16x8xf32> -> vector<18x16x8xf32>
    %cst_8 = arith.constant 0.000000e+00 : f32
    %14 = vector.broadcast %cst_8 : f32 to vector<18x1x8xf32>
    %cst_9 = arith.constant 0.000000e+00 : f32
    %15 = vector.broadcast %cst_9 : f32 to vector<18x1x8xf32>
    %16 = tpu.concatenate %14, %13, %15 in 1 : vector<18x1x8xf32>, vector<18x16x8xf32>, vector<18x1x8xf32> -> vector<18x18x8xf32>
    %17 = vector.extract_strided_slice %16 {offsets = [0, 0, 0], sizes = [16, 16, 8], strides = [1, 1, 1]} : vector<18x18x8xf32> to vector<16x16x8xf32>
    %18 = vector.shape_cast %17 : vector<16x16x8xf32> to vector<256x8xf32>
    %19 = vector.extract_strided_slice %16 {offsets = [0, 1, 0], sizes = [16, 16, 8], strides = [1, 1, 1]} : vector<18x18x8xf32> to vector<16x16x8xf32>
    %20 = vector.shape_cast %19 : vector<16x16x8xf32> to vector<256x8xf32>
    %21 = vector.extract_strided_slice %16 {offsets = [0, 2, 0], sizes = [16, 16, 8], strides = [1, 1, 1]} : vector<18x18x8xf32> to vector<16x16x8xf32>
    %22 = vector.shape_cast %21 : vector<16x16x8xf32> to vector<256x8xf32>
    %23 = vector.extract_strided_slice %16 {offsets = [1, 0, 0], sizes = [16, 16, 8], strides = [1, 1, 1]} : vector<18x18x8xf32> to vector<16x16x8xf32>
    %24 = vector.shape_cast %23 : vector<16x16x8xf32> to vector<256x8xf32>
    %25 = vector.extract_strided_slice %16 {offsets = [1, 1, 0], sizes = [16, 16, 8], strides = [1, 1, 1]} : vector<18x18x8xf32> to vector<16x16x8xf32>
    %26 = vector.shape_cast %25 : vector<16x16x8xf32> to vector<256x8xf32>
    %27 = vector.extract_strided_slice %16 {offsets = [1, 2, 0], sizes = [16, 16, 8], strides = [1, 1, 1]} : vector<18x18x8xf32> to vector<16x16x8xf32>
    %28 = vector.shape_cast %27 : vector<16x16x8xf32> to vector<256x8xf32>
    %29 = vector.extract_strided_slice %16 {offsets = [2, 0, 0], sizes = [16, 16, 8], strides = [1, 1, 1]} : vector<18x18x8xf32> to vector<16x16x8xf32>
    %30 = vector.shape_cast %29 : vector<16x16x8xf32> to vector<256x8xf32>
    %31 = vector.extract_strided_slice %16 {offsets = [2, 1, 0], sizes = [16, 16, 8], strides = [1, 1, 1]} : vector<18x18x8xf32> to vector<16x16x8xf32>
    %32 = vector.shape_cast %31 : vector<16x16x8xf32> to vector<256x8xf32>
    %33 = vector.extract_strided_slice %16 {offsets = [2, 2, 0], sizes = [16, 16, 8], strides = [1, 1, 1]} : vector<18x18x8xf32> to vector<16x16x8xf32>
    %34 = vector.shape_cast %33 : vector<16x16x8xf32> to vector<256x8xf32>
    %35 = tpu.concatenate %18, %20, %22, %24, %26, %28, %30, %32, %34 in 1 : vector<256x8xf32>, vector<256x8xf32>, vector<256x8xf32>, vector<256x8xf32>, vector<256x8xf32>, vector<256x8xf32>, vector<256x8xf32>, vector<256x8xf32>, vector<256x8xf32> -> vector<256x72xf32>
    %36 = arith.truncf %35 : vector<256x72xf32> to vector<256x72xbf16>
    %c0_10 = arith.constant 0 : index
    %c0_11 = arith.constant 0 : index
    %37 = vector.load %arg4[%c0_10, %c0_11] : memref<72x8xbf16, #tpu.memory_space<vmem>>, vector<72x8xbf16>
    %cst_12 = arith.constant dense<0.000000e+00> : vector<256x8xf32>
    %38 = tpu.matmul %36, %37, %cst_12 {dimension_numbers = #tpu.dot_dimension_numbers<[1], [0], [0], [1], [0, 0, 1, 1], [], []>} : vector<256x72xbf16>, vector<72x8xbf16>, vector<256x8xf32> -> vector<256x8xf32>
    %c0_i32 = arith.constant 0 : i32
    %39 = arith.cmpi eq, %arg0, %c0_i32 : i32
    %40 = arith.extui %39 : i1 to i32
    %c0_i32_13 = arith.constant 0 : i32
    %41 = arith.cmpi ne, %40, %c0_i32_13 : i32
    scf.if %41 {
      %cst_23 = arith.constant 0.000000e+00 : f32
      %54 = vector.broadcast %cst_23 : f32 to vector<2x8xf32>
      %c0_24 = arith.constant 0 : index
      %c0_25 = arith.constant 0 : index
      %55 = vector.load %arg6[%c0_24, %c0_25] : memref<2x8xf32, #tpu.memory_space<vmem>>, vector<2x8xf32>
      tpu.vector_store %arg6[%c0_24, %c0_25], %54 {strides = array<i32>} : memref<2x8xf32, #tpu.memory_space<vmem>>, vector<2x8xf32>,
    } else {
    }
    %c0_14 = arith.constant 0 : index
    %c0_15 = arith.constant 0 : index
    %c0_16 = arith.constant 0 : index
    %42 = vector.load %arg5[%c0_14, %c0_15, %c0_16] : memref<1x256x8xf32, #tpu.memory_space<vmem>>, vector<1x256x8xf32>
    %43 = vector.shape_cast %42 : vector<1x256x8xf32> to vector<256x8xf32>
    %44 = vector.shape_cast %38 : vector<256x8xf32> to vector<1x256x8xf32>
    tpu.vector_store %arg5[%c0_14, %c0_15, %c0_16], %44 {strides = array<i32>} : memref<1x256x8xf32, #tpu.memory_space<vmem>>, vector<1x256x8xf32>,
    %c0_17 = arith.constant 0 : index
    %c0_18 = arith.constant 0 : index
    %45 = vector.load %arg6[%c0_17, %c0_18] : memref<2x8xf32, #tpu.memory_space<vmem>>, vector<2x8xf32>
    %cst_19 = arith.constant dense<0.000000e+00> : vector<8xf32>
    %46 = vector.multi_reduction <add>, %38, %cst_19 [0] : vector<256x8xf32> to vector<8xf32>
    %47 = vector.shape_cast %46 : vector<8xf32> to vector<1x8xf32>
    %48 = arith.mulf %38, %38 : vector<256x8xf32>
    %cst_20 = arith.constant dense<0.000000e+00> : vector<8xf32>
    %49 = vector.multi_reduction <add>, %48, %cst_20 [0] : vector<256x8xf32> to vector<8xf32>
    %50 = vector.shape_cast %49 : vector<8xf32> to vector<1x8xf32>
    %51 = tpu.concatenate %47, %50 in 0 : vector<1x8xf32>, vector<1x8xf32> -> vector<2x8xf32>
    %52 = arith.addf %45, %51 : vector<2x8xf32>
    %c0_21 = arith.constant 0 : index
    %c0_22 = arith.constant 0 : index
    %53 = vector.load %arg6[%c0_21, %c0_22] : memref<2x8xf32, #tpu.memory_space<vmem>>, vector<2x8xf32>
    tpu.vector_store %arg6[%c0_21, %c0_22], %52 {strides = array<i32>} : memref<2x8xf32, #tpu.memory_space<vmem>>, vector<2x8xf32>,
    return
  }
  func.func @transform_0(%arg0: i32) -> (i32, i32, i32) {
    %c0_i32 = arith.constant 0 : i32
    %c0_i32_0 = arith.constant 0 : i32
    %c0_i32_1 = arith.constant 0 : i32
    return %arg0, %c0_i32, %c0_i32_0 : i32, i32, i32
  }
  func.func @transform_1(%arg0: i32) -> (i32, i32) {
    %c0_i32 = arith.constant 0 : i32
    %c0_i32_0 = arith.constant 0 : i32
    %c0_i32_1 = arith.constant 0 : i32
    return %c0_i32, %c0_i32_0 : i32, i32
  }
  func.func @transform_2(%arg0: i32) -> (i32, i32) {
    %c0_i32 = arith.constant 0 : i32
    %c0_i32_0 = arith.constant 0 : i32
    %c0_i32_1 = arith.constant 0 : i32
    return %c0_i32, %c0_i32_0 : i32, i32
  }
  func.func @transform_3(%arg0: i32) -> (i32, i32) {
    %c0_i32 = arith.constant 0 : i32
    %c0_i32_0 = arith.constant 0 : i32
    %c0_i32_1 = arith.constant 0 : i32
    return %c0_i32, %c0_i32_0 : i32, i32
  }
  func.func @transform_4(%arg0: i32) -> (i32, i32, i32) {
    %c0_i32 = arith.constant 0 : i32
    %c0_i32_0 = arith.constant 0 : i32
    %c0_i32_1 = arith.constant 0 : i32
    return %arg0, %c0_i32, %c0_i32_0 : i32, i32, i32
  }
  func.func @transform_5(%arg0: i32) -> (i32, i32) {
    %c0_i32 = arith.constant 0 : i32
    %c0_i32_0 = arith.constant 0 : i32
    %c0_i32_1 = arith.constant 0 : i32
    return %c0_i32, %c0_i32_0 : i32, i32
  }
}

module attributes {stable_mosaic.version = 11 : i64} {
  func.func @_stage3_kernel(%arg0: i32, %arg1: memref<1x256x8xf32, #tpu.memory_space<vmem>>, %arg2: memref<1x8xf32, #tpu.memory_space<vmem>>, %arg3: memref<1x8xf32, #tpu.memory_space<vmem>>, %arg4: memref<1x256x8xf32, #tpu.memory_space<vmem>>, %arg5: memref<1x8xf32, #tpu.memory_space<vmem>>, %arg6: memref<1x8xf32, #tpu.memory_space<vmem>>, %arg7: memref<1x256x8xf32, #tpu.memory_space<vmem>>) attributes {dimension_semantics = [#tpu.dimension_semantics<parallel>], iteration_bounds = array<i64: 2>, scalar_prefetch = 0 : i64, scratch_operands = 0 : i64, tpu.core_type = #tpu.core_type<tc>, window_params = [{transform_indices = @transform_0, window_bounds = array<i64: 1, 256, 8>}, {pipeline_mode = #tpu.pipeline_mode<synchronous>, transform_indices = @transform_1, window_bounds = array<i64: 1, 8>}, {pipeline_mode = #tpu.pipeline_mode<synchronous>, transform_indices = @transform_2, window_bounds = array<i64: 1, 8>}, {transform_indices = @transform_3, window_bounds = array<i64: 1, 256, 8>}, {pipeline_mode = #tpu.pipeline_mode<synchronous>, transform_indices = @transform_4, window_bounds = array<i64: 1, 8>}, {pipeline_mode = #tpu.pipeline_mode<synchronous>, transform_indices = @transform_5, window_bounds = array<i64: 1, 8>}, {transform_indices = @transform_6, window_bounds = array<i64: 1, 256, 8>}]} {
    %c0 = arith.constant 0 : index
    %c0_0 = arith.constant 0 : index
    %c0_1 = arith.constant 0 : index
    %0 = vector.load %arg4[%c0, %c0_0, %c0_1] : memref<1x256x8xf32, #tpu.memory_space<vmem>>, vector<1x256x8xf32>
    %1 = vector.shape_cast %0 : vector<1x256x8xf32> to vector<256x8xf32>
    %c0_2 = arith.constant 0 : index
    %c0_3 = arith.constant 0 : index
    %2 = vector.load %arg5[%c0_2, %c0_3] : memref<1x8xf32, #tpu.memory_space<vmem>>, vector<1x8xf32>
    %3 = vector.broadcast %2 : vector<1x8xf32> to vector<256x8xf32>
    %4 = arith.mulf %1, %3 : vector<256x8xf32>
    %c0_4 = arith.constant 0 : index
    %c0_5 = arith.constant 0 : index
    %5 = vector.load %arg6[%c0_4, %c0_5] : memref<1x8xf32, #tpu.memory_space<vmem>>, vector<1x8xf32>
    %6 = vector.broadcast %5 : vector<1x8xf32> to vector<256x8xf32>
    %7 = arith.addf %4, %6 : vector<256x8xf32>
    %c0_6 = arith.constant 0 : index
    %c0_7 = arith.constant 0 : index
    %c0_8 = arith.constant 0 : index
    %8 = vector.load %arg1[%c0_6, %c0_7, %c0_8] : memref<1x256x8xf32, #tpu.memory_space<vmem>>, vector<1x256x8xf32>
    %9 = vector.shape_cast %8 : vector<1x256x8xf32> to vector<256x8xf32>
    %c0_9 = arith.constant 0 : index
    %c0_10 = arith.constant 0 : index
    %10 = vector.load %arg2[%c0_9, %c0_10] : memref<1x8xf32, #tpu.memory_space<vmem>>, vector<1x8xf32>
    %11 = vector.broadcast %10 : vector<1x8xf32> to vector<256x8xf32>
    %12 = arith.mulf %9, %11 : vector<256x8xf32>
    %c0_11 = arith.constant 0 : index
    %c0_12 = arith.constant 0 : index
    %13 = vector.load %arg3[%c0_11, %c0_12] : memref<1x8xf32, #tpu.memory_space<vmem>>, vector<1x8xf32>
    %14 = vector.broadcast %13 : vector<1x8xf32> to vector<256x8xf32>
    %15 = arith.addf %12, %14 : vector<256x8xf32>
    %16 = arith.addf %15, %7 : vector<256x8xf32>
    %cst = arith.constant 0.000000e+00 : f32
    %17 = vector.broadcast %cst : f32 to vector<256x8xf32>
    %18 = arith.maximumf %16, %17 : vector<256x8xf32>
    %c0_13 = arith.constant 0 : index
    %c0_14 = arith.constant 0 : index
    %c0_15 = arith.constant 0 : index
    %19 = vector.load %arg7[%c0_13, %c0_14, %c0_15] : memref<1x256x8xf32, #tpu.memory_space<vmem>>, vector<1x256x8xf32>
    %20 = vector.shape_cast %19 : vector<1x256x8xf32> to vector<256x8xf32>
    %21 = vector.shape_cast %18 : vector<256x8xf32> to vector<1x256x8xf32>
    tpu.vector_store %arg7[%c0_13, %c0_14, %c0_15], %21 {strides = array<i32>} : memref<1x256x8xf32, #tpu.memory_space<vmem>>, vector<1x256x8xf32>,
    return
  }
  func.func @transform_0(%arg0: i32) -> (i32, i32, i32) {
    %c0_i32 = arith.constant 0 : i32
    %c0_i32_0 = arith.constant 0 : i32
    %c0_i32_1 = arith.constant 0 : i32
    return %arg0, %c0_i32, %c0_i32_0 : i32, i32, i32
  }
  func.func @transform_1(%arg0: i32) -> (i32, i32) {
    %c0_i32 = arith.constant 0 : i32
    %c0_i32_0 = arith.constant 0 : i32
    %c0_i32_1 = arith.constant 0 : i32
    return %c0_i32, %c0_i32_0 : i32, i32
  }
  func.func @transform_2(%arg0: i32) -> (i32, i32) {
    %c0_i32 = arith.constant 0 : i32
    %c0_i32_0 = arith.constant 0 : i32
    %c0_i32_1 = arith.constant 0 : i32
    return %c0_i32, %c0_i32_0 : i32, i32
  }
  func.func @transform_3(%arg0: i32) -> (i32, i32, i32) {
    %c0_i32 = arith.constant 0 : i32
    %c0_i32_0 = arith.constant 0 : i32
    %c0_i32_1 = arith.constant 0 : i32
    return %arg0, %c0_i32, %c0_i32_0 : i32, i32, i32
  }
  func.func @transform_4(%arg0: i32) -> (i32, i32) {
    %c0_i32 = arith.constant 0 : i32
    %c0_i32_0 = arith.constant 0 : i32
    %c0_i32_1 = arith.constant 0 : i32
    return %c0_i32, %c0_i32_0 : i32, i32
  }
  func.func @transform_5(%arg0: i32) -> (i32, i32) {
    %c0_i32 = arith.constant 0 : i32
    %c0_i32_0 = arith.constant 0 : i32
    %c0_i32_1 = arith.constant 0 : i32
    return %c0_i32, %c0_i32_0 : i32, i32
  }
  func.func @transform_6(%arg0: i32) -> (i32, i32, i32) {
    %c0_i32 = arith.constant 0 : i32
    %c0_i32_0 = arith.constant 0 : i32
    %c0_i32_1 = arith.constant 0 : i32
    return %arg0, %c0_i32, %c0_i32_0 : i32, i32, i32
  }
}

</mosaic_0001>

<bundles_post_ra>
// kernel: basic_block_forward.5
= control target key start
LH: loop header
LB: loop body
LE: loop exit
PB: predicated region body
PF: predicated region fallthrough
CT: control target
= control target key end

     0   :  { %s727_s21 = smov 0   ;;  %s1034_s0 = inlined_call_operand.vmem [shape: f32[2,256,8], index: 0, kind: input, shape index: {}]   ;;  %s1035_s1 = inlined_call_operand.vmem [shape: f32[1,8], index: 1, kind: input, shape index: {}]   ;;  %s1036_s2 = inlined_call_operand.vmem [shape: f32[1,8], index: 2, kind: input, shape index: {}]   ;;  %s1037_s3 = inlined_call_operand.vmem [shape: f32[2,256,8], index: 3, kind: input, shape index: {}]   ;;  %s1038_s4 = inlined_call_operand.vmem [shape: f32[1,8], index: 4, kind: input, shape index: {}]   ;;  %s1039_s5 = inlined_call_operand.vmem [shape: f32[1,8], index: 5, kind: input, shape index: {}]   ;;  %s1040_s6 = inlined_call_operand.vmem [shape: f32[2,256,8], index: 6, kind: output, shape index: {}]  }
   0x1 LB: > { %s656_s22 = sadd.s32 4294967295, %s690_s21   ;;  %p660_p0 = scmp.ge.s32.totalorder %s690_s21, 1  ;;  %s690_s21 = sphi %s727_s21, %s16_s21  }
   0x2   : > { %p222_p1 = scmp.lt.s32.totalorder %s690_s21, 3 }
   0x4   : > { %p223_p2 = pnand %p660_p0, %p222_p1 }
   0x5   : > { %p257_p3 = scmp.lt.s32.totalorder (!%p223_p2), %s656_s22, 1  ;;  %v740_v0 = vld [vmem:[%s1038_s4] ss:$0 sm:$0xff] (!%p223_p2)  ;;  %vm556_vm0 = vcmask (!%p223_p2), 64512  }
   0x6   : > { %226 = sbr.rel (%p223_p2) target bundleno = 71 (0x47), region = 44  ;;  %v745_v1 = vld [vmem:[%s1035_s1] ss:$0 sm:$0xff] (!%p223_p2) }
   0x7   : > { %v762_v2 = vld [vmem:[%s1039_s5] ss:$0 sm:$0xff] (!%p223_p2) }
   0x8   : > { %v767_v3 = vld [vmem:[%s1036_s2] ss:$0 sm:$0xff] (!%p223_p2) }
   0xd   : > { %s1042_s22 = smov (!%p257_p3, %s656_s22), 1 }
   0xe   : > { %s735_s23 = sshll.u32 %s1042_s22, 8 }
   0xf   : > { %s751_s30 = scalar_lea.vmem %s1034_s0, %s735_s23  ;;  %s757_s9 = scalar_lea.vmem %s1037_s3, %s735_s23 }
  0x10   : > { %v272_v4 = vld [vmem:[%s757_s9] sm:$0xff]  ;;  %v273_v6 = vld [vmem:[%s757_s9 + $0x8] sm:$0xff]  ;;  %v274_v11 = vld [vmem:[%s757_s9 + $0x10] sm:$0xff]  ;;  %s802_s16 = scalar_lea.vmem %s1040_s6, %s735_s23 }
  0x11   : > { %v382_v5 = vld [vmem:[%s751_s30] sm:$0xff]  ;;  %v311_v7 = vmul.f32 %v740_v0, %v272_v4  ;;  %v312_v9 = vmul.f32 %v740_v0, %v273_v6  ;;  %v383_v10 = vld [vmem:[%s751_s30 + $0x8] sm:$0xff]  ;;  %v384_v12 = vld [vmem:[%s751_s30 + $0x10] sm:$0xff]  ;;  %v313_v14 = vmul.f32 %v740_v0, %v274_v11 }
  0x12   : > { %v421_v8 = vmul.f32 %v745_v1, %v382_v5  ;;  %v422_v13 = vmul.f32 %v745_v1, %v383_v10  ;;  %v423_v15 = vmul.f32 %v745_v1, %v384_v12  ;;  %v275_v16 = vld [vmem:[%s757_s9 + $0x18] sm:$0xff]  ;;  %v276_v18 = vld [vmem:[%s757_s9 + $0x20] sm:$0xff]  ;;  %v277_v24 = vld [vmem:[%s757_s9 + $0x28] sm:$0xff] }
  0x13   : > { %v385_v17 = vld [vmem:[%s751_s30 + $0x18] sm:$0xff]  ;;  %v350_v19 = vadd.f32 %v762_v2, %v311_v7  ;;  %v351_v21 = vadd.f32 %v762_v2, %v312_v9  ;;  %v314_v22 = vmul.f32 %v740_v0, %v275_v16  ;;  %v386_v23 = vld [vmem:[%s751_s30 + $0x20] sm:$0xff]  ;;  %v352_v26 = vadd.f32 %v762_v2, %v313_v14  ;;  %v387_v29 = vld [vmem:[%s751_s30 + $0x28] sm:$0xff] }
  0x14   : > { %v460_v20 = vadd.f32 %v767_v3, %v421_v8  ;;  %v461_v25 = vadd.f32 %v767_v3, %v422_v13  ;;  %v462_v27 = vadd.f32 %v767_v3, %v423_v15  ;;  %v424_v28 = vmul.f32 %v745_v1, %v385_v17  ;;  %v278_v38 = vld [vmem:[%s757_s9 + $0x30] sm:$0xff]  ;;  %v279_v44 = vld [vmem:[%s757_s9 + $0x38] sm:$0xff]  ;;  %v280_v46 = vld [vmem:[%s757_s9 + $0x40] sm:$0xff] }
  0x15   : > { %v353_v31 = vadd.f32 %v762_v2, %v314_v22  ;;  %v315_v32 = vmul.f32 %v740_v0, %v276_v18  ;;  %v425_v33 = vmul.f32 %v745_v1, %v386_v23  ;;  %v316_v37 = vmul.f32 %v740_v0, %v277_v24  ;;  %v388_v39 = vld [vmem:[%s751_s30 + $0x30] sm:$0xff]  ;;  %v389_v45 = vld [vmem:[%s751_s30 + $0x38] sm:$0xff]  ;;  %v390_v55 = vld [vmem:[%s751_s30 + $0x40] sm:$0xff] }
  0x16   : > { %v492_v30 = vadd.f32 %v460_v20, %v350_v19  ;;  %v493_v34 = vadd.f32 %v461_v25, %v351_v21  ;;  %v494_v35 = vadd.f32 %v462_v27, %v352_v26  ;;  %v463_v36 = vadd.f32 %v767_v3, %v424_v28  ;;  %v281_v60 = vld [vmem:[%s757_s9 + $0x48] sm:$0xff]  ;;  %v282_v6 = vld [vmem:[%s757_s9 + $0x50] sm:$0xff]  ;;  %v283_v12 = vld [vmem:[%s757_s9 + $0x58] sm:$0xff] }
  0x17   : > { %v354_v41 = vadd.f32 %v762_v2, %v315_v32  ;;  %v464_v42 = vadd.f32 %v767_v3, %v425_v33  ;;  %v426_v43 = vmul.f32 %v745_v1, %v387_v29  ;;  %v355_v50 = vadd.f32 %v762_v2, %v316_v37  ;;  %v391_v61 = vld [vmem:[%s751_s30 + $0x48] sm:$0xff]  ;;  %v392_v7 = vld [vmem:[%s751_s30 + $0x50] sm:$0xff]  ;;  %v393_v21 = vld [vmem:[%s751_s30 + $0x58] sm:$0xff] }
  0x18   : > { %v524_v40 = vmax.f32 %v492_v30, 0.0  ;;  %v525_v47 = vmax.f32 %v493_v34, 0.0  ;;  %v526_v48 = vmax.f32 %v494_v35, 0.0  ;;  %v495_v49 = vadd.f32 %v463_v36, %v353_v31  ;;  %v284_v22 = vld [vmem:[%s757_s9 + $0x60] sm:$0xff]  ;;  %v285_v28 = vld [vmem:[%s757_s9 + $0x68] sm:$0xff] }
  0x19   : > { %v496_v51 = vadd.f32 %v464_v42, %v354_v41  ;;  %v465_v52 = vadd.f32 %v767_v3, %v426_v43  ;;  %v317_v53 = vmul.f32 %v740_v0, %v278_v38  ;;  %v427_v54 = vmul.f32 %v745_v1, %v388_v39  ;;  %v394_v27 = vld [vmem:[%s751_s30 + $0x60] sm:$0xff]  ;;  %v395_v33 = vld [vmem:[%s751_s30 + $0x68] sm:$0xff]  ;;  %v286_v38 = vld [vmem:[%s757_s9 + $0x70] sm:$0xff] }
  0x1a   : > { %557 = vst.msk [vmem:[%s802_s16] sm:$0xff] %vm556_vm0, %v524_v40  ;;  %558 = vst.msk [vmem:[%s802_s16 + $0x8] sm:$0xff] %vm556_vm0, %v525_v47  ;;  %v527_v56 = vmax.f32 %v495_v49, 0.0  ;;  %v318_v57 = vmul.f32 %v740_v0, %v279_v44  ;;  %v428_v58 = vmul.f32 %v745_v1, %v389_v45  ;;  %v319_v59 = vmul.f32 %v740_v0, %v280_v46  ;;  %v396_v43 = vld [vmem:[%s751_s30 + $0x70] sm:$0xff]  ;;  %v287_v44 = vld [vmem:[%s757_s9 + $0x78] sm:$0xff] }
  0x1b   : > { %559 = vst.msk [vmem:[%s802_s16 + $0x10] sm:$0xff] %vm556_vm0, %v526_v48  ;;  %v528_v62 = vmax.f32 %v496_v51, 0.0  ;;  %v497_v63 = vadd.f32 %v465_v52, %v355_v50  ;;  %v356_v4 = vadd.f32 %v762_v2, %v317_v53  ;;  %v466_v5 = vadd.f32 %v767_v3, %v427_v54  ;;  %v397_v49 = vld [vmem:[%s751_s30 + $0x78] sm:$0xff]  ;;  %v288_v50 = vld [vmem:[%s757_s9 + $0x80] sm:$0xff] }
  0x1c   : > { %560 = vst.msk [vmem:[%s802_s16 + $0x18] sm:$0xff] %vm556_vm0, %v527_v56  ;;  %v357_v8 = vadd.f32 %v762_v2, %v318_v57  ;;  %v467_v9 = vadd.f32 %v767_v3, %v428_v58  ;;  %v358_v10 = vadd.f32 %v762_v2, %v319_v59  ;;  %v429_v11 = vmul.f32 %v745_v1, %v390_v55  ;;  %v398_v59 = vld [vmem:[%s751_s30 + $0x80] sm:$0xff] }
  0x1d   : > { %561 = vst.msk [vmem:[%s802_s16 + $0x20] sm:$0xff] %vm556_vm0, %v528_v62  ;;  %v529_v13 = vmax.f32 %v497_v63, 0.0  ;;  %v498_v14 = vadd.f32 %v466_v5, %v356_v4  ;;  %v320_v15 = vmul.f32 %v740_v0, %v281_v60  ;;  %v430_v16 = vmul.f32 %v745_v1, %v391_v61  ;;  %v289_v4 = vld [vmem:[%s757_s9 + $0x88] sm:$0xff] }
  0x1e   : > { %v499_v17 = vadd.f32 %v467_v9, %v357_v8  ;;  %v468_v18 = vadd.f32 %v767_v3, %v429_v11  ;;  %v321_v19 = vmul.f32 %v740_v0, %v282_v6  ;;  %v431_v20 = vmul.f32 %v745_v1, %v392_v7  ;;  %v399_v5 = vld [vmem:[%s751_s30 + $0x88] sm:$0xff]  ;;  %v400_v11 = vld [vmem:[%s751_s30 + $0x90] sm:$0xff] }
  0x1f   : > { %562 = vst.msk [vmem:[%s802_s16 + $0x28] sm:$0xff] %vm556_vm0, %v529_v13  ;;  %v530_v23 = vmax.f32 %v498_v14, 0.0  ;;  %v359_v24 = vadd.f32 %v762_v2, %v320_v15  ;;  %v469_v25 = vadd.f32 %v767_v3, %v430_v16  ;;  %v322_v26 = vmul.f32 %v740_v0, %v283_v12  ;;  %v291_v16 = vld [vmem:[%s757_s9 + $0x98] sm:$0xff] }
  0x20   : > { %v531_v29 = vmax.f32 %v499_v17, 0.0  ;;  %v500_v30 = vadd.f32 %v468_v18, %v358_v10  ;;  %v360_v31 = vadd.f32 %v762_v2, %v321_v19  ;;  %v470_v32 = vadd.f32 %v767_v3, %v431_v20  ;;  %v290_v10 = vld [vmem:[%s757_s9 + $0x90] sm:$0xff] }
  0x21   : > { %563 = vst.msk [vmem:[%s802_s16 + $0x30] sm:$0xff] %vm556_vm0, %v530_v23  ;;  %v501_v34 = vadd.f32 %v469_v25, %v359_v24  ;;  %v361_v35 = vadd.f32 %v762_v2, %v322_v26  ;;  %v432_v36 = vmul.f32 %v745_v1, %v393_v21  ;;  %v323_v37 = vmul.f32 %v740_v0, %v284_v22  ;;  %v401_v25 = vld [vmem:[%s751_s30 + $0x98] sm:$0xff]  ;;  %v292_v26 = vld [vmem:[%s757_s9 + $0xa0] sm:$0xff] }
  0x22   : > { %564 = vst.msk [vmem:[%s802_s16 + $0x38] sm:$0xff] %vm556_vm0, %v531_v29  ;;  %v532_v39 = vmax.f32 %v500_v30, 0.0  ;;  %v502_v40 = vadd.f32 %v470_v32, %v360_v31  ;;  %v433_v41 = vmul.f32 %v745_v1, %v394_v27  ;;  %v324_v42 = vmul.f32 %v740_v0, %v285_v28  ;;  %v402_v31 = vld [vmem:[%s751_s30 + $0xa0] sm:$0xff]  ;;  %v293_v32 = vld [vmem:[%s757_s9 + $0xa8] sm:$0xff] }
  0x23   : > { %v533_v45 = vmax.f32 %v501_v34, 0.0  ;;  %v471_v46 = vadd.f32 %v767_v3, %v432_v36  ;;  %v362_v47 = vadd.f32 %v762_v2, %v323_v37  ;;  %v434_v48 = vmul.f32 %v745_v1, %v395_v33  ;;  %v403_v37 = vld [vmem:[%s751_s30 + $0xa8] sm:$0xff] }
  0x24   : > { %565 = vst.msk [vmem:[%s802_s16 + $0x40] sm:$0xff] %vm556_vm0, %v532_v39  ;;  %v534_v51 = vmax.f32 %v502_v40, 0.0  ;;  %v472_v52 = vadd.f32 %v767_v3, %v433_v41  ;;  %v363_v53 = vadd.f32 %v762_v2, %v324_v42  ;;  %v325_v54 = vmul.f32 %v740_v0, %v286_v38  ;;  %v294_v42 = vld [vmem:[%s757_s9 + $0xb0] sm:$0xff] }
  0x25   : > { %566 = vst.msk [vmem:[%s802_s16 + $0x48] sm:$0xff] %vm556_vm0, %v533_v45  ;;  %v503_v55 = vadd.f32 %v471_v46, %v361_v35  ;;  %v473_v56 = vadd.f32 %v767_v3, %v434_v48  ;;  %v435_v57 = vmul.f32 %v745_v1, %v396_v43  ;;  %v326_v58 = vmul.f32 %v740_v0, %v287_v44  ;;  %v295_v48 = vld [vmem:[%s757_s9 + $0xb8] sm:$0xff] }
  0x26   : > { %567 = vst.msk [vmem:[%s802_s16 + $0x50] sm:$0xff] %vm556_vm0, %v534_v51  ;;  %v504_v60 = vadd.f32 %v472_v52, %v362_v47  ;;  %v364_v61 = vadd.f32 %v762_v2, %v325_v54  ;;  %v436_v62 = vmul.f32 %v745_v1, %v397_v49  ;;  %v327_v63 = vmul.f32 %v740_v0, %v288_v50  ;;  %v404_v47 = vld [vmem:[%s751_s30 + $0xb0] sm:$0xff]  ;;  %v296_v54 = vld [vmem:[%s757_s9 + $0xc0] sm:$0xff] }
  0x27   : > { %v535_v6 = vmax.f32 %v503_v55, 0.0  ;;  %v505_v7 = vadd.f32 %v473_v56, %v363_v53  ;;  %v474_v8 = vadd.f32 %v767_v3, %v435_v57  ;;  %v365_v9 = vadd.f32 %v762_v2, %v326_v58  ;;  %v405_v53 = vld [vmem:[%s751_s30 + $0xb8] sm:$0xff] }
  0x28   : > { %v536_v12 = vmax.f32 %v504_v60, 0.0  ;;  %v475_v13 = vadd.f32 %v767_v3, %v436_v62  ;;  %v366_v14 = vadd.f32 %v762_v2, %v327_v63  ;;  %v437_v15 = vmul.f32 %v745_v1, %v398_v59  ;;  %v406_v63 = vld [vmem:[%s751_s30 + $0xc0] sm:$0xff] }
  0x29   : > { %568 = vst.msk [vmem:[%s802_s16 + $0x58] sm:$0xff] %vm556_vm0, %v535_v6  ;;  %v537_v17 = vmax.f32 %v505_v7, 0.0  ;;  %v506_v18 = vadd.f32 %v474_v8, %v364_v61  ;;  %v328_v19 = vmul.f32 %v740_v0, %v289_v4  ;;  %v438_v20 = vmul.f32 %v745_v1, %v399_v5  ;;  %v297_v8 = vld [vmem:[%s757_s9 + $0xc8] sm:$0xff] }
  0x2a   : > { %569 = vst.msk [vmem:[%s802_s16 + $0x60] sm:$0xff] %vm556_vm0, %v536_v12  ;;  %v507_v21 = vadd.f32 %v475_v13, %v365_v9  ;;  %v476_v22 = vadd.f32 %v767_v3, %v437_v15  ;;  %v329_v23 = vmul.f32 %v740_v0, %v290_v10  ;;  %v439_v24 = vmul.f32 %v745_v1, %v400_v11  ;;  %v407_v9 = vld [vmem:[%s751_s30 + $0xc8] sm:$0xff]  ;;  %v408_v15 = vld [vmem:[%s751_s30 + $0xd0] sm:$0xff] }
  0x2b   : > { %570 = vst.msk [vmem:[%s802_s16 + $0x68] sm:$0xff] %vm556_vm0, %v537_v17  ;;  %v538_v27 = vmax.f32 %v506_v18, 0.0  ;;  %v367_v28 = vadd.f32 %v762_v2, %v328_v19  ;;  %v477_v29 = vadd.f32 %v767_v3, %v438_v20  ;;  %v330_v30 = vmul.f32 %v740_v0, %v291_v16  ;;  %v299_v20 = vld [vmem:[%s757_s9 + $0xd8] sm:$0xff] }
  0x2c   : > { %v539_v33 = vmax.f32 %v507_v21, 0.0  ;;  %v508_v34 = vadd.f32 %v476_v22, %v366_v14  ;;  %v368_v35 = vadd.f32 %v762_v2, %v329_v23  ;;  %v478_v36 = vadd.f32 %v767_v3, %v439_v24  ;;  %v298_v14 = vld [vmem:[%s757_s9 + $0xd0] sm:$0xff] }
  0x2d   : > { %571 = vst.msk [vmem:[%s802_s16 + $0x70] sm:$0xff] %vm556_vm0, %v538_v27  ;;  %v509_v38 = vadd.f32 %v477_v29, %v367_v28  ;;  %v369_v39 = vadd.f32 %v762_v2, %v330_v30  ;;  %v440_v40 = vmul.f32 %v745_v1, %v401_v25  ;;  %v331_v41 = vmul.f32 %v740_v0, %v292_v26  ;;  %v409_v29 = vld [vmem:[%s751_s30 + $0xd8] sm:$0xff]  ;;  %v300_v30 = vld [vmem:[%s757_s9 + $0xe0] sm:$0xff] }
  0x2e   : > { %572 = vst.msk [vmem:[%s802_s16 + $0x78] sm:$0xff] %vm556_vm0, %v539_v33  ;;  %v540_v43 = vmax.f32 %v508_v34, 0.0  ;;  %v510_v44 = vadd.f32 %v478_v36, %v368_v35  ;;  %v441_v45 = vmul.f32 %v745_v1, %v402_v31  ;;  %v332_v46 = vmul.f32 %v740_v0, %v293_v32  ;;  %v410_v35 = vld [vmem:[%s751_s30 + $0xe0] sm:$0xff]  ;;  %v301_v36 = vld [vmem:[%s757_s9 + $0xe8] sm:$0xff] }
  0x2f   : > { %v541_v49 = vmax.f32 %v509_v38, 0.0  ;;  %v479_v50 = vadd.f32 %v767_v3, %v440_v40  ;;  %v370_v51 = vadd.f32 %v762_v2, %v331_v41  ;;  %v442_v52 = vmul.f32 %v745_v1, %v403_v37  ;;  %v411_v41 = vld [vmem:[%s751_s30 + $0xe8] sm:$0xff] }
  0x30   : > { %573 = vst.msk [vmem:[%s802_s16 + $0x80] sm:$0xff] %vm556_vm0, %v540_v43  ;;  %v542_v55 = vmax.f32 %v510_v44, 0.0  ;;  %v480_v56 = vadd.f32 %v767_v3, %v441_v45  ;;  %v371_v57 = vadd.f32 %v762_v2, %v332_v46  ;;  %v333_v58 = vmul.f32 %v740_v0, %v294_v42  ;;  %v302_v46 = vld [vmem:[%s757_s9 + $0xf0] sm:$0xff] }
  0x31   : > { %574 = vst.msk [vmem:[%s802_s16 + $0x88] sm:$0xff] %vm556_vm0, %v541_v49  ;;  %v511_v59 = vadd.f32 %v479_v50, %v369_v39  ;;  %v481_v60 = vadd.f32 %v767_v3, %v442_v52  ;;  %v443_v61 = vmul.f32 %v745_v1, %v404_v47  ;;  %v334_v62 = vmul.f32 %v740_v0, %v295_v48  ;;  %v303_v52 = vld [vmem:[%s757_s9 + $0xf8] sm:$0xff] }
  0x32   : > { %575 = vst.msk [vmem:[%s802_s16 + $0x90] sm:$0xff] %vm556_vm0, %v542_v55  ;;  %v512_v4 = vadd.f32 %v480_v56, %v370_v51  ;;  %v372_v5 = vadd.f32 %v762_v2, %v333_v58  ;;  %v444_v6 = vmul.f32 %v745_v1, %v405_v53  ;;  %v335_v7 = vmul.f32 %v740_v0, %v296_v54  ;;  %v412_v51 = vld [vmem:[%s751_s30 + $0xf0] sm:$0xff] }
  0x33   : > { %v543_v10 = vmax.f32 %v511_v59, 0.0  ;;  %v513_v11 = vadd.f32 %v481_v60, %v371_v57  ;;  %v482_v12 = vadd.f32 %v767_v3, %v443_v61  ;;  %v373_v13 = vadd.f32 %v762_v2, %v334_v62  ;;  %v413_v57 = vld [vmem:[%s751_s30 + $0xf8] sm:$0xff] }
  0x34   : > { %v544_v16 = vmax.f32 %v512_v4, 0.0  ;;  %v483_v17 = vadd.f32 %v767_v3, %v444_v6  ;;  %v374_v18 = vadd.f32 %v762_v2, %v335_v7  ;;  %v445_v19 = vmul.f32 %v745_v1, %v406_v63 }
  0x35   : > { %576 = vst.msk [vmem:[%s802_s16 + $0x98] sm:$0xff] %vm556_vm0, %v543_v10  ;;  %v545_v21 = vmax.f32 %v513_v11, 0.0  ;;  %v514_v22 = vadd.f32 %v482_v12, %v372_v5  ;;  %v336_v23 = vmul.f32 %v740_v0, %v297_v8  ;;  %v446_v24 = vmul.f32 %v745_v1, %v407_v9 }
  0x36   : > { %577 = vst.msk [vmem:[%s802_s16 + $0xa0] sm:$0xff] %vm556_vm0, %v544_v16  ;;  %v515_v25 = vadd.f32 %v483_v17, %v373_v13  ;;  %v484_v26 = vadd.f32 %v767_v3, %v445_v19  ;;  %v337_v27 = vmul.f32 %v740_v0, %v298_v14  ;;  %v447_v28 = vmul.f32 %v745_v1, %v408_v15 }
  0x37   : > { %578 = vst.msk [vmem:[%s802_s16 + $0xa8] sm:$0xff] %vm556_vm0, %v545_v21  ;;  %v546_v31 = vmax.f32 %v514_v22, 0.0  ;;  %v375_v32 = vadd.f32 %v762_v2, %v336_v23  ;;  %v485_v33 = vadd.f32 %v767_v3, %v446_v24  ;;  %v338_v34 = vmul.f32 %v740_v0, %v299_v20 }
  0x38   : > { %v547_v37 = vmax.f32 %v515_v25, 0.0  ;;  %v516_v38 = vadd.f32 %v484_v26, %v374_v18  ;;  %v376_v39 = vadd.f32 %v762_v2, %v337_v27  ;;  %v486_v40 = vadd.f32 %v767_v3, %v447_v28 }
  0x39   : > { %579 = vst.msk [vmem:[%s802_s16 + $0xb0] sm:$0xff] %vm556_vm0, %v546_v31  ;;  %v517_v42 = vadd.f32 %v485_v33, %v375_v32  ;;  %v377_v43 = vadd.f32 %v762_v2, %v338_v34  ;;  %v448_v44 = vmul.f32 %v745_v1, %v409_v29  ;;  %v339_v45 = vmul.f32 %v740_v0, %v300_v30 }
  0x3a   : > { %580 = vst.msk [vmem:[%s802_s16 + $0xb8] sm:$0xff] %vm556_vm0, %v547_v37  ;;  %v548_v47 = vmax.f32 %v516_v38, 0.0  ;;  %v518_v48 = vadd.f32 %v486_v40, %v376_v39  ;;  %v449_v49 = vmul.f32 %v745_v1, %v410_v35  ;;  %v340_v50 = vmul.f32 %v740_v0, %v301_v36 }
  0x3b   : > { %v549_v53 = vmax.f32 %v517_v42, 0.0  ;;  %v487_v54 = vadd.f32 %v767_v3, %v448_v44  ;;  %v378_v55 = vadd.f32 %v762_v2, %v339_v45  ;;  %v450_v56 = vmul.f32 %v745_v1, %v411_v41 }
  0x3c   : > { %581 = vst.msk [vmem:[%s802_s16 + $0xc0] sm:$0xff] %vm556_vm0, %v548_v47  ;;  %v550_v58 = vmax.f32 %v518_v48, 0.0  ;;  %v488_v59 = vadd.f32 %v767_v3, %v449_v49  ;;  %v379_v60 = vadd.f32 %v762_v2, %v340_v50  ;;  %v341_v61 = vmul.f32 %v740_v0, %v302_v46 }
  0x3d   : > { %582 = vst.msk [vmem:[%s802_s16 + $0xc8] sm:$0xff] %vm556_vm0, %v549_v53  ;;  %v519_v62 = vadd.f32 %v487_v54, %v377_v43  ;;  %v489_v63 = vadd.f32 %v767_v3, %v450_v56  ;;  %v451_v4 = vmul.f32 %v745_v1, %v412_v51  ;;  %v342_v5 = vmul.f32 %v740_v0, %v303_v52 }
  0x3e   : > { %583 = vst.msk [vmem:[%s802_s16 + $0xd0] sm:$0xff] %vm556_vm0, %v550_v58  ;;  %v520_v6 = vadd.f32 %v488_v59, %v378_v55  ;;  %v380_v7 = vadd.f32 %v762_v2, %v341_v61  ;;  %v452_v8 = vmul.f32 %v745_v1, %v413_v57 }
  0x3f   : > { %v551_v9 = vmax.f32 %v519_v62, 0.0  ;;  %v521_v10 = vadd.f32 %v489_v63, %v379_v60  ;;  %v490_v11 = vadd.f32 %v767_v3, %v451_v4  ;;  %v381_v12 = vadd.f32 %v762_v2, %v342_v5 }
  0x40   : > { %v552_v13 = vmax.f32 %v520_v6, 0.0  ;;  %v491_v14 = vadd.f32 %v767_v3, %v452_v8 }
  0x41   : > { %584 = vst.msk [vmem:[%s802_s16 + $0xd8] sm:$0xff] %vm556_vm0, %v551_v9  ;;  %v553_v0 = vmax.f32 %v521_v10, 0.0  ;;  %v522_v15 = vadd.f32 %v490_v11, %v380_v7 }
  0x42   : > { %585 = vst.msk [vmem:[%s802_s16 + $0xe0] sm:$0xff] %vm556_vm0, %v552_v13  ;;  %v523_v16 = vadd.f32 %v491_v14, %v381_v12 }
  0x43   : > { %586 = vst.msk [vmem:[%s802_s16 + $0xe8] sm:$0xff] %vm556_vm0, %v553_v0  ;;  %v554_v1 = vmax.f32 %v522_v15, 0.0 }
  0x44   : > { %v555_v17 = vmax.f32 %v523_v16, 0.0 }
  0x45   : > { %587 = vst.msk [vmem:[%s802_s16 + $0xf0] sm:$0xff] %vm556_vm0, %v554_v1 }
  0x46   : > { %588 = vst.msk [vmem:[%s802_s16 + $0xf8] sm:$0xff] %vm556_vm0, %v555_v17 }
  0x47 PF: > { %s16_s21 = sadd.s32 1, %s690_s21  }
  0x48   : > { %p13_p4 = scmp.ge.s32.totalorder %s16_s21, 4  }
  0x4a   :  { %15 = sbr.rel (!%p13_p4) target bundleno = 1 (0x1), region = 77 }

// kernel: basic_block_forward.4
= control target key start
LH: loop header
LB: loop body
LE: loop exit
PB: predicated region body
PF: predicated region fallthrough
CT: control target
= control target key end

     0   :  { %s3134_s18 = smov 0   ;;  %s4956_s0 = inlined_call_operand.vmem [shape: f32[2,256,8], index: 0, kind: input, shape index: {}]   ;;  %s4957_s1 = inlined_call_operand.vmem [shape: f32[1,8], index: 1, kind: input, shape index: {}]   ;;  %s4958_s2 = inlined_call_operand.vmem [shape: f32[1,8], index: 2, kind: input, shape index: {}]   ;;  %s4959_s3 = inlined_call_operand.vmem [shape: bf16[72,8], index: 3, kind: input, shape index: {}]   ;;  %s4960_s4 = inlined_call_operand.vmem [shape: f32[2,256,8], index: 4, kind: output, shape index: {0}]   ;;  %s4961_s5 = inlined_call_operand.vmem [shape: f32[2,8], index: 5, kind: output, shape index: {1}]  }
   0x1 LB: > { %s3140_s19 = sadd.s32 4294967295, %s3092_s18   ;;  %p2315_p0 = scmp.ge.s32.totalorder %s3092_s18, 1  ;;  %s3092_s18 = sphi %s3134_s18, %s16_s18  }
   0x2   : > { %p185_p1 = scmp.lt.s32.totalorder %s3092_s18, 3 }
   0x4   : > { %p186_p2 = pnand %p2315_p0, %p185_p1 }
   0x6   : > { %189 = sbr.rel (%p186_p2) target bundleno = 735 (0x2df), region = 36 }
   0xd   : > { %vm399_vm0 = vcmask 1040384   ;;  %p213_p3 = scmp.lt.s32.totalorder %s3140_s19, 1  ;;  %v3094_v0 = vmov 0.0   ;;  %vm565_vm1 = vcmask 1046528   ;;  %vm646_vm2 = vcmask 1045504   ;;  %s3095_s7 = smov 8  }
   0xe   : > { %v3145_v1 = vrot.slane %v3094_v0, 7  ;;  %v3158_v5 = vld [vmem:[%s4957_s1] ss:$0 sm:$0xff]  ;;  %s3096_s8 = smov 16   ;;  %s3097_s9 = smov 24   ;;  %vm1872_vm3 = vcmask 1043456  }
   0xf   : > { %s214_s20 = scalar_select %p213_p3, %s3140_s19, 1  ;;  %v3165_v9 = vld [vmem:[%s4958_s2] ss:$0 sm:$0xff]  ;;  %vm1507_vm4 = vcmask 64512   ;;  %vm1540_vm5 = vcmask 130048   ;;  %vm1573_vm6 = vcmask 195584  }
  0x10   : > { %5024 = vst [vmem:[#allocation2_spill] sm:$0xff] %v3145_v1  ;;  %v3150_v2 = vsel %vm399_vm0, 0.0, %v3145_v1  ;;  %v516_v3 = vsel %vm399_vm0, %v3145_v1, 0.0  ;;  %v567_v4 = vrot.slane %v3145_v1, 1  ;;  %v648_v6 = vrot.slane %v3145_v1, 2  ;;  %s3098_s10 = smov 32  }
  0x11   : > { %5025 = vst [vmem:[#allocation3_spill] sm:$0xff] %v3150_v2  ;;  %v566_v7 = vrot.slane %v3150_v2, 1  ;;  %v569_v8 = vrot.slane %v516_v3, 1  ;;  %s2346_s23 = sshll.u32 %s214_s20, 8  ;;  %v647_v10 = vrot.slane %v3150_v2, 2  ;;  %v650_v13 = vrot.slane %v516_v3, 2 }
  0x12   : > { %s3171_s28 = scalar_lea.vmem %s4956_s0, %s2346_s23  ;;  %s3176_s6 = scalar_lea.vmem %s4960_s4, %s2346_s23  ;;  %vm1606_vm7 = vcmask 261120   ;;  %vm1639_vm8 = vcmask 326656   ;;  %vm1672_vm9 = vcmask 392192   ;;  %vm1705_vm10 = vcmask 457728  }
  0x13   : > { %v568_v11 = vsel %vm565_vm1, %v566_v7, %v567_v4  ;;  %v570_v12 = vsel %vm565_vm1, %v567_v4, %v569_v8  ;;  %v226_v14 = vld [vmem:[%s3171_s28 + $0x10] sm:$0xff]  ;;  %v227_v15 = vld [vmem:[%s3171_s28 + $0x18] sm:$0xff]  ;;  %v224_v16 = vld [vmem:[%s3171_s28] sm:$0xff]  ;;  %v3184_v17 = vsel %vm646_vm2, %v647_v10, %v648_v6  ;;  %v3212_v49 = vsel %vm646_vm2, %v648_v6, %v650_v13  ;;  %s3099_s11 = smov 40   ;;  %s3100_s16 = smov 48  }
  0x14   : > { %v3186_v18 = vpack.i.bf16 %v570_v12, %v568_v11  ;;  %v265_v19 = vmul.f32 %v3158_v5, %v226_v14  ;;  %v266_v20 = vmul.f32 %v3158_v5, %v227_v15  ;;  %v225_v21 = vld [vmem:[%s3171_s28 + $0x8] sm:$0xff]  ;;  %v228_v22 = vld [vmem:[%s3171_s28 + $0x20] sm:$0xff]  ;;  %v263_v24 = vmul.f32 %v3158_v5, %v224_v16  ;;  %v230_v28 = vld [vmem:[%s3171_s28 + $0x30] sm:$0xff]  ;;  %s3101_s23 = smov 56   ;;  %s3102_s26 = smov 64  }
  0x15   : > { %v229_v23 = vld [vmem:[%s3171_s28 + $0x28] sm:$0xff]  ;;  %v264_v25 = vmul.f32 %v3158_v5, %v225_v21  ;;  %v267_v26 = vmul.f32 %v3158_v5, %v228_v22  ;;  %v231_v29 = vld [vmem:[%s3171_s28 + $0x38] sm:$0xff]  ;;  %v269_v32 = vmul.f32 %v3158_v5, %v230_v28  ;;  %v232_v4 = vld [vmem:[%s3171_s28 + $0x40] sm:$0xff]  ;;  %vm1738_vm11 = vcmask 523264   ;;  %p2343_p4 = scmp.ne.s32.totalorder %s3140_s19, 0 }
  0x16   : > { %5026 = vst [vmem:[#allocation4_spill] sm:$0xff] %v3186_v18  ;;  %v268_v27 = vmul.f32 %v3158_v5, %v229_v23  ;;  %2442 = vrot.lane.b32.xlu0 %v3186_v18, %s3095_s7  ;;  %v304_v30 = vadd.f32 %v3165_v9, %v265_v19  ;;  %v305_v31 = vadd.f32 %v3165_v9, %v266_v20  ;;  %v233_v21 = vld [vmem:[%s3171_s28 + $0x48] sm:$0xff]  ;;  %vm1823_vm12 = vcmask 588800  }
  0x17   : > { %v270_v33 = vmul.f32 %v3158_v5, %v231_v29  ;;  %v302_v34 = vadd.f32 %v3165_v9, %v263_v24  ;;  %v303_v35 = vadd.f32 %v3165_v9, %v264_v25  ;;  %v306_v36 = vadd.f32 %v3165_v9, %v267_v26  ;;  %v234_v26 = vld [vmem:[%s3171_s28 + $0x50] sm:$0xff] }
  0x18   : > { %v307_v37 = vadd.f32 %v3165_v9, %v268_v27  ;;  %v336_v38 = vmax.f32 %v304_v30, 0.0  ;;  %v337_v39 = vmax.f32 %v305_v31, 0.0  ;;  %v308_v40 = vadd.f32 %v3165_v9, %v269_v32  ;;  %v235_v31 = vld [vmem:[%s3171_s28 + $0x58] sm:$0xff]  ;;  %v236_v32 = vld [vmem:[%s3171_s28 + $0x60] sm:$0xff] }
  0x19   : > { %v309_v41 = vadd.f32 %v3165_v9, %v270_v33  ;;  %v334_v42 = vmax.f32 %v302_v34, 0.0  ;;  %v335_v43 = vmax.f32 %v303_v35, 0.0  ;;  %v338_v44 = vmax.f32 %v306_v36, 0.0  ;;  %v237_v33 = vld [vmem:[%s3171_s28 + $0x68] sm:$0xff] }
  0x1a   : > { %v339_v45 = vmax.f32 %v307_v37, 0.0  ;;  %v405_v46 = vrot.slane %v336_v38, 7  ;;  %v406_v47 = vrot.slane %v337_v39, 7  ;;  %v340_v48 = vmax.f32 %v308_v40, 0.0 }
  0x1b   : > { %v402_v50 = vrot.slane %v334_v42, 7  ;;  %v403_v51 = vrot.slane %v335_v43, 7  ;;  %v408_v52 = vrot.slane %v338_v44, 7  ;;  %v341_v57 = vmax.f32 %v309_v41, 0.0 }
  0x1c   : > { %v409_v53 = vrot.slane %v339_v45, 7  ;;  %v3215_v54 = vsel %vm399_vm0, %v405_v46, %v406_v47  ;;  %v3218_v55 = vsel %vm399_vm0, 0.0, %v405_v46  ;;  %v3221_v56 = vsel %vm399_vm0, %v406_v47, 0.0  ;;  %v238_v46 = vld [vmem:[%s3171_s28 + $0x70] sm:$0xff] }
  0x1d   : > { %v576_v58 = vrot.slane %v3218_v55, 1  ;;  %v577_v59 = vrot.slane %v3215_v54, 1  ;;  %v579_v60 = vrot.slane %v3221_v56, 1  ;;  %v411_v61 = vrot.slane %v340_v48, 7 }
  0x1e   : > { %v3227_v62 = vsel %vm399_vm0, %v402_v50, %v403_v51  ;;  %v3230_v63 = vsel %vm399_vm0, 0.0, %v402_v50  ;;  %v3233_v0 = vsel %vm399_vm0, %v403_v51, 0.0  ;;  %v3236_v3 = vsel %vm399_vm0, %v408_v52, %v409_v53 }
  0x1f   : > { %5027 = vst [vmem:[#allocation5_spill] sm:$0xff] %v3236_v3  ;;  %v578_v6 = vsel %vm565_vm1, %v576_v58, %v577_v59  ;;  %v580_v7 = vsel %vm565_vm1, %v577_v59, %v579_v60  ;;  %v571_v8 = vrot.slane %v3230_v63, 1  ;;  %v572_v10 = vrot.slane %v3227_v62, 1 }
  0x20   : > { %v3243_v11 = vpack.i.bf16 %v580_v7, %v578_v6  ;;  %v574_v12 = vrot.slane %v3233_v0, 1  ;;  %v3247_v13 = vsel %vm399_vm0, 0.0, %v408_v52  ;;  %v3250_v14 = vsel %vm399_vm0, %v409_v53, 0.0  ;;  %v239_v52 = vld [vmem:[%s3171_s28 + $0x78] sm:$0xff] }
  0x21   : > { %5029 = vst [vmem:[#allocation7_spill] sm:$0xff] %v3247_v13  ;;  %v573_v15 = vsel %vm565_vm1, %v571_v8, %v572_v10  ;;  %v581_v16 = vrot.slane %v3247_v13, 1  ;;  %v582_v19 = vrot.slane %v3236_v3, 1  ;;  %v584_v20 = vrot.slane %v3250_v14, 1 }
  0x22   : > { %5028 = vst [vmem:[#allocation6_spill] sm:$0xff] %v3243_v11  ;;  %2452 = vrot.lane.b32.xlu1 %v3243_v11, %s3095_s7  ;;  %v575_v22 = vsel %vm565_vm1, %v572_v10, %v574_v12  ;;  %v412_v23 = vrot.slane %v341_v57, 7  ;;  %v3261_v24 = vsel %vm399_vm0, 0.0, %v411_v61  ;;  %v271_v25 = vmul.f32 %v3158_v5, %v232_v4 }
  0x23   : > { %v3265_v27 = vpack.i.bf16 %v575_v22, %v573_v15  ;;  %v583_v28 = vsel %vm565_vm1, %v581_v16, %v582_v19  ;;  %v585_v29 = vsel %vm565_vm1, %v582_v19, %v584_v20  ;;  %v586_v30 = vrot.slane %v3261_v24, 1 }
  0x24   : > { %v3273_v34 = vpack.i.bf16 %v585_v29, %v583_v28  ;;  %v3276_v35 = vsel %vm399_vm0, %v411_v61, %v412_v23  ;;  %v3279_v36 = vsel %vm399_vm0, %v412_v23, 0.0  ;;  %v272_v37 = vmul.f32 %v3158_v5, %v233_v21 }
  0x25   : > { %5030 = vst [vmem:[#allocation8_spill] sm:$0xff] %v3265_v27  ;;  %2447 = vrot.lane.b32.xlu0 %v3265_v27, %s3095_s7  ;;  %v587_v38 = vrot.slane %v3276_v35, 1  ;;  %v589_v39 = vrot.slane %v3279_v36, 1  ;;  %v310_v40 = vadd.f32 %v3165_v9, %v271_v25  ;;  %v273_v41 = vmul.f32 %v3158_v5, %v234_v26 }
  0x26   : > { %5031 = vst [vmem:[#allocation9_spill] sm:$0xff] %v3273_v34  ;;  %2457 = vrot.lane.b32.xlu1 %v3273_v34, %s3095_s7  ;;  %v311_v42 = vadd.f32 %v3165_v9, %v272_v37  ;;  %v274_v43 = vmul.f32 %v3158_v5, %v235_v31  ;;  %v275_v44 = vmul.f32 %v3158_v5, %v236_v32  ;;  %v658_v34 = vrot.slane %v3215_v54, 2 }
  0x27   : > { %v276_v45 = vmul.f32 %v3158_v5, %v237_v33  ;;  %v588_v47 = vsel %vm565_vm1, %v586_v30, %v587_v38  ;;  %v590_v48 = vsel %vm565_vm1, %v587_v38, %v589_v39  ;;  %v342_v50 = vmax.f32 %v310_v40, 0.0 }
  0x28   : > { %v312_v51 = vadd.f32 %v3165_v9, %v273_v41  ;;  %v3299_v53 = vpack.i.bf16 %v590_v48, %v588_v47  ;;  %v343_v57 = vmax.f32 %v311_v42, 0.0  ;;  %v313_v58 = vadd.f32 %v3165_v9, %v274_v43  ;;  %v241_v47 = vld [vmem:[%s3171_s28 + $0x88] sm:$0xff]  ;;  %v242_v48 = vld [vmem:[%s3171_s28 + $0x90] sm:$0xff] }
  0x29   : > { %v314_v59 = vadd.f32 %v3165_v9, %v275_v44  ;;  %v414_v60 = vrot.slane %v342_v50, 7  ;;  %v315_v4 = vadd.f32 %v3165_v9, %v276_v45  ;;  %v277_v6 = vmul.f32 %v3158_v5, %v238_v46  ;;  %v240_v46 = vld [vmem:[%s3171_s28 + $0x80] sm:$0xff] }
  0x2a   : > { %5032 = vst [vmem:[#allocation10_spill] sm:$0xff] %v3299_v53  ;;  %v344_v61 = vmax.f32 %v312_v51, 0.0  ;;  %2462 = vrot.lane.b32.xlu0 %v3299_v53, %s3095_s7  ;;  %v415_v7 = vrot.slane %v343_v57, 7  ;;  %v345_v8 = vmax.f32 %v313_v58, 0.0  ;;  %v278_v12 = vmul.f32 %v3158_v5, %v239_v52  ;;  %v243_v58 = vld [vmem:[%s3171_s28 + $0x98] sm:$0xff] }
  0x2b   : > { %v346_v10 = vmax.f32 %v314_v59, 0.0  ;;  %v3309_v15 = vsel %vm399_vm0, 0.0, %v414_v60  ;;  %v347_v19 = vmax.f32 %v315_v4, 0.0  ;;  %v316_v20 = vadd.f32 %v3165_v9, %v277_v6 }
  0x2c   : > { %v417_v16 = vrot.slane %v344_v61, 7  ;;  %v3313_v21 = vsel %vm399_vm0, %v414_v60, %v415_v7  ;;  %v3316_v22 = vsel %vm399_vm0, %v415_v7, 0.0  ;;  %v591_v23 = vrot.slane %v3309_v15, 1 }
  0x2d   : > { %v418_v25 = vrot.slane %v345_v8, 7  ;;  %v592_v26 = vrot.slane %v3313_v21, 1  ;;  %v594_v28 = vrot.slane %v3316_v22, 1  ;;  %v420_v30 = vrot.slane %v346_v10, 7 }
  0x2e   : > { %v3322_v29 = vsel %vm399_vm0, 0.0, %v417_v16  ;;  %v421_v37 = vrot.slane %v347_v19, 7  ;;  %v317_v61 = vadd.f32 %v3165_v9, %v278_v12  ;;  %v348_v4 = vmax.f32 %v316_v20, 0.0 }
  0x2f   : > { %v3325_v31 = vsel %vm399_vm0, %v417_v16, %v418_v25  ;;  %v3328_v32 = vsel %vm399_vm0, %v418_v25, 0.0  ;;  %v596_v33 = vrot.slane %v3322_v29, 1  ;;  %v593_v38 = vsel %vm565_vm1, %v591_v23, %v592_v26  ;;  %v244_v16 = vld [vmem:[%s3171_s28 + $0xa0] sm:$0xff] }
  0x30   : > { %v595_v39 = vsel %vm565_vm1, %v592_v26, %v594_v28  ;;  %v597_v40 = vrot.slane %v3325_v31, 1  ;;  %v599_v41 = vrot.slane %v3328_v32, 1  ;;  %v3338_v43 = vsel %vm399_vm0, %v420_v30, %v421_v37 }
  0x31   : > { %v3335_v42 = vpack.i.bf16 %v595_v39, %v593_v38  ;;  %v3341_v44 = vsel %vm399_vm0, 0.0, %v420_v30  ;;  %v3344_v45 = vsel %vm399_vm0, %v421_v37, 0.0  ;;  %v602_v57 = vrot.slane %v3338_v43, 1 }
  0x32   : > { %v598_v50 = vsel %vm565_vm1, %v596_v33, %v597_v40  ;;  %v600_v51 = vsel %vm565_vm1, %v597_v40, %v599_v41  ;;  %v601_v52 = vrot.slane %v3341_v44, 1  ;;  %v604_v60 = vrot.slane %v3344_v45, 1  ;;  %v245_v33 = vld [vmem:[%s3171_s28 + $0xa8] sm:$0xff] }
  0x33   : > { %5033 = vst [vmem:[#allocation11_spill] sm:$0xff] %v3335_v42  ;;  %2467 = vrot.lane.b32.xlu1 %v3335_v42, %s3095_s7  ;;  %v3356_v59 = vpack.i.bf16 %v600_v51, %v598_v50  ;;  %v279_v7 = vmul.f32 %v3158_v5, %v240_v46  ;;  %v280_v8 = vmul.f32 %v3158_v5, %v241_v47  ;;  %v349_v23 = vmax.f32 %v317_v61, 0.0  ;;  %v252_v42 = vld [vmem:[%s3171_s28 + $0xe0] sm:$0xff] }
  0x34   : > { %v603_v6 = vsel %vm565_vm1, %v601_v52, %v602_v57  ;;  %v281_v10 = vmul.f32 %v3158_v5, %v242_v48  ;;  %v605_v19 = vsel %vm565_vm1, %v602_v57, %v604_v60  ;;  %v423_v25 = vrot.slane %v348_v4, 7 }
  0x35   : > { %5034 = vst [vmem:[#allocation12_spill] sm:$0xff] %v3356_v59  ;;  %2472 = vrot.lane.b32.xlu0 %v3356_v59, %s3095_s7  ;;  %v282_v12 = vmul.f32 %v3158_v5, %v243_v58  ;;  %v3369_v26 = vpack.i.bf16 %v605_v19, %v603_v6  ;;  %v318_v20 = vadd.f32 %v3165_v9, %v279_v7  ;;  %v424_v37 = vrot.slane %v349_v23, 7 }
  0x36   : > { %v319_v28 = vadd.f32 %v3165_v9, %v280_v8  ;;  %v320_v30 = vadd.f32 %v3165_v9, %v281_v10  ;;  %v3376_v38 = vsel %vm399_vm0, 0.0, %v423_v25  ;;  %v283_v40 = vmul.f32 %v3158_v5, %v244_v16 }
  0x37   : > { %5035 = vst [vmem:[#allocation13_spill] sm:$0xff] %v3369_v26  ;;  %5036 = vst [vmem:[#allocation14_spill] sm:$0xff] %v3376_v38  ;;  %v321_v39 = vadd.f32 %v3165_v9, %v282_v12  ;;  %2477 = vrot.lane.b32.xlu1 %v3369_v26, %s3095_s7  ;;  %v606_v41 = vrot.slane %v3376_v38, 1  ;;  %v350_v46 = vmax.f32 %v318_v20, 0.0  ;;  %v3384_v50 = vsel %vm399_vm0, %v423_v25, %v424_v37 }
  0x38   : > { %v351_v47 = vmax.f32 %v319_v28, 0.0  ;;  %v352_v48 = vmax.f32 %v320_v30, 0.0  ;;  %5037 = vst [vmem:[#allocation15_spill] sm:$0xff] %v3384_v50  ;;  %v3387_v51 = vsel %vm399_vm0, %v424_v37, 0.0  ;;  %v284_v57 = vmul.f32 %v3158_v5, %v245_v33  ;;  %v246_v33 = vld [vmem:[%s3171_s28 + $0xb0] sm:$0xff] }
  0x39   : > { %v353_v52 = vmax.f32 %v321_v39, 0.0  ;;  %v607_v58 = vrot.slane %v3384_v50, 1  ;;  %v609_v60 = vrot.slane %v3387_v51, 1  ;;  %v426_v61 = vrot.slane %v350_v46, 7  ;;  %v247_v46 = vld [vmem:[%s3171_s28 + $0xb8] sm:$0xff] }
  0x3a   : > { %v427_v4 = vrot.slane %v351_v47, 7  ;;  %v429_v6 = vrot.slane %v352_v48, 7  ;;  %v322_v8 = vadd.f32 %v3165_v9, %v283_v40  ;;  %v323_v10 = vadd.f32 %v3165_v9, %v284_v57 }
  0x3b   : > { %v430_v7 = vrot.slane %v353_v52, 7  ;;  %v608_v16 = vsel %vm565_vm1, %v606_v41, %v607_v58  ;;  %v610_v19 = vsel %vm565_vm1, %v607_v58, %v609_v60  ;;  %v3400_v25 = vsel %vm399_vm0, 0.0, %v426_v61 }
  0x3c   : > { %v3397_v23 = vsel %vm399_vm0, %v426_v61, %v427_v4  ;;  %5039 = vst [vmem:[#allocation17_spill] sm:$0xff] %v3400_v25  ;;  %v3402_v12 = vpack.i.bf16 %v610_v19, %v608_v16  ;;  %v3405_v20 = vsel %vm399_vm0, %v427_v4, 0.0  ;;  %v611_v28 = vrot.slane %v3400_v25, 1  ;;  %v250_v16 = vld [vmem:[%s3171_s28 + $0xd0] sm:$0xff] }
  0x3d   : > { %5038 = vst [vmem:[#allocation16_spill] sm:$0xff] %v3397_v23  ;;  %v612_v30 = vrot.slane %v3397_v23, 1  ;;  %v614_v37 = vrot.slane %v3405_v20, 1  ;;  %v3412_v39 = vsel %vm399_vm0, %v429_v6, %v430_v7  ;;  %v3415_v40 = vsel %vm399_vm0, 0.0, %v429_v6  ;;  %v248_v6 = vld [vmem:[%s3171_s28 + $0xc0] sm:$0xff] }
  0x3e   : > { %5040 = vst [vmem:[#allocation18_spill] sm:$0xff] %v3402_v12  ;;  %5041 = vst [vmem:[#allocation19_spill] sm:$0xff] %v3412_v39  ;;  %v3418_v41 = vsel %vm399_vm0, %v430_v7, 0.0  ;;  %2482 = vrot.lane.b32.xlu0 %v3402_v12, %s3095_s7  ;;  %v616_v48 = vrot.slane %v3415_v40, 1  ;;  %v617_v52 = vrot.slane %v3412_v39, 1  ;;  %v354_v60 = vmax.f32 %v322_v8, 0.0 }
  0x3f   : > { %5042 = vst [vmem:[#allocation20_spill] sm:$0xff] %v3415_v40  ;;  %v613_v47 = vsel %vm565_vm1, %v611_v28, %v612_v30  ;;  %v619_v57 = vrot.slane %v3418_v41, 1  ;;  %v615_v58 = vsel %vm565_vm1, %v612_v30, %v614_v37  ;;  %v355_v61 = vmax.f32 %v323_v10, 0.0  ;;  %v249_v7 = vld [vmem:[%s3171_s28 + $0xc8] sm:$0xff] }
  0x40   : > { %v285_v4 = vmul.f32 %v3158_v5, %v246_v33  ;;  %v3432_v19 = vpack.i.bf16 %v615_v58, %v613_v47  ;;  %v618_v28 = vsel %vm565_vm1, %v616_v48, %v617_v52  ;;  %v286_v2 = vmul.f32 %v3158_v5, %v247_v46  ;;  %v251_v47 = vld [vmem:[%s3171_s28 + $0xd8] sm:$0xff] }
  0x41   : > { %v620_v18 = vsel %vm565_vm1, %v617_v52, %v619_v57  ;;  %v432_v12 = vrot.slane %v354_v60, 7  ;;  %v433_v30 = vrot.slane %v355_v61, 7  ;;  %v287_v33 = vmul.f32 %v3158_v5, %v248_v6 }
  0x42   : > { %5043 = vst [vmem:[#allocation21_spill] sm:$0xff] %v3432_v19  ;;  %v3437_v1 = vpack.i.bf16 %v620_v18, %v618_v28  ;;  %v324_v8 = vadd.f32 %v3165_v9, %v285_v4  ;;  %2487 = vrot.lane.b32.xlu1 %v3432_v19, %s3095_s7  ;;  %v325_v10 = vadd.f32 %v3165_v9, %v286_v2  ;;  %vm2041_vm13 = vcmask (!%p2343_p4), 58368  }
  0x43   : > { %v288_v37 = vmul.f32 %v3158_v5, %v249_v7  ;;  %v289_v48 = vmul.f32 %v3158_v5, %v250_v16  ;;  %v3450_v18 = vsel %vm399_vm0, %v432_v12, %v433_v30  ;;  %v3453_v46 = vsel %vm399_vm0, 0.0, %v432_v12 }
  0x44   : > { %5044 = vst [vmem:[#allocation22_spill] sm:$0xff] %v3437_v1  ;;  %2492 = vrot.lane.b32.xlu0 %v3437_v1, %s3095_s7  ;;  %5045 = vst [vmem:[#allocation23_spill] sm:$0xff] %v3450_v18  ;;  %v3456_v52 = vsel %vm399_vm0, %v433_v30, 0.0  ;;  %v356_v2 = vmax.f32 %v324_v8, 0.0  ;;  %v621_v57 = vrot.slane %v3453_v46, 1  ;;  %v622_v58 = vrot.slane %v3450_v18, 1 }
  0x45   : > { %5046 = vst [vmem:[#allocation24_spill] sm:$0xff] %v3453_v46  ;;  %v624_v60 = vrot.slane %v3456_v52, 1  ;;  %v357_v61 = vmax.f32 %v325_v10, 0.0  ;;  %v326_v6 = vadd.f32 %v3165_v9, %v287_v33  ;;  %v327_v7 = vadd.f32 %v3165_v9, %v288_v37  ;;  %v253_v33 = vld [vmem:[%s3171_s28 + $0xe8] sm:$0xff] }
  0x46   : > { %v435_v4 = vrot.slane %v356_v2, 7  ;;  %v290_v12 = vmul.f32 %v3158_v5, %v251_v47  ;;  %v623_v16 = vsel %vm565_vm1, %v621_v57, %v622_v58  ;;  %v328_v8 = vadd.f32 %v3165_v9, %v289_v48 }
  0x47   : > { %v625_v28 = vsel %vm565_vm1, %v622_v58, %v624_v60  ;;  %v436_v30 = vrot.slane %v357_v61, 7  ;;  %v358_v10 = vmax.f32 %v326_v6, 0.0  ;;  %v359_v2 = vmax.f32 %v327_v7, 0.0 }
  0x48   : > { %v3467_v26 = vpack.i.bf16 %v625_v28, %v623_v16  ;;  %v3470_v59 = vsel %vm399_vm0, 0.0, %v435_v4  ;;  %v329_v58 = vadd.f32 %v3165_v9, %v290_v12  ;;  %v360_v7 = vmax.f32 %v328_v8, 0.0 }
  0x49   : > { %v3475_v37 = vsel %vm399_vm0, %v435_v4, %v436_v30  ;;  %v3478_v47 = vsel %vm399_vm0, %v436_v30, 0.0  ;;  %v626_v57 = vrot.slane %v3470_v59, 1  ;;  %v438_v61 = vrot.slane %v358_v10, 7 }
  0x4a   : > { %5047 = vst [vmem:[#allocation25_spill] sm:$0xff] %v3467_v26  ;;  %2497 = vrot.lane.b32.xlu1 %v3467_v26, %s3095_s7  ;;  %v627_v48 = vrot.slane %v3475_v37, 1  ;;  %v629_v60 = vrot.slane %v3478_v47, 1  ;;  %v439_v6 = vrot.slane %v359_v2, 7  ;;  %v361_v16 = vmax.f32 %v329_v58, 0.0 }
  0x4b   : > { %v291_v4 = vmul.f32 %v3158_v5, %v252_v42  ;;  %v292_v28 = vmul.f32 %v3158_v5, %v253_v33  ;;  %v3494_v26 = vsel %vm399_vm0, 0.0, %v438_v61  ;;  %v441_v33 = vrot.slane %v360_v7, 7 }
  0x4c   : > { %v628_v30 = vsel %vm565_vm1, %v626_v57, %v627_v48  ;;  %v630_v1 = vsel %vm565_vm1, %v627_v48, %v629_v60  ;;  %v3491_v12 = vsel %vm399_vm0, %v438_v61, %v439_v6  ;;  %v3499_v10 = vsel %vm399_vm0, %v439_v6, 0.0 }
  0x4d   : > { %v3496_v53 = vpack.i.bf16 %v630_v1, %v628_v30  ;;  %v631_v8 = vrot.slane %v3494_v26, 1  ;;  %v632_v42 = vrot.slane %v3491_v12, 1  ;;  %v634_v2 = vrot.slane %v3499_v10, 1 }
  0x4e   : > { %v442_v57 = vrot.slane %v361_v16, 7  ;;  %v330_v58 = vadd.f32 %v3165_v9, %v291_v4  ;;  %v331_v1 = vadd.f32 %v3165_v9, %v292_v28  ;;  %v3511_v60 = vpack.i.bf16 %v3212_v49, %v3184_v17 }
  0x4f   : > { %5048 = vst [vmem:[#allocation26_spill] sm:$0xff] %v3496_v53  ;;  %2502 = vrot.lane.b32.xlu0 %v3496_v53, %s3095_s7  ;;  %v633_v48 = vsel %vm565_vm1, %v631_v8, %v632_v42  ;;  %v635_v61 = vsel %vm565_vm1, %v632_v42, %v634_v2  ;;  %v3518_v7 = vsel %vm399_vm0, 0.0, %v441_v33  ;;  %v652_v42 = vrot.slane %v3230_v63, 2 }
  0x50   : > { %5049 = vst [vmem:[#allocation27_spill] sm:$0xff] %v3511_v60  ;;  %v3515_v6 = vsel %vm399_vm0, %v441_v33, %v442_v57  ;;  %v3521_v16 = vsel %vm399_vm0, %v442_v57, 0.0  ;;  %v3523_v4 = vpack.i.bf16 %v635_v61, %v633_v48  ;;  %v636_v30 = vrot.slane %v3518_v7, 1 }
  0x51   : > { %v637_v28 = vrot.slane %v3515_v6, 1  ;;  %v639_v17 = vrot.slane %v3521_v16, 1  ;;  %v362_v49 = vmax.f32 %v330_v58, 0.0  ;;  %v363_v8 = vmax.f32 %v331_v1, 0.0 }
  0x52   : > { %5050 = vst [vmem:[#allocation28_spill] sm:$0xff] %v3523_v4  ;;  %v653_v2 = vrot.slane %v3227_v62, 2  ;;  %2507 = vrot.lane.b32.xlu1 %v3523_v4, %s3095_s7  ;;  %v655_v48 = vrot.slane %v3233_v0, 2  ;;  %v657_v61 = vrot.slane %v3218_v55, 2  ;;  %v660_v53 = vrot.slane %v3221_v56, 2 }
  0x53   : > { %v638_v33 = vsel %vm565_vm1, %v636_v30, %v637_v28  ;;  %v640_v57 = vsel %vm565_vm1, %v637_v28, %v639_v17  ;;  %v444_v58 = vrot.slane %v362_v49, 7  ;;  %v445_v1 = vrot.slane %v363_v8, 7 }
  0x54   : > { %v3537_v19 = vpack.i.bf16 %v640_v57, %v638_v33  ;;  %v654_v11 = vsel %vm646_vm2, %v652_v42, %v653_v2  ;;  %v656_v56 = vsel %vm646_vm2, %v653_v2, %v655_v48  ;;  %v659_v42 = vsel %vm646_vm2, %v657_v61, %v658_v34 }
  0x55   : > { %v3544_v30 = vsel %vm399_vm0, %v444_v58, %v445_v1  ;;  %v3547_v0 = vsel %vm399_vm0, 0.0, %v444_v58  ;;  %v3550_v28 = vsel %vm399_vm0, %v445_v1, 0.0  ;;  %v661_v33 = vsel %vm646_vm2, %v658_v34, %v660_v53 }
  0x56   : > { %5051 = vst [vmem:[#allocation29_spill] sm:$0xff] %v3537_v19  ;;  %2512 = vrot.lane.b32.xlu0 %v3537_v19, %s3095_s7  ;;  %v641_v17 = vrot.slane %v3547_v0, 1  ;;  %v642_v49 = vrot.slane %v3544_v30, 1  ;;  %v644_v8 = vrot.slane %v3550_v28, 1  ;;  %v662_v57 = vrot.slane %v3247_v13, 2 }
  0x57   : > { %v663_v58 = vrot.slane %v3236_v3, 2  ;;  %v667_v19 = vrot.slane %v3261_v24, 2  ;;  %v665_v48 = vrot.slane %v3250_v14, 2  ;;  %v668_v4 = vrot.slane %v3276_v35, 2 }
  0x58   : > { %v643_v1 = vsel %vm565_vm1, %v641_v17, %v642_v49  ;;  %v645_v2 = vsel %vm565_vm1, %v642_v49, %v644_v8  ;;  %v3569_v34 = vpack.i.bf16 %v661_v33, %v659_v42  ;;  %v670_v53 = vrot.slane %v3279_v36, 2 }
  0x59   : > { %v3565_v27 = vpack.i.bf16 %v645_v2, %v643_v1  ;;  %v3572_v61 = vpack.i.bf16 %v656_v56, %v654_v11  ;;  %v669_v17 = vsel %vm646_vm2, %v667_v19, %v668_v4  ;;  %v672_v49 = vrot.slane %v3309_v15, 2 }
  0x5a   : > { %2522 = vrot.lane.b32.xlu0 %v3511_v60, %s3096_s8  ;;  %v673_v14 = vrot.slane %v3313_v21, 2  ;;  %v671_v8 = vsel %vm646_vm2, %v668_v4, %v670_v53  ;;  %v677_v1 = vrot.slane %v3322_v29, 2  ;;  %v678_v42 = vrot.slane %v3325_v31, 2 }
  0x5b   : > { %2517 = vrot.lane.b32.xlu1 %v3565_v27, %s3095_s7  ;;  %v680_v33 = vrot.slane %v3328_v32, 2  ;;  %v664_v11 = vsel %vm646_vm2, %v662_v57, %v663_v58  ;;  %v666_v36 = vsel %vm646_vm2, %v663_v58, %v665_v48  ;;  %v675_v19 = vrot.slane %v3316_v22, 2 }
  0x5c   : > { %v3588_v56 = vpack.i.bf16 %v671_v8, %v669_v17  ;;  %v679_v2 = vsel %vm646_vm2, %v677_v1, %v678_v42  ;;  %v687_v53 = vrot.slane %v3376_v38, 2  ;;  %v688_v60 = vrot.slane %v3384_v50, 2 }
  0x5d   : > { %v681_v4 = vsel %vm646_vm2, %v678_v42, %v680_v33  ;;  %v3596_v32 = vpack.i.bf16 %v666_v36, %v664_v11  ;;  %v674_v22 = vsel %vm646_vm2, %v672_v49, %v673_v14  ;;  %v690_v57 = vrot.slane %v3387_v51, 2 }
  0x5e   : > { %2532 = vrot.lane.b32.xlu0 %v3569_v34, %s3096_s8  ;;  %v676_v58 = vsel %vm646_vm2, %v673_v14, %v675_v19  ;;  %v682_v48 = vrot.slane %v3341_v44, 2  ;;  %v683_v17 = vrot.slane %v3338_v43, 2  ;;  %v685_v8 = vrot.slane %v3344_v45, 2 }
  0x5f   : > { %2527 = vrot.lane.b32.xlu1 %v3572_v61, %s3096_s8  ;;  %v3606_v1 = vpack.i.bf16 %v681_v4, %v679_v2  ;;  %v689_v42 = vsel %vm646_vm2, %v687_v53, %v688_v60  ;;  %v691_v33 = vsel %vm646_vm2, %v688_v60, %v690_v57  ;;  %v697_v49 = vrot.slane %v3415_v40, 2 }
  0x60   : > { %v698_v51 = vrot.slane %v3412_v39, 2  ;;  %v700_v14 = vrot.slane %v3418_v41, 2  ;;  %v3615_v11 = vpack.i.bf16 %v676_v58, %v674_v22  ;;  %v692_v45 = vrot.slane %v3400_v25, 2 }
  0x61   : > { %v693_v36 = vrot.slane %v3397_v23, 2  ;;  %v684_v19 = vsel %vm646_vm2, %v682_v48, %v683_v17  ;;  %v686_v2 = vsel %vm646_vm2, %v683_v17, %v685_v8  ;;  %v695_v60 = vrot.slane %v3405_v20, 2 }
  0x62   : > { %2542 = vrot.lane.b32.xlu0 %v3588_v56, %s3096_s8  ;;  %v3624_v4 = vpack.i.bf16 %v691_v33, %v689_v42  ;;  %v707_v41 = vrot.slane %v3470_v59, 2  ;;  %v708_v53 = vrot.slane %v3475_v37, 2  ;;  %v699_v22 = vsel %vm646_vm2, %v697_v49, %v698_v51 }
  0x63   : > { %2537 = vrot.lane.b32.xlu1 %v3596_v32, %s3096_s8  ;;  %v701_v57 = vsel %vm646_vm2, %v698_v51, %v700_v14  ;;  %v710_v58 = vrot.slane %v3478_v47, 2  ;;  %v3633_v48 = vpack.i.bf16 %v686_v2, %v684_v19  ;;  %v694_v20 = vsel %vm646_vm2, %v692_v45, %v693_v36 }
  0x64   : > { %5052 = vst [vmem:[#allocation30_spill] sm:$0xff] %v3624_v4  ;;  %v696_v17 = vsel %vm646_vm2, %v693_v36, %v695_v60  ;;  %v702_v8 = vrot.slane %v3453_v46, 2  ;;  %v703_v42 = vrot.slane %v3450_v18, 2  ;;  %v705_v33 = vrot.slane %v3456_v52, 2 }
  0x65   : > { %v3642_v49 = vpack.i.bf16 %v701_v57, %v699_v22  ;;  %v709_v47 = vsel %vm646_vm2, %v707_v41, %v708_v53  ;;  %v711_v51 = vsel %vm646_vm2, %v708_v53, %v710_v58  ;;  %v717_v14 = vrot.slane %v3518_v7, 2 }
  0x66   : > { %2552 = vrot.lane.b32.xlu0 %v3606_v1, %s3096_s8  ;;  %v718_v45 = vrot.slane %v3515_v6, 2  ;;  %v720_v36 = vrot.slane %v3521_v16, 2  ;;  %v3651_v19 = vpack.i.bf16 %v696_v17, %v694_v20  ;;  %v712_v52 = vrot.slane %v3494_v26, 2 }
  0x67   : > { %2547 = vrot.lane.b32.xlu1 %v3615_v11, %s3096_s8  ;;  %v713_v2 = vrot.slane %v3491_v12, 2  ;;  %v704_v60 = vsel %vm646_vm2, %v702_v8, %v703_v42  ;;  %v706_v41 = vsel %vm646_vm2, %v703_v42, %v705_v33  ;;  %v715_v53 = vrot.slane %v3499_v10, 2 }
  0x68   : > { %5053 = vst [vmem:[#allocation31_spill] sm:$0xff] %v3651_v19  ;;  %v3660_v22 = vpack.i.bf16 %v711_v51, %v709_v47  ;;  %v719_v16 = vsel %vm646_vm2, %v717_v14, %v718_v45  ;;  %v721_v57 = vsel %vm646_vm2, %v718_v45, %v720_v36  ;;  %v3666_v58 = vpack.i.bf16 %v706_v41, %v704_v60  ;;  %v254_v41 = vld [vmem:[%s3171_s28 + $0xf0] sm:$0xff] }
  0x69   : > { %v714_v20 = vsel %vm646_vm2, %v712_v52, %v713_v2  ;;  %v722_v17 = vrot.slane %v3547_v0, 2  ;;  %v716_v10 = vsel %vm646_vm2, %v713_v2, %v715_v53  ;;  %v723_v8 = vrot.slane %v3544_v30, 2  ;;  %v255_v53 = vld [vmem:[%s3171_s28 + $0xf8] sm:$0xff] }
  0x6a   : > { %2562 = vrot.lane.b32.xlu0 %v3624_v4, %s3096_s8  ;;  %v725_v42 = vrot.slane %v3550_v28, 2  ;;  %v3675_v33 = vpack.i.bf16 %v721_v57, %v719_v16  ;;  %v3679_v47 = vpack.i.bf16 %v716_v10, %v714_v20  ;;  %v2601_v28 = vpack.i.bf16 %v3227_v62, %v3230_v63 }
  0x6b   : > { %2557 = vrot.lane.b32.xlu1 %v3633_v48, %s3096_s8  ;;  %v724_v51 = vsel %vm646_vm2, %v722_v17, %v723_v8  ;;  %v3694_v36 = vpack.i.bf16 %v3236_v3, %v3247_v13  ;;  %v3700_v52 = vpack.i.bf16 %v3215_v54, %v3218_v55  ;;  %v3706_v2 = vpack.i.bf16 %v3313_v21, %v3309_v15 }
  0x6c   : > { %v726_v14 = vsel %vm646_vm2, %v723_v8, %v725_v42  ;;  %v3712_v60 = vpack.i.bf16 %v3276_v35, %v3261_v24  ;;  %v3720_v16 = vpack.i.bf16 %v3338_v43, %v3341_v44  ;;  %v3726_v57 = vpack.i.bf16 %v3325_v31, %v3322_v29 }
  0x6d   : > { %v3689_v45 = vpack.i.bf16 %v726_v14, %v724_v51  ;;  %v293_v20 = vmul.f32 %v3158_v5, %v254_v41  ;;  %v294_v17 = vmul.f32 %v3158_v5, %v255_v53  ;;  %v3734_v10 = vpack.i.bf16 %v3397_v23, %v3400_v25  ;;  %v5058_v23 = vld [vmem:[#allocation9_spill] sm:$0xff] }
  0x6e   : > { %2572 = vrot.lane.b32.xlu0 %v3642_v49, %s3096_s8  ;;  %v3740_v8 = vpack.i.bf16 %v3384_v50, %v3376_v38  ;;  %v3748_v5 = vpack.i.bf16 %v3450_v18, %v3453_v46  ;;  %v3754_v14 = vpack.i.bf16 %v3412_v39, %v3415_v40  ;;  %v3766_v53 = vpack.i.bf16 %v3475_v37, %v3470_v59 }
  0x6f   : > { %2567 = vrot.lane.b32.xlu1 %v3651_v19, %s3096_s8  ;;  %5054 = vst [vmem:[#allocation32_spill] sm:$0xff] %v3734_v10  ;;  %v332_v42 = vadd.f32 %v3165_v9, %v293_v20  ;;  %v333_v51 = vadd.f32 %v3165_v9, %v294_v17  ;;  %v3760_v9 = vpack.i.bf16 %v3491_v12, %v3494_v26 }
  0x70   : > { %5055 = vst [vmem:[#allocation33_spill] sm:$0xff] %v3740_v8 }
  0x71   : > { %v365_v41 = vmax.f32 %v333_v51, 0.0  ;;  %v3778_v51 = vpack.i.bf16 %v3515_v6, %v3518_v7 }
  0x72   : > { %2582 = vrot.lane.b32.xlu0 %v3660_v22, %s3096_s8 }
  0x73   : > { %2577 = vrot.lane.b32.xlu1 %v3666_v58, %s3096_s8  ;;  %v448_v17 = vrot.slane %v365_v41, 7 }
  0x75   : > { %v532_v40 = vsel %vm399_vm0, %v448_v17, 0.0 }
  0x76   : > { %2592 = vrot.lane.b32.xlu0 %v3675_v33, %s3096_s8  ;;  %v732_v13 = vrot.slane %v532_v40, 1  ;;  %v737_v50 = vrot.slane %v532_v40, 2 }
  0x77   : > { %2587 = vrot.lane.b32.xlu1 %v3679_v47, %s3096_s8 }
  0x7a   : > { %2602 = vrot.lane.b32.xlu0 %v2601_v28, %s3097_s9  ;;  %v364_v28 = vmax.f32 %v332_v42, 0.0  ;;  %v3772_v42 = vpack.i.bf16 %v3544_v30, %v3547_v0 }
  0x7b   : > { %2597 = vrot.lane.b32.xlu1 %v3689_v45, %s3096_s8 }
  0x7c   : > { %v447_v20 = vrot.slane %v364_v28, 7 }
  0x7e   : > { %2612 = vrot.lane.b32.xlu0 %v3694_v36, %s3097_s9  ;;  %v449_v46 = vsel %vm399_vm0, %v447_v20, %v448_v17  ;;  %v515_v18 = vsel %vm399_vm0, 0.0, %v447_v20 }
  0x7f   : > { %2607 = vrot.lane.b32.xlu1 %v3700_v52, %s3097_s9  ;;  %v729_v28 = vrot.slane %v515_v18, 1  ;;  %v730_v41 = vrot.slane %v449_v46, 1  ;;  %v3787_v39 = vpack.i.bf16 %v449_v46, %v515_v18  ;;  %v734_v17 = vrot.slane %v515_v18, 2  ;;  %v5062_v18 = vld [vmem:[#allocation10_spill] sm:$0xff] }
  0x80   : > { %v735_v25 = vrot.slane %v449_v46, 2 }
  0x81   : > { %5056 = vst [vmem:[#allocation34_spill] sm:$0xff] %v3787_v39  ;;  %v731_v3 = vsel %vm565_vm1, %v729_v28, %v730_v41  ;;  %v733_v20 = vsel %vm565_vm1, %v730_v41, %v732_v13  ;;  %v5059_v28 = vld [vmem:[#allocation6_spill] sm:$0xff] }
  0x82   : > { %2622 = vrot.lane.b32.xlu0 %v3706_v2, %s3097_s9  ;;  %v738_v13 = vsel %vm646_vm2, %v735_v25, %v737_v50  ;;  %v3081_v50 = vld [vmem:[%s4959_s3] sm:$0xff]  }
  0x83   : > { %2617 = vrot.lane.b32.xlu1 %v3712_v60, %s3097_s9  ;;  %2369 = vmatprep.subr.bf16.mxu0 %v3081_v50 }
  0x84   : > { %2370 = vmatpush3.bf16.msra.mxu0 %v3081_v50  ;;  %2411 = vmatprep.subr.bf16.mxu1 %v3081_v50 }
  0x85   : > { %2416 = vmatpush3.bf16.msra.mxu1 %v3081_v50 }
  0x86   : > { %2632 = vrot.lane.b32.xlu0 %v3720_v16, %s3097_s9 }
  0x87   : > { %2627 = vrot.lane.b32.xlu1 %v3726_v57, %s3097_s9 }
  0x88   : > { %v3799_v38 = vpop.permute.xlu0 %2442 }
  0x8a   : > { %2642 = vrot.lane.b32.xlu0 %v3734_v10, %s3097_s9  ;;  %v5057_v10 = vld [vmem:[#allocation8_spill] sm:$0xff] }
  0x8b   : > { %2637 = vrot.lane.b32.xlu1 %v3740_v8, %s3097_s9  ;;  %v3793_v8 = vpack.i.bf16 %v733_v20, %v731_v3  ;;  %v5060_v3 = vld [vmem:[#allocation21_spill] sm:$0xff] }
  0x8e   : > { %2652 = vrot.lane.b32.xlu0 %v3748_v5, %s3097_s9 }
  0x8f   : > { %2647 = vrot.lane.b32.xlu1 %v3754_v14, %s3097_s9 }
  0x92   : > { %2662 = vrot.lane.b32.xlu0 %v3760_v9, %s3097_s9 }
  0x93   : > { %2657 = vrot.lane.b32.xlu1 %v3766_v53, %s3097_s9 }
  0x94   : > { %v3811_v46 = vpop.permute.xlu1 %2452 }
  0x96   : > { %2672 = vrot.lane.b32.xlu0 %v3772_v42, %s3097_s9 }
  0x97   : > { %2667 = vrot.lane.b32.xlu1 %v3778_v51, %s3097_s9  ;;  %v3813_v20 = vpop.permute.xlu0 %2447 }
  0x98   : > { %v3824_v40 = vpop.permute.xlu1 %2457 }
  0x99   : > { %5064 = vst [vmem:[#allocation9_spill] sm:$0xff] %v3824_v40 }
  0x9a   : > { %2682 = vrot.lane.b32.xlu0 %v5057_v10, %s3098_s10  ;;  %v736_v10 = vsel %vm646_vm2, %v734_v17, %v735_v25  ;;  %v5063_v25 = vld [vmem:[#allocation22_spill] sm:$0xff] }
  0x9b   : > { %2677 = vrot.lane.b32.xlu1 %v3787_v39, %s3097_s9  ;;  %v3807_v41 = vpack.i.bf16 %v738_v13, %v736_v10  ;;  %v3083_v10 = vld [vmem:[%s4959_s3 + $0x10] sm:$0xff]  }
  0x9c   : > { %v3826_v17 = vpop.permute.xlu0 %2462 }
  0x9d   : > { %5061 = vst [vmem:[#allocation8_spill] sm:$0xff] %v3807_v41 }
  0x9e   : > { %2692 = vrot.lane.b32.xlu0 %v5058_v23, %s3098_s10 }
  0x9f   : > { %2687 = vrot.lane.b32.xlu1 %v5059_v28, %s3098_s10 }
  0xa2   : > { %2702 = vrot.lane.b32.xlu0 %v5060_v3, %s3098_s10 }
  0xa3   : > { %2697 = vrot.lane.b32.xlu1 %v5062_v18, %s3098_s10 }
  0xa5   : > { %v3840_v13 = vpop.permute.xlu1 %2467 }
  0xa6   : > { %2712 = vrot.lane.b32.xlu0 %v3572_v61, %s3099_s11  ;;  %v3082_v61 = vld [vmem:[%s4959_s3 + $0x8] sm:$0xff]  }
  0xa7   : > { %2707 = vrot.lane.b32.xlu1 %v5063_v25, %s3098_s10  ;;  %2371 = vmatprep.subr.bf16.mxu0 %v3082_v61  ;;  %v3842_v50 = vpop.permute.xlu0 %2472 }
  0xa8   : > { %2372 = vmatpush3.bf16.msra.mxu0 %v3082_v61  ;;  %2412 = vmatprep.subr.bf16.mxu1 %v3082_v61 }
  0xa9   : > { %2417 = vmatpush3.bf16.msra.mxu1 %v3082_v61  ;;  %2373 = vmatprep.subr.bf16.mxu0 %v3083_v10  ;;  %v3853_v61 = vpop.permute.xlu1 %2477 }
  0xaa   : > { %2722 = vrot.lane.b32.xlu0 %v3569_v34, %s3099_s11  ;;  %2413 = vmatprep.subr.bf16.mxu1 %v3083_v10 }
  0xab   : > { %2717 = vrot.lane.b32.xlu1 %v3651_v19, %s3099_s11 }
  0xac   : > { %2374 = vmatpush3.bf16.msra.mxu0 %v3083_v10 }
  0xad   : > { %2418 = vmatpush3.bf16.msra.mxu1 %v3083_v10 }
  0xae   : > { %2732 = vrot.lane.b32.xlu0 %v3700_v52, %s3100_s16  ;;  %v3084_v52 = vld [vmem:[%s4959_s3 + $0x18] sm:$0xff]  }
  0xaf   : > { %2727 = vrot.lane.b32.xlu1 %v3642_v49, %s3099_s11  ;;  %2375 = vmatprep.subr.bf16.mxu0 %v3084_v52 }
  0xb0   : > { %2376 = vmatpush3.bf16.msra.mxu0 %v3084_v52  ;;  %2414 = vmatprep.subr.bf16.mxu1 %v3084_v52  ;;  %v3855_v40 = vpop.permute.xlu0 %2482 }
  0xb1   : > { %2419 = vmatpush3.bf16.msra.mxu1 %v3084_v52 }
  0xb2   : > { %2742 = vrot.lane.b32.xlu0 %v3694_v36, %s3100_s16  ;;  %v3085_v36 = vld [vmem:[%s4959_s3 + $0x20] ss:$0 sps:$4 sm:$0xff]  }
  0xb3   : > { %2737 = vrot.lane.b32.xlu1 %v3754_v14, %s3100_s16  ;;  %2421 = vmatprep.subr.msk.bf16.mxu0 %vm1872_vm3, %v3085_v36  ;;  %v1874_v14 = vsel %vm1872_vm3, %v3085_v36, 0 }
  0xb4   : > { %2378 = vmatpush3.bf16.msra.mxu0 %v1874_v14  ;;  %2422 = vmatprep.subr.msk.bf16.mxu1 %vm1872_vm3, %v3085_v36  ;;  %v5069_v36 = vld [vmem:[#allocation26_spill] sm:$0xff] }
  0xb5   : > { %2420 = vmatpush3.bf16.msra.mxu1 %v1874_v14 }
  0xb6   : > { %2752 = vrot.lane.b32.xlu0 %v5059_v28, %s3101_s23  ;;  %v3866_v28 = vpop.permute.xlu1 %2487  ;;  %v3868_v10 = vpop.permute.xlu0 %2492 }
  0xb7   : > { %2747 = vrot.lane.b32.xlu1 %v3748_v5, %s3100_s16  ;;  %5065 = vst [vmem:[#allocation6_spill] sm:$0xff] %v3866_v28  ;;  %5066 = vst [vmem:[#allocation10_spill] sm:$0xff] %v3868_v10  ;;  %v5067_v5 = vld [vmem:[#allocation25_spill] sm:$0xff] }
  0xba   : > { %2762 = vrot.lane.b32.xlu0 %v5058_v23, %s3101_s23 }
  0xbb   : > { %2757 = vrot.lane.b32.xlu1 %v5063_v25, %s3101_s23 }
  0xbc   : > { %v3876_v52 = vpop.permute.xlu1 %2497 }
  0xbd   : > { %5068 = vst [vmem:[#allocation22_spill] sm:$0xff] %v3876_v52 }
  0xbe   : > { %2772 = vrot.lane.b32.xlu0 %v3569_v34, %s3102_s26 }
  0xbf   : > { %2767 = vrot.lane.b32.xlu1 %v5067_v5, %s3101_s23 }
  0xc1   : > { %v3878_v23 = vpop.permute.xlu0 %2502 }
  0xc2   : > { %2782 = vrot.lane.b32.xlu0 %v3596_v32, %s3102_s26 }
  0xc3   : > { %2777 = vrot.lane.b32.xlu1 %v3642_v49, %s3102_s26 }
  0xc4   : > { %v3886_v34 = vpop.permute.xlu1 %2507 }
  0xc6   : > { %2792 = vrot.lane.b32.xlu0 %v5067_v5, %s3098_s10 }
  0xc7   : > { %2787 = vrot.lane.b32.xlu1 %v3666_v58, %s3102_s26 }
  0xc8   : > { %v2513_v25 = vpop.permute.xlu0 %2512 }
  0xc9   : > { %v2515_v39 = vunpack.i.h.bf16 %v2513_v25  ;;  %v2514_v41 = vunpack.i.l.bf16 %v2513_v25 }
  0xca   : > { %2802 = vrot.lane.b32.xlu0 %v3596_v32, %s3099_s11 }
  0xcb   : > { %2797 = vrot.lane.b32.xlu1 %v5069_v36, %s3098_s10 }
  0xcc   : > { %v3892_v14 = vpop.permute.xlu0 %2522 }
  0xcd   : > { %5070 = vst [vmem:[#allocation25_spill] sm:$0xff] %v3892_v14  ;;  %v2518_v52 = vpop.permute.xlu1 %2517 }
  0xce   : > { %2812 = vrot.lane.b32.xlu0 %v3588_v56, %s3099_s11  ;;  %v2520_v4 = vunpack.i.h.bf16 %v2518_v52 }
  0xcf   : > { %2807 = vrot.lane.b32.xlu1 %v3666_v58, %s3099_s11 }
  0xd0   : > { %v3898_v49 = vpop.permute.xlu0 %2532 }
  0xd1   : > { %v3900_v5 = vpop.permute.xlu1 %2527 }
  0xd2   : > { %5071 = vst [vmem:[#allocation26_spill] sm:$0xff] %v3900_v5  ;;  %2822 = vrot.lane.b32.xlu0 %v3712_v60, %s3100_s16  ;;  %v1536_v5 = vsel %vm1507_vm4, %v3518_v7, %v2514_v41  ;;  %v5080_v7 = vld [vmem:[#allocation12_spill] sm:$0xff] }
  0xd3   : > { %2817 = vrot.lane.b32.xlu1 %v3660_v22, %s3099_s11 }
  0xd4   : > { %v3906_v32 = vpop.permute.xlu0 %2542 }
  0xd5   : > { %v3908_v10 = vpop.permute.xlu1 %2537 }
  0xd6   : > { %5072 = vst [vmem:[#allocation35_spill] sm:$0xff] %v3908_v10  ;;  %2832 = vrot.lane.b32.xlu0 %v3706_v2, %s3100_s16  ;;  %v5074_v10 = vld [vmem:[#allocation11_spill] sm:$0xff] }
  0xd7   : > { %2827 = vrot.lane.b32.xlu1 %v3766_v53, %s3100_s16 }
  0xd8   : > { %v3914_v58 = vpop.permute.xlu0 %2552 }
  0xd9   : > { %v3916_v19 = vpop.permute.xlu1 %2547 }
  0xda   : > { %2842 = vrot.lane.b32.xlu0 %v5062_v18, %s3101_s23  ;;  %v5077_v18 = vld [vmem:[#allocation28_spill] sm:$0xff] }
  0xdb   : > { %2837 = vrot.lane.b32.xlu1 %v3760_v9, %s3100_s16 }
  0xdc   : > { %v3922_v60 = vpop.permute.xlu0 %2562 }
  0xdd   : > { %5073 = vst [vmem:[#allocation36_spill] sm:$0xff] %v3922_v60  ;;  %v3924_v3 = vpop.permute.xlu1 %2557 }
  0xde   : > { %2852 = vrot.lane.b32.xlu0 %v5074_v10, %s3101_s23 }
  0xdf   : > { %2847 = vrot.lane.b32.xlu1 %v5069_v36, %s3101_s23 }
  0xe0   : > { %v3930_v2 = vpop.permute.xlu0 %2572 }
  0xe1   : > { %5075 = vst [vmem:[#allocation11_spill] sm:$0xff] %v3930_v2  ;;  %v3932_v53 = vpop.permute.xlu1 %2567 }
  0xe2   : > { %5076 = vst [vmem:[#allocation37_spill] sm:$0xff] %v3932_v53  ;;  %2862 = vrot.lane.b32.xlu0 %v3588_v56, %s3102_s26  ;;  %v1537_v56 = vsel %vm1507_vm4, %v3515_v6, %v2515_v39 }
  0xe3   : > { %2857 = vrot.lane.b32.xlu1 %v5077_v18, %s3101_s23 }
  0xe4   : > { %v3938_v9 = vpop.permute.xlu0 %2582 }
  0xe5   : > { %v3940_v60 = vpop.permute.xlu1 %2577 }
  0xe6   : > { %5078 = vst [vmem:[#allocation28_spill] sm:$0xff] %v3940_v60  ;;  %2872 = vrot.lane.b32.xlu0 %v3615_v11, %s3102_s26 }
  0xe7   : > { %2867 = vrot.lane.b32.xlu1 %v3660_v22, %s3102_s26 }
  0xe8   : > { %v2593_v36 = vpop.permute.xlu0 %2592 }
  0xe9   : > { %v2595_v2 = vunpack.i.h.bf16 %v2593_v36  ;;  %v2594_v53 = vunpack.i.l.bf16 %v2593_v36  ;;  %v3950_v25 = vpop.permute.xlu1 %2587  ;;  %v2519_v36 = vunpack.i.l.bf16 %v2518_v52 }
  0xea   : > { %2882 = vrot.lane.b32.xlu0 %v5074_v10, %s3098_s10  ;;  %v2465_v10 = vunpack.i.h.bf16 %v3826_v17 }
  0xeb   : > { %v3955_v60 = vsel %vm1540_vm5, %v1536_v5, %v2594_v53  ;;  %v3958_v22 = vsel %vm1540_vm5, %v1537_v56, %v2595_v2  ;;  %2877 = vrot.lane.b32.xlu1 %v3679_v47, %s3102_s26  ;;  %v2464_v5 = vunpack.i.l.bf16 %v3826_v17  ;;  %v1539_v2 = vsel %vm1507_vm4, %v3544_v30, %v2520_v4 }
  0xec   : > { %v3962_v39 = vpop.permute.xlu0 %2602  ;;  %v1538_v52 = vsel %vm1507_vm4, %v3547_v0, %v2519_v36  ;;  %v2544_v17 = vunpack.i.l.bf16 %v3906_v32  ;;  %v1517_v30 = vsel %vm1507_vm4, %v3276_v35, %v2465_v10  ;;  %v2470_v4 = vunpack.i.h.bf16 %v3840_v13 }
  0xed   : > { %5079 = vst [vmem:[#allocation38_spill] sm:$0xff] %v3962_v39  ;;  %v2598_v6 = vpop.permute.xlu1 %2597  ;;  %v2545_v39 = vunpack.i.h.bf16 %v3906_v32  ;;  %v1516_v0 = vsel %vm1507_vm4, %v3261_v24, %v2464_v5  ;;  %v2475_v36 = vunpack.i.h.bf16 %v3842_v50  ;;  %v2555_v24 = vunpack.i.h.bf16 %v3914_v58 }
  0xee   : > { %2892 = vrot.lane.b32.xlu0 %v5080_v7, %s3098_s10  ;;  %v2600_v41 = vunpack.i.h.bf16 %v2598_v6  ;;  %v2599_v14 = vunpack.i.l.bf16 %v2598_v6  ;;  %v2554_v10 = vunpack.i.l.bf16 %v3914_v58  ;;  %v2549_v58 = vunpack.i.l.bf16 %v3916_v19 }
  0xef   : > { %2887 = vrot.lane.b32.xlu1 %v5077_v18, %s3098_s10  ;;  %v5081_v18 = vld [vmem:[#allocation29_spill] sm:$0xff]  ;;  %v1550_v35 = vsel %vm1540_vm5, %v1517_v30, %v2545_v39  ;;  %v2550_v30 = vunpack.i.h.bf16 %v3916_v19 }
  0xf0   : > { %v3974_v53 = vpop.permute.xlu0 %2612  ;;  %v3977_v56 = vsel %vm1540_vm5, %v1539_v2, %v2600_v41  ;;  %v3980_v6 = vsel %vm1540_vm5, %v1538_v52, %v2599_v14  ;;  %v2469_v14 = vunpack.i.l.bf16 %v3840_v13  ;;  %v2474_v41 = vunpack.i.l.bf16 %v3842_v50 }
  0xf1   : > { %v3984_v28 = vpop.permute.xlu1 %2607  ;;  %v1549_v52 = vsel %vm1540_vm5, %v1516_v0, %v2544_v17  ;;  %v1519_v17 = vsel %vm1507_vm4, %v3313_v21, %v2470_v4  ;;  %v2480_v21 = vunpack.i.h.bf16 %v3853_v61 }
  0xf2   : > { %2902 = vrot.lane.b32.xlu0 %v3615_v11, %s3099_s11  ;;  %v1518_v39 = vsel %vm1507_vm4, %v3309_v15, %v2469_v14  ;;  %v2479_v15 = vunpack.i.l.bf16 %v3853_v61 }
  0xf3   : > { %2897 = vrot.lane.b32.xlu1 %v5081_v18, %s3098_s10  ;;  %v1551_v61 = vsel %vm1540_vm5, %v1518_v39, %v2549_v58 }
  0xf4   : > { %v2623_v32 = vpop.permute.xlu0 %2622 }
  0xf5   : > { %v2625_v11 = vunpack.i.h.bf16 %v2623_v32  ;;  %v2624_v2 = vunpack.i.l.bf16 %v2623_v32  ;;  %v4002_v5 = vpop.permute.xlu1 %2617  ;;  %v1521_v32 = vsel %vm1507_vm4, %v3325_v31, %v2475_v36  ;;  %v1552_v36 = vsel %vm1540_vm5, %v1519_v17, %v2550_v30 }
  0xf6   : > { %2912 = vrot.lane.b32.xlu0 %v3606_v1, %s3099_s11  ;;  %v1554_v19 = vsel %vm1540_vm5, %v1521_v32, %v2555_v24  ;;  %v2559_v24 = vunpack.i.l.bf16 %v3924_v3  ;;  %v1523_v17 = vsel %vm1507_vm4, %v3338_v43, %v2480_v21  ;;  %v2585_v21 = vunpack.i.h.bf16 %v3938_v9 }
  0xf7   : > { %v4007_v13 = vsel %vm1573_vm6, %v1549_v52, %v2624_v2  ;;  %v4010_v50 = vsel %vm1573_vm6, %v1550_v35, %v2625_v11  ;;  %2907 = vrot.lane.b32.xlu1 %v3679_v47, %s3099_s11  ;;  %v1520_v11 = vsel %vm1507_vm4, %v3322_v29, %v2474_v41  ;;  %v2560_v41 = vunpack.i.h.bf16 %v3924_v3 }
  0xf8   : > { %v2633_v0 = vpop.permute.xlu0 %2632  ;;  %v1553_v4 = vsel %vm1540_vm5, %v1520_v11, %v2554_v10  ;;  %v1522_v3 = vsel %vm1507_vm4, %v3341_v44, %v2479_v15  ;;  %v2584_v15 = vunpack.i.l.bf16 %v3938_v9  ;;  %v2509_v9 = vunpack.i.l.bf16 %v3886_v34 }
  0xf9   : > { %v2635_v2 = vunpack.i.h.bf16 %v2633_v0  ;;  %v2634_v52 = vunpack.i.l.bf16 %v2633_v0  ;;  %v2628_v14 = vpop.permute.xlu1 %2627  ;;  %v1556_v58 = vsel %vm1540_vm5, %v1523_v17, %v2560_v41  ;;  %v1555_v11 = vsel %vm1540_vm5, %v1522_v3, %v2559_v24 }
  0xfa   : > { %2922 = vrot.lane.b32.xlu0 %v3726_v57, %s3100_s16  ;;  %v2630_v47 = vunpack.i.h.bf16 %v2628_v14  ;;  %v2629_v35 = vunpack.i.l.bf16 %v2628_v14  ;;  %v2590_v41 = vunpack.i.h.bf16 %v3950_v25  ;;  %v2589_v24 = vunpack.i.l.bf16 %v3950_v25 }
  0xfb   : > { %v4031_v31 = vsel %vm1573_vm6, %v1553_v4, %v2634_v52  ;;  %v4034_v29 = vsel %vm1573_vm6, %v1554_v19, %v2635_v2  ;;  %2917 = vrot.lane.b32.xlu1 %v3675_v33, %s3099_s11  ;;  %v2505_v52 = vunpack.i.h.bf16 %v3878_v23  ;;  %v2455_v3 = vunpack.i.h.bf16 %v3811_v46 }
  0xfc   : > { %v4042_v57 = vpop.permute.xlu0 %2642  ;;  %v4045_v10 = vsel %vm1573_vm6, %v1551_v61, %v2629_v35  ;;  %v4048_v0 = vsel %vm1573_vm6, %v1552_v36, %v2630_v47  ;;  %v2510_v35 = vunpack.i.h.bf16 %v3886_v34 }
  0xfd   : > { %v2638_v32 = vpop.permute.xlu1 %2637 }
  0xfe   : > { %2932 = vrot.lane.b32.xlu0 %v3720_v16, %s3100_s16  ;;  %v2640_v39 = vunpack.i.h.bf16 %v2638_v32  ;;  %v2639_v30 = vunpack.i.l.bf16 %v2638_v32  ;;  %v2504_v16 = vunpack.i.l.bf16 %v3878_v23  ;;  %v1533_v23 = vsel %vm1507_vm4, %v3475_v37, %v2505_v52 }
  0xff   : > { %2927 = vrot.lane.b32.xlu1 %v3778_v51, %s3100_s16 }
 0x100   : > { %v4060_v2 = vpop.permute.xlu0 %2652  ;;  %v4065_v43 = vsel %vm1573_vm6, %v1555_v11, %v2639_v30  ;;  %v4068_v44 = vsel %vm1573_vm6, %v1556_v58, %v2640_v39  ;;  %v1532_v19 = vsel %vm1507_vm4, %v3470_v59, %v2504_v16  ;;  %v2454_v39 = vunpack.i.l.bf16 %v3811_v46 }
 0x101   : > { %v4072_v4 = vpop.permute.xlu1 %2647  ;;  %v1565_v36 = vsel %vm1540_vm5, %v1532_v19, %v2584_v15  ;;  %v1535_v30 = vsel %vm1507_vm4, %v3491_v12, %v2510_v35  ;;  %v1534_v58 = vsel %vm1507_vm4, %v3494_v26, %v2509_v9  ;;  %v2535_v46 = vunpack.i.h.bf16 %v3898_v49 }
 0x102   : > { %2942 = vrot.lane.b32.xlu0 %v5080_v7, %s3101_s23  ;;  %v1566_v7 = vsel %vm1540_vm5, %v1533_v23, %v2585_v21  ;;  %v2534_v12 = vunpack.i.l.bf16 %v3898_v49  ;;  %v1568_v26 = vsel %vm1540_vm5, %v1535_v30, %v2590_v41  ;;  %v1567_v21 = vsel %vm1540_vm5, %v1534_v58, %v2589_v24 }
 0x103   : > { %2937 = vrot.lane.b32.xlu1 %v3772_v42, %s3100_s16  ;;  %v5082_v42 = vld [vmem:[#allocation13_spill] sm:$0xff]  ;;  %v1513_v23 = vsel %vm1507_vm4, %v3215_v54, %v2455_v3  ;;  %v1512_v19 = vsel %vm1507_vm4, %v3218_v55, %v2454_v39  ;;  %v2445_v3 = vunpack.i.h.bf16 %v3799_v38  ;;  %v2450_v39 = vunpack.i.h.bf16 %v3813_v20 }
 0x104   : > { %v2663_v51 = vpop.permute.xlu0 %2662  ;;  %v1546_v35 = vsel %vm1540_vm5, %v1513_v23, %v2535_v46  ;;  %v1545_v9 = vsel %vm1540_vm5, %v1512_v19, %v2534_v12  ;;  %v2449_v30 = vunpack.i.l.bf16 %v3813_v20  ;;  %v5086_v46 = vld [vmem:[#allocation3_spill] sm:$0xff]  ;;  %v2485_v12 = vunpack.i.h.bf16 %v3855_v40 }
 0x105   : > { %v2665_v14 = vunpack.i.h.bf16 %v2663_v51  ;;  %v2664_v47 = vunpack.i.l.bf16 %v2663_v51  ;;  %v4086_v61 = vpop.permute.xlu1 %2657  ;;  %v2614_v51 = vunpack.i.l.bf16 %v3974_v53  ;;  %v1511_v20 = vsel %vm1507_vm4, %v3227_v62, %v2450_v39  ;;  %v5089_v62 = vld [vmem:[#allocation30_spill] sm:$0xff]  ;;  %v5094_v39 = vld [vmem:[#allocation16_spill] sm:$0xff] }
 0x106   : > { %2952 = vrot.lane.b32.xlu0 %v5082_v42, %s3101_s23 }
 0x107   : > { %v4091_v37 = vsel %vm1573_vm6, %v1565_v36, %v2664_v47  ;;  %v4094_v59 = vsel %vm1573_vm6, %v1566_v7, %v2665_v14  ;;  %2947 = vrot.lane.b32.xlu1 %v5081_v18, %s3101_s23  ;;  %v1578_v41 = vsel %vm1573_vm6, %v1545_v9, %v2614_v51 }
 0x108   : > { %v2673_v34 = vpop.permute.xlu0 %2672 }
 0x109   : > { %v2675_v32 = vunpack.i.h.bf16 %v2673_v34  ;;  %v2674_v17 = vunpack.i.l.bf16 %v2673_v34  ;;  %v2668_v11 = vpop.permute.xlu1 %2667 }
 0x10a   : > { %2962 = vrot.lane.b32.xlu0 %v3606_v1, %s3102_s26  ;;  %v2670_v25 = vunpack.i.h.bf16 %v2668_v11  ;;  %v2669_v52 = vunpack.i.l.bf16 %v2668_v11 }
 0x10b   : > { %v4110_v18 = vsel %vm1573_vm6, %v3955_v60, %v2674_v17  ;;  %v4114_v16 = vsel %vm1573_vm6, %v3958_v22, %v2675_v32  ;;  %2957 = vrot.lane.b32.xlu1 %v3565_v27, %s3101_s23  ;;  %v2615_v22 = vunpack.i.h.bf16 %v3974_v53  ;;  %v5084_v17 = vld [vmem:[#allocation18_spill] sm:$0xff] }
 0x10c   : > { %v4122_v1 = vpop.permute.xlu0 %2682  ;;  %v4125_v60 = vsel %vm1573_vm6, %v1567_v21, %v2669_v52  ;;  %v4128_v15 = vsel %vm1573_vm6, %v1568_v26, %v2670_v25  ;;  %v5085_v25 = vld [vmem:[#allocation2_spill] sm:$0xff]  ;;  %v2484_v26 = vunpack.i.l.bf16 %v3855_v40  ;;  %v5090_v40 = vld [vmem:[#allocation15_spill] sm:$0xff] }
 0x10d   : > { %v2678_v49 = vpop.permute.xlu1 %2677  ;;  %v1579_v24 = vsel %vm1573_vm6, %v1546_v35, %v2615_v22  ;;  %v1509_v52 = vsel %vm1507_vm4, %v5085_v25, %v2445_v3  ;;  %v5087_v21 = vld [vmem:[#allocation6_spill] sm:$0xff] }
 0x10e   : > { %2972 = vrot.lane.b32.xlu0 %v3633_v48, %s3102_s26  ;;  %v2680_v14 = vunpack.i.h.bf16 %v2678_v49  ;;  %v2679_v47 = vunpack.i.l.bf16 %v2678_v49  ;;  %v2490_v22 = vunpack.i.h.bf16 %v5087_v21  ;;  %v2489_v51 = vunpack.i.l.bf16 %v5087_v21  ;;  %v5088_v49 = vld [vmem:[#allocation25_spill] sm:$0xff]  ;;  %v5091_v35 = vld [vmem:[#allocation26_spill] sm:$0xff] }
 0x10f   : > { %2967 = vrot.lane.b32.xlu1 %v3675_v33, %s3102_s26  ;;  %v2525_v23 = vunpack.i.h.bf16 %v5088_v49  ;;  %v2524_v19 = vunpack.i.l.bf16 %v5088_v49  ;;  %v2530_v9 = vunpack.i.h.bf16 %v5091_v35 }
 0x110   : > { %v2693_v53 = vpop.permute.xlu0 %2692  ;;  %v4144_v36 = vsel %vm1573_vm6, %v3980_v6, %v2679_v47  ;;  %v4148_v54 = vsel %vm1573_vm6, %v3977_v56, %v2680_v14  ;;  %v1525_v47 = vsel %vm1507_vm4, %v5090_v40, %v2485_v12  ;;  %v5095_v12 = vld [vmem:[#allocation17_spill] sm:$0xff] }
 0x111   : > { %5083 = vst [vmem:[#allocation12_spill] sm:$0xff] %v4148_v54  ;;  %v2695_v7 = vunpack.i.h.bf16 %v2693_v53  ;;  %v2694_v55 = vunpack.i.l.bf16 %v2693_v53  ;;  %v4152_v34 = vpop.permute.xlu1 %2687  ;;  %v2529_v53 = vunpack.i.l.bf16 %v5091_v35  ;;  %v1526_v21 = vsel %vm1507_vm4, %v5095_v12, %v2489_v51  ;;  %v5096_v40 = vld [vmem:[#allocation37_spill] sm:$0xff] }
 0x112   : > { %2982 = vrot.lane.b32.xlu0 %v5082_v42, %s3098_s10  ;;  %v2444_v42 = vunpack.i.l.bf16 %v3799_v38  ;;  %v1542_v49 = vsel %vm1540_vm5, %v1509_v52, %v2525_v23  ;;  %v2570_v35 = vunpack.i.h.bf16 %v5096_v40  ;;  %v1544_v52 = vsel %vm1540_vm5, %v1511_v20, %v2530_v9 }
 0x113   : > { %v4157_v33 = vsel %vm1606_vm7, %v1578_v41, %v2694_v55  ;;  %v4160_v6 = vsel %vm1606_vm7, %v1579_v24, %v2695_v7  ;;  %2977 = vrot.lane.b32.xlu1 %v3689_v45, %s3102_s26  ;;  %v5092_v7 = vld [vmem:[#allocation14_spill] sm:$0xff]  ;;  %v5093_v41 = vld [vmem:[#allocation36_spill] sm:$0xff]  ;;  %v2610_v23 = vunpack.i.h.bf16 %v3984_v28  ;;  %v2645_v12 = vunpack.i.h.bf16 %v4042_v57 }
 0x114   : > { %v4164_v56 = vpop.permute.xlu0 %2702  ;;  %v1508_v38 = vsel %vm1507_vm4, %v5086_v46, %v2444_v42  ;;  %v1524_v55 = vsel %vm1507_vm4, %v5092_v7, %v2484_v26  ;;  %v2565_v24 = vunpack.i.h.bf16 %v5093_v41  ;;  %v2564_v3 = vunpack.i.l.bf16 %v5093_v41  ;;  %v5097_v41 = vld [vmem:[#allocation38_spill] sm:$0xff] }
 0x115   : > { %v4166_v32 = vpop.permute.xlu1 %2697  ;;  %v1541_v26 = vsel %vm1540_vm5, %v1508_v38, %v2524_v19  ;;  %v2569_v7 = vunpack.i.l.bf16 %v5096_v40  ;;  %v2609_v38 = vunpack.i.l.bf16 %v3984_v28  ;;  %v2644_v40 = vunpack.i.l.bf16 %v4042_v57 }
 0x116   : > { %2992 = vrot.lane.b32.xlu0 %v5084_v17, %s3098_s10  ;;  %v1557_v19 = vsel %vm1540_vm5, %v1524_v55, %v2564_v3  ;;  %v2650_v20 = vunpack.i.h.bf16 %v4072_v4  ;;  %v2649_v9 = vunpack.i.l.bf16 %v4072_v4  ;;  %v2684_v28 = vunpack.i.l.bf16 %v4122_v1  ;;  %v5100_v3 = vld [vmem:[#allocation32_spill] sm:$0xff] }
 0x117   : > { %2987 = vrot.lane.b32.xlu1 %v3565_v27, %s3098_s10  ;;  %v1510_v27 = vsel %vm1507_vm4, %v3230_v63, %v2449_v30  ;;  %v1527_v30 = vsel %vm1507_vm4, %v5094_v39, %v2490_v22  ;;  %v2605_v63 = vunpack.i.h.bf16 %v5097_v41  ;;  %v5098_v22 = vld [vmem:[#allocation33_spill] sm:$0xff]  ;;  %v1558_v39 = vsel %vm1540_vm5, %v1525_v47, %v2565_v24 }
 0x118   : > { %v4176_v58 = vpop.permute.xlu0 %2712  ;;  %v1543_v51 = vsel %vm1540_vm5, %v1510_v27, %v2529_v53  ;;  %v1560_v27 = vsel %vm1540_vm5, %v1527_v30, %v2570_v35  ;;  %v1559_v47 = vsel %vm1540_vm5, %v1526_v21, %v2569_v7  ;;  %v2685_v55 = vunpack.i.h.bf16 %v4122_v1  ;;  %v5101_v7 = vld [vmem:[#allocation34_spill] sm:$0xff] }
 0x119   : > { %v4178_v11 = vpop.permute.xlu1 %2707  ;;  %v1575_v57 = vsel %vm1573_vm6, %v1542_v49, %v2605_v63  ;;  %v1576_v30 = vsel %vm1573_vm6, %v1543_v51, %v2609_v38  ;;  %v1577_v4 = vsel %vm1573_vm6, %v1544_v52, %v2610_v23  ;;  %v2690_v35 = vunpack.i.h.bf16 %v4152_v34 }
 0x11a   : > { %3002 = vrot.lane.b32.xlu0 %v3633_v48, %s3099_s11  ;;  %v2689_v21 = vunpack.i.l.bf16 %v4152_v34  ;;  %v1591_v63 = vsel %vm1573_vm6, %v1558_v39, %v2645_v12  ;;  %v2705_v1 = vunpack.i.h.bf16 %v4164_v56  ;;  %v2704_v49 = vunpack.i.l.bf16 %v4164_v56 }
 0x11b   : > { %2997 = vrot.lane.b32.xlu1 %v3793_v8, %s3098_s10  ;;  %v4267_v51 = vsel %vm1573_vm6, %v1559_v47, %v2649_v9  ;;  %v4270_v52 = vsel %vm1573_vm6, %v1560_v27, %v2650_v20  ;;  %v2714_v23 = vunpack.i.l.bf16 %v4176_v58  ;;  %v1608_v38 = vsel %vm1606_vm7, %v1575_v57, %v2685_v55 }
 0x11c   : > { %v4194_v48 = vpop.permute.xlu0 %2722  ;;  %v1610_v27 = vsel %vm1606_vm7, %v1577_v4, %v2690_v35  ;;  %v2710_v57 = vunpack.i.h.bf16 %v4178_v11  ;;  %v2709_v55 = vunpack.i.l.bf16 %v4178_v11 }
 0x11d   : > { %v4200_v14 = vpop.permute.xlu1 %2717  ;;  %v2725_v56 = vunpack.i.h.bf16 %v4194_v48  ;;  %v2724_v39 = vunpack.i.l.bf16 %v4194_v48 }
 0x11e   : > { %3012 = vrot.lane.b32.xlu0 %v5089_v62, %s3099_s11  ;;  %v2720_v20 = vunpack.i.h.bf16 %v4200_v14  ;;  %v2719_v9 = vunpack.i.l.bf16 %v4200_v14 }
 0x11f   : > { %3007 = vrot.lane.b32.xlu1 %v3689_v45, %s3099_s11  ;;  %v2604_v45 = vunpack.i.l.bf16 %v5097_v41  ;;  %v5099_v41 = vld [vmem:[#allocation8_spill] sm:$0xff]  ;;  %v1643_v35 = vsel %vm1639_vm8, %v1610_v27, %v2725_v56 }
 0x120   : > { %v4216_v42 = vpop.permute.xlu0 %2732 }
 0x121   : > { %v4228_v54 = vpop.permute.xlu1 %2727  ;;  %v1574_v53 = vsel %vm1573_vm6, %v1541_v26, %v2604_v45  ;;  %v1590_v26 = vsel %vm1573_vm6, %v1557_v19, %v2644_v40  ;;  %v2715_v19 = vunpack.i.h.bf16 %v4176_v58  ;;  %v1609_v40 = vsel %vm1606_vm7, %v1576_v30, %v2689_v21 }
 0x122   : > { %3022 = vrot.lane.b32.xlu0 %v5098_v22, %s3100_s16  ;;  %v1607_v34 = vsel %vm1606_vm7, %v1574_v53, %v2684_v28  ;;  %v1623_v58 = vsel %vm1606_vm7, %v1590_v26, %v2704_v49  ;;  %v1624_v28 = vsel %vm1606_vm7, %v1591_v63, %v2705_v1  ;;  %v2735_v48 = vunpack.i.h.bf16 %v4216_v42  ;;  %v5103_v26 = vld [vmem:[#allocation21_spill] sm:$0xff] }
 0x123   : > { %3017 = vrot.lane.b32.xlu1 %v5099_v41, %s3099_s11  ;;  %v2734_v47 = vunpack.i.l.bf16 %v4216_v42  ;;  %v1640_v14 = vsel %vm1639_vm8, %v1607_v34, %v2714_v23  ;;  %v1641_v30 = vsel %vm1639_vm8, %v1608_v38, %v2715_v19  ;;  %v1642_v4 = vsel %vm1639_vm8, %v1609_v40, %v2724_v39 }
 0x124   : > { %v4242_v22 = vpop.permute.xlu0 %2742  ;;  %v2730_v63 = vunpack.i.h.bf16 %v4228_v54 }
 0x125   : > { %v4252_v24 = vpop.permute.xlu1 %2737  ;;  %v2744_v1 = vunpack.i.l.bf16 %v4242_v22  ;;  %v1673_v49 = vsel %vm1672_vm9, %v1640_v14, %v2734_v47 }
 0x126   : > { %3032 = vrot.lane.b32.xlu0 %v5100_v3, %s3100_s16  ;;  %v2739_v34 = vunpack.i.l.bf16 %v4252_v24  ;;  %v2740_v38 = vunpack.i.h.bf16 %v4252_v24 }
 0x127   : > { %3027 = vrot.lane.b32.xlu1 %v5101_v7, %s3100_s16  ;;  %v1674_v7 = vsel %vm1672_vm9, %v1641_v30, %v2735_v48 }
 0x128   : > { %v2753_v45 = vpop.permute.xlu0 %2752 }
 0x129   : > { %v4278_v12 = vpop.permute.xlu1 %2747  ;;  %v2754_v3 = vunpack.i.l.bf16 %v2753_v45  ;;  %v2755_v42 = vunpack.i.h.bf16 %v2753_v45  ;;  %v2745_v45 = vunpack.i.h.bf16 %v4242_v22  ;;  %v2729_v22 = vunpack.i.l.bf16 %v4228_v54 }
 0x12a   : > { %3042 = vrot.lane.b32.xlu0 %v5084_v17, %s3101_s23  ;;  %v5102_v17 = vpack.i.bf16 %v5085_v25, %v5086_v46  ;;  %v1656_v25 = vsel %vm1639_vm8, %v1623_v58, %v2719_v9  ;;  %v1657_v46 = vsel %vm1639_vm8, %v1624_v28, %v2720_v20  ;;  %v2750_v54 = vunpack.i.h.bf16 %v4278_v12 }
 0x12b   : > { %v1706_v39 = vsel %vm1705_vm10, %v1673_v49, %v2754_v3  ;;  %v1707_v58 = vsel %vm1705_vm10, %v1674_v7, %v2755_v42  ;;  %v1689_v48 = vsel %vm1672_vm9, %v1656_v25, %v2739_v34  ;;  %v1676_v47 = vsel %vm1672_vm9, %v1643_v35, %v2745_v45  ;;  %v5105_v35 = vld [vmem:[#allocation31_spill] sm:$0xff] }
 0x12c   : > { %3037 = vrot.lane.b32.xlu1 %v5102_v17, %s3100_s16  ;;  %v2763_v53 = vpop.permute.xlu0 %2762  ;;  %v1690_v3 = vsel %vm1672_vm9, %v1657_v46, %v2740_v38  ;;  %v2749_v42 = vunpack.i.l.bf16 %v4278_v12 }
 0x12d   : > { %v2758_v21 = vpop.permute.xlu1 %2757  ;;  %v2765_v27 = vunpack.i.h.bf16 %v2763_v53  ;;  %v2764_v20 = vunpack.i.l.bf16 %v2763_v53  ;;  %v5104_v53 = vld [vmem:[#allocation4_spill] sm:$0xff] }
 0x12e   : > { %3052 = vrot.lane.b32.xlu0 %v5103_v26, %s3101_s23  ;;  %v2759_v40 = vunpack.i.l.bf16 %v2758_v21  ;;  %v2760_v17 = vunpack.i.h.bf16 %v2758_v21 }
 0x12f   : > { %v1709_v25 = vsel %vm1705_vm10, %v1676_v47, %v2765_v27 }
 0x130   : > { %3047 = vrot.lane.b32.xlu1 %v3793_v8, %s3101_s23  ;;  %v2773_v23 = vpop.permute.xlu0 %2772  ;;  %v1675_v8 = vsel %vm1672_vm9, %v1642_v4, %v2744_v1  ;;  %v1722_v21 = vsel %vm1705_vm10, %v1689_v48, %v2759_v40 }
 0x131   : > { %v2775_v19 = vunpack.i.h.bf16 %v2773_v23  ;;  %v2774_v56 = vunpack.i.l.bf16 %v2773_v23  ;;  %v2768_v9 = vpop.permute.xlu1 %2767  ;;  %v1708_v26 = vsel %vm1705_vm10, %v1675_v8, %v2764_v20 }
 0x132   : > { %3062 = vrot.lane.b32.xlu0 %v5089_v62, %s3102_s26  ;;  %v2770_v45 = vunpack.i.h.bf16 %v2768_v9  ;;  %v2769_v12 = vunpack.i.l.bf16 %v2768_v9 }
 0x133   : > { %v1739_v28 = vsel %vm1738_vm11, %v1706_v39, %v2774_v56  ;;  %v1740_v24 = vsel %vm1738_vm11, %v1707_v58, %v2775_v19  ;;  %v1723_v19 = vsel %vm1705_vm10, %v1690_v3, %v2760_v17  ;;  %v1625_v56 = vsel %vm1606_vm7, %v4267_v51, %v2709_v55 }
 0x134   : > { %3057 = vrot.lane.b32.xlu1 %v5104_v53, %s3101_s23  ;;  %v2783_v14 = vpop.permute.xlu0 %2782  ;;  %v1771_v62 = vpack.c.bf16 %v1740_v24, %v1739_v28  ;;  %v1626_v39 = vsel %vm1606_vm7, %v4270_v52, %v2710_v57  ;;  %v1658_v20 = vsel %vm1639_vm8, %v1625_v56, %v2729_v22  ;;  %v5106_v28 = vld [vmem:[#allocation27_spill] sm:$0xff]  ;;  %v5107_v53 = vld [vmem:[#allocation9_spill] sm:$0xff] }
 0x135   : > { %v2785_v30 = vunpack.i.h.bf16 %v2783_v14  ;;  %v2784_v4 = vunpack.i.l.bf16 %v2783_v14  ;;  %v2778_v1 = vpop.permute.xlu1 %2777  ;;  %v1691_v8 = vsel %vm1672_vm9, %v1658_v20, %v2749_v42  ;;  %v2460_v14 = vunpack.i.h.bf16 %v5107_v53  ;;  %v5109_v42 = vld [vmem:[#allocation22_spill] sm:$0xff] }
 0x136   : > { %3072 = vrot.lane.b32.xlu0 %v5105_v35, %s3102_s26  ;;  %2379 = vmatprep.mubr.msk.bf16.mxu0 %vm1823_vm12, %v1771_v62  ;;  %v2780_v49 = vunpack.i.h.bf16 %v2778_v1  ;;  %v2779_v46 = vunpack.i.l.bf16 %v2778_v1  ;;  %v1724_v52 = vsel %vm1705_vm10, %v1691_v8, %v2769_v12  ;;  %v2459_v62 = vunpack.i.l.bf16 %v5107_v53  ;;  %v5110_v35 = vld [vmem:[#allocation5_spill] sm:$0xff]  ;;  %v5113_v12 = vld [vmem:[#allocation11_spill] sm:$0xff] }
 0x137   : > { %v1741_v7 = vsel %vm1738_vm11, %v1708_v26, %v2784_v4  ;;  %v1742_v34 = vsel %vm1738_vm11, %v1709_v25, %v2785_v30  ;;  %v2500_v26 = vunpack.i.h.bf16 %v5109_v42  ;;  %v2499_v25 = vunpack.i.l.bf16 %v5109_v42  ;;  %v5117_v8 = vld [vmem:[#allocation23_spill] sm:$0xff] }
 0x138   : > { %v1772_v23 = vpack.c.bf16 %v1742_v34, %v1741_v7  ;;  %3067 = vrot.lane.b32.xlu1 %v5099_v41, %s3102_s26  ;;  %v4338_v38 = vpop.permute.xlu0 %2792  ;;  %v1755_v40 = vsel %vm1738_vm11, %v1722_v21, %v2779_v46  ;;  %v1756_v27 = vsel %vm1738_vm11, %v1723_v19, %v2780_v49  ;;  %v1659_v41 = vsel %vm1639_vm8, %v1626_v39, %v2730_v63  ;;  %v5111_v49 = vld [vmem:[#allocation35_spill] sm:$0xff] }
 0x139   : > { %v2788_v9 = vpop.permute.xlu1 %2787  ;;  %v1779_v58 = vpack.c.bf16 %v1756_v27, %v1755_v40  ;;  %v1692_v51 = vsel %vm1672_vm9, %v1659_v41, %v2750_v54  ;;  %v5108_v54 = vld [vmem:[#allocation10_spill] sm:$0xff]  ;;  %v1515_v21 = vsel %vm1507_vm4, %v5110_v35, %v2460_v14  ;;  %v2540_v46 = vunpack.i.h.bf16 %v5111_v49  ;;  %v5112_v7 = vld [vmem:[#allocation7_spill] sm:$0xff]  ;;  %v5115_v27 = vld [vmem:[#allocation20_spill] sm:$0xff] }
 0x13a   : > { %2380 = vmatmul.mubr.msk.bf16.vlgmr.msra.gmra.mrb[0].mxu0 %vm1823_vm12, %v1772_v23  ;;  %v2790_v11 = vunpack.i.h.bf16 %v2788_v9  ;;  %v2789_v55 = vunpack.i.l.bf16 %v2788_v9  ;;  %v1725_v57 = vsel %vm1705_vm10, %v1692_v51, %v2770_v45  ;;  %v2495_v30 = vunpack.i.h.bf16 %v5108_v54  ;;  %v5114_v39 = vld [vmem:[#allocation19_spill] sm:$0xff]  ;;  %v5116_v41 = vld [vmem:[#allocation28_spill] sm:$0xff] }
 0x13b   : > { %2395 = vmatprep.mubr.msk.bf16.mxu1 %vm1823_vm12, %v1779_v58  ;;  %v2494_v4 = vunpack.i.l.bf16 %v5108_v54  ;;  %v1514_v34 = vsel %vm1507_vm4, %v5112_v7, %v2459_v62  ;;  %v2539_v45 = vunpack.i.l.bf16 %v5111_v49  ;;  %v2575_v23 = vunpack.i.h.bf16 %v5113_v12 }
 0x13c   : > { %3077 = vrot.lane.b32.xlu1 %v5106_v28, %s3102_s26  ;;  %v4359_v63 = vpop.permute.xlu0 %2802  ;;  %v1757_v22 = vsel %vm1738_vm11, %v1724_v52, %v2789_v55  ;;  %v1758_v24 = vsel %vm1738_vm11, %v1725_v57, %v2790_v11  ;;  %v2574_v19 = vunpack.i.l.bf16 %v5113_v12  ;;  %v1529_v40 = vsel %vm1507_vm4, %v5114_v39, %v2495_v30  ;;  %v5118_v11 = vld [vmem:[#allocation24_spill] sm:$0xff] }
 0x13d   : > { %v1780_v48 = vpack.c.bf16 %v1758_v24, %v1757_v22  ;;  %v4363_v47 = vpop.permute.xlu1 %2797  ;;  %v1528_v20 = vsel %vm1507_vm4, %v5115_v27, %v2494_v4  ;;  %v2580_v9 = vunpack.i.h.bf16 %v5116_v41  ;;  %v2579_v58 = vunpack.i.l.bf16 %v5116_v41 }
 0x13e   : > { %v1531_v51 = vsel %vm1507_vm4, %v5117_v8, %v2500_v26  ;;  %v1530_v55 = vsel %vm1507_vm4, %v5118_v11, %v2499_v25  ;;  %v2620_v52 = vunpack.i.h.bf16 %v4002_v5  ;;  %v2619_v57 = vunpack.i.l.bf16 %v4002_v5 }
 0x13f   : > { %2396 = vmatmul.mubr.msk.bf16.vlgmr.msra.gmra.mrb[0].mxu1 %vm1823_vm12, %v1780_v48  ;;  %v1548_v22 = vsel %vm1540_vm5, %v1515_v21, %v2540_v46  ;;  %v2655_v24 = vunpack.i.h.bf16 %v4060_v2  ;;  %v2654_v48 = vunpack.i.l.bf16 %v4060_v2  ;;  %v2659_v53 = vunpack.i.l.bf16 %v4086_v61 }
 0x140   : > { %v4366_v17 = vpop.permute.xlu0 %2812  ;;  %v1547_v14 = vsel %vm1540_vm5, %v1514_v34, %v2539_v45  ;;  %v1561_v62 = vsel %vm1540_vm5, %v1528_v20, %v2574_v19  ;;  %v1562_v54 = vsel %vm1540_vm5, %v1529_v40, %v2575_v23  ;;  %v2660_v30 = vunpack.i.h.bf16 %v4086_v61 }
 0x141   : > { %v4370_v3 = vpop.permute.xlu1 %2807  ;;  %v1564_v5 = vsel %vm1540_vm5, %v1531_v51, %v2580_v9  ;;  %v1563_v42 = vsel %vm1540_vm5, %v1530_v55, %v2579_v58  ;;  %v2700_v26 = vunpack.i.h.bf16 %v4166_v32  ;;  %v2699_v2 = vunpack.i.l.bf16 %v4166_v32 }
 0x142   : > { %v1580_v25 = vsel %vm1573_vm6, %v1547_v14, %v2619_v57  ;;  %v1581_v35 = vsel %vm1573_vm6, %v1548_v22, %v2620_v52  ;;  %v2795_v21 = vunpack.i.h.bf16 %v4338_v38  ;;  %v2794_v49 = vunpack.i.l.bf16 %v4338_v38 }
 0x143   : > { %v1594_v61 = vsel %vm1573_vm6, %v1561_v62, %v2654_v48  ;;  %v1595_v7 = vsel %vm1573_vm6, %v1562_v54, %v2655_v24  ;;  %v4423_v34 = vsel %vm1573_vm6, %v1563_v42, %v2659_v53  ;;  %v2804_v45 = vunpack.i.l.bf16 %v4359_v63 }
 0x144   : > { %v4376_v1 = vpop.permute.xlu0 %2822  ;;  %v4427_v32 = vsel %vm1573_vm6, %v1564_v5, %v2660_v30  ;;  %v2805_v12 = vunpack.i.h.bf16 %v4359_v63  ;;  %v2815_v23 = vunpack.i.h.bf16 %v4366_v17  ;;  %v2814_v19 = vunpack.i.l.bf16 %v4366_v17 }
 0x145   : > { %v4386_v56 = vpop.permute.xlu1 %2817  ;;  %v1613_v39 = vsel %vm1606_vm7, %v1580_v25, %v2699_v2  ;;  %v1614_v40 = vsel %vm1606_vm7, %v1581_v35, %v2700_v26  ;;  %v2810_v27 = vunpack.i.h.bf16 %v4370_v3  ;;  %v2809_v20 = vunpack.i.l.bf16 %v4370_v3 }
 0x146   : > { %v1627_v41 = vsel %vm1606_vm7, %v1594_v61, %v2794_v49  ;;  %v1628_v9 = vsel %vm1606_vm7, %v1595_v7, %v2795_v21  ;;  %v2825_v63 = vunpack.i.h.bf16 %v4376_v1  ;;  %v2824_v58 = vunpack.i.l.bf16 %v4376_v1 }
 0x147   : > { %v2800_v17 = vunpack.i.h.bf16 %v4363_v47  ;;  %v2799_v51 = vunpack.i.l.bf16 %v4363_v47  ;;  %v1644_v11 = vsel %vm1639_vm8, %v4157_v33, %v2804_v45  ;;  %v1645_v3 = vsel %vm1639_vm8, %v4160_v6, %v2805_v12 }
 0x148   : > { %v4400_v28 = vpop.permute.xlu0 %2832  ;;  %v1647_v52 = vsel %vm1639_vm8, %v1614_v40, %v2815_v23  ;;  %v1646_v57 = vsel %vm1639_vm8, %v1613_v39, %v2814_v19  ;;  %v1660_v1 = vsel %vm1639_vm8, %v1627_v41, %v2809_v20  ;;  %v1661_v48 = vsel %vm1639_vm8, %v1628_v9, %v2810_v27 }
 0x149   : > { %v4410_v4 = vpop.permute.xlu1 %2827  ;;  %v2820_v53 = vunpack.i.h.bf16 %v4386_v56  ;;  %v2834_v47 = vunpack.i.l.bf16 %v4400_v28  ;;  %v1677_v33 = vsel %vm1672_vm9, %v1644_v11, %v2824_v58  ;;  %v1678_v14 = vsel %vm1672_vm9, %v1645_v3, %v2825_v63 }
 0x14a   : > { %v2829_v6 = vunpack.i.l.bf16 %v4410_v4  ;;  %v2835_v62 = vunpack.i.h.bf16 %v4400_v28  ;;  %v2830_v30 = vunpack.i.h.bf16 %v4410_v4 }
 0x14b   : > { %v1679_v61 = vsel %vm1672_vm9, %v1646_v57, %v2834_v47 }
 0x14c   : > { %v2843_v46 = vpop.permute.xlu0 %2842  ;;  %v1693_v4 = vsel %vm1672_vm9, %v1660_v1, %v2829_v6  ;;  %v1680_v45 = vsel %vm1672_vm9, %v1647_v52, %v2835_v62  ;;  %v1694_v39 = vsel %vm1672_vm9, %v1661_v48, %v2830_v30  ;;  %v1629_v1 = vsel %vm1606_vm7, %v4423_v34, %v2799_v51 }
 0x14d   : > { %v4432_v38 = vpop.permute.xlu1 %2837  ;;  %v2844_v55 = vunpack.i.l.bf16 %v2843_v46  ;;  %v2845_v22 = vunpack.i.h.bf16 %v2843_v46  ;;  %v2819_v46 = vunpack.i.l.bf16 %v4386_v56  ;;  %v1630_v48 = vsel %vm1606_vm7, %v4427_v32, %v2800_v17 }
 0x14e   : > { %v2840_v40 = vunpack.i.h.bf16 %v4432_v38  ;;  %v2839_v56 = vunpack.i.l.bf16 %v4432_v38  ;;  %v1663_v6 = vsel %vm1639_vm8, %v1630_v48, %v2820_v53 }
 0x14f   : > { %v1710_v5 = vsel %vm1705_vm10, %v1677_v33, %v2844_v55  ;;  %v1711_v2 = vsel %vm1705_vm10, %v1678_v14, %v2845_v22  ;;  %v1662_v14 = vsel %vm1639_vm8, %v1629_v1, %v2819_v46 }
 0x150   : > { %v2853_v8 = vpop.permute.xlu0 %2852  ;;  %v1695_v30 = vsel %vm1672_vm9, %v1662_v14, %v2839_v56 }
 0x151   : > { %v2848_v24 = vpop.permute.xlu1 %2847  ;;  %v2855_v35 = vunpack.i.h.bf16 %v2853_v8  ;;  %v2854_v21 = vunpack.i.l.bf16 %v2853_v8 }
 0x152   : > { %v2849_v25 = vunpack.i.l.bf16 %v2848_v24  ;;  %v2850_v12 = vunpack.i.h.bf16 %v2848_v24 }
 0x153   : > { %v1712_v9 = vsel %vm1705_vm10, %v1679_v61, %v2854_v21  ;;  %v1713_v63 = vsel %vm1705_vm10, %v1680_v45, %v2855_v35 }
 0x154   : > { %v2863_v54 = vpop.permute.xlu0 %2862  ;;  %v1726_v41 = vsel %vm1705_vm10, %v1693_v4, %v2849_v25  ;;  %v1727_v52 = vsel %vm1705_vm10, %v1694_v39, %v2850_v12 }
 0x155   : > { %v2865_v42 = vunpack.i.h.bf16 %v2863_v54  ;;  %v2864_v26 = vunpack.i.l.bf16 %v2863_v54  ;;  %v2858_v49 = vpop.permute.xlu1 %2857 }
 0x156   : > { %v2860_v57 = vunpack.i.h.bf16 %v2858_v49  ;;  %v2859_v22 = vunpack.i.l.bf16 %v2858_v49 }
 0x157   : > { %v1743_v7 = vsel %vm1738_vm11, %v1710_v5, %v2864_v26  ;;  %v1744_v28 = vsel %vm1738_vm11, %v1711_v2, %v2865_v42  ;;  %v1696_v5 = vsel %vm1672_vm9, %v1663_v6, %v2840_v40 }
 0x158   : > { %v1773_v23 = vpack.c.bf16 %v1744_v28, %v1743_v7  ;;  %v2873_v19 = vpop.permute.xlu0 %2872  ;;  %v1728_v32 = vsel %vm1705_vm10, %v1695_v30, %v2859_v22  ;;  %v1729_v17 = vsel %vm1705_vm10, %v1696_v5, %v2860_v57 }
 0x159   : > { %v2875_v27 = vunpack.i.h.bf16 %v2873_v19  ;;  %v2874_v20 = vunpack.i.l.bf16 %v2873_v19  ;;  %v2868_v58 = vpop.permute.xlu1 %2867 }
 0x15a   : > { %2383 = vmatprep.mubr.msk.bf16.mxu0 %vm1823_vm12, %v1773_v23  ;;  %v2870_v8 = vunpack.i.h.bf16 %v2868_v58  ;;  %v2869_v11 = vunpack.i.l.bf16 %v2868_v58 }
 0x15b   : > { %v1745_v55 = vsel %vm1738_vm11, %v1712_v9, %v2874_v20  ;;  %v1746_v3 = vsel %vm1738_vm11, %v1713_v63, %v2875_v27 }
 0x15c   : > { %v1774_v38 = vpack.c.bf16 %v1746_v3, %v1745_v55  ;;  %v2883_v24 = vpop.permute.xlu0 %2882  ;;  %v1759_v47 = vsel %vm1738_vm11, %v1726_v41, %v2869_v11  ;;  %v1760_v33 = vsel %vm1738_vm11, %v1727_v52, %v2870_v8 }
 0x15d   : > { %v1781_v62 = vpack.c.bf16 %v1760_v33, %v1759_v47  ;;  %v2878_v54 = vpop.permute.xlu1 %2877  ;;  %v2884_v4 = vunpack.i.l.bf16 %v2883_v24  ;;  %v2885_v45 = vunpack.i.h.bf16 %v2883_v24 }
 0x15e   : > { %2384 = vmatmul.mubr.msk.bf16.gmra.mrb[4].mxu0 %vm1823_vm12, %v1774_v38  ;;  %v2880_v34 = vunpack.i.h.bf16 %v2878_v54  ;;  %v2879_v51 = vunpack.i.l.bf16 %v2878_v54 }
 0x15f   : > { %2399 = vmatprep.mubr.msk.bf16.mxu1 %vm1823_vm12, %v1781_v62  ;;  %v1615_v20 = vsel %vm1606_vm7, %v4007_v13, %v2884_v4  ;;  %v1616_v41 = vsel %vm1606_vm7, %v4010_v50, %v2885_v45 }
 0x160   : > { %v2893_v42 = vpop.permute.xlu0 %2892  ;;  %v1761_v26 = vsel %vm1738_vm11, %v1728_v32, %v2879_v51  ;;  %v1762_v53 = vsel %vm1738_vm11, %v1729_v17, %v2880_v34 }
 0x161   : > { %v1782_v2 = vpack.c.bf16 %v1762_v53, %v1761_v26  ;;  %v2888_v25 = vpop.permute.xlu1 %2887  ;;  %v2895_v23 = vunpack.i.h.bf16 %v2893_v42  ;;  %v2894_v19 = vunpack.i.l.bf16 %v2893_v42 }
 0x162   : > { %v2890_v39 = vunpack.i.h.bf16 %v2888_v25  ;;  %v2889_v40 = vunpack.i.l.bf16 %v2888_v25 }
 0x163   : > { %2400 = vmatmul.mubr.msk.bf16.gmra.mrb[4].mxu1 %vm1823_vm12, %v1782_v2  ;;  %v1618_v11 = vsel %vm1606_vm7, %v4048_v0, %v2895_v23  ;;  %v1617_v55 = vsel %vm1606_vm7, %v4045_v10, %v2894_v19 }
 0x164   : > { %v2903_v35 = vpop.permute.xlu0 %2902  ;;  %v1631_v13 = vsel %vm1606_vm7, %v4091_v37, %v2889_v40  ;;  %v1632_v57 = vsel %vm1606_vm7, %v4094_v59, %v2890_v39 }
 0x165   : > { %v4494_v21 = vpop.permute.xlu1 %2897  ;;  %v2904_v56 = vunpack.i.l.bf16 %v2903_v35  ;;  %v2905_v9 = vunpack.i.h.bf16 %v2903_v35 }
 0x166   : > { %v2900_v24 = vunpack.i.h.bf16 %v4494_v21  ;;  %v2899_v1 = vunpack.i.l.bf16 %v4494_v21 }
 0x167   : > { %v1648_v0 = vsel %vm1639_vm8, %v1615_v20, %v2904_v56  ;;  %v1649_v10 = vsel %vm1639_vm8, %v1616_v41, %v2905_v9 }
 0x168   : > { %v2913_v49 = vpop.permute.xlu0 %2912 }
 0x169   : > { %v2908_v46 = vpop.permute.xlu1 %2907  ;;  %v2915_v63 = vunpack.i.h.bf16 %v2913_v49  ;;  %v2914_v58 = vunpack.i.l.bf16 %v2913_v49 }
 0x16a   : > { %v2910_v3 = vunpack.i.h.bf16 %v2908_v46  ;;  %v2909_v52 = vunpack.i.l.bf16 %v2908_v46 }
 0x16b   : > { %v1650_v47 = vsel %vm1639_vm8, %v1617_v55, %v2914_v58  ;;  %v1651_v33 = vsel %vm1639_vm8, %v1618_v11, %v2915_v63 }
 0x16c   : > { %v2923_v61 = vpop.permute.xlu0 %2922  ;;  %v1664_v59 = vsel %vm1639_vm8, %v1631_v13, %v2909_v52  ;;  %v1665_v6 = vsel %vm1639_vm8, %v1632_v57, %v2910_v3 }
 0x16d   : > { %v4496_v7 = vpop.permute.xlu1 %2917  ;;  %v2925_v50 = vunpack.i.h.bf16 %v2923_v61  ;;  %v2924_v22 = vunpack.i.l.bf16 %v2923_v61 }
 0x16e   : > { %v2920_v62 = vunpack.i.h.bf16 %v4496_v7  ;;  %v2919_v46 = vunpack.i.l.bf16 %v4496_v7 }
 0x16f   : > { %v1681_v30 = vsel %vm1672_vm9, %v1648_v0, %v2924_v22  ;;  %v1682_v5 = vsel %vm1672_vm9, %v1649_v10, %v2925_v50  ;;  %v1634_v0 = vsel %vm1606_vm7, %v4128_v15, %v2900_v24 }
 0x170   : > { %v2933_v28 = vpop.permute.xlu0 %2932 }
 0x171   : > { %v2928_v12 = vpop.permute.xlu1 %2927  ;;  %v2934_v54 = vunpack.i.l.bf16 %v2933_v28  ;;  %v2935_v51 = vunpack.i.h.bf16 %v2933_v28 }
 0x172   : > { %v2929_v34 = vunpack.i.l.bf16 %v2928_v12  ;;  %v2930_v17 = vunpack.i.h.bf16 %v2928_v12 }
 0x173   : > { %v1683_v61 = vsel %vm1672_vm9, %v1650_v47, %v2934_v54  ;;  %v1684_v12 = vsel %vm1672_vm9, %v1651_v33, %v2935_v51  ;;  %v1667_v33 = vsel %vm1639_vm8, %v1634_v0, %v2920_v62 }
 0x174   : > { %v2943_v27 = vpop.permute.xlu0 %2942  ;;  %v1697_v45 = vsel %vm1672_vm9, %v1664_v59, %v2929_v34  ;;  %v1698_v40 = vsel %vm1672_vm9, %v1665_v6, %v2930_v17 }
 0x175   : > { %v4502_v8 = vpop.permute.xlu1 %2937  ;;  %v2944_v48 = vunpack.i.l.bf16 %v2943_v27  ;;  %v2945_v37 = vunpack.i.h.bf16 %v2943_v27 }
 0x176   : > { %v2940_v27 = vunpack.i.h.bf16 %v4502_v8  ;;  %v2939_v7 = vunpack.i.l.bf16 %v4502_v8 }
 0x177   : > { %v1714_v42 = vsel %vm1705_vm10, %v1681_v30, %v2944_v48  ;;  %v1715_v2 = vsel %vm1705_vm10, %v1682_v5, %v2945_v37 }
 0x178   : > { %v2953_v38 = vpop.permute.xlu0 %2952  ;;  %v1700_v6 = vsel %vm1672_vm9, %v1667_v33, %v2940_v27 }
 0x179   : > { %v2948_v14 = vpop.permute.xlu1 %2947  ;;  %v2955_v35 = vunpack.i.h.bf16 %v2953_v38  ;;  %v2954_v21 = vunpack.i.l.bf16 %v2953_v38  ;;  %v1633_v38 = vsel %vm1606_vm7, %v4125_v60, %v2899_v1 }
 0x17a   : > { %v2949_v25 = vunpack.i.l.bf16 %v2948_v14  ;;  %v2950_v23 = vunpack.i.h.bf16 %v2948_v14  ;;  %v1666_v47 = vsel %vm1639_vm8, %v1633_v38, %v2919_v46 }
 0x17b   : > { %v1716_v9 = vsel %vm1705_vm10, %v1683_v61, %v2954_v21  ;;  %v1717_v63 = vsel %vm1705_vm10, %v1684_v12, %v2955_v35  ;;  %v1699_v59 = vsel %vm1672_vm9, %v1666_v47, %v2939_v7 }
 0x17c   : > { %v2963_v32 = vpop.permute.xlu0 %2962  ;;  %v1730_v41 = vsel %vm1705_vm10, %v1697_v45, %v2949_v25  ;;  %v1731_v13 = vsel %vm1705_vm10, %v1698_v40, %v2950_v23 }
 0x17d   : > { %v2965_v26 = vunpack.i.h.bf16 %v2963_v32  ;;  %v2964_v53 = vunpack.i.l.bf16 %v2963_v32  ;;  %v2958_v49 = vpop.permute.xlu1 %2957 }
 0x17e   : > { %v2960_v57 = vunpack.i.h.bf16 %v2958_v49  ;;  %v2959_v50 = vunpack.i.l.bf16 %v2958_v49 }
 0x17f   : > { %v1747_v4 = vsel %vm1738_vm11, %v1714_v42, %v2964_v53  ;;  %v1748_v28 = vsel %vm1738_vm11, %v1715_v2, %v2965_v26 }
 0x180   : > { %v1775_v19 = vpack.c.bf16 %v1748_v28, %v1747_v4  ;;  %v2973_v39 = vpop.permute.xlu0 %2972  ;;  %v1732_v15 = vsel %vm1705_vm10, %v1699_v59, %v2959_v50  ;;  %v1733_v24 = vsel %vm1705_vm10, %v1700_v6, %v2960_v57 }
 0x181   : > { %v2975_v20 = vunpack.i.h.bf16 %v2973_v39  ;;  %v2974_v56 = vunpack.i.l.bf16 %v2973_v39  ;;  %v2968_v58 = vpop.permute.xlu1 %2967 }
 0x182   : > { %2387 = vmatprep.mubr.msk.bf16.mxu0 %vm1823_vm12, %v1775_v19  ;;  %v2970_v11 = vunpack.i.h.bf16 %v2968_v58  ;;  %v2969_v55 = vunpack.i.l.bf16 %v2968_v58 }
 0x183   : > { %v1749_v3 = vsel %vm1738_vm11, %v1716_v9, %v2974_v56  ;;  %v1750_v52 = vsel %vm1738_vm11, %v1717_v63, %v2975_v20 }
 0x184   : > { %v1776_v8 = vpack.c.bf16 %v1750_v52, %v1749_v3  ;;  %v2983_v22 = vpop.permute.xlu0 %2982  ;;  %v1763_v48 = vsel %vm1738_vm11, %v1730_v41, %v2969_v55  ;;  %v1764_v10 = vsel %vm1738_vm11, %v1731_v13, %v2970_v11 }
 0x185   : > { %v1783_v37 = vpack.c.bf16 %v1764_v10, %v1763_v48  ;;  %v2978_v14 = vpop.permute.xlu1 %2977  ;;  %v2984_v25 = vunpack.i.l.bf16 %v2983_v22  ;;  %v2985_v35 = vunpack.i.h.bf16 %v2983_v22 }
 0x186   : > { %2388 = vmatmul.mubr.msk.bf16.gmra.mrb[8].mxu0 %vm1823_vm12, %v1776_v8  ;;  %v2980_v60 = vunpack.i.h.bf16 %v2978_v14  ;;  %v2979_v1 = vunpack.i.l.bf16 %v2978_v14 }
 0x187   : > { %2403 = vmatprep.mubr.msk.bf16.mxu1 %vm1823_vm12, %v1783_v37  ;;  %v1619_v45 = vsel %vm1606_vm7, %v4031_v31, %v2984_v25  ;;  %v1620_v23 = vsel %vm1606_vm7, %v4034_v29, %v2985_v35 }
 0x188   : > { %v2993_v54 = vpop.permute.xlu0 %2992  ;;  %v1765_v30 = vsel %vm1738_vm11, %v1732_v15, %v2979_v1  ;;  %v1766_v62 = vsel %vm1738_vm11, %v1733_v24, %v2980_v60 }
 0x189   : > { %v1784_v5 = vpack.c.bf16 %v1766_v62, %v1765_v30  ;;  %v2988_v34 = vpop.permute.xlu1 %2987  ;;  %v2995_v49 = vunpack.i.h.bf16 %v2993_v54  ;;  %v2994_v46 = vunpack.i.l.bf16 %v2993_v54 }
 0x18a   : > { %v2990_v61 = vunpack.i.h.bf16 %v2988_v34  ;;  %v2989_v4 = vunpack.i.l.bf16 %v2988_v34 }
 0x18b   : > { %2404 = vmatmul.mubr.msk.bf16.gmra.mrb[8].mxu1 %vm1823_vm12, %v1784_v5  ;;  %v1622_v20 = vsel %vm1606_vm7, %v4068_v44, %v2995_v49  ;;  %v1621_v56 = vsel %vm1606_vm7, %v4065_v43, %v2994_v46 }
 0x18c   : > { %v3003_v51 = vpop.permute.xlu0 %3002  ;;  %v1635_v31 = vsel %vm1606_vm7, %v4110_v18, %v2989_v4  ;;  %v1636_v9 = vsel %vm1606_vm7, %v4114_v16, %v2990_v61 }
 0x18d   : > { %v4558_v32 = vpop.permute.xlu1 %2997  ;;  %v3004_v12 = vunpack.i.l.bf16 %v3003_v51  ;;  %v3005_v19 = vunpack.i.h.bf16 %v3003_v51 }
 0x18e   : > { %v3000_v11 = vunpack.i.h.bf16 %v4558_v32  ;;  %v2999_v55 = vunpack.i.l.bf16 %v4558_v32 }
 0x18f   : > { %v1652_v44 = vsel %vm1639_vm8, %v1619_v45, %v3004_v12  ;;  %v1653_v43 = vsel %vm1639_vm8, %v1620_v23, %v3005_v19 }
 0x190   : > { %v3013_v17 = vpop.permute.xlu0 %3012 }
 0x191   : > { %v3008_v42 = vpop.permute.xlu1 %3007  ;;  %v3015_v39 = vunpack.i.h.bf16 %v3013_v17  ;;  %v3014_v40 = vunpack.i.l.bf16 %v3013_v17 }
 0x192   : > { %v3010_v7 = vunpack.i.h.bf16 %v3008_v42  ;;  %v3009_v41 = vunpack.i.l.bf16 %v3008_v42 }
 0x193   : > { %v1654_v52 = vsel %vm1639_vm8, %v1621_v56, %v3014_v40  ;;  %v1655_v13 = vsel %vm1639_vm8, %v1622_v20, %v3015_v39  ;;  %v5119_v20 = vld [vmem:[#allocation12_spill] sm:$0xff] }
 0x194   : > { %v3023_v26 = vpop.permute.xlu0 %3022  ;;  %v1668_v16 = vsel %vm1639_vm8, %v1635_v31, %v3009_v41  ;;  %v1669_v50 = vsel %vm1639_vm8, %v1636_v9, %v3010_v7  ;;  %v1638_v56 = vsel %vm1606_vm7, %v5119_v20, %v3000_v11 }
 0x195   : > { %v4560_v53 = vpop.permute.xlu1 %3017  ;;  %v3025_v29 = vunpack.i.h.bf16 %v3023_v26  ;;  %v3024_v63 = vunpack.i.l.bf16 %v3023_v26 }
 0x196   : > { %v3020_v8 = vunpack.i.h.bf16 %v4560_v53  ;;  %v3019_v54 = vunpack.i.l.bf16 %v4560_v53 }
 0x197   : > { %v1685_v38 = vsel %vm1672_vm9, %v1652_v44, %v3024_v63  ;;  %v1686_v0 = vsel %vm1672_vm9, %v1653_v43, %v3025_v29 }
 0x198   : > { %v3033_v2 = vpop.permute.xlu0 %3032  ;;  %v1671_v9 = vsel %vm1639_vm8, %v1638_v56, %v3020_v8 }
 0x199   : > { %v3028_v21 = vpop.permute.xlu1 %3027  ;;  %v3034_v22 = vunpack.i.l.bf16 %v3033_v2  ;;  %v3035_v10 = vunpack.i.h.bf16 %v3033_v2 }
 0x19a   : > { %v3029_v48 = vunpack.i.l.bf16 %v3028_v21  ;;  %v3030_v33 = vunpack.i.h.bf16 %v3028_v21 }
 0x19b   : > { %v1687_v30 = vsel %vm1672_vm9, %v1654_v52, %v3034_v22  ;;  %v1688_v51 = vsel %vm1672_vm9, %v1655_v13, %v3035_v10 }
 0x19c   : > { %v3043_v28 = vpop.permute.xlu0 %3042  ;;  %v1701_v34 = vsel %vm1672_vm9, %v1668_v16, %v3029_v48  ;;  %v1702_v26 = vsel %vm1672_vm9, %v1669_v50, %v3030_v33 }
 0x19d   : > { %v3044_v3 = vunpack.i.l.bf16 %v3043_v28  ;;  %v3045_v18 = vunpack.i.h.bf16 %v3043_v28 }
 0x19e   : > { %v4566_v27 = vpop.permute.xlu1 %3037 }
 0x19f   : > { %v1718_v37 = vsel %vm1705_vm10, %v1685_v38, %v3044_v3  ;;  %v1719_v6 = vsel %vm1705_vm10, %v1686_v0, %v3045_v18  ;;  %v3040_v2 = vunpack.i.h.bf16 %v4566_v27  ;;  %v3039_v53 = vunpack.i.l.bf16 %v4566_v27 }
 0x1a0   : > { %v3053_v58 = vpop.permute.xlu0 %3052  ;;  %v1637_v27 = vsel %vm1606_vm7, %v4144_v36, %v2999_v55 }
 0x1a1   : > { %v3055_v1 = vunpack.i.h.bf16 %v3053_v58  ;;  %v3054_v15 = vunpack.i.l.bf16 %v3053_v58  ;;  %v1670_v31 = vsel %vm1639_vm8, %v1637_v27, %v3019_v54  ;;  %v1704_v44 = vsel %vm1672_vm9, %v1671_v9, %v3040_v2 }
 0x1a2   : > { %v3048_v57 = vpop.permute.xlu1 %3047  ;;  %v1703_v58 = vsel %vm1672_vm9, %v1670_v31, %v3039_v53 }
 0x1a3   : > { %v3049_v60 = vunpack.i.l.bf16 %v3048_v57  ;;  %v3050_v32 = vunpack.i.h.bf16 %v3048_v57  ;;  %v1720_v49 = vsel %vm1705_vm10, %v1687_v30, %v3054_v15  ;;  %v1721_v46 = vsel %vm1705_vm10, %v1688_v51, %v3055_v1 }
 0x1a4   : > { %v3063_v47 = vpop.permute.xlu0 %3062 }
 0x1a5   : > { %v3065_v14 = vunpack.i.h.bf16 %v3063_v47  ;;  %v3064_v59 = vunpack.i.l.bf16 %v3063_v47  ;;  %v1734_v21 = vsel %vm1705_vm10, %v1701_v34, %v3049_v60  ;;  %v1735_v23 = vsel %vm1705_vm10, %v1702_v26, %v3050_v32 }
 0x1a6   : > { %v3058_v24 = vpop.permute.xlu1 %3057 }
 0x1a7   : > { %v1751_v62 = vsel %vm1738_vm11, %v1718_v37, %v3064_v59  ;;  %v1752_v5 = vsel %vm1738_vm11, %v1719_v6, %v3065_v14  ;;  %v3060_v19 = vunpack.i.h.bf16 %v3058_v24  ;;  %v3059_v39 = vunpack.i.l.bf16 %v3058_v24 }
 0x1a8   : > { %v1777_v17 = vpack.c.bf16 %v1752_v5, %v1751_v62  ;;  %v3073_v42 = vpop.permute.xlu0 %3072 }
 0x1a9   : > { %v3075_v25 = vunpack.i.h.bf16 %v3073_v42  ;;  %v3074_v35 = vunpack.i.l.bf16 %v3073_v42  ;;  %v1736_v11 = vsel %vm1705_vm10, %v1703_v58, %v3059_v39  ;;  %v1737_v3 = vsel %vm1705_vm10, %v1704_v44, %v3060_v19 }
 0x1aa   : > { %v3068_v61 = vpop.permute.xlu1 %3067  ;;  %2391 = vmatprep.mubr.msk.bf16.mxu0 %vm1823_vm12, %v1777_v17 }
 0x1ab   : > { %v3070_v4 = vunpack.i.h.bf16 %v3068_v61  ;;  %v3069_v28 = vunpack.i.l.bf16 %v3068_v61  ;;  %v1753_v45 = vsel %vm1738_vm11, %v1720_v49, %v3074_v35  ;;  %v1754_v12 = vsel %vm1738_vm11, %v1721_v46, %v3075_v25 }
 0x1ac   : > { %v1778_v40 = vpack.c.bf16 %v1754_v12, %v1753_v45  ;;  %v3103_v35 = vmov (!%p2343_p4), 0.0  }
 0x1ad   : > { %v1767_v7 = vsel %vm1738_vm11, %v1734_v21, %v3069_v28  ;;  %v1768_v41 = vsel %vm1738_vm11, %v1735_v23, %v3070_v4  ;;  %2042 = vst.msk [vmem:[%s4961_s5] sm:$0x3] (!%p2343_p4), %vm2041_vm13, %v3103_v35 }
 0x1ae   : > { %v1785_v29 = vpack.c.bf16 %v1768_v41, %v1767_v7  ;;  %v3078_v63 = vpop.permute.xlu1 %3077  ;;  %2392 = vmatmul.mubr.msk.bf16.gmra.mrb[12].mxu0 %vm1823_vm12, %v1778_v40 }
 0x1af   : > { %v3080_v36 = vunpack.i.h.bf16 %v3078_v63  ;;  %v3079_v55 = vunpack.i.l.bf16 %v3078_v63 }
 0x1b0   : > { %2407 = vmatprep.mubr.msk.bf16.mxu1 %vm1823_vm12, %v1785_v29 }
 0x1b1   : > { %v1769_v43 = vsel %vm1738_vm11, %v1736_v11, %v3079_v55  ;;  %v1770_v52 = vsel %vm1738_vm11, %v1737_v3, %v3080_v36 }
 0x1b2   : > { %v1786_v13 = vpack.c.bf16 %v1770_v52, %v1769_v43 }
 0x1b4   : > { %2408 = vmatmul.mubr.msk.bf16.gmra.mrb[12].mxu1 %vm1823_vm12, %v1786_v13 }
 0x20d   : > { %v4622_v18 = vpop.f32.mrb[0].mxu0 }
 0x20e   : > { %v4624_v57 = vpop.f32.mrb[1].mxu0 }
 0x20f   : > { %v4626_v16 = vpop.f32.mrb[2].mxu0 }
 0x210   : > { %v4628_v50 = vpop.f32.mrb[3].mxu0 }
 0x212   : > { %v4630_v8 = vpop.f32.mrb[0].mxu1 }
 0x213   : > { %v4632_v22 = vpop.f32.mrb[1].mxu1 }
 0x214   : > { %v4634_v38 = vpop.f32.mrb[2].mxu1 }
 0x215   : > { %v4636_v0 = vpop.f32.mrb[3].mxu1 }
 0x231   : > { %v4638_v48 = vpop.f32.mrb[4].mxu0 }
 0x232   : > { %v4640_v10 = vpop.f32.mrb[5].mxu0 }
 0x233   : > { %v4642_v47 = vpop.f32.mrb[6].mxu0 }
 0x234   : > { %v4644_v33 = vpop.f32.mrb[7].mxu0 }
 0x236   : > { %v4646_v37 = vpop.f32.mrb[4].mxu1 }
 0x237   : > { %v4648_v14 = vpop.f32.mrb[5].mxu1 }
 0x238   : > { %v4650_v59 = vpop.f32.mrb[6].mxu1 }
 0x239   : > { %v4652_v6 = vpop.f32.mrb[7].mxu1 }
 0x259   : > { %v4654_v60 = vpop.f32.mrb[8].mxu0 }
 0x25a   : > { %v4656_v1 = vpop.f32.mrb[9].mxu0 }
 0x25b   : > { %v4658_v15 = vpop.f32.mrb[10].mxu0 }
 0x25c   : > { %v4660_v24 = vpop.f32.mrb[11].mxu0 }
 0x25e   : > { %v4662_v54 = vpop.f32.mrb[8].mxu1 }
 0x25f   : > { %v4664_v30 = vpop.f32.mrb[9].mxu1 }
 0x260   : > { %v4666_v62 = vpop.f32.mrb[10].mxu1 }
 0x261   : > { %v4668_v5 = vpop.f32.mrb[11].mxu1 }
 0x281   : > { %v4670_v34 = vpop.f32.mrb[12].mxu0 }
 0x282   : > { %v4672_v51 = vpop.f32.mrb[13].mxu0 }
 0x283   : > { %v4674_v32 = vpop.f32.mrb[14].mxu0 }
 0x284   : > { %v4676_v17 = vpop.f32.mrb[15].mxu0  ;;  %2040 = sbr.rel (%p2343_p4) target bundleno = 651 (0x28b), region = 40 }
 0x287   : > { %v4678_v42 = vpop.f32.mrb[12].mxu1 }
 0x288   : > { %v4680_v26 = vpop.f32.mrb[13].mxu1 }
 0x289   : > { %v4682_v2 = vpop.f32.mrb[14].mxu1 }
 0x28a   : > { %v4684_v25 = vpop.f32.mrb[15].mxu1 }
 0x28b PF: > { %2043 = vst.msk [vmem:[%s3176_s6] sm:$0xff] %vm1507_vm4, %v4624_v57  ;;  %2044 = vst.msk [vmem:[%s3176_s6 + $0x8] sm:$0xff] %vm1507_vm4, %v4628_v50  ;;  %v2076_v53 = vsel %vm1507_vm4, %v4624_v57, 0.0  ;;  %v2077_v21 = vsel %vm1507_vm4, %v4628_v50, 0.0  ;;  %v2079_v49 = vsel %vm1507_vm4, %v4622_v18, 0.0  ;;  %v2081_v61 = vsel %vm1507_vm4, %v4626_v16, 0.0 }
 0x28c   : > { %2045 = vst.msk [vmem:[%s3176_s6 + $0x10] sm:$0xff] %vm1507_vm4, %v4622_v18  ;;  %2046 = vst.msk [vmem:[%s3176_s6 + $0x18] sm:$0xff] %vm1507_vm4, %v4626_v16  ;;  %v2078_v46 = vadd.f32 %v2077_v21, %v2076_v53  ;;  %v2083_v28 = vsel %vm1507_vm4, %v4640_v10, 0.0  ;;  %v2085_v12 = vsel %vm1507_vm4, %v4644_v33, 0.0  ;;  %v2087_v19 = vsel %vm1507_vm4, %v4638_v48, 0.0 }
 0x28d   : > { %2047 = vst.msk [vmem:[%s3176_s6 + $0x20] sm:$0xff] %vm1507_vm4, %v4640_v10  ;;  %2048 = vst.msk [vmem:[%s3176_s6 + $0x28] sm:$0xff] %vm1507_vm4, %v4644_v33  ;;  %v2089_v40 = vsel %vm1507_vm4, %v4642_v47, 0.0  ;;  %v2091_v20 = vsel %vm1507_vm4, %v4656_v1, 0.0  ;;  %v2093_v7 = vsel %vm1507_vm4, %v4660_v24, 0.0  ;;  %v2145_v41 = vmul.f32 %v4624_v57, %v4624_v57 }
 0x28e   : > { %2049 = vst.msk [vmem:[%s3176_s6 + $0x30] sm:$0xff] %vm1507_vm4, %v4638_v48  ;;  %2050 = vst.msk [vmem:[%s3176_s6 + $0x38] sm:$0xff] %vm1507_vm4, %v4642_v47  ;;  %v2080_v4 = vadd.f32 %v2079_v49, %v2078_v46  ;;  %v2146_v31 = vmul.f32 %v4628_v50, %v4628_v50  ;;  %v2147_v9 = vmul.f32 %v4622_v18, %v4622_v18  ;;  %v2095_v63 = vsel %vm1507_vm4, %v4654_v60, 0.0 }
 0x28f   : > { %2051 = vst.msk [vmem:[%s3176_s6 + $0x40] sm:$0xff] %vm1507_vm4, %v4656_v1  ;;  %2052 = vst.msk [vmem:[%s3176_s6 + $0x48] sm:$0xff] %vm1507_vm4, %v4660_v24  ;;  %v2148_v58 = vmul.f32 %v4626_v16, %v4626_v16  ;;  %v2097_v36 = vsel %vm1507_vm4, %v4658_v15, 0.0  ;;  %v2149_v55 = vmul.f32 %v4640_v10, %v4640_v10  ;;  %v2177_v11 = vsel %vm1507_vm4, %v2145_v41, 0.0 }
 0x290   : > { %2053 = vst.msk [vmem:[%s3176_s6 + $0x50] sm:$0xff] %vm1507_vm4, %v4654_v60  ;;  %2054 = vst.msk [vmem:[%s3176_s6 + $0x58] sm:$0xff] %vm1507_vm4, %v4658_v15  ;;  %v2082_v45 = vadd.f32 %v2081_v61, %v2080_v4  ;;  %v2178_v3 = vsel %vm1507_vm4, %v2146_v31, 0.0  ;;  %v2180_v43 = vsel %vm1507_vm4, %v2147_v9, 0.0  ;;  %v2099_v18 = vsel %vm1507_vm4, %v4672_v51, 0.0 }
 0x291   : > { %2055 = vst.msk [vmem:[%s3176_s6 + $0x60] sm:$0xff] %vm1507_vm4, %v4672_v51  ;;  %2056 = vst.msk [vmem:[%s3176_s6 + $0x68] sm:$0xff] %vm1507_vm4, %v4676_v17  ;;  %v2179_v13 = vadd.f32 %v2178_v3, %v2177_v11  ;;  %v2150_v57 = vmul.f32 %v4644_v33, %v4644_v33  ;;  %v2182_v16 = vsel %vm1507_vm4, %v2148_v58, 0.0  ;;  %v2101_v10 = vsel %vm1507_vm4, %v4676_v17, 0.0 }
 0x292   : > { %2057 = vst.msk [vmem:[%s3176_s6 + $0x70] sm:$0xff] %vm1507_vm4, %v4670_v34  ;;  %2058 = vst.msk [vmem:[%s3176_s6 + $0x78] sm:$0xff] %vm1507_vm4, %v4674_v32  ;;  %v2084_v23 = vadd.f32 %v2083_v28, %v2082_v45  ;;  %v2151_v53 = vmul.f32 %v4638_v48, %v4638_v48  ;;  %v2184_v21 = vsel %vm1507_vm4, %v2149_v55, 0.0  ;;  %v2103_v61 = vsel %vm1507_vm4, %v4670_v34, 0.0 }
 0x293   : > { %2059 = vst.msk [vmem:[%s3176_s6 + $0x80] sm:$0xff] %vm1507_vm4, %v4632_v22  ;;  %2060 = vst.msk [vmem:[%s3176_s6 + $0x88] sm:$0xff] %vm1507_vm4, %v4636_v0  ;;  %v2181_v35 = vadd.f32 %v2180_v43, %v2179_v13  ;;  %v2152_v33 = vmul.f32 %v4642_v47, %v4642_v47  ;;  %v2186_v4 = vsel %vm1507_vm4, %v2150_v57, 0.0  ;;  %v2153_v48 = vmul.f32 %v4656_v1, %v4656_v1 }
 0x294   : > { %2061 = vst.msk [vmem:[%s3176_s6 + $0x90] sm:$0xff] %vm1507_vm4, %v4630_v8  ;;  %2062 = vst.msk [vmem:[%s3176_s6 + $0x98] sm:$0xff] %vm1507_vm4, %v4634_v38  ;;  %v2086_v39 = vadd.f32 %v2085_v12, %v2084_v23  ;;  %v2105_v12 = vsel %vm1507_vm4, %v4674_v32, 0.0  ;;  %v2188_v23 = vsel %vm1507_vm4, %v2151_v53, 0.0  ;;  %v2154_v47 = vmul.f32 %v4660_v24, %v4660_v24 }
 0x295   : > { %2063 = vst.msk [vmem:[%s3176_s6 + $0xa0] sm:$0xff] %vm1507_vm4, %v4648_v14  ;;  %2064 = vst.msk [vmem:[%s3176_s6 + $0xa8] sm:$0xff] %vm1507_vm4, %v4652_v6  ;;  %v2183_v46 = vadd.f32 %v2182_v16, %v2181_v35  ;;  %v2155_v1 = vmul.f32 %v4654_v60, %v4654_v60  ;;  %v2192_v41 = vsel %vm1507_vm4, %v2153_v48, 0.0  ;;  %v2156_v24 = vmul.f32 %v4658_v15, %v4658_v15 }
 0x296   : > { %2065 = vst.msk [vmem:[%s3176_s6 + $0xb0] sm:$0xff] %vm1507_vm4, %v4646_v37  ;;  %2066 = vst.msk [vmem:[%s3176_s6 + $0xb8] sm:$0xff] %vm1507_vm4, %v4650_v59  ;;  %v2088_v27 = vadd.f32 %v2087_v19, %v2086_v39  ;;  %v2157_v60 = vmul.f32 %v4672_v51, %v4672_v51  ;;  %v2115_v43 = vsel %vm1507_vm4, %v4648_v14, 0.0  ;;  %v2158_v15 = vmul.f32 %v4676_v17, %v4676_v17 }
 0x297   : > { %2067 = vst.msk [vmem:[%s3176_s6 + $0xc0] sm:$0xff] %vm1507_vm4, %v4664_v30  ;;  %2068 = vst.msk [vmem:[%s3176_s6 + $0xc8] sm:$0xff] %vm1507_vm4, %v4668_v5  ;;  %v2185_v45 = vadd.f32 %v2184_v21, %v2183_v46  ;;  %v2196_v55 = vsel %vm1507_vm4, %v2155_v1, 0.0  ;;  %v2117_v57 = vsel %vm1507_vm4, %v4652_v6, 0.0  ;;  %v2159_v51 = vmul.f32 %v4670_v34, %v4670_v34 }
 0x298   : > { %2069 = vst.msk [vmem:[%s3176_s6 + $0xd0] sm:$0xff] %vm1507_vm4, %v4662_v54  ;;  %2070 = vst.msk [vmem:[%s3176_s6 + $0xd8] sm:$0xff] %vm1507_vm4, %v4666_v62  ;;  %v2090_v56 = vadd.f32 %v2089_v40, %v2088_v27  ;;  %v2107_v40 = vsel %vm1507_vm4, %v4632_v22, 0.0  ;;  %v2190_v27 = vsel %vm1507_vm4, %v2152_v33, 0.0  ;;  %v2200_v16 = vsel %vm1507_vm4, %v2157_v60, 0.0 }
 0x299   : > { %2071 = vst.msk [vmem:[%s3176_s6 + $0xe0] sm:$0xff] %vm1507_vm4, %v4680_v26  ;;  %2072 = vst.msk [vmem:[%s3176_s6 + $0xe8] sm:$0xff] %vm1507_vm4, %v4684_v25  ;;  %v2187_v39 = vadd.f32 %v2186_v4, %v2185_v45  ;;  %v2160_v17 = vmul.f32 %v4674_v32, %v4674_v32  ;;  %v2202_v53 = vsel %vm1507_vm4, %v2158_v15, 0.0  ;;  %v2121_v46 = vsel %vm1507_vm4, %v4650_v59, 0.0 }
 0x29a   : > { %2073 = vst.msk [vmem:[%s3176_s6 + $0xf0] sm:$0xff] %vm1507_vm4, %v4678_v42  ;;  %2074 = vst.msk [vmem:[%s3176_s6 + $0xf8] sm:$0xff] %vm1507_vm4, %v4682_v2  ;;  %v2092_v29 = vadd.f32 %v2091_v20, %v2090_v56  ;;  %v2161_v34 = vmul.f32 %v4632_v22, %v4632_v22  ;;  %v2162_v32 = vmul.f32 %v4636_v0, %v4636_v0  ;;  %vm2248_vm14 = vcmask 58368  }
 0x29b   : > { %v2189_v56 = vadd.f32 %v2188_v23, %v2187_v39  ;;  %v2206_v45 = vsel %vm1507_vm4, %v2160_v17, 0.0  ;;  %v2125_v23 = vsel %vm1507_vm4, %v4668_v5, 0.0  ;;  %v2163_v22 = vmul.f32 %v4630_v8, %v4630_v8 }
 0x29c   : > { %v2094_v44 = vadd.f32 %v2093_v7, %v2092_v29  ;;  %v2109_v7 = vsel %vm1507_vm4, %v4636_v0, 0.0  ;;  %v2111_v29 = vsel %vm1507_vm4, %v4630_v8, 0.0  ;;  %v2164_v0 = vmul.f32 %v4634_v38, %v4634_v38 }
 0x29d   : > { %v2191_v9 = vadd.f32 %v2190_v27, %v2189_v56  ;;  %v2210_v27 = vsel %vm1507_vm4, %v2162_v32, 0.0  ;;  %v2165_v8 = vmul.f32 %v4648_v14, %v4648_v14  ;;  %v2212_v1 = vsel %vm1507_vm4, %v2163_v22, 0.0 }
 0x29e   : > { %v2096_v52 = vadd.f32 %v2095_v63, %v2094_v44  ;;  %v2194_v63 = vsel %vm1507_vm4, %v2154_v47, 0.0  ;;  %v2127_v47 = vsel %vm1507_vm4, %v4662_v54, 0.0  ;;  %v2167_v14 = vmul.f32 %v4646_v37, %v4646_v37 }
 0x29f   : > { %v2193_v44 = vadd.f32 %v2192_v41, %v2191_v9  ;;  %v2131_v9 = vsel %vm1507_vm4, %v4680_v26, 0.0  ;;  %v2169_v15 = vmul.f32 %v4664_v30, %v4664_v30 }
 0x2a0   : > { %v2098_v50 = vadd.f32 %v2097_v36, %v2096_v52  ;;  %v2113_v36 = vsel %vm1507_vm4, %v4634_v38, 0.0  ;;  %v2198_v52 = vsel %vm1507_vm4, %v2156_v24, 0.0  ;;  %v2166_v38 = vmul.f32 %v4652_v6, %v4652_v6 }
 0x2a1   : > { %v2195_v3 = vadd.f32 %v2194_v63, %v2193_v44  ;;  %v2216_v44 = vsel %vm1507_vm4, %v2165_v8, 0.0 }
 0x2a2   : > { %v2100_v49 = vadd.f32 %v2099_v18, %v2098_v50 }
 0x2a3   : > { %v2197_v18 = vadd.f32 %v2196_v55, %v2195_v3  ;;  %v2168_v55 = vmul.f32 %v4650_v59, %v4650_v59 }
 0x2a4   : > { %v2102_v28 = vadd.f32 %v2101_v10, %v2100_v49  ;;  %v2119_v10 = vsel %vm1507_vm4, %v4646_v37, 0.0 }
 0x2a5   : > { %v2199_v35 = vadd.f32 %v2198_v52, %v2197_v18  ;;  %v2220_v52 = vsel %vm1507_vm4, %v2167_v14, 0.0  ;;  %v2222_v18 = vsel %vm1507_vm4, %v2168_v55, 0.0 }
 0x2a6   : > { %v2104_v19 = vadd.f32 %v2103_v61, %v2102_v28  ;;  %v2204_v61 = vsel %vm1507_vm4, %v2159_v51, 0.0  ;;  %v2123_v28 = vsel %vm1507_vm4, %v4664_v30, 0.0  ;;  %v2137_v51 = vsel %vm1507_vm4, %v4682_v2, 0.0 }
 0x2a7   : > { %v2201_v49 = vadd.f32 %v2200_v16, %v2199_v35  ;;  %v2171_v16 = vmul.f32 %v4662_v54, %v4662_v54  ;;  %v2172_v30 = vmul.f32 %v4666_v62, %v4666_v62 }
 0x2a8   : > { %v2106_v20 = vadd.f32 %v2105_v12, %v2104_v19  ;;  %v2208_v19 = vsel %vm1507_vm4, %v2161_v34, 0.0 }
 0x2a9   : > { %v2203_v4 = vadd.f32 %v2202_v53, %v2201_v49  ;;  %v2173_v53 = vmul.f32 %v4680_v26, %v4680_v26  ;;  %v2230_v54 = vsel %vm1507_vm4, %v2172_v30, 0.0 }
 0x2aa   : > { %v2108_v31 = vadd.f32 %v2107_v40, %v2106_v20 }
 0x2ab   : > { %v2205_v48 = vadd.f32 %v2204_v61, %v2203_v4 }
 0x2ac   : > { %v2110_v58 = vadd.f32 %v2109_v7, %v2108_v31  ;;  %v2129_v7 = vsel %vm1507_vm4, %v4666_v62, 0.0  ;;  %v2175_v62 = vmul.f32 %v4678_v42, %v4678_v42 }
 0x2ad   : > { %v2207_v40 = vadd.f32 %v2206_v45, %v2205_v48 }
 0x2ae   : > { %v2112_v11 = vadd.f32 %v2111_v29, %v2110_v58  ;;  %v2214_v29 = vsel %vm1507_vm4, %v2164_v0, 0.0  ;;  %v2133_v58 = vsel %vm1507_vm4, %v4684_v25, 0.0 }
 0x2af   : > { %v2209_v56 = vadd.f32 %v2208_v19, %v2207_v40 }
 0x2b0   : > { %v2114_v13 = vadd.f32 %v2113_v36, %v2112_v11  ;;  %v2218_v11 = vsel %vm1507_vm4, %v2166_v38, 0.0 }
 0x2b1   : > { %v2211_v31 = vadd.f32 %v2210_v27, %v2209_v56  ;;  %v2075_v56 = vld [vmem:[%s4961_s5] sm:$0x3] }
 0x2b2   : > { %v2116_v50 = vadd.f32 %v2115_v43, %v2114_v13  ;;  %v2135_v43 = vsel %vm1507_vm4, %v4678_v42, 0.0  ;;  %v2170_v13 = vmul.f32 %v4668_v5, %v4668_v5 }
 0x2b3   : > { %v2213_v63 = vadd.f32 %v2212_v1, %v2211_v31 }
 0x2b4   : > { %v2118_v21 = vadd.f32 %v2117_v57, %v2116_v50  ;;  %v2224_v50 = vsel %vm1507_vm4, %v2169_v15, 0.0 }
 0x2b5   : > { %v2215_v60 = vadd.f32 %v2214_v29, %v2213_v63 }
 0x2b6   : > { %v2120_v33 = vadd.f32 %v2119_v10, %v2118_v21  ;;  %v2226_v10 = vsel %vm1507_vm4, %v2170_v13, 0.0  ;;  %v2228_v21 = vsel %vm1507_vm4, %v2171_v16, 0.0 }
 0x2b7   : > { %v2217_v3 = vadd.f32 %v2216_v44, %v2215_v60 }
 0x2b8   : > { %v2122_v12 = vadd.f32 %v2121_v46, %v2120_v33  ;;  %v2174_v46 = vmul.f32 %v4684_v25, %v4684_v25  ;;  %v2232_v33 = vsel %vm1507_vm4, %v2173_v53, 0.0 }
 0x2b9   : > { %v2219_v37 = vadd.f32 %v2218_v11, %v2217_v3 }
 0x2ba   : > { %v2124_v39 = vadd.f32 %v2123_v28, %v2122_v12  ;;  %v2176_v28 = vmul.f32 %v4682_v2, %v4682_v2  ;;  %v2234_v26 = vsel %vm1507_vm4, %v2174_v46, 0.0  ;;  %v2236_v12 = vsel %vm1507_vm4, %v2175_v62, 0.0 }
 0x2bb   : > { %v2221_v59 = vadd.f32 %v2220_v52, %v2219_v37 }
 0x2bc   : > { %v2126_v20 = vadd.f32 %v2125_v23, %v2124_v39  ;;  %v2238_v48 = vsel %vm1507_vm4, %v2176_v28, 0.0 }
 0x2bd   : > { %v2223_v35 = vadd.f32 %v2222_v18, %v2221_v59 }
 0x2be   : > { %v2128_v41 = vadd.f32 %v2127_v47, %v2126_v20 }
 0x2bf   : > { %v2225_v5 = vadd.f32 %v2224_v50, %v2223_v35 }
 0x2c0   : > { %v2130_v24 = vadd.f32 %v2129_v7, %v2128_v41 }
 0x2c1   : > { %v2227_v49 = vadd.f32 %v2226_v10, %v2225_v5 }
 0x2c2   : > { %v2132_v36 = vadd.f32 %v2131_v9, %v2130_v24 }
 0x2c3   : > { %v2229_v61 = vadd.f32 %v2228_v21, %v2227_v49 }
 0x2c4   : > { %v2134_v6 = vadd.f32 %v2133_v58, %v2132_v36 }
 0x2c5   : > { %v2231_v4 = vadd.f32 %v2230_v54, %v2229_v61 }
 0x2c6   : > { %v2136_v57 = vadd.f32 %v2135_v43, %v2134_v6 }
 0x2c7   : > { %v2233_v45 = vadd.f32 %v2232_v33, %v2231_v4 }
 0x2c8   : > { %v2138_v17 = vadd.f32 %v2137_v51, %v2136_v57 }
 0x2c9   : > { %v2235_v25 = vadd.f32 %v2234_v26, %v2233_v45 }
 0x2ca   : > { %v2139_v34 = vrot.slane %v2138_v17, 4 }
 0x2cb   : > { %v2237_v22 = vadd.f32 %v2236_v12, %v2235_v25 }
 0x2cc   : > { %v2140_v32 = vadd.f32 %v2139_v34, %v2138_v17 }
 0x2cd   : > { %v2239_v19 = vadd.f32 %v2238_v48, %v2237_v22 }
 0x2ce   : > { %v2141_v23 = vrot.slane %v2140_v32, 2 }
 0x2cf   : > { %v2240_v42 = vrot.slane %v2239_v19, 4 }
 0x2d0   : > { %v2142_v39 = vadd.f32 %v2141_v23, %v2140_v32 }
 0x2d1   : > { %v2241_v40 = vadd.f32 %v2240_v42, %v2239_v19 }
 0x2d2   : > { %v2143_v47 = vrot.slane %v2142_v39, 1 }
 0x2d3   : > { %v2242_v0 = vrot.slane %v2241_v40, 2 }
 0x2d4   : > { %v2144_v20 = vadd.f32 %v2143_v47, %v2142_v39 }
 0x2d5   : > { %v2243_v27 = vadd.f32 %v2242_v0, %v2241_v40 }
 0x2d7   : > { %v2244_v2 = vrot.slane %v2243_v27, 1 }
 0x2d9   : > { %v2245_v7 = vadd.f32 %v2244_v2, %v2243_v27 }
 0x2db   : > { %v2246_v8 = vsel %vm399_vm0, %v2144_v20, %v2245_v7 }
 0x2dc   : > { %v2247_v1 = vadd.f32 %v2246_v8, %v2075_v56 }
 0x2de   : > { %2249 = vst.msk [vmem:[%s4961_s5] sm:$0x3] %vm2248_vm14, %v2247_v1 }
 0x2df PF: > { %s16_s18 = sadd.s32 1, %s3092_s18  }
 0x2e0   : > { %p13_p5 = scmp.ge.s32.totalorder %s16_s18, 4  }
 0x2e2   :  { %15 = sbr.rel (!%p13_p5) target bundleno = 1 (0x1), region = 78 }

// kernel: basic_block_forward.3
= control target key start
LH: loop header
LB: loop body
LE: loop exit
PB: predicated region body
PF: predicated region fallthrough
CT: control target
= control target key end

     0   :  { %s3604_s21 = smov 0   ;;  %s5517_s0 = inlined_call_operand.vmem [shape: f32[2,16,16,4], index: 0, kind: input, shape index: {}]   ;;  %s5518_s1 = inlined_call_operand.vmem [shape: bf16[36,8], index: 1, kind: input, shape index: {}]   ;;  %s5519_s2 = inlined_call_operand.vmem [shape: bf16[4,8], index: 2, kind: input, shape index: {}]   ;;  %s5520_s3 = inlined_call_operand.vmem [shape: f32[2,256,8], index: 3, kind: output, shape index: {0}]   ;;  %s5521_s4 = inlined_call_operand.vmem [shape: f32[2,8], index: 4, kind: output, shape index: {1}]   ;;  %s5522_s5 = inlined_call_operand.vmem [shape: f32[2,256,8], index: 5, kind: output, shape index: {2}]   ;;  %s5523_s6 = inlined_call_operand.vmem [shape: f32[2,8], index: 6, kind: output, shape index: {3}]  }
   0x1 LB: > { %s3610_s22 = sadd.s32 4294967295, %s3557_s21   ;;  %p2732_p0 = scmp.ge.s32.totalorder %s3557_s21, 1  ;;  %s3557_s21 = sphi %s3604_s21, %s17_s21  }
   0x2   : > { %p209_p1 = scmp.lt.s32.totalorder %s3557_s21, 3 }
   0x4   : > { %p210_p2 = pnand %p2732_p0, %p209_p1 }
   0x6   : > { %213 = sbr.rel (%p210_p2) target bundleno = 926 (0x39e), region = 32 }
   0xd   : > { %vm325_vm0 = vcmask 1040384   ;;  %p244_p3 = scmp.lt.s32.totalorder %s3610_s22, 1  ;;  %v3559_v0 = vmov 0.0   ;;  %vm491_vm1 = vcmask 1046528   ;;  %vm572_vm2 = vcmask 1045504   ;;  %s3560_s10 = smov 4  }
   0xe   : > { %v3615_v1 = vrot.slane %v3559_v0, 7  ;;  %s3561_s11 = smov 8   ;;  %s3562_s12 = smov 12   ;;  %vm1814_vm3 = vcmask 1041408   ;;  %vm1465_vm4 = vcmask 31744   ;;  %vm1498_vm5 = vcmask 64512  }
   0xf   : > { %s245_s23 = scalar_select %p244_p3, %s3610_s22, 1  ;;  %vm1531_vm6 = vcmask 97280   ;;  %vm1564_vm7 = vcmask 130048   ;;  %vm1597_vm8 = vcmask 162816   ;;  %vm1630_vm9 = vcmask 195584  }
  0x10   : > { %5604 = vst [vmem:[#allocation2_spill] sm:$0xff] %v3615_v1  ;;  %v3620_v2 = vsel %vm325_vm0, 0.0, %v3615_v1  ;;  %v442_v3 = vsel %vm325_vm0, %v3615_v1, 0.0  ;;  %v493_v4 = vrot.slane %v3615_v1, 1  ;;  %v574_v5 = vrot.slane %v3615_v1, 2  ;;  %s3563_s15 = smov 16  }
  0x11   : > { %5605 = vst [vmem:[#allocation3_spill] sm:$0xff] %v3620_v2  ;;  %v492_v6 = vrot.slane %v3620_v2, 1  ;;  %v495_v7 = vrot.slane %v442_v3, 1  ;;  %v576_v8 = vrot.slane %v442_v3, 2  ;;  %s2777_s24 = sshll.u32 %s245_s23, 8  ;;  %v573_v9 = vrot.slane %v3620_v2, 2 }
  0x12   : > { %s3631_s27 = scalar_lea.vmem %s5517_s0, %s2777_s24  ;;  %s3636_s30 = scalar_lea.vmem %s5520_s3, %s2777_s24  ;;  %vm1663_vm10 = vcmask 228352   ;;  %vm1696_vm11 = vcmask 261120   ;;  %vm1765_vm12 = vcmask 293888  }
  0x13   : > { %v494_v10 = vsel %vm491_vm1, %v492_v6, %v493_v4  ;;  %v496_v11 = vsel %vm491_vm1, %v493_v4, %v495_v7  ;;  %s3643_s9 = scalar_lea.vmem %s5522_s5, %s2777_s24  ;;  %v262_v12 = vld [vmem:[%s3631_s27 + $0x10] sm:$0xff]  ;;  %v263_v13 = vld [vmem:[%s3631_s27 + $0x18] sm:$0xff]  ;;  %v260_v14 = vld [vmem:[%s3631_s27] sm:$0xff]  ;;  %v3649_v15 = vsel %vm572_vm2, %v573_v9, %v574_v5  ;;  %v3652_v16 = vsel %vm572_vm2, %v574_v5, %v576_v8  ;;  %s3564_s18 = smov 20  }
  0x14   : > { %v3654_v17 = vpack.i.bf16 %v496_v11, %v494_v10  ;;  %v331_v18 = vrot.slane %v262_v12, 7  ;;  %v332_v19 = vrot.slane %v263_v13, 7  ;;  %v261_v20 = vld [vmem:[%s3631_s27 + $0x8] sm:$0xff]  ;;  %v264_v21 = vld [vmem:[%s3631_s27 + $0x20] sm:$0xff]  ;;  %v328_v23 = vrot.slane %v260_v14, 7  ;;  %v266_v27 = vld [vmem:[%s3631_s27 + $0x30] sm:$0xff] }
  0x15   : > { %v265_v22 = vld [vmem:[%s3631_s27 + $0x28] sm:$0xff]  ;;  %v329_v24 = vrot.slane %v261_v20, 7  ;;  %v334_v25 = vrot.slane %v264_v21, 7  ;;  %v337_v31 = vrot.slane %v266_v27, 7  ;;  %v267_v44 = vld [vmem:[%s3631_s27 + $0x38] sm:$0xff]  ;;  %v268_v45 = vld [vmem:[%s3631_s27 + $0x40] sm:$0xff] }
  0x16   : > { %5606 = vst [vmem:[#allocation4_spill] sm:$0xff] %v3654_v17  ;;  %v335_v26 = vrot.slane %v265_v22, 7  ;;  %2909 = vrot.lane.b32.xlu0 %v3654_v17, %s3560_s10  ;;  %v3663_v28 = vsel %vm325_vm0, %v331_v18, %v332_v19  ;;  %v3666_v29 = vsel %vm325_vm0, 0.0, %v331_v18  ;;  %v3669_v30 = vsel %vm325_vm0, %v332_v19, 0.0  ;;  %v269_v54 = vld [vmem:[%s3631_s27 + $0x48] sm:$0xff]  ;;  %v270_v59 = vld [vmem:[%s3631_s27 + $0x50] sm:$0xff] }
  0x17   : > { %v502_v32 = vrot.slane %v3666_v29, 1  ;;  %v503_v33 = vrot.slane %v3663_v28, 1  ;;  %v505_v34 = vrot.slane %v3669_v30, 1  ;;  %v3676_v36 = vsel %vm325_vm0, %v328_v23, %v329_v24  ;;  %v271_v0 = vld [vmem:[%s3631_s27 + $0x58] sm:$0xff]  ;;  %v272_v22 = vld [vmem:[%s3631_s27 + $0x60] sm:$0xff]  ;;  %s3565_s23 = smov 24  }
  0x18   : > { %v3679_v37 = vsel %vm325_vm0, 0.0, %v328_v23  ;;  %v3682_v38 = vsel %vm325_vm0, %v329_v24, 0.0  ;;  %v3685_v39 = vsel %vm325_vm0, %v334_v25, %v335_v26  ;;  %v498_v43 = vrot.slane %v3676_v36, 1  ;;  %v273_v23 = vld [vmem:[%s3631_s27 + $0x68] sm:$0xff]  ;;  %v287_v17 = vld [vmem:[%s3631_s27 + $0xd8] sm:$0xff]  ;;  %s3566_s24 = smov 28  }
  0x19   : > { %v3688_v40 = vsel %vm491_vm1, %v502_v32, %v503_v33  ;;  %v3691_v41 = vsel %vm491_vm1, %v503_v33, %v505_v34  ;;  %v497_v42 = vrot.slane %v3679_v37, 1  ;;  %v500_v47 = vrot.slane %v3682_v38, 1  ;;  %v275_v32 = vld [vmem:[%s3631_s27 + $0x78] sm:$0xff]  ;;  %v276_v33 = vld [vmem:[%s3631_s27 + $0x80] sm:$0xff]  ;;  %s3567_s25 = smov 32   ;;  %p2758_p4 = scmp.ne.s32.totalorder %s3610_s22, 0 }
  0x1a   : > { %5607 = vst [vmem:[#allocation5_spill] sm:$0xff] %v3688_v40  ;;  %5608 = vst [vmem:[#allocation6_spill] sm:$0xff] %v3691_v41  ;;  %v3699_v46 = vpack.i.bf16 %v3691_v41, %v3688_v40  ;;  %v3703_v48 = vsel %vm325_vm0, 0.0, %v334_v25  ;;  %v3706_v49 = vsel %vm325_vm0, %v335_v26, 0.0  ;;  %v508_v52 = vrot.slane %v3685_v39, 1  ;;  %v286_v41 = vld [vmem:[%s3631_s27 + $0xd0] sm:$0xff] }
  0x1b   : > { %v3709_v50 = vsel %vm491_vm1, %v497_v42, %v498_v43  ;;  %v507_v51 = vrot.slane %v3703_v48, 1  ;;  %v510_v53 = vrot.slane %v3706_v49, 1  ;;  %v3718_v55 = vsel %vm491_vm1, %v498_v43, %v500_v47 }
  0x1c   : > { %5609 = vst [vmem:[#allocation7_spill] sm:$0xff] %v3699_v46  ;;  %5610 = vst [vmem:[#allocation8_spill] sm:$0xff] %v3709_v50  ;;  %2919 = vrot.lane.b32.xlu1 %v3699_v46, %s3560_s10  ;;  %v338_v56 = vrot.slane %v267_v44, 7  ;;  %v3721_v57 = vsel %vm325_vm0, 0.0, %v337_v31  ;;  %v340_v58 = vrot.slane %v268_v45, 7  ;;  %v3726_v60 = vpack.i.bf16 %v3718_v55, %v3709_v50 }
  0x1d   : > { %5611 = vst [vmem:[#allocation9_spill] sm:$0xff] %v3718_v55  ;;  %5612 = vst [vmem:[#allocation10_spill] sm:$0xff] %v3721_v57  ;;  %v3729_v61 = vsel %vm491_vm1, %v507_v51, %v508_v52  ;;  %v3732_v62 = vsel %vm491_vm1, %v508_v52, %v510_v53  ;;  %v512_v63 = vrot.slane %v3721_v57, 1  ;;  %v341_v6 = vrot.slane %v269_v54, 7 }
  0x1e   : > { %5613 = vst [vmem:[#allocation11_spill] sm:$0xff] %v3729_v61  ;;  %5614 = vst [vmem:[#allocation12_spill] sm:$0xff] %v3732_v62  ;;  %v3738_v3 = vpack.i.bf16 %v3732_v62, %v3729_v61  ;;  %v3741_v4 = vsel %vm325_vm0, %v337_v31, %v338_v56  ;;  %v3744_v5 = vsel %vm325_vm0, %v338_v56, 0.0  ;;  %2914 = vrot.lane.b32.xlu0 %v3726_v60, %s3560_s10  ;;  %v3751_v9 = vsel %vm325_vm0, 0.0, %v340_v58  ;;  %v274_v31 = vld [vmem:[%s3631_s27 + $0x70] sm:$0xff] }
  0x1f   : > { %5616 = vst [vmem:[#allocation14_spill] sm:$0xff] %v3741_v4  ;;  %v513_v7 = vrot.slane %v3741_v4, 1  ;;  %v515_v8 = vrot.slane %v3744_v5, 1  ;;  %5617 = vst [vmem:[#allocation15_spill] sm:$0xff] %v3751_v9  ;;  %v343_v10 = vrot.slane %v270_v59, 7  ;;  %v3756_v11 = vsel %vm325_vm0, %v340_v58, %v341_v6  ;;  %v277_v58 = vld [vmem:[%s3631_s27 + $0x88] sm:$0xff] }
  0x20   : > { %5615 = vst [vmem:[#allocation13_spill] sm:$0xff] %v3738_v3  ;;  %2924 = vrot.lane.b32.xlu1 %v3738_v3, %s3560_s10  ;;  %5618 = vst [vmem:[#allocation16_spill] sm:$0xff] %v3756_v11  ;;  %v3759_v12 = vsel %vm325_vm0, %v341_v6, 0.0  ;;  %v517_v13 = vrot.slane %v3751_v9, 1  ;;  %v344_v14 = vrot.slane %v271_v0, 7  ;;  %v518_v20 = vrot.slane %v3756_v11, 1 }
  0x21   : > { %v3763_v18 = vsel %vm491_vm1, %v512_v63, %v513_v7  ;;  %v3766_v19 = vsel %vm491_vm1, %v513_v7, %v515_v8  ;;  %v520_v21 = vrot.slane %v3759_v12, 1  ;;  %v3780_v26 = vsel %vm325_vm0, 0.0, %v343_v10 }
  0x22   : > { %5619 = vst [vmem:[#allocation17_spill] sm:$0xff] %v3763_v18  ;;  %5620 = vst [vmem:[#allocation18_spill] sm:$0xff] %v3766_v19  ;;  %v3774_v24 = vpack.i.bf16 %v3766_v19, %v3763_v18  ;;  %v3777_v25 = vsel %vm325_vm0, %v343_v10, %v344_v14  ;;  %v3783_v27 = vsel %vm325_vm0, %v344_v14, 0.0  ;;  %v3789_v34 = vsel %vm491_vm1, %v517_v13, %v518_v20  ;;  %v282_v19 = vld [vmem:[%s3631_s27 + $0xb0] sm:$0xff] }
  0x23   : > { %5622 = vst [vmem:[#allocation20_spill] sm:$0xff] %v3777_v25  ;;  %5623 = vst [vmem:[#allocation21_spill] sm:$0xff] %v3780_v26  ;;  %v3792_v42 = vsel %vm491_vm1, %v518_v20, %v520_v21  ;;  %v522_v43 = vrot.slane %v3780_v26, 1  ;;  %v523_v44 = vrot.slane %v3777_v25, 1  ;;  %v525_v47 = vrot.slane %v3783_v27, 1 }
  0x24   : > { %5621 = vst [vmem:[#allocation19_spill] sm:$0xff] %v3774_v24  ;;  %5624 = vst [vmem:[#allocation22_spill] sm:$0xff] %v3789_v34  ;;  %2929 = vrot.lane.b32.xlu0 %v3774_v24, %s3560_s10  ;;  %v3800_v45 = vpack.i.bf16 %v3792_v42, %v3789_v34  ;;  %v346_v51 = vrot.slane %v272_v22, 7  ;;  %v347_v52 = vrot.slane %v273_v23, 7  ;;  %v349_v54 = vrot.slane %v274_v31, 7 }
  0x25   : > { %5625 = vst [vmem:[#allocation23_spill] sm:$0xff] %v3792_v42  ;;  %v3804_v53 = vsel %vm491_vm1, %v522_v43, %v523_v44  ;;  %v350_v56 = vrot.slane %v275_v32, 7  ;;  %v352_v59 = vrot.slane %v276_v33, 7  ;;  %v3810_v63 = vsel %vm491_vm1, %v523_v44, %v525_v47  ;;  %v278_v44 = vld [vmem:[%s3631_s27 + $0x90] sm:$0xff]  ;;  %v279_v47 = vld [vmem:[%s3631_s27 + $0x98] sm:$0xff] }
  0x26   : > { %5626 = vst [vmem:[#allocation24_spill] sm:$0xff] %v3800_v45  ;;  %5627 = vst [vmem:[#allocation25_spill] sm:$0xff] %v3804_v53  ;;  %2934 = vrot.lane.b32.xlu1 %v3800_v45, %s3560_s10  ;;  %v3813_v0 = vsel %vm325_vm0, %v346_v51, %v347_v52  ;;  %v3816_v6 = vsel %vm325_vm0, 0.0, %v346_v51  ;;  %v3819_v7 = vsel %vm325_vm0, %v347_v52, 0.0  ;;  %v3823_v8 = vpack.i.bf16 %v3810_v63, %v3804_v53 }
  0x27   : > { %5628 = vst [vmem:[#allocation26_spill] sm:$0xff] %v3810_v63  ;;  %5629 = vst [vmem:[#allocation27_spill] sm:$0xff] %v3813_v0  ;;  %v527_v10 = vrot.slane %v3816_v6, 1  ;;  %v528_v13 = vrot.slane %v3813_v0, 1  ;;  %v530_v14 = vrot.slane %v3819_v7, 1  ;;  %v3829_v20 = vsel %vm325_vm0, %v349_v54, %v350_v56 }
  0x28   : > { %5630 = vst [vmem:[#allocation28_spill] sm:$0xff] %v3816_v6  ;;  %5631 = vst [vmem:[#allocation29_spill] sm:$0xff] %v3823_v8  ;;  %v3832_v21 = vsel %vm325_vm0, 0.0, %v349_v54  ;;  %v3835_v22 = vsel %vm325_vm0, %v350_v56, 0.0  ;;  %v353_v23 = vrot.slane %v277_v58, 7  ;;  %2939 = vrot.lane.b32.xlu0 %v3823_v8, %s3560_s10  ;;  %v533_v43 = vrot.slane %v3829_v20, 1 }
  0x29   : > { %v3840_v31 = vsel %vm491_vm1, %v527_v10, %v528_v13  ;;  %v3843_v32 = vsel %vm491_vm1, %v528_v13, %v530_v14  ;;  %v532_v33 = vrot.slane %v3832_v21, 1  ;;  %v535_v52 = vrot.slane %v3835_v22, 1  ;;  %v280_v58 = vld [vmem:[%s3631_s27 + $0xa0] sm:$0xff]  ;;  %v281_v10 = vld [vmem:[%s3631_s27 + $0xa8] sm:$0xff] }
  0x2a   : > { %5632 = vst [vmem:[#allocation30_spill] sm:$0xff] %v3840_v31  ;;  %5633 = vst [vmem:[#allocation31_spill] sm:$0xff] %v3843_v32  ;;  %v3851_v51 = vpack.i.bf16 %v3843_v32, %v3840_v31  ;;  %v3855_v54 = vsel %vm325_vm0, %v352_v59, %v353_v23  ;;  %v3858_v56 = vsel %vm325_vm0, 0.0, %v352_v59  ;;  %v3866_v14 = vsel %vm325_vm0, %v353_v23, 0.0 }
  0x2b   : > { %v3863_v13 = vsel %vm491_vm1, %v532_v33, %v533_v43  ;;  %v537_v35 = vrot.slane %v3858_v56, 1  ;;  %v538_v32 = vrot.slane %v3855_v54, 1  ;;  %v3873_v31 = vsel %vm491_vm1, %v533_v43, %v535_v52 }
  0x2c   : > { %5634 = vst [vmem:[#allocation32_spill] sm:$0xff] %v3851_v51  ;;  %5635 = vst [vmem:[#allocation33_spill] sm:$0xff] %v3863_v13  ;;  %2944 = vrot.lane.b32.xlu1 %v3851_v51, %s3560_s10  ;;  %v540_v59 = vrot.slane %v3866_v14, 1  ;;  %v355_v63 = vrot.slane %v278_v44, 7  ;;  %v356_v53 = vrot.slane %v279_v47, 7  ;;  %v3878_v33 = vpack.i.bf16 %v3873_v31, %v3863_v13 }
  0x2d   : > { %5636 = vst [vmem:[#allocation34_spill] sm:$0xff] %v3873_v31  ;;  %v3881_v23 = vsel %vm491_vm1, %v537_v35, %v538_v32  ;;  %v358_v42 = vrot.slane %v280_v58, 7  ;;  %v359_v34 = vrot.slane %v281_v10, 7  ;;  %v361_v13 = vrot.slane %v282_v19, 7 }
  0x2e   : > { %5637 = vst [vmem:[#allocation35_spill] sm:$0xff] %v3878_v33  ;;  %5638 = vst [vmem:[#allocation36_spill] sm:$0xff] %v3881_v23  ;;  %v3885_v43 = vsel %vm491_vm1, %v538_v32, %v540_v59  ;;  %v3888_v52 = vsel %vm325_vm0, %v355_v63, %v356_v53  ;;  %v3891_v44 = vsel %vm325_vm0, 0.0, %v355_v63  ;;  %v3894_v47 = vsel %vm325_vm0, %v356_v53, 0.0  ;;  %2949 = vrot.lane.b32.xlu0 %v3878_v33, %s3560_s10  ;;  %v283_v59 = vld [vmem:[%s3631_s27 + $0xb8] sm:$0xff] }
  0x2f   : > { %5639 = vst [vmem:[#allocation37_spill] sm:$0xff] %v3885_v43  ;;  %v3900_v35 = vpack.i.bf16 %v3885_v43, %v3881_v23  ;;  %v542_v32 = vrot.slane %v3891_v44, 1  ;;  %v543_v58 = vrot.slane %v3888_v52, 1  ;;  %v545_v10 = vrot.slane %v3894_v47, 1  ;;  %v284_v43 = vld [vmem:[%s3631_s27 + $0xc0] sm:$0xff]  ;;  %v285_v23 = vld [vmem:[%s3631_s27 + $0xc8] sm:$0xff] }
  0x30   : > { %v3907_v63 = vsel %vm325_vm0, %v358_v42, %v359_v34  ;;  %v3910_v53 = vsel %vm325_vm0, 0.0, %v358_v42  ;;  %v3913_v31 = vsel %vm325_vm0, %v359_v34, 0.0  ;;  %v362_v40 = vrot.slane %v283_v59, 7 }
  0x31   : > { %5640 = vst [vmem:[#allocation38_spill] sm:$0xff] %v3900_v35  ;;  %2954 = vrot.lane.b32.xlu1 %v3900_v35, %s3560_s10  ;;  %v3920_v18 = vsel %vm491_vm1, %v542_v32, %v543_v58  ;;  %v3923_v62 = vsel %vm491_vm1, %v543_v58, %v545_v10  ;;  %v547_v61 = vrot.slane %v3910_v53, 1  ;;  %v548_v42 = vrot.slane %v3907_v63, 1  ;;  %v289_v35 = vld [vmem:[%s3631_s27 + $0xe8] sm:$0xff] }
  0x32   : > { %5641 = vst [vmem:[#allocation39_spill] sm:$0xff] %v3920_v18  ;;  %5642 = vst [vmem:[#allocation40_spill] sm:$0xff] %v3923_v62  ;;  %v3930_v19 = vpack.i.bf16 %v3923_v62, %v3920_v18  ;;  %v550_v34 = vrot.slane %v3913_v31, 1  ;;  %v3934_v55 = vsel %vm325_vm0, 0.0, %v361_v13  ;;  %v364_v10 = vrot.slane %v284_v43, 7 }
  0x33   : > { %v3937_v32 = vsel %vm491_vm1, %v547_v61, %v548_v42  ;;  %v552_v58 = vrot.slane %v3934_v55, 1  ;;  %v365_v50 = vrot.slane %v285_v23, 7  ;;  %v3947_v18 = vsel %vm325_vm0, %v361_v13, %v362_v40 }
  0x34   : > { %5643 = vst [vmem:[#allocation41_spill] sm:$0xff] %v3930_v19  ;;  %5644 = vst [vmem:[#allocation42_spill] sm:$0xff] %v3937_v32  ;;  %2959 = vrot.lane.b32.xlu0 %v3930_v19, %s3560_s10  ;;  %v3944_v62 = vsel %vm491_vm1, %v548_v42, %v550_v34  ;;  %v3950_v59 = vsel %vm325_vm0, %v362_v40, 0.0  ;;  %v367_v61 = vrot.slane %v286_v41, 7  ;;  %v553_v23 = vrot.slane %v3947_v18, 1  ;;  %v288_v19 = vld [vmem:[%s3631_s27 + $0xe0] sm:$0xff] }
  0x35   : > { %5645 = vst [vmem:[#allocation43_spill] sm:$0xff] %v3944_v62  ;;  %v3954_v43 = vpack.i.bf16 %v3944_v62, %v3937_v32  ;;  %v555_v2 = vrot.slane %v3950_v59, 1  ;;  %v3959_v42 = vsel %vm325_vm0, %v364_v10, %v365_v50  ;;  %v3962_v13 = vsel %vm325_vm0, 0.0, %v364_v10 }
  0x36   : > { %v3965_v34 = vsel %vm325_vm0, %v365_v50, 0.0  ;;  %v558_v40 = vrot.slane %v3959_v42, 1  ;;  %v368_v41 = vrot.slane %v287_v17, 7  ;;  %v3971_v62 = vsel %vm491_vm1, %v552_v58, %v553_v23 }
  0x37   : > { %5646 = vst [vmem:[#allocation44_spill] sm:$0xff] %v3954_v43  ;;  %2964 = vrot.lane.b32.xlu1 %v3954_v43, %s3560_s10  ;;  %5647 = vst [vmem:[#allocation45_spill] sm:$0xff] %v3971_v62  ;;  %v3974_v32 = vsel %vm491_vm1, %v553_v23, %v555_v2  ;;  %v557_v1 = vrot.slane %v3962_v13, 1  ;;  %v560_v10 = vrot.slane %v3965_v34, 1  ;;  %v3988_v43 = vsel %vm325_vm0, 0.0, %v367_v61 }
  0x38   : > { %5648 = vst [vmem:[#allocation46_spill] sm:$0xff] %v3974_v32  ;;  %v3982_v50 = vpack.i.bf16 %v3974_v32, %v3971_v62  ;;  %v3985_v17 = vsel %vm325_vm0, %v367_v61, %v368_v41  ;;  %v3991_v58 = vsel %vm325_vm0, %v368_v41, 0.0  ;;  %v562_v33 = vrot.slane %v3988_v43, 1 }
  0x39   : > { %v3994_v2 = vsel %vm491_vm1, %v557_v1, %v558_v40  ;;  %v3997_v23 = vsel %vm491_vm1, %v558_v40, %v560_v10  ;;  %v563_v32 = vrot.slane %v3985_v17, 1  ;;  %v565_v41 = vrot.slane %v3991_v58, 1 }
  0x3a   : > { %5649 = vst [vmem:[#allocation47_spill] sm:$0xff] %v3982_v50  ;;  %5650 = vst [vmem:[#allocation48_spill] sm:$0xff] %v3994_v2  ;;  %2969 = vrot.lane.b32.xlu0 %v3982_v50, %s3560_s10  ;;  %v4005_v61 = vpack.i.bf16 %v3997_v23, %v3994_v2  ;;  %v370_v62 = vrot.slane %v288_v19, 7  ;;  %v371_v51 = vrot.slane %v289_v35, 7  ;;  %v4013_v40 = vpack.i.bf16 %v3652_v16, %v3649_v15 }
  0x3b   : > { %5651 = vst [vmem:[#allocation49_spill] sm:$0xff] %v3997_v23  ;;  %v4009_v1 = vsel %vm491_vm1, %v562_v33, %v563_v32  ;;  %v578_v10 = vrot.slane %v3679_v37, 2  ;;  %v4019_v50 = vsel %vm491_vm1, %v563_v32, %v565_v41  ;;  %v579_v41 = vrot.slane %v3676_v36, 2 }
  0x3c   : > { %5652 = vst [vmem:[#allocation50_spill] sm:$0xff] %v4005_v61  ;;  %5653 = vst [vmem:[#allocation51_spill] sm:$0xff] %v4009_v1  ;;  %2974 = vrot.lane.b32.xlu1 %v4005_v61, %s3560_s10  ;;  %v4022_v23 = vsel %vm325_vm0, %v370_v62, %v371_v51  ;;  %v4025_v35 = vsel %vm325_vm0, 0.0, %v370_v62  ;;  %v4028_v33 = vsel %vm325_vm0, %v371_v51, 0.0  ;;  %v4032_v15 = vpack.i.bf16 %v4019_v50, %v4009_v1 }
  0x3d   : > { %5654 = vst [vmem:[#allocation52_spill] sm:$0xff] %v4013_v40  ;;  %5655 = vst [vmem:[#allocation53_spill] sm:$0xff] %v4019_v50  ;;  %v567_v16 = vrot.slane %v4025_v35, 1  ;;  %v568_v19 = vrot.slane %v4022_v23, 1  ;;  %v570_v32 = vrot.slane %v4028_v33, 1  ;;  %v581_v2 = vrot.slane %v3682_v38, 2 }
  0x3e   : > { %5656 = vst [vmem:[#allocation54_spill] sm:$0xff] %v4032_v15  ;;  %v583_v62 = vrot.slane %v3666_v29, 2  ;;  %v584_v61 = vrot.slane %v3663_v28, 2  ;;  %2979 = vrot.lane.b32.xlu0 %v4032_v15, %s3560_s10  ;;  %v588_v1 = vrot.slane %v3703_v48, 2  ;;  %v589_v8 = vrot.slane %v3685_v39, 2 }
  0x3f   : > { %v4044_v51 = vsel %vm491_vm1, %v567_v16, %v568_v19  ;;  %v4047_v50 = vsel %vm491_vm1, %v568_v19, %v570_v32  ;;  %v580_v45 = vsel %vm572_vm2, %v578_v10, %v579_v41  ;;  %v582_v24 = vsel %vm572_vm2, %v579_v41, %v581_v2 }
  0x40   : > { %5657 = vst [vmem:[#allocation55_spill] sm:$0xff] %v4044_v51  ;;  %5658 = vst [vmem:[#allocation56_spill] sm:$0xff] %v4047_v50  ;;  %v4053_v38 = vpack.i.bf16 %v4047_v50, %v4044_v51  ;;  %v585_v15 = vsel %vm572_vm2, %v583_v62, %v584_v61  ;;  %v4058_v3 = vpack.i.bf16 %v582_v24, %v580_v45  ;;  %v5659_v16 = vrot.slane %v3669_v30, 2 }
  0x41   : > { %v590_v32 = vsel %vm572_vm2, %v588_v1, %v589_v8  ;;  %v591_v46 = vrot.slane %v3706_v49, 2  ;;  %v593_v10 = vrot.slane %v3721_v57, 2  ;;  %v594_v2 = vrot.slane %v3741_v4, 2 }
  0x42   : > { %v587_v19 = vsel %vm572_vm2, %v584_v61, %v5659_v16  ;;  %2984 = vrot.lane.b32.xlu1 %v4053_v38, %s3560_s10  ;;  %v596_v24 = vrot.slane %v3744_v5, 2  ;;  %2989 = vrot.lane.b32.xlu0 %v4013_v40, %s3561_s11  ;;  %v598_v45 = vrot.slane %v3751_v9, 2  ;;  %v599_v49 = vrot.slane %v3756_v11, 2 }
  0x43   : > { %v4067_v50 = vpack.i.bf16 %v587_v19, %v585_v15  ;;  %v592_v30 = vsel %vm572_vm2, %v589_v8, %v591_v46  ;;  %v601_v61 = vrot.slane %v3759_v12, 2  ;;  %v595_v1 = vsel %vm572_vm2, %v593_v10, %v594_v2 }
  0x44   : > { %v597_v15 = vsel %vm572_vm2, %v594_v2, %v596_v24  ;;  %v603_v41 = vrot.slane %v3780_v26, 2  ;;  %v4081_v62 = vpack.i.bf16 %v592_v30, %v590_v32  ;;  %v600_v5 = vsel %vm572_vm2, %v598_v45, %v599_v49 }
  0x45   : > { %v604_v16 = vrot.slane %v3777_v25, 2  ;;  %v602_v46 = vsel %vm572_vm2, %v599_v49, %v601_v61  ;;  %v606_v8 = vrot.slane %v3783_v27, 2  ;;  %v608_v12 = vrot.slane %v3816_v6, 2 }
  0x46   : > { %2994 = vrot.lane.b32.xlu1 %v4058_v3, %s3561_s11  ;;  %v609_v19 = vrot.slane %v3813_v0, 2  ;;  %2999 = vrot.lane.b32.xlu0 %v4067_v50, %s3561_s11  ;;  %v4093_v32 = vpack.i.bf16 %v597_v15, %v595_v1  ;;  %v611_v10 = vrot.slane %v3819_v7, 2  ;;  %v613_v2 = vrot.slane %v3832_v21, 2 }
  0x47   : > { %v614_v24 = vrot.slane %v3829_v20, 2  ;;  %v605_v30 = vsel %vm572_vm2, %v603_v41, %v604_v16  ;;  %v607_v45 = vsel %vm572_vm2, %v604_v16, %v606_v8  ;;  %v616_v27 = vrot.slane %v3835_v22, 2 }
  0x48   : > { %v4101_v49 = vpack.i.bf16 %v602_v46, %v600_v5  ;;  %v610_v61 = vsel %vm572_vm2, %v608_v12, %v609_v19  ;;  %v612_v1 = vsel %vm572_vm2, %v609_v19, %v611_v10  ;;  %v618_v7 = vrot.slane %v3858_v56, 2 }
  0x49   : > { %v619_v15 = vrot.slane %v3855_v54, 2  ;;  %v621_v51 = vrot.slane %v3866_v14, 2  ;;  %v4112_v41 = vpack.i.bf16 %v607_v45, %v605_v30  ;;  %v615_v22 = vsel %vm572_vm2, %v613_v2, %v614_v24 }
  0x4a   : > { %3004 = vrot.lane.b32.xlu1 %v4081_v62, %s3561_s11  ;;  %3009 = vrot.lane.b32.xlu0 %v4093_v32, %s3561_s11  ;;  %v617_v5 = vsel %vm572_vm2, %v614_v24, %v616_v27  ;;  %v623_v16 = vrot.slane %v3891_v44, 2  ;;  %v624_v46 = vrot.slane %v3888_v52, 2  ;;  %v626_v8 = vrot.slane %v3894_v47, 2 }
  0x4b   : > { %v4119_v12 = vpack.i.bf16 %v612_v1, %v610_v61  ;;  %v4123_v14 = vpack.i.bf16 %v617_v5, %v615_v22  ;;  %v620_v19 = vsel %vm572_vm2, %v618_v7, %v619_v15  ;;  %v622_v10 = vsel %vm572_vm2, %v619_v15, %v621_v51 }
  0x4c   : > { %v628_v2 = vrot.slane %v3910_v53, 2  ;;  %v629_v24 = vrot.slane %v3907_v63, 2  ;;  %v631_v47 = vrot.slane %v3913_v31, 2  ;;  %v633_v30 = vrot.slane %v3934_v55, 2 }
  0x4d   : > { %v634_v45 = vrot.slane %v3947_v18, 2  ;;  %v625_v27 = vsel %vm572_vm2, %v623_v16, %v624_v46  ;;  %v627_v61 = vsel %vm572_vm2, %v624_v46, %v626_v8  ;;  %v636_v1 = vrot.slane %v3950_v59, 2 }
  0x4e   : > { %3014 = vrot.lane.b32.xlu1 %v4101_v49, %s3561_s11  ;;  %3019 = vrot.lane.b32.xlu0 %v4112_v41, %s3561_s11  ;;  %v4139_v51 = vpack.i.bf16 %v622_v10, %v620_v19  ;;  %v638_v7 = vrot.slane %v3962_v13, 2  ;;  %v639_v15 = vrot.slane %v3959_v42, 2  ;;  %v641_v31 = vrot.slane %v3965_v34, 2 }
  0x4f   : > { %v4146_v22 = vpack.i.bf16 %v627_v61, %v625_v27  ;;  %v630_v5 = vsel %vm572_vm2, %v628_v2, %v629_v24  ;;  %v632_v59 = vsel %vm572_vm2, %v629_v24, %v631_v47  ;;  %v635_v16 = vsel %vm572_vm2, %v633_v30, %v634_v45 }
  0x50   : > { %v637_v46 = vsel %vm572_vm2, %v634_v45, %v636_v1  ;;  %v643_v8 = vrot.slane %v3988_v43, 2  ;;  %v644_v19 = vrot.slane %v3985_v17, 2  ;;  %v646_v10 = vrot.slane %v3991_v58, 2 }
  0x51   : > { %v4157_v34 = vpack.i.bf16 %v632_v59, %v630_v5  ;;  %v640_v27 = vsel %vm572_vm2, %v638_v7, %v639_v15  ;;  %v642_v2 = vsel %vm572_vm2, %v639_v15, %v641_v31  ;;  %v648_v24 = vrot.slane %v4025_v35, 2 }
  0x52   : > { %3024 = vrot.lane.b32.xlu1 %v4119_v12, %s3561_s11  ;;  %3029 = vrot.lane.b32.xlu0 %v4123_v14, %s3561_s11  ;;  %v4164_v47 = vpack.i.bf16 %v637_v46, %v635_v16  ;;  %v649_v30 = vrot.slane %v4022_v23, 2  ;;  %v651_v58 = vrot.slane %v4028_v33, 2  ;;  %v645_v45 = vsel %vm572_vm2, %v643_v8, %v644_v19 }
  0x53   : > { %v647_v61 = vsel %vm572_vm2, %v644_v19, %v646_v10  ;;  %v4170_v1 = vpack.i.bf16 %v642_v2, %v640_v27  ;;  %v3068_v5 = vpack.i.bf16 %v3676_v36, %v3679_v37  ;;  %v3073_v59 = vpack.i.bf16 %v3663_v28, %v3666_v29 }
  0x54   : > { %v4176_v7 = vpack.i.bf16 %v647_v61, %v645_v45  ;;  %v650_v15 = vsel %vm572_vm2, %v648_v24, %v649_v30  ;;  %v652_v31 = vsel %vm572_vm2, %v649_v30, %v651_v58  ;;  %v3078_v16 = vpack.i.bf16 %v3685_v39, %v3703_v48  ;;  %v3548_v45 = vld [vmem:[%s5518_s1] sm:$0xff]   ;;  %v3549_v61 = vld [vmem:[%s5518_s1 + $0x8] sm:$0xff]  }
  0x55   : > { %v4182_v33 = vpack.i.bf16 %v652_v31, %v650_v15  ;;  %v3083_v46 = vpack.i.bf16 %v3741_v4, %v3721_v57  ;;  %v3088_v8 = vpack.i.bf16 %v3756_v11, %v3751_v9  ;;  %v4204_v19 = vpack.i.bf16 %v3777_v25, %v3780_v26  ;;  %2816 = vmatprep.subr.bf16.mxu0 %v3548_v45  ;;  %v5661_v15 = vld [vmem:[#allocation7_spill] sm:$0xff]  ;;  %v3550_v31 = vld [vmem:[%s5518_s1 + $0x10] ss:$0 sps:$4 sm:$0x33]  }
  0x56   : > { %3034 = vrot.lane.b32.xlu1 %v4139_v51, %s3561_s11  ;;  %3039 = vrot.lane.b32.xlu0 %v4146_v22, %s3561_s11  ;;  %v4209_v10 = vpack.i.bf16 %v3813_v0, %v3816_v6  ;;  %v4215_v27 = vpack.i.bf16 %v3829_v20, %v3832_v21  ;;  %v4221_v2 = vpack.i.bf16 %v3855_v54, %v3858_v56  ;;  %v5671_v25 = vld [vmem:[#allocation35_spill] sm:$0xff]  ;;  %vm1983_vm13 = vcmask (!%p2758_p4), 58368  }
  0x57   : > { %5660 = vst [vmem:[#allocation57_spill] sm:$0xff] %v4182_v33  ;;  %v4227_v24 = vpack.i.bf16 %v3888_v52, %v3891_v44  ;;  %v4233_v30 = vpack.i.bf16 %v3907_v63, %v3910_v53  ;;  %v4239_v58 = vpack.i.bf16 %v3947_v18, %v3934_v55  ;;  %2817 = vmatpush3.bf16.msra.mxu0 %v3548_v45  ;;  %v5663_v45 = vld [vmem:[#allocation19_spill] sm:$0xff] }
  0x58   : > { %2818 = vmatprep.subr.bf16.mxu0 %v3549_v61 }
  0x5a   : > { %3044 = vrot.lane.b32.xlu1 %v4157_v34, %s3561_s11  ;;  %3049 = vrot.lane.b32.xlu0 %v4164_v47, %s3561_s11 }
  0x5b   : > { %2819 = vmatpush3.bf16.msra.mxu0 %v3549_v61 }
  0x5c   : > { %2888 = vmatprep.subr.msk.bf16.mxu0 %vm1814_vm3, %v3550_v31 }
  0x5e   : > { %3054 = vrot.lane.b32.xlu1 %v4170_v1, %s3561_s11  ;;  %3059 = vrot.lane.b32.xlu0 %v4176_v7, %s3561_s11 }
  0x62   : > { %3064 = vrot.lane.b32.xlu1 %v4182_v33, %s3561_s11  ;;  %3069 = vrot.lane.b32.xlu0 %v3068_v5, %s3562_s12 }
  0x66   : > { %3074 = vrot.lane.b32.xlu1 %v3073_v59, %s3562_s12  ;;  %3079 = vrot.lane.b32.xlu0 %v3078_v16, %s3562_s12 }
  0x6a   : > { %3084 = vrot.lane.b32.xlu1 %v3083_v46, %s3562_s12  ;;  %3089 = vrot.lane.b32.xlu0 %v3088_v8, %s3562_s12 }
  0x6e   : > { %3094 = vrot.lane.b32.xlu1 %v4204_v19, %s3562_s12  ;;  %3099 = vrot.lane.b32.xlu0 %v4209_v10, %s3562_s12 }
  0x72   : > { %3104 = vrot.lane.b32.xlu1 %v4215_v27, %s3562_s12  ;;  %3109 = vrot.lane.b32.xlu0 %v4221_v2, %s3562_s12 }
  0x76   : > { %3114 = vrot.lane.b32.xlu1 %v4227_v24, %s3562_s12  ;;  %3119 = vrot.lane.b32.xlu0 %v4233_v30, %s3562_s12 }
  0x7a   : > { %3124 = vrot.lane.b32.xlu1 %v4239_v58, %s3562_s12  ;;  %3129 = vrot.lane.b32.xlu0 %v3726_v60, %s3563_s15  ;;  %v1816_v60 = vsel %vm1814_vm3, %v3550_v31, 0 }
  0x7b   : > { %2821 = vmatpush3.bf16.msra.mxu0 %v1816_v60  ;;  %v5667_v60 = vld [vmem:[#allocation24_spill] sm:$0xff] }
  0x7e   : > { %3134 = vrot.lane.b32.xlu1 %v5661_v15, %s3563_s15  ;;  %3139 = vrot.lane.b32.xlu0 %v4058_v3, %s3564_s18  ;;  %v5662_v3 = vld [vmem:[#allocation13_spill] sm:$0xff] }
  0x82   : > { %3144 = vrot.lane.b32.xlu1 %v4067_v50, %s3564_s18  ;;  %3149 = vrot.lane.b32.xlu0 %v3073_v59, %s3565_s23 }
  0x86   : > { %3154 = vrot.lane.b32.xlu1 %v3078_v16, %s3565_s23  ;;  %3159 = vrot.lane.b32.xlu0 %v5661_v15, %s3566_s24 }
  0x88   : > { %v4272_v5 = vpop.permute.xlu0 %2909 }
  0x8a   : > { %3164 = vrot.lane.b32.xlu1 %v5662_v3, %s3566_s24  ;;  %3169 = vrot.lane.b32.xlu0 %v4067_v50, %s3567_s25 }
  0x8e   : > { %3174 = vrot.lane.b32.xlu1 %v4081_v62, %s3567_s25  ;;  %v4276_v59 = vpop.permute.xlu1 %2919  ;;  %3179 = vrot.lane.b32.xlu0 %v5662_v3, %s3563_s15 }
  0x90   : > { %v4280_v16 = vpop.permute.xlu0 %2914 }
  0x92   : > { %3184 = vrot.lane.b32.xlu1 %v5663_v45, %s3563_s15  ;;  %v4284_v61 = vpop.permute.xlu1 %2924  ;;  %3189 = vrot.lane.b32.xlu0 %v4081_v62, %s3564_s18 }
  0x96   : > { %3194 = vrot.lane.b32.xlu1 %v4093_v32, %s3564_s18  ;;  %v4290_v50 = vpop.permute.xlu0 %2929  ;;  %3199 = vrot.lane.b32.xlu0 %v3083_v46, %s3565_s23 }
  0x97   : > { %5664 = vst [vmem:[#allocation7_spill] sm:$0xff] %v4290_v50 }
  0x98   : > { %v4293_v15 = vpop.permute.xlu1 %2934 }
  0x99   : > { %5665 = vst [vmem:[#allocation13_spill] sm:$0xff] %v4293_v15 }
  0x9a   : > { %3204 = vrot.lane.b32.xlu1 %v3088_v8, %s3565_s23  ;;  %3209 = vrot.lane.b32.xlu0 %v5663_v45, %s3566_s24  ;;  %v4298_v31 = vpop.permute.xlu0 %2939  ;;  %v5669_v8 = vld [vmem:[#allocation29_spill] sm:$0xff] }
  0x9b   : > { %5666 = vst [vmem:[#allocation19_spill] sm:$0xff] %v4298_v31 }
  0x9e   : > { %3214 = vrot.lane.b32.xlu1 %v5667_v60, %s3566_s24  ;;  %v4302_v62 = vpop.permute.xlu1 %2944  ;;  %3219 = vrot.lane.b32.xlu0 %v4093_v32, %s3567_s25 }
  0x9f   : > { %5668 = vst [vmem:[#allocation24_spill] sm:$0xff] %v4302_v62 }
  0xa0   : > { %v2950_v3 = vpop.permute.xlu0 %2949 }
  0xa1   : > { %v2952_v40 = vunpack.i.h.bf16 %v2950_v3  ;;  %v2951_v9 = vunpack.i.l.bf16 %v2950_v3 }
  0xa2   : > { %3224 = vrot.lane.b32.xlu1 %v4101_v49, %s3567_s25  ;;  %3229 = vrot.lane.b32.xlu0 %v5667_v60, %s3563_s15 }
  0xa3   : > { %v2955_v46 = vpop.permute.xlu1 %2954  ;;  %v1482_v3 = vsel %vm1465_vm4, %v3832_v21, %v2951_v9 }
  0xa4   : > { %v2957_v11 = vunpack.i.h.bf16 %v2955_v46  ;;  %v2956_v57 = vunpack.i.l.bf16 %v2955_v46 }
  0xa6   : > { %3234 = vrot.lane.b32.xlu1 %v5669_v8, %s3563_s15  ;;  %v2960_v45 = vpop.permute.xlu0 %2959  ;;  %3239 = vrot.lane.b32.xlu0 %v4101_v49, %s3564_s18  ;;  %v5670_v49 = vld [vmem:[#allocation32_spill] sm:$0xff]  ;;  %v1484_v9 = vsel %vm1465_vm4, %v3858_v56, %v2956_v57 }
  0xa9   : > { %v4314_v6 = vpop.permute.xlu1 %2964 }
  0xaa   : > { %3244 = vrot.lane.b32.xlu1 %v4112_v41, %s3564_s18  ;;  %3249 = vrot.lane.b32.xlu0 %v4204_v19, %s3565_s23  ;;  %v2967_v46 = vunpack.i.h.bf16 %v4314_v6 }
  0xac   : > { %v4320_v32 = vpop.permute.xlu0 %2969  ;;  %v1489_v56 = vsel %vm1465_vm4, %v3907_v63, %v2967_v46 }
  0xae   : > { %3254 = vrot.lane.b32.xlu1 %v4209_v10, %s3565_s23  ;;  %v4324_v60 = vpop.permute.xlu1 %2974  ;;  %3259 = vrot.lane.b32.xlu0 %v5669_v8, %s3566_s24 }
  0xb0   : > { %v4328_v0 = vpop.permute.xlu0 %2979 }
  0xb2   : > { %3264 = vrot.lane.b32.xlu1 %v5670_v49, %s3566_s24  ;;  %3269 = vrot.lane.b32.xlu0 %v4112_v41, %s3567_s25 }
  0xb4   : > { %v4334_v26 = vpop.permute.xlu1 %2984  ;;  %v4336_v19 = vpop.permute.xlu0 %2989 }
  0xb6   : > { %3274 = vrot.lane.b32.xlu1 %v4119_v12, %s3567_s25  ;;  %3279 = vrot.lane.b32.xlu0 %v5670_v49, %s3563_s15 }
  0xb8   : > { %v4342_v10 = vpop.permute.xlu1 %2994  ;;  %v4344_v8 = vpop.permute.xlu0 %2999 }
  0xba   : > { %3284 = vrot.lane.b32.xlu1 %v5671_v25, %s3563_s15  ;;  %3289 = vrot.lane.b32.xlu0 %v4119_v12, %s3564_s18 }
  0xbc   : > { %v4350_v41 = vpop.permute.xlu1 %3004  ;;  %v4352_v62 = vpop.permute.xlu0 %3009 }
  0xbd   : > { %5672 = vst [vmem:[#allocation29_spill] sm:$0xff] %v4352_v62 }
  0xbe   : > { %3294 = vrot.lane.b32.xlu1 %v4123_v14, %s3564_s18  ;;  %3299 = vrot.lane.b32.xlu0 %v4215_v27, %s3565_s23 }
  0xc0   : > { %v4358_v49 = vpop.permute.xlu1 %3014  ;;  %v4360_v31 = vpop.permute.xlu0 %3019 }
  0xc1   : > { %5673 = vst [vmem:[#allocation32_spill] sm:$0xff] %v4358_v49  ;;  %5674 = vst [vmem:[#allocation35_spill] sm:$0xff] %v4360_v31  ;;  %v5676_v49 = vld [vmem:[#allocation38_spill] sm:$0xff]  ;;  %v2962_v31 = vunpack.i.h.bf16 %v2960_v45 }
  0xc2   : > { %3304 = vrot.lane.b32.xlu1 %v4221_v2, %s3565_s23  ;;  %3309 = vrot.lane.b32.xlu0 %v5671_v25, %s3566_s24  ;;  %v1483_v2 = vsel %vm1465_vm4, %v3829_v20, %v2952_v40  ;;  %v2961_v25 = vunpack.i.l.bf16 %v2960_v45  ;;  %v1485_v20 = vsel %vm1465_vm4, %v3855_v54, %v2957_v11  ;;  %v2972_v45 = vunpack.i.h.bf16 %v4320_v32 }
  0xc4   : > { %v4366_v12 = vpop.permute.xlu1 %3024  ;;  %v3030_v4 = vpop.permute.xlu0 %3029  ;;  %v1486_v11 = vsel %vm1465_vm4, %v3891_v44, %v2961_v25  ;;  %v1491_v63 = vsel %vm1465_vm4, %v3947_v18, %v2972_v45 }
  0xc5   : > { %5675 = vst [vmem:[#allocation58_spill] sm:$0xff] %v4366_v12  ;;  %v3032_v27 = vunpack.i.h.bf16 %v3030_v4  ;;  %v3031_v62 = vunpack.i.l.bf16 %v3030_v4  ;;  %v2966_v12 = vunpack.i.l.bf16 %v4314_v6  ;;  %v2971_v6 = vunpack.i.l.bf16 %v4320_v32 }
  0xc6   : > { %3314 = vrot.lane.b32.xlu1 %v5676_v49, %s3566_s24  ;;  %3319 = vrot.lane.b32.xlu0 %v4123_v14, %s3567_s25  ;;  %v2977_v32 = vunpack.i.h.bf16 %v4324_v60 }
  0xc7   : > { %v4379_v4 = vsel %vm1498_vm5, %v1482_v3, %v3031_v62  ;;  %v4382_v15 = vsel %vm1498_vm5, %v1483_v2, %v3032_v27  ;;  %v1487_v27 = vsel %vm1465_vm4, %v3888_v52, %v2962_v31  ;;  %v2976_v2 = vunpack.i.l.bf16 %v4324_v60 }
  0xc8   : > { %v3035_v50 = vpop.permute.xlu1 %3034  ;;  %v3040_v14 = vpop.permute.xlu0 %3039 }
  0xc9   : > { %v3037_v21 = vunpack.i.h.bf16 %v3035_v50  ;;  %v3036_v40 = vunpack.i.l.bf16 %v3035_v50  ;;  %v3042_v33 = vunpack.i.h.bf16 %v3040_v14  ;;  %v3041_v62 = vunpack.i.l.bf16 %v3040_v14 }
  0xca   : > { %3324 = vrot.lane.b32.xlu1 %v4139_v51, %s3567_s25  ;;  %3329 = vrot.lane.b32.xlu0 %v5676_v49, %s3563_s15  ;;  %v1488_v50 = vsel %vm1465_vm4, %v3910_v53, %v2966_v12  ;;  %v1490_v53 = vsel %vm1465_vm4, %v3934_v55, %v2971_v6  ;;  %v1493_v14 = vsel %vm1465_vm4, %v3959_v42, %v2977_v32 }
  0xcb   : > { %v4397_v57 = vsel %vm1498_vm5, %v1485_v20, %v3037_v21  ;;  %v4400_v54 = vsel %vm1498_vm5, %v1484_v9, %v3036_v40  ;;  %v4409_v52 = vsel %vm1498_vm5, %v1486_v11, %v3041_v62  ;;  %v4412_v44 = vsel %vm1498_vm5, %v1487_v27, %v3042_v33  ;;  %v5677_v20 = vld [vmem:[#allocation41_spill] sm:$0xff] }
  0xcc   : > { %v3045_v31 = vpop.permute.xlu1 %3044  ;;  %v3050_v49 = vpop.permute.xlu0 %3049  ;;  %v2982_v33 = vunpack.i.h.bf16 %v4328_v0  ;;  %v2981_v9 = vunpack.i.l.bf16 %v4328_v0  ;;  %v1492_v0 = vsel %vm1465_vm4, %v3962_v13, %v2976_v2  ;;  %v2987_v27 = vunpack.i.h.bf16 %v4334_v26 }
  0xcd   : > { %v3047_v3 = vunpack.i.h.bf16 %v3045_v31  ;;  %v3046_v25 = vunpack.i.l.bf16 %v3045_v31  ;;  %v3052_v12 = vunpack.i.h.bf16 %v3050_v49  ;;  %v3051_v46 = vunpack.i.l.bf16 %v3050_v49 }
  0xce   : > { %3334 = vrot.lane.b32.xlu1 %v5677_v20, %s3563_s15  ;;  %3339 = vrot.lane.b32.xlu0 %v4139_v51, %s3564_s18  ;;  %v2986_v51 = vunpack.i.l.bf16 %v4334_v26  ;;  %v1494_v31 = vsel %vm1465_vm4, %v3988_v43, %v2981_v9 }
  0xcf   : > { %v4425_v60 = vsel %vm1498_vm5, %v1489_v56, %v3047_v3  ;;  %v4428_v21 = vsel %vm1498_vm5, %v1488_v50, %v3046_v25  ;;  %v4433_v55 = vsel %vm1498_vm5, %v1490_v53, %v3051_v46  ;;  %v4436_v18 = vsel %vm1498_vm5, %v1491_v63, %v3052_v12 }
  0xd0   : > { %v3055_v40 = vpop.permute.xlu1 %3054  ;;  %v3060_v62 = vpop.permute.xlu0 %3059  ;;  %v1495_v50 = vsel %vm1465_vm4, %v3985_v17, %v2982_v33  ;;  %v1497_v12 = vsel %vm1465_vm4, %v4022_v23, %v2987_v27  ;;  %v1496_v46 = vsel %vm1465_vm4, %v4025_v35, %v2986_v51 }
  0xd1   : > { %v3057_v45 = vunpack.i.h.bf16 %v3055_v40  ;;  %v3056_v6 = vunpack.i.l.bf16 %v3055_v40  ;;  %v3062_v11 = vunpack.i.h.bf16 %v3060_v62  ;;  %v3061_v56 = vunpack.i.l.bf16 %v3060_v62 }
  0xd2   : > { %3344 = vrot.lane.b32.xlu1 %v4146_v22, %s3564_s18  ;;  %3349 = vrot.lane.b32.xlu0 %v4227_v24, %s3565_s23 }
  0xd3   : > { %v4451_v32 = vsel %vm1498_vm5, %v1493_v14, %v3057_v45  ;;  %v4454_v2 = vsel %vm1498_vm5, %v1492_v0, %v3056_v6  ;;  %v4459_v26 = vsel %vm1498_vm5, %v1494_v31, %v3061_v56  ;;  %v4462_v3 = vsel %vm1498_vm5, %v1495_v50, %v3062_v11  ;;  %v5684_v14 = vld [vmem:[#allocation44_spill] sm:$0xff]  ;;  %v5685_v6 = vld [vmem:[#allocation47_spill] sm:$0xff] }
  0xd4   : > { %5678 = vst [vmem:[#allocation38_spill] sm:$0xff] %v4451_v32  ;;  %5679 = vst [vmem:[#allocation41_spill] sm:$0xff] %v4454_v2  ;;  %v3065_v25 = vpop.permute.xlu1 %3064  ;;  %v4464_v53 = vpop.permute.xlu0 %3069  ;;  %v3403_v11 = vpack.i.bf16 %v3959_v42, %v3962_v13  ;;  %v290_v42 = vld [vmem:[%s3631_s27 + $0xf0] sm:$0xff]  ;;  %v291_v13 = vld [vmem:[%s3631_s27 + $0xf8] sm:$0xff] }
  0xd5   : > { %5680 = vst [vmem:[#allocation59_spill] sm:$0xff] %v4459_v26  ;;  %5681 = vst [vmem:[#allocation60_spill] sm:$0xff] %v4462_v3  ;;  %v3067_v49 = vunpack.i.h.bf16 %v3065_v25  ;;  %v3066_v63 = vunpack.i.l.bf16 %v3065_v25 }
  0xd6   : > { %3354 = vrot.lane.b32.xlu1 %v4233_v30, %s3565_s23  ;;  %3359 = vrot.lane.b32.xlu0 %v5677_v20, %s3566_s24 }
  0xd7   : > { %v4473_v24 = vsel %vm1498_vm5, %v1497_v12, %v3067_v49  ;;  %v4476_v33 = vsel %vm1498_vm5, %v1496_v46, %v3066_v63 }
  0xd8   : > { %5682 = vst [vmem:[#allocation61_spill] sm:$0xff] %v4473_v24  ;;  %5683 = vst [vmem:[#allocation62_spill] sm:$0xff] %v4476_v33  ;;  %v4480_v9 = vpop.permute.xlu1 %3074  ;;  %v4482_v40 = vpop.permute.xlu0 %3079  ;;  %v3072_v24 = vunpack.i.h.bf16 %v4464_v53 }
  0xd9   : > { %v3076_v3 = vunpack.i.l.bf16 %v4480_v9 }
  0xda   : > { %3364 = vrot.lane.b32.xlu1 %v5684_v14, %s3566_s24  ;;  %3369 = vrot.lane.b32.xlu0 %v4146_v22, %s3567_s25 }
  0xdc   : > { %v4488_v30 = vpop.permute.xlu1 %3084  ;;  %v4490_v0 = vpop.permute.xlu0 %3089 }
  0xde   : > { %3374 = vrot.lane.b32.xlu1 %v4157_v34, %s3567_s25  ;;  %3379 = vrot.lane.b32.xlu0 %v5684_v14, %s3563_s15 }
  0xe0   : > { %v4496_v20 = vpop.permute.xlu1 %3094  ;;  %v4498_v45 = vpop.permute.xlu0 %3099 }
  0xe2   : > { %3384 = vrot.lane.b32.xlu1 %v5685_v6, %s3563_s15  ;;  %3389 = vrot.lane.b32.xlu0 %v4157_v34, %s3564_s18 }
  0xe4   : > { %v4504_v22 = vpop.permute.xlu1 %3104  ;;  %v3110_v62 = vpop.permute.xlu0 %3109 }
  0xe5   : > { %v3112_v27 = vunpack.i.h.bf16 %v3110_v62  ;;  %v3111_v51 = vunpack.i.l.bf16 %v3110_v62 }
  0xe6   : > { %3394 = vrot.lane.b32.xlu1 %v4164_v47, %s3564_s18  ;;  %3399 = vrot.lane.b32.xlu0 %v4239_v58, %s3565_s23 }
  0xe7   : > { %v4514_v34 = vsel %vm1531_vm6, %v4379_v4, %v3111_v51  ;;  %v4518_v56 = vsel %vm1531_vm6, %v4382_v15, %v3112_v27  ;;  %v373_v51 = vrot.slane %v290_v42, 7 }
  0xe8   : > { %v3115_v50 = vpop.permute.xlu1 %3114  ;;  %v3120_v49 = vpop.permute.xlu0 %3119 }
  0xe9   : > { %v3117_v31 = vunpack.i.h.bf16 %v3115_v50  ;;  %v3116_v25 = vunpack.i.l.bf16 %v3115_v50  ;;  %v3122_v63 = vunpack.i.h.bf16 %v3120_v49  ;;  %v3121_v12 = vunpack.i.l.bf16 %v3120_v49 }
  0xea   : > { %3404 = vrot.lane.b32.xlu1 %v3403_v11, %s3565_s23  ;;  %3409 = vrot.lane.b32.xlu0 %v5685_v6, %s3566_s24  ;;  %v374_v50 = vrot.slane %v291_v13, 7  ;;  %v5686_v6 = vld [vmem:[#allocation50_spill] sm:$0xff]  ;;  %v4565_v49 = vpack.i.bf16 %v4022_v23, %v4025_v35  ;;  %v5688_v13 = vld [vmem:[#allocation3_spill] sm:$0xff]  ;;  %v2917_v23 = vunpack.i.h.bf16 %v4280_v16  ;;  %v2992_v35 = vunpack.i.h.bf16 %v4336_v19 }
  0xeb   : > { %v4525_v58 = vsel %vm1531_vm6, %v4400_v54, %v3116_v25  ;;  %v4529_v4 = vsel %vm1531_vm6, %v4397_v57, %v3117_v31  ;;  %v4535_v15 = vsel %vm1531_vm6, %v4409_v52, %v3121_v12  ;;  %v4539_v46 = vsel %vm1531_vm6, %v4412_v44, %v3122_v63 }
  0xec   : > { %v3125_v14 = vpop.permute.xlu1 %3124  ;;  %v4541_v54 = vpop.permute.xlu0 %3129  ;;  %v2912_v57 = vunpack.i.h.bf16 %v4272_v5  ;;  %v2911_v31 = vunpack.i.l.bf16 %v4272_v5  ;;  %v4561_v5 = vpack.i.bf16 %v3985_v17, %v3988_v43  ;;  %v4572_v12 = vsel %vm325_vm0, 0.0, %v373_v51 }
  0xed   : > { %v3127_v62 = vunpack.i.h.bf16 %v3125_v14  ;;  %v3126_v27 = vunpack.i.l.bf16 %v3125_v14  ;;  %v4581_v17 = vsel %vm325_vm0, %v374_v50, 0.0  ;;  %v2991_v14 = vunpack.i.l.bf16 %v4336_v19 }
  0xee   : > { %3414 = vrot.lane.b32.xlu1 %v5686_v6, %s3566_s24  ;;  %3419 = vrot.lane.b32.xlu0 %v4164_v47, %s3567_s25  ;;  %v5687_v47 = vld [vmem:[#allocation2_spill] sm:$0xff]  ;;  %v1466_v43 = vsel %vm1465_vm4, %v5688_v13, %v2911_v31  ;;  %v3132_v26 = vunpack.i.h.bf16 %v4541_v54 }
  0xef   : > { %v4549_v52 = vsel %vm1531_vm6, %v4428_v21, %v3126_v27  ;;  %v4553_v44 = vsel %vm1531_vm6, %v4425_v60, %v3127_v62  ;;  %v2916_v21 = vunpack.i.l.bf16 %v4280_v16  ;;  %v4569_v60 = vsel %vm325_vm0, %v373_v51, %v374_v50 }
  0xf0   : > { %v4557_v25 = vpop.permute.xlu1 %3134  ;;  %v3140_v63 = vpop.permute.xlu0 %3139  ;;  %v1467_v42 = vsel %vm1465_vm4, %v5687_v47, %v2912_v57  ;;  %v2996_v62 = vunpack.i.l.bf16 %v4342_v10  ;;  %v2997_v27 = vunpack.i.h.bf16 %v4342_v10  ;;  %v3071_v51 = vunpack.i.l.bf16 %v4464_v53 }
  0xf1   : > { %v1468_v19 = vsel %vm1465_vm4, %v3679_v37, %v2916_v21  ;;  %v3131_v50 = vunpack.i.l.bf16 %v4541_v54  ;;  %v1469_v37 = vsel %vm1465_vm4, %v3676_v36, %v2917_v23  ;;  %v1500_v53 = vsel %vm1498_vm5, %v1467_v42, %v2992_v35 }
  0xf2   : > { %3424 = vrot.lane.b32.xlu1 %v4170_v1, %s3567_s25  ;;  %3429 = vrot.lane.b32.xlu0 %v3403_v11, %s3562_s12  ;;  %v3077_v11 = vunpack.i.h.bf16 %v4480_v9  ;;  %v1499_v21 = vsel %vm1498_vm5, %v1466_v43, %v2991_v14  ;;  %v1501_v16 = vsel %vm1498_vm5, %v1468_v19, %v2996_v62  ;;  %v1502_v9 = vsel %vm1498_vm5, %v1469_v37, %v2997_v27  ;;  %v5689_v27 = vld [vmem:[#allocation54_spill] sm:$0xff] }
  0xf3   : > { %v1532_v10 = vsel %vm1531_vm6, %v1499_v21, %v3071_v51  ;;  %v3142_v54 = vunpack.i.h.bf16 %v3140_v63  ;;  %v3141_v31 = vunpack.i.l.bf16 %v3140_v63  ;;  %v1533_v2 = vsel %vm1531_vm6, %v1500_v53, %v3072_v24 }
  0xf4   : > { %v4590_v57 = vpop.permute.xlu1 %3144  ;;  %v3150_v33 = vpop.permute.xlu0 %3149  ;;  %v3136_v36 = vunpack.i.l.bf16 %v4557_v25  ;;  %v1534_v35 = vsel %vm1531_vm6, %v1501_v16, %v3076_v3  ;;  %v1535_v14 = vsel %vm1531_vm6, %v1502_v9, %v3077_v11  ;;  %v1566_v62 = vsel %vm1564_vm7, %v1533_v2, %v3132_v26 }
  0xf5   : > { %v3152_v42 = vunpack.i.h.bf16 %v3150_v33  ;;  %v3151_v23 = vunpack.i.l.bf16 %v3150_v33  ;;  %v3137_v63 = vunpack.i.h.bf16 %v4557_v25  ;;  %v3146_v24 = vunpack.i.l.bf16 %v4590_v57 }
  0xf6   : > { %3434 = vrot.lane.b32.xlu1 %v4561_v5, %s3562_s12  ;;  %3439 = vrot.lane.b32.xlu0 %v5686_v6, %s3563_s15  ;;  %v1565_v6 = vsel %vm1564_vm7, %v1532_v10, %v3131_v50  ;;  %v1599_v33 = vsel %vm1597_vm8, %v1566_v62, %v3142_v54  ;;  %v3147_v50 = vunpack.i.h.bf16 %v4590_v57  ;;  %v1567_v26 = vsel %vm1564_vm7, %v1534_v35, %v3136_v36 }
  0xf7   : > { %v1598_v3 = vsel %vm1597_vm8, %v1565_v6, %v3141_v31  ;;  %v1632_v25 = vsel %vm1630_vm9, %v1599_v33, %v3152_v42  ;;  %v1568_v31 = vsel %vm1564_vm7, %v1535_v14, %v3137_v63  ;;  %v1600_v57 = vsel %vm1597_vm8, %v1567_v26, %v3146_v24 }
  0xf8   : > { %v3155_v32 = vpop.permute.xlu1 %3154  ;;  %v3160_v43 = vpop.permute.xlu0 %3159  ;;  %v1631_v10 = vsel %vm1630_vm9, %v1598_v3, %v3151_v23  ;;  %v2921_v24 = vunpack.i.l.bf16 %v4276_v59  ;;  %v5690_v3 = vrot.slane %v4569_v60, 1  ;;  %v5691_v33 = vrot.slane %v4572_v12, 1 }
  0xf9   : > { %v3162_v51 = vunpack.i.h.bf16 %v3160_v43  ;;  %v3161_v19 = vunpack.i.l.bf16 %v3160_v43  ;;  %v3156_v16 = vunpack.i.l.bf16 %v3155_v32  ;;  %v3157_v11 = vunpack.i.h.bf16 %v3155_v32 }
  0xfa   : > { %3444 = vrot.lane.b32.xlu1 %v5689_v27, %s3563_s15  ;;  %3449 = vrot.lane.b32.xlu0 %v4170_v1, %s3564_s18  ;;  %v1601_v32 = vsel %vm1597_vm8, %v1568_v31, %v3147_v50  ;;  %v4657_v50 = vsel %vm491_vm1, %v5691_v33, %v5690_v3  ;;  %v5692_v26 = vrot.slane %v4581_v17, 1 }
  0xfb   : > { %v1664_v54 = vsel %vm1663_vm10, %v1631_v10, %v3161_v19  ;;  %v1665_v36 = vsel %vm1663_vm10, %v1632_v25, %v3162_v51  ;;  %v1633_v42 = vsel %vm1630_vm9, %v1600_v57, %v3156_v16  ;;  %v1634_v14 = vsel %vm1630_vm9, %v1601_v32, %v3157_v11 }
  0xfc   : > { %v3165_v2 = vpop.permute.xlu1 %3164  ;;  %v3170_v37 = vpop.permute.xlu0 %3169  ;;  %v5693_v10 = vmov %v5690_v3  ;;  %v4680_v57 = vpack.i.bf16 %v4569_v60, %v4572_v12  ;;  %v1470_v32 = vsel %vm1465_vm4, %v3666_v29, %v2921_v24  ;;  %v3006_v29 = vunpack.i.l.bf16 %v4350_v41 }
  0xfd   : > { %v3167_v53 = vunpack.i.h.bf16 %v3165_v2  ;;  %v3166_v21 = vunpack.i.l.bf16 %v3165_v2  ;;  %v3172_v9 = vunpack.i.h.bf16 %v3170_v37  ;;  %v3171_v1 = vunpack.i.l.bf16 %v3170_v37 }
  0xfe   : > { %3454 = vrot.lane.b32.xlu1 %v4176_v7, %s3564_s18  ;;  %3459 = vrot.lane.b32.xlu0 %v4561_v5, %s3565_s23  ;;  %v4669_v25 = vsel %vm491_vm1, %v5693_v10, %v5692_v26 }
  0xff   : > { %v1697_v43 = vsel %vm1696_vm11, %v1664_v54, %v3171_v1  ;;  %v1698_v35 = vsel %vm1696_vm11, %v1665_v36, %v3172_v9  ;;  %v1666_v51 = vsel %vm1663_vm10, %v1633_v42, %v3166_v21  ;;  %v1667_v19 = vsel %vm1663_vm10, %v1634_v14, %v3167_v53 }
 0x100   : > { %v3175_v23 = vpop.permute.xlu1 %3174  ;;  %v4645_v63 = vpop.permute.xlu0 %3179  ;;  %v1729_v5 = vpack.c.bf16 %v1698_v35, %v1697_v43  ;;  %v692_v53 = vrot.slane %v4572_v12, 2  ;;  %v693_v21 = vrot.slane %v4569_v60, 2  ;;  %v695_v9 = vrot.slane %v4581_v17, 2 }
 0x101   : > { %v3177_v6 = vunpack.i.h.bf16 %v3175_v23  ;;  %v3176_v62 = vunpack.i.l.bf16 %v3175_v23  ;;  %v2926_v1 = vunpack.i.l.bf16 %v4284_v61  ;;  %v5694_v54 = vunpack.i.h.bf16 %v4276_v59 }
 0x102   : > { %3464 = vrot.lane.b32.xlu1 %v4565_v49, %s3565_s23  ;;  %3469 = vrot.lane.b32.xlu0 %v5689_v27, %s3566_s24  ;;  %v2927_v27 = vunpack.i.h.bf16 %v4284_v61  ;;  %v3002_v61 = vunpack.i.h.bf16 %v4344_v8  ;;  %v3001_v17 = vunpack.i.l.bf16 %v4344_v8  ;;  %v3007_v60 = vunpack.i.h.bf16 %v4350_v41 }
 0x103   : > { %v1699_v16 = vsel %vm1696_vm11, %v1666_v51, %v3176_v62  ;;  %v1700_v2 = vsel %vm1696_vm11, %v1667_v19, %v3177_v6  ;;  %2822 = vmatprep.mubr.msk.bf16.mxu0 %vm1765_vm12, %v1729_v5  ;;  %v1471_v36 = vsel %vm1465_vm4, %v3663_v28, %v5694_v54  ;;  %v4698_v28 = vpack.i.bf16 %v4669_v25, %v4657_v50  ;;  %v5695_v5 = vld [vmem:[#allocation57_spill] sm:$0xff] }
 0x104   : > { %v1730_v11 = vpack.c.bf16 %v1700_v2, %v1699_v16  ;;  %v4671_v37 = vpop.permute.xlu1 %3184  ;;  %v3190_v31 = vpop.permute.xlu0 %3189  ;;  %v3081_v59 = vunpack.i.l.bf16 %v4482_v40  ;;  %v694_v42 = vsel %vm572_vm2, %v692_v53, %v693_v21  ;;  %v696_v23 = vsel %vm572_vm2, %v693_v21, %v695_v9 }
 0x105   : > { %v1473_v8 = vsel %vm1465_vm4, %v3685_v39, %v2927_v27  ;;  %v1472_v43 = vsel %vm1465_vm4, %v3703_v48, %v2926_v1  ;;  %v3087_v14 = vunpack.i.h.bf16 %v4488_v30  ;;  %v3086_v41 = vunpack.i.l.bf16 %v4488_v30 }
 0x106   : > { %3474 = vrot.lane.b32.xlu1 %v4053_v38, %s3566_s24  ;;  %2823 = vmatmul.mubr.msk.bf16.vlgmr.msra.gmra.mrb[0].mxu0 %vm1765_vm12, %v1730_v11  ;;  %v3182_v6 = vunpack.i.h.bf16 %v4645_v63  ;;  %v3181_v62 = vunpack.i.l.bf16 %v4645_v63  ;;  %v1504_v24 = vsel %vm1498_vm5, %v1471_v36, %v3002_v61  ;;  %v1503_v39 = vsel %vm1498_vm5, %v1470_v32, %v3001_v17 }
 0x107   : > { %3479 = vrot.lane.b32.xlu0 %v4176_v7, %s3567_s25  ;;  %v3082_v7 = vunpack.i.h.bf16 %v4482_v40  ;;  %v1506_v48 = vsel %vm1498_vm5, %v1473_v8, %v3007_v60  ;;  %v4720_v40 = vpack.i.bf16 %v696_v23, %v694_v42  ;;  %v1505_v30 = vsel %vm1498_vm5, %v1472_v43, %v3006_v29 }
 0x108   : > { %v3195_v12 = vpop.permute.xlu1 %3194  ;;  %v3200_v35 = vpop.permute.xlu0 %3199  ;;  %v1536_v51 = vsel %vm1531_vm6, %v1503_v39, %v3081_v59  ;;  %v3192_v19 = vunpack.i.h.bf16 %v3190_v31  ;;  %v3191_v63 = vunpack.i.l.bf16 %v3190_v31  ;;  %v3186_v16 = vunpack.i.l.bf16 %v4671_v37 }
 0x109   : > { %v1537_v33 = vsel %vm1531_vm6, %v1504_v24, %v3082_v7  ;;  %v3202_v2 = vunpack.i.h.bf16 %v3200_v35  ;;  %v3201_v26 = vunpack.i.l.bf16 %v3200_v35  ;;  %v1538_v11 = vsel %vm1531_vm6, %v1505_v30, %v3086_v41 }
 0x10a   : > { %3484 = vrot.lane.b32.xlu1 %v5695_v5, %s3567_s25  ;;  %v1569_v53 = vsel %vm1564_vm7, %v1536_v51, %v3181_v62  ;;  %v1570_v21 = vsel %vm1564_vm7, %v1537_v33, %v3182_v6  ;;  %v3187_v9 = vunpack.i.h.bf16 %v4671_v37  ;;  %v3196_v27 = vunpack.i.l.bf16 %v3195_v12 }
 0x10b   : > { %3489 = vrot.lane.b32.xlu0 %v4565_v49, %s3562_s12  ;;  %v1539_v49 = vsel %vm1531_vm6, %v1506_v48, %v3087_v14  ;;  %v1602_v54 = vsel %vm1597_vm8, %v1569_v53, %v3191_v63  ;;  %v1603_v36 = vsel %vm1597_vm8, %v1570_v21, %v3192_v19  ;;  %v3197_v32 = vunpack.i.h.bf16 %v3195_v12  ;;  %v5697_v21 = vld [vmem:[#allocation13_spill] sm:$0xff] }
 0x10c   : > { %v3205_v3 = vpop.permute.xlu1 %3204  ;;  %v3210_v10 = vpop.permute.xlu0 %3209  ;;  %v1571_v60 = vsel %vm1564_vm7, %v1538_v11, %v3186_v16  ;;  %v1635_v29 = vsel %vm1630_vm9, %v1602_v54, %v3201_v26  ;;  %v1636_v59 = vsel %vm1630_vm9, %v1603_v36, %v3202_v2  ;;  %v5696_v11 = vld [vmem:[#allocation7_spill] sm:$0xff] }
 0x10d   : > { %v3212_v1 = vunpack.i.h.bf16 %v3210_v10  ;;  %v3211_v31 = vunpack.i.l.bf16 %v3210_v10  ;;  %v3206_v61 = vunpack.i.l.bf16 %v3205_v3  ;;  %v3207_v37 = vunpack.i.h.bf16 %v3205_v3 }
 0x10e   : > { %3494 = vrot.lane.b32.xlu1 %v4680_v57, %s3562_s12  ;;  %v1604_v12 = vsel %vm1597_vm8, %v1571_v60, %v3196_v27  ;;  %v2931_v53 = vunpack.i.l.bf16 %v5696_v11 }
 0x10f   : > { %3499 = vrot.lane.b32.xlu0 %v4053_v38, %s3563_s15  ;;  %v1572_v38 = vsel %vm1564_vm7, %v1539_v49, %v3187_v9  ;;  %v1668_v35 = vsel %vm1663_vm10, %v1635_v29, %v3211_v31  ;;  %v1669_v14 = vsel %vm1663_vm10, %v1636_v59, %v3212_v1  ;;  %v1637_v6 = vsel %vm1630_vm9, %v1604_v12, %v3206_v61  ;;  %v5699_v31 = vld [vmem:[#allocation32_spill] sm:$0xff]  ;;  %v5701_v29 = vld [vmem:[#allocation10_spill] sm:$0xff] }
 0x110   : > { %v3215_v17 = vpop.permute.xlu1 %3214  ;;  %v3220_v42 = vpop.permute.xlu0 %3219  ;;  %v1605_v41 = vsel %vm1597_vm8, %v1572_v38, %v3197_v32  ;;  %v2932_v49 = vunpack.i.h.bf16 %v5696_v11  ;;  %v2937_v9 = vunpack.i.h.bf16 %v5697_v21  ;;  %v3017_v54 = vunpack.i.h.bf16 %v5699_v31  ;;  %v5703_v12 = vld [vmem:[#allocation4_spill] sm:$0xff] }
 0x111   : > { %v3217_v23 = vunpack.i.h.bf16 %v3215_v17  ;;  %v3216_v8 = vunpack.i.l.bf16 %v3215_v17  ;;  %v3222_v43 = vunpack.i.h.bf16 %v3220_v42  ;;  %v3221_v7 = vunpack.i.l.bf16 %v3220_v42  ;;  %v5700_v17 = vld [vmem:[#allocation14_spill] sm:$0xff] }
 0x112   : > { %3504 = vrot.lane.b32.xlu1 %v4698_v28, %s3563_s15  ;;  %v1638_v48 = vsel %vm1630_vm9, %v1605_v41, %v3207_v37  ;;  %v3016_v36 = vunpack.i.l.bf16 %v5699_v31  ;;  %v3091_v32 = vunpack.i.l.bf16 %v4490_v0  ;;  %v1475_v60 = vsel %vm1465_vm4, %v5700_v17, %v2932_v49  ;;  %v5702_v37 = vld [vmem:[#allocation16_spill] sm:$0xff] }
 0x113   : > { %3509 = vrot.lane.b32.xlu0 %v5695_v5, %s3564_s18  ;;  %v1701_v62 = vsel %vm1696_vm11, %v1668_v35, %v3221_v7  ;;  %v1702_v24 = vsel %vm1696_vm11, %v1669_v14, %v3222_v43  ;;  %v1670_v3 = vsel %vm1663_vm10, %v1637_v6, %v3216_v8  ;;  %v1671_v33 = vsel %vm1663_vm10, %v1638_v48, %v3217_v23  ;;  %v5704_v35 = vld [vmem:[#allocation15_spill] sm:$0xff] }
 0x114   : > { %v3225_v39 = vpop.permute.xlu1 %3224  ;;  %v1731_v30 = vpack.c.bf16 %v1702_v24, %v1701_v62  ;;  %v3230_v63 = vpop.permute.xlu0 %3229  ;;  %v3523_v5 = vpack.i.bf16 %v5687_v47, %v5688_v13  ;;  %v2936_v47 = vunpack.i.l.bf16 %v5697_v21  ;;  %v5698_v13 = vld [vmem:[#allocation29_spill] sm:$0xff]  ;;  %v1474_v59 = vsel %vm1465_vm4, %v5701_v29, %v2931_v53 }
 0x115   : > { %v3227_v51 = vunpack.i.h.bf16 %v3225_v39  ;;  %v3226_v19 = vunpack.i.l.bf16 %v3225_v39  ;;  %v3011_v1 = vunpack.i.l.bf16 %v5698_v13  ;;  %v1477_v42 = vsel %vm1465_vm4, %v5702_v37, %v2937_v9 }
 0x116   : > { %3514 = vrot.lane.b32.xlu1 %v4720_v40, %s3564_s18  ;;  %2826 = vmatprep.mubr.msk.bf16.mxu0 %vm1765_vm12, %v1731_v30  ;;  %v3092_v23 = vunpack.i.h.bf16 %v4490_v0  ;;  %v3097_v43 = vunpack.i.h.bf16 %v4496_v20  ;;  %v3232_v7 = vunpack.i.h.bf16 %v3230_v63  ;;  %v3231_v38 = vunpack.i.l.bf16 %v3230_v63 }
 0x117   : > { %v1703_v16 = vsel %vm1696_vm11, %v1670_v3, %v3226_v19  ;;  %v1704_v2 = vsel %vm1696_vm11, %v1671_v33, %v3227_v51  ;;  %3519 = vrot.lane.b32.xlu0 %v4680_v57, %s3565_s23  ;;  %v3012_v57 = vunpack.i.h.bf16 %v5698_v13  ;;  %v1476_v14 = vsel %vm1465_vm4, %v5704_v35, %v2936_v47 }
 0x118   : > { %v1732_v26 = vpack.c.bf16 %v1704_v2, %v1703_v16  ;;  %v4764_v10 = vpop.permute.xlu1 %3234  ;;  %v3240_v27 = vpop.permute.xlu0 %3239  ;;  %v1507_v41 = vsel %vm1498_vm5, %v1474_v59, %v3011_v1  ;;  %v1510_v62 = vsel %vm1498_vm5, %v1477_v42, %v3017_v54  ;;  %v1509_v0 = vsel %vm1498_vm5, %v1476_v14, %v3016_v36  ;;  %v5705_v2 = vld [vmem:[#allocation52_spill] sm:$0xff] }
 0x119   : > { %v1508_v6 = vsel %vm1498_vm5, %v1475_v60, %v3012_v57  ;;  %v3242_v24 = vunpack.i.h.bf16 %v3240_v27  ;;  %v3241_v39 = vunpack.i.l.bf16 %v3240_v27  ;;  %v3236_v51 = vunpack.i.l.bf16 %v4764_v10 }
 0x11a   : > { %3524 = vrot.lane.b32.xlu1 %v3523_v5, %s3565_s23  ;;  %2827 = vmatmul.mubr.msk.bf16.gmra.mrb[4].mxu0 %vm1765_vm12, %v1732_v26  ;;  %v1541_v30 = vsel %vm1531_vm6, %v1508_v6, %v3092_v23  ;;  %v1543_v5 = vsel %vm1531_vm6, %v1510_v62, %v3097_v43  ;;  %v3237_v26 = vunpack.i.h.bf16 %v4764_v10 }
 0x11b   : > { %3529 = vrot.lane.b32.xlu0 %v4698_v28, %s3566_s24  ;;  %v3096_v28 = vunpack.i.l.bf16 %v4496_v20  ;;  %v1540_v20 = vsel %vm1531_vm6, %v1507_v41, %v3091_v32  ;;  %v1574_v16 = vsel %vm1564_vm7, %v1541_v30, %v3232_v7 }
 0x11c   : > { %v3245_v61 = vpop.permute.xlu1 %3244  ;;  %v3250_v8 = vpop.permute.xlu0 %3249  ;;  %v1607_v9 = vsel %vm1597_vm8, %v1574_v16, %v3242_v24  ;;  %v1576_v29 = vsel %vm1564_vm7, %v1543_v5, %v3237_v26  ;;  %v5709_v16 = vld [vmem:[#allocation58_spill] sm:$0xff] }
 0x11d   : > { %v3252_v19 = vunpack.i.h.bf16 %v3250_v8  ;;  %v3251_v63 = vunpack.i.l.bf16 %v3250_v8  ;;  %v1542_v33 = vsel %vm1531_vm6, %v1509_v0, %v3096_v28  ;;  %v3246_v11 = vunpack.i.l.bf16 %v3245_v61 }
 0x11e   : > { %3534 = vrot.lane.b32.xlu1 %v5703_v12, %s3566_s24  ;;  %v3247_v27 = vunpack.i.h.bf16 %v3245_v61  ;;  %v1575_v57 = vsel %vm1564_vm7, %v1542_v33, %v3236_v51  ;;  %v5707_v51 = vld [vmem:[#allocation24_spill] sm:$0xff]  ;;  %v5708_v33 = vld [vmem:[#allocation35_spill] sm:$0xff]  ;;  %v3026_v26 = vunpack.i.l.bf16 %v5709_v16 }
 0x11f   : > { %3539 = vrot.lane.b32.xlu0 %v4720_v40, %s3567_s25  ;;  %v1573_v40 = vsel %vm1564_vm7, %v1540_v20, %v3231_v38  ;;  %v1640_v31 = vsel %vm1630_vm9, %v1607_v9, %v3252_v19  ;;  %v1608_v59 = vsel %vm1597_vm8, %v1575_v57, %v3246_v11  ;;  %v2947_v19 = vunpack.i.h.bf16 %v5707_v51  ;;  %v5711_v9 = vld [vmem:[#allocation21_spill] sm:$0xff] }
 0x120   : > { %v3255_v48 = vpop.permute.xlu1 %3254  ;;  %v3260_v3 = vpop.permute.xlu0 %3259  ;;  %v1606_v21 = vsel %vm1597_vm8, %v1573_v40, %v3241_v39  ;;  %v1609_v42 = vsel %vm1597_vm8, %v1576_v29, %v3247_v27  ;;  %v5706_v39 = vld [vmem:[#allocation19_spill] sm:$0xff]  ;;  %v3022_v5 = vunpack.i.h.bf16 %v5708_v33  ;;  %v3021_v40 = vunpack.i.l.bf16 %v5708_v33 }
 0x121   : > { %v3262_v49 = vunpack.i.h.bf16 %v3260_v3  ;;  %v3261_v53 = vunpack.i.l.bf16 %v3260_v3  ;;  %v3256_v47 = vunpack.i.l.bf16 %v3255_v48  ;;  %v1639_v1 = vsel %vm1630_vm9, %v1606_v21, %v3251_v63 }
 0x122   : > { %3544 = vrot.lane.b32.xlu1 %v5705_v2, %s3567_s25  ;;  %v3257_v54 = vunpack.i.h.bf16 %v3255_v48  ;;  %v2942_v48 = vunpack.i.h.bf16 %v5706_v39  ;;  %v2941_v30 = vunpack.i.l.bf16 %v5706_v39  ;;  %v2946_v3 = vunpack.i.l.bf16 %v5707_v51 }
 0x123   : > { %v1672_v61 = vsel %vm1663_vm10, %v1639_v1, %v3261_v53  ;;  %v1673_v37 = vsel %vm1663_vm10, %v1640_v31, %v3262_v49  ;;  %v1641_v23 = vsel %vm1630_vm9, %v1608_v59, %v3256_v47  ;;  %v3027_v2 = vunpack.i.h.bf16 %v5709_v16  ;;  %v5710_v53 = vld [vmem:[#allocation20_spill] sm:$0xff]  ;;  %v5712_v47 = vld [vmem:[#allocation27_spill] sm:$0xff] }
 0x124   : > { %v3265_v13 = vpop.permute.xlu1 %3264  ;;  %v3270_v36 = vpop.permute.xlu0 %3269  ;;  %v1642_v7 = vsel %vm1630_vm9, %v1609_v42, %v3257_v54  ;;  %v3101_v11 = vunpack.i.l.bf16 %v4498_v45  ;;  %v1479_v21 = vsel %vm1465_vm4, %v5710_v53, %v2942_v48  ;;  %v1478_v27 = vsel %vm1465_vm4, %v5711_v9, %v2941_v30 }
 0x125   : > { %v3267_v32 = vunpack.i.h.bf16 %v3265_v13  ;;  %v3266_v10 = vunpack.i.l.bf16 %v3265_v13  ;;  %v3272_v17 = vunpack.i.h.bf16 %v3270_v36  ;;  %v3271_v60 = vunpack.i.l.bf16 %v3270_v36 }
 0x126   : > { %v1481_v13 = vsel %vm1465_vm4, %v5712_v47, %v2947_v19  ;;  %v3102_v57 = vunpack.i.h.bf16 %v4498_v45  ;;  %v3107_v31 = vunpack.i.h.bf16 %v4504_v22  ;;  %v3106_v54 = vunpack.i.l.bf16 %v4504_v22 }
 0x127   : > { %v1705_v8 = vsel %vm1696_vm11, %v1672_v61, %v3271_v60  ;;  %v1706_v43 = vsel %vm1696_vm11, %v1673_v37, %v3272_v17  ;;  %v1674_v41 = vsel %vm1663_vm10, %v1641_v23, %v3266_v10  ;;  %v1675_v6 = vsel %vm1663_vm10, %v1642_v7, %v3267_v32  ;;  %v5713_v10 = vld [vmem:[#allocation28_spill] sm:$0xff] }
 0x128   : > { %v3275_v28 = vpop.permute.xlu1 %3274  ;;  %v1733_v38 = vpack.c.bf16 %v1706_v43, %v1705_v8  ;;  %v3280_v14 = vpop.permute.xlu0 %3279  ;;  %v1480_v17 = vsel %vm1465_vm4, %v5713_v10, %v2946_v3  ;;  %v1511_v60 = vsel %vm1498_vm5, %v1478_v27, %v3021_v40  ;;  %v1512_v29 = vsel %vm1498_vm5, %v1479_v21, %v3022_v5 }
 0x129   : > { %v3277_v12 = vunpack.i.h.bf16 %v3275_v28  ;;  %v3276_v35 = vunpack.i.l.bf16 %v3275_v28  ;;  %v3282_v36 = vunpack.i.h.bf16 %v3280_v14  ;;  %v3281_v32 = vunpack.i.l.bf16 %v3280_v14 }
 0x12a   : > { %2830 = vmatprep.mubr.msk.bf16.mxu0 %vm1765_vm12, %v1733_v38  ;;  %v1514_v59 = vsel %vm1498_vm5, %v1481_v13, %v3027_v2  ;;  %v1513_v61 = vsel %vm1498_vm5, %v1480_v17, %v3026_v26  ;;  %v1544_v45 = vsel %vm1531_vm6, %v1511_v60, %v3101_v11  ;;  %v1545_v22 = vsel %vm1531_vm6, %v1512_v29, %v3102_v57 }
 0x12b   : > { %v1707_v62 = vsel %vm1696_vm11, %v1674_v41, %v3276_v35  ;;  %v1708_v0 = vsel %vm1696_vm11, %v1675_v6, %v3277_v12  ;;  %v1546_v38 = vsel %vm1531_vm6, %v1513_v61, %v3106_v54  ;;  %v1547_v12 = vsel %vm1531_vm6, %v1514_v59, %v3107_v31 }
 0x12c   : > { %v1734_v20 = vpack.c.bf16 %v1708_v0, %v1707_v62  ;;  %v3285_v24 = vpop.permute.xlu1 %3284  ;;  %v3290_v63 = vpop.permute.xlu0 %3289  ;;  %v1577_v35 = vsel %vm1564_vm7, %v1544_v45, %v3281_v32  ;;  %v1578_v14 = vsel %vm1564_vm7, %v1545_v22, %v3282_v36 }
 0x12d   : > { %v3292_v37 = vunpack.i.h.bf16 %v3290_v63  ;;  %v3291_v42 = vunpack.i.l.bf16 %v3290_v63  ;;  %v3286_v8 = vunpack.i.l.bf16 %v3285_v24  ;;  %v3287_v41 = vunpack.i.h.bf16 %v3285_v24 }
 0x12e   : > { %2831 = vmatmul.mubr.msk.bf16.gmra.mrb[8].mxu0 %vm1765_vm12, %v1734_v20 }
 0x12f   : > { %v1610_v20 = vsel %vm1597_vm8, %v1577_v35, %v3291_v42  ;;  %v1611_v39 = vsel %vm1597_vm8, %v1578_v14, %v3292_v37  ;;  %v1579_v19 = vsel %vm1564_vm7, %v1546_v38, %v3286_v8  ;;  %v1580_v26 = vsel %vm1564_vm7, %v1547_v12, %v3287_v41 }
 0x130   : > { %v3295_v49 = vpop.permute.xlu1 %3294  ;;  %v3300_v1 = vpop.permute.xlu0 %3299 }
 0x131   : > { %v3302_v43 = vunpack.i.h.bf16 %v3300_v1  ;;  %v3301_v28 = vunpack.i.l.bf16 %v3300_v1  ;;  %v3296_v6 = vunpack.i.l.bf16 %v3295_v49  ;;  %v3297_v48 = vunpack.i.h.bf16 %v3295_v49 }
 0x133   : > { %v1643_v63 = vsel %vm1630_vm9, %v1610_v20, %v3301_v28  ;;  %v1644_v3 = vsel %vm1630_vm9, %v1611_v39, %v3302_v43  ;;  %v1612_v11 = vsel %vm1597_vm8, %v1579_v19, %v3296_v6  ;;  %v1613_v21 = vsel %vm1597_vm8, %v1580_v26, %v3297_v48 }
 0x134   : > { %v3305_v23 = vpop.permute.xlu1 %3304  ;;  %v3310_v7 = vpop.permute.xlu0 %3309 }
 0x135   : > { %v3312_v62 = vunpack.i.h.bf16 %v3310_v7  ;;  %v3311_v0 = vunpack.i.l.bf16 %v3310_v7  ;;  %v3306_v30 = vunpack.i.l.bf16 %v3305_v23  ;;  %v3307_v33 = vunpack.i.h.bf16 %v3305_v23 }
 0x137   : > { %v1676_v49 = vsel %vm1663_vm10, %v1643_v63, %v3311_v0  ;;  %v1677_v53 = vsel %vm1663_vm10, %v1644_v3, %v3312_v62  ;;  %v1645_v9 = vsel %vm1630_vm9, %v1612_v11, %v3306_v30  ;;  %v1646_v57 = vsel %vm1630_vm9, %v1613_v21, %v3307_v33 }
 0x138   : > { %v3315_v51 = vpop.permute.xlu1 %3314  ;;  %v3320_v5 = vpop.permute.xlu0 %3319 }
 0x139   : > { %v3317_v40 = vunpack.i.h.bf16 %v3315_v51  ;;  %v3316_v24 = vunpack.i.l.bf16 %v3315_v51  ;;  %v3322_v16 = vunpack.i.h.bf16 %v3320_v5  ;;  %v3321_v2 = vunpack.i.l.bf16 %v3320_v5 }
 0x13b   : > { %v1709_v27 = vsel %vm1696_vm11, %v1676_v49, %v3321_v2  ;;  %v1710_v47 = vsel %vm1696_vm11, %v1677_v53, %v3322_v16  ;;  %v1678_v32 = vsel %vm1663_vm10, %v1645_v9, %v3316_v24  ;;  %v1679_v10 = vsel %vm1663_vm10, %v1646_v57, %v3317_v40 }
 0x13c   : > { %v3325_v13 = vpop.permute.xlu1 %3324  ;;  %v1735_v1 = vpack.c.bf16 %v1710_v47, %v1709_v27  ;;  %v3330_v36 = vpop.permute.xlu0 %3329 }
 0x13d   : > { %v3327_v31 = vunpack.i.h.bf16 %v3325_v13  ;;  %v3326_v54 = vunpack.i.l.bf16 %v3325_v13  ;;  %v3332_v42 = vunpack.i.h.bf16 %v3330_v36  ;;  %v3331_v23 = vunpack.i.l.bf16 %v3330_v36 }
 0x13e   : > { %2834 = vmatprep.mubr.msk.bf16.mxu0 %vm1765_vm12, %v1735_v1 }
 0x13f   : > { %v1711_v17 = vsel %vm1696_vm11, %v1678_v32, %v3326_v54  ;;  %v1712_v60 = vsel %vm1696_vm11, %v1679_v10, %v3327_v31  ;;  %v1581_v35 = vsel %vm1564_vm7, %v4514_v34, %v3331_v23  ;;  %v1582_v14 = vsel %vm1564_vm7, %v4518_v56, %v3332_v42 }
 0x140   : > { %v1736_v29 = vpack.c.bf16 %v1712_v60, %v1711_v17  ;;  %v3335_v59 = vpop.permute.xlu1 %3334  ;;  %v3340_v61 = vpop.permute.xlu0 %3339 }
 0x141   : > { %v3342_v22 = vunpack.i.h.bf16 %v3340_v61  ;;  %v3341_v8 = vunpack.i.l.bf16 %v3340_v61  ;;  %v3336_v28 = vunpack.i.l.bf16 %v3335_v59  ;;  %v3337_v41 = vunpack.i.h.bf16 %v3335_v59 }
 0x142   : > { %2835 = vmatmul.mubr.msk.bf16.gmra.mrb[12].mxu0 %vm1765_vm12, %v1736_v29 }
 0x143   : > { %v1614_v20 = vsel %vm1597_vm8, %v1581_v35, %v3341_v8  ;;  %v1615_v39 = vsel %vm1597_vm8, %v1582_v14, %v3342_v22  ;;  %v1583_v19 = vsel %vm1564_vm7, %v4525_v58, %v3336_v28  ;;  %v1584_v16 = vsel %vm1564_vm7, %v4529_v4, %v3337_v41 }
 0x144   : > { %v3345_v45 = vpop.permute.xlu1 %3344  ;;  %v3350_v37 = vpop.permute.xlu0 %3349 }
 0x145   : > { %v3352_v7 = vunpack.i.h.bf16 %v3350_v37  ;;  %v3351_v38 = vunpack.i.l.bf16 %v3350_v37  ;;  %v3346_v6 = vunpack.i.l.bf16 %v3345_v45  ;;  %v3347_v48 = vunpack.i.h.bf16 %v3345_v45 }
 0x147   : > { %v1647_v63 = vsel %vm1630_vm9, %v1614_v20, %v3351_v38  ;;  %v1648_v34 = vsel %vm1630_vm9, %v1615_v39, %v3352_v7  ;;  %v1616_v2 = vsel %vm1597_vm8, %v1583_v19, %v3346_v6  ;;  %v1617_v58 = vsel %vm1597_vm8, %v1584_v16, %v3347_v48 }
 0x148   : > { %v3355_v43 = vpop.permute.xlu1 %3354  ;;  %v3360_v12 = vpop.permute.xlu0 %3359 }
 0x149   : > { %v3362_v62 = vunpack.i.h.bf16 %v3360_v12  ;;  %v3361_v0 = vunpack.i.l.bf16 %v3360_v12  ;;  %v3356_v30 = vunpack.i.l.bf16 %v3355_v43  ;;  %v3357_v3 = vunpack.i.h.bf16 %v3355_v43 }
 0x14b   : > { %v1680_v26 = vsel %vm1663_vm10, %v1647_v63, %v3361_v0  ;;  %v1681_v11 = vsel %vm1663_vm10, %v1648_v34, %v3362_v62  ;;  %v1649_v49 = vsel %vm1630_vm9, %v1616_v2, %v3356_v30  ;;  %v1650_v27 = vsel %vm1630_vm9, %v1617_v58, %v3357_v3 }
 0x14c   : > { %v3365_v51 = vpop.permute.xlu1 %3364  ;;  %v3370_v56 = vpop.permute.xlu0 %3369 }
 0x14d   : > { %v3367_v33 = vunpack.i.h.bf16 %v3365_v51  ;;  %v3366_v5 = vunpack.i.l.bf16 %v3365_v51  ;;  %v3372_v40 = vunpack.i.h.bf16 %v3370_v56  ;;  %v3371_v24 = vunpack.i.l.bf16 %v3370_v56 }
 0x14f   : > { %v1713_v53 = vsel %vm1696_vm11, %v1680_v26, %v3371_v24  ;;  %v1714_v21 = vsel %vm1696_vm11, %v1681_v11, %v3372_v40  ;;  %v1682_v1 = vsel %vm1663_vm10, %v1649_v49, %v3366_v5  ;;  %v1683_v31 = vsel %vm1663_vm10, %v1650_v27, %v3367_v33 }
 0x150   : > { %v3375_v9 = vpop.permute.xlu1 %3374  ;;  %v1737_v47 = vpack.c.bf16 %v1714_v21, %v1713_v53  ;;  %v3380_v57 = vpop.permute.xlu0 %3379 }
 0x151   : > { %v3377_v13 = vunpack.i.h.bf16 %v3375_v9  ;;  %v3376_v4 = vunpack.i.l.bf16 %v3375_v9  ;;  %v3382_v59 = vunpack.i.h.bf16 %v3380_v57  ;;  %v3381_v61 = vunpack.i.l.bf16 %v3380_v57 }
 0x152   : > { %2838 = vmatprep.mubr.msk.bf16.mxu0 %vm1765_vm12, %v1737_v47 }
 0x153   : > { %v1715_v54 = vsel %vm1696_vm11, %v1682_v1, %v3376_v4  ;;  %v1716_v36 = vsel %vm1696_vm11, %v1683_v31, %v3377_v13  ;;  %v1585_v28 = vsel %vm1564_vm7, %v4535_v15, %v3381_v61  ;;  %v1586_v7 = vsel %vm1564_vm7, %v4539_v46, %v3382_v59 }
 0x154   : > { %v1738_v32 = vpack.c.bf16 %v1716_v36, %v1715_v54  ;;  %v3385_v10 = vpop.permute.xlu1 %3384  ;;  %v3390_v17 = vpop.permute.xlu0 %3389 }
 0x155   : > { %v3392_v45 = vunpack.i.h.bf16 %v3390_v17  ;;  %v3391_v37 = vunpack.i.l.bf16 %v3390_v17  ;;  %v3386_v23 = vunpack.i.l.bf16 %v3385_v10  ;;  %v3387_v38 = vunpack.i.h.bf16 %v3385_v10 }
 0x156   : > { %2839 = vmatmul.mubr.msk.bf16.gmra.mrb[16].mxu0 %vm1765_vm12, %v1738_v32 }
 0x157   : > { %v1618_v41 = vsel %vm1597_vm8, %v1585_v28, %v3391_v37  ;;  %v1619_v6 = vsel %vm1597_vm8, %v1586_v7, %v3392_v45  ;;  %v1587_v39 = vsel %vm1564_vm7, %v4549_v52, %v3386_v23  ;;  %v1588_v3 = vsel %vm1564_vm7, %v4553_v44, %v3387_v38  ;;  %v5714_v28 = vld [vmem:[#allocation41_spill] sm:$0xff]  ;;  %v5715_v38 = vld [vmem:[#allocation38_spill] sm:$0xff] }
 0x158   : > { %v3395_v60 = vpop.permute.xlu1 %3394  ;;  %v3400_v29 = vpop.permute.xlu0 %3399 }
 0x159   : > { %v3402_v22 = vunpack.i.h.bf16 %v3400_v29  ;;  %v3401_v8 = vunpack.i.l.bf16 %v3400_v29  ;;  %v3396_v12 = vunpack.i.l.bf16 %v3395_v60  ;;  %v3397_v62 = vunpack.i.h.bf16 %v3395_v60 }
 0x15b   : > { %v1651_v48 = vsel %vm1630_vm9, %v1618_v41, %v3401_v8  ;;  %v1652_v15 = vsel %vm1630_vm9, %v1619_v6, %v3402_v22  ;;  %v1620_v56 = vsel %vm1597_vm8, %v1587_v39, %v3396_v12  ;;  %v1621_v52 = vsel %vm1597_vm8, %v1588_v3, %v3397_v62 }
 0x15c   : > { %v3405_v42 = vpop.permute.xlu1 %3404  ;;  %v3410_v43 = vpop.permute.xlu0 %3409 }
 0x15d   : > { %v3412_v35 = vunpack.i.h.bf16 %v3410_v43  ;;  %v3411_v14 = vunpack.i.l.bf16 %v3410_v43  ;;  %v3406_v0 = vunpack.i.l.bf16 %v3405_v42  ;;  %v3407_v30 = vunpack.i.h.bf16 %v3405_v42 }
 0x15f   : > { %v1684_v33 = vsel %vm1663_vm10, %v1651_v48, %v3411_v14  ;;  %v1685_v5 = vsel %vm1663_vm10, %v1652_v15, %v3412_v35  ;;  %v1653_v40 = vsel %vm1630_vm9, %v1620_v56, %v3406_v0  ;;  %v1654_v26 = vsel %vm1630_vm9, %v1621_v52, %v3407_v30 }
 0x160   : > { %v3415_v20 = vpop.permute.xlu1 %3414  ;;  %v3420_v46 = vpop.permute.xlu0 %3419 }
 0x161   : > { %v3417_v51 = vunpack.i.h.bf16 %v3415_v20  ;;  %v3416_v19 = vunpack.i.l.bf16 %v3415_v20  ;;  %v3422_v63 = vunpack.i.h.bf16 %v3420_v46  ;;  %v3421_v34 = vunpack.i.l.bf16 %v3420_v46 }
 0x163   : > { %v1717_v24 = vsel %vm1696_vm11, %v1684_v33, %v3421_v34  ;;  %v1718_v16 = vsel %vm1696_vm11, %v1685_v5, %v3422_v63  ;;  %v1686_v53 = vsel %vm1663_vm10, %v1653_v40, %v3416_v19  ;;  %v1687_v21 = vsel %vm1663_vm10, %v1654_v26, %v3417_v51 }
 0x164   : > { %v3425_v2 = vpop.permute.xlu1 %3424  ;;  %v1739_v11 = vpack.c.bf16 %v1718_v16, %v1717_v24  ;;  %v3430_v49 = vpop.permute.xlu0 %3429 }
 0x165   : > { %v3427_v58 = vunpack.i.h.bf16 %v3425_v2  ;;  %v3426_v44 = vunpack.i.l.bf16 %v3425_v2  ;;  %v3431_v31 = vunpack.i.l.bf16 %v3430_v49  ;;  %v3432_v36 = vunpack.i.h.bf16 %v3430_v49 }
 0x166   : > { %2842 = vmatprep.mubr.msk.bf16.mxu0 %vm1765_vm12, %v1739_v11 }
 0x167   : > { %v1719_v9 = vsel %vm1696_vm11, %v1686_v53, %v3426_v44  ;;  %v1720_v27 = vsel %vm1696_vm11, %v1687_v21, %v3427_v58  ;;  %v1556_v59 = vsel %vm1531_vm6, %v4433_v55, %v3431_v31  ;;  %v1557_v42 = vsel %vm1531_vm6, %v4436_v18, %v3432_v36 }
 0x168   : > { %v1740_v47 = vpack.c.bf16 %v1720_v27, %v1719_v9  ;;  %v3435_v13 = vpop.permute.xlu1 %3434  ;;  %v3440_v4 = vpop.permute.xlu0 %3439 }
 0x169   : > { %v3437_v10 = vunpack.i.h.bf16 %v3435_v13  ;;  %v3436_v17 = vunpack.i.l.bf16 %v3435_v13  ;;  %v3442_v60 = vunpack.i.h.bf16 %v3440_v4  ;;  %v3441_v29 = vunpack.i.l.bf16 %v3440_v4 }
 0x16a   : > { %2843 = vmatmul.mubr.msk.bf16.gmra.mrb[20].mxu0 %vm1765_vm12, %v1740_v47 }
 0x16b   : > { %v1558_v7 = vsel %vm1531_vm6, %v5714_v28, %v3436_v17  ;;  %v1559_v12 = vsel %vm1531_vm6, %v5715_v38, %v3437_v10  ;;  %v1589_v35 = vsel %vm1564_vm7, %v1556_v59, %v3441_v29  ;;  %v1590_v55 = vsel %vm1564_vm7, %v1557_v42, %v3442_v60 }
 0x16c   : > { %v3445_v57 = vpop.permute.xlu1 %3444  ;;  %v3450_v1 = vpop.permute.xlu0 %3449 }
 0x16d   : > { %v3452_v61 = vunpack.i.h.bf16 %v3450_v1  ;;  %v3451_v45 = vunpack.i.l.bf16 %v3450_v1  ;;  %v3446_v23 = vunpack.i.l.bf16 %v3445_v57  ;;  %v3447_v14 = vunpack.i.h.bf16 %v3445_v57 }
 0x16f   : > { %v1622_v18 = vsel %vm1597_vm8, %v1589_v35, %v3451_v45  ;;  %v1623_v0 = vsel %vm1597_vm8, %v1590_v55, %v3452_v61  ;;  %v1591_v15 = vsel %vm1564_vm7, %v1558_v7, %v3446_v23  ;;  %v1592_v33 = vsel %vm1564_vm7, %v1559_v12, %v3447_v14  ;;  %v5716_v45 = vld [vmem:[#allocation59_spill] sm:$0xff]  ;;  %v5718_v35 = vld [vmem:[#allocation62_spill] sm:$0xff]  ;;  %v5719_v14 = vld [vmem:[#allocation61_spill] sm:$0xff] }
 0x170   : > { %v3455_v54 = vpop.permute.xlu1 %3454  ;;  %v3460_v32 = vpop.permute.xlu0 %3459 }
 0x171   : > { %v3462_v22 = vunpack.i.h.bf16 %v3460_v32  ;;  %v3461_v8 = vunpack.i.l.bf16 %v3460_v32  ;;  %v3456_v41 = vunpack.i.l.bf16 %v3455_v54  ;;  %v3457_v20 = vunpack.i.h.bf16 %v3455_v54 }
 0x173   : > { %v1655_v30 = vsel %vm1630_vm9, %v1622_v18, %v3461_v8  ;;  %v1656_v46 = vsel %vm1630_vm9, %v1623_v0, %v3462_v22  ;;  %v1624_v5 = vsel %vm1597_vm8, %v1591_v15, %v3456_v41  ;;  %v1625_v24 = vsel %vm1597_vm8, %v1592_v33, %v3457_v20  ;;  %v5717_v8 = vld [vmem:[#allocation60_spill] sm:$0xff] }
 0x174   : > { %v3465_v37 = vpop.permute.xlu1 %3464  ;;  %v3470_v43 = vpop.permute.xlu0 %3469 }
 0x175   : > { %v3472_v6 = vunpack.i.h.bf16 %v3470_v43  ;;  %v3471_v62 = vunpack.i.l.bf16 %v3470_v43  ;;  %v3466_v39 = vunpack.i.l.bf16 %v3465_v37  ;;  %v3467_v51 = vunpack.i.h.bf16 %v3465_v37 }
 0x177   : > { %v1688_v52 = vsel %vm1663_vm10, %v1655_v30, %v3471_v62  ;;  %v1689_v40 = vsel %vm1663_vm10, %v1656_v46, %v3472_v6  ;;  %v1657_v16 = vsel %vm1630_vm9, %v1624_v5, %v3466_v39  ;;  %v1658_v58 = vsel %vm1630_vm9, %v1625_v24, %v3467_v51 }
 0x178   : > { %v3475_v48 = vpop.permute.xlu1 %3474 }
 0x179   : > { %v3480_v19 = vpop.permute.xlu0 %3479  ;;  %v3477_v63 = vunpack.i.h.bf16 %v3475_v48  ;;  %v3476_v34 = vunpack.i.l.bf16 %v3475_v48 }
 0x17a   : > { %v3482_v3 = vunpack.i.h.bf16 %v3480_v19  ;;  %v3481_v56 = vunpack.i.l.bf16 %v3480_v19 }
 0x17b   : > { %v1690_v9 = vsel %vm1663_vm10, %v1657_v16, %v3476_v34  ;;  %v1691_v27 = vsel %vm1663_vm10, %v1658_v58, %v3477_v63 }
 0x17c   : > { %v1721_v2 = vsel %vm1696_vm11, %v1688_v52, %v3481_v56  ;;  %v1722_v26 = vsel %vm1696_vm11, %v1689_v40, %v3482_v3  ;;  %v3485_v11 = vpop.permute.xlu1 %3484 }
 0x17d   : > { %v1741_v44 = vpack.c.bf16 %v1722_v26, %v1721_v2  ;;  %v3487_v49 = vunpack.i.h.bf16 %v3485_v11  ;;  %v3486_v53 = vunpack.i.l.bf16 %v3485_v11  ;;  %v3490_v21 = vpop.permute.xlu0 %3489 }
 0x17e   : > { %v3491_v36 = vunpack.i.l.bf16 %v3490_v21  ;;  %v3492_v10 = vunpack.i.h.bf16 %v3490_v21 }
 0x17f   : > { %v1723_v47 = vsel %vm1696_vm11, %v1690_v9, %v3486_v53  ;;  %v1724_v13 = vsel %vm1696_vm11, %v1691_v27, %v3487_v49  ;;  %2846 = vmatprep.mubr.msk.bf16.mxu0 %vm1765_vm12, %v1741_v44 }
 0x180   : > { %v1742_v4 = vpack.c.bf16 %v1724_v13, %v1723_v47  ;;  %v3495_v57 = vpop.permute.xlu1 %3494  ;;  %v1560_v37 = vsel %vm1531_vm6, %v5716_v45, %v3491_v36  ;;  %v1561_v43 = vsel %vm1531_vm6, %v5717_v8, %v3492_v10 }
 0x181   : > { %v3500_v1 = vpop.permute.xlu0 %3499  ;;  %v3497_v60 = vunpack.i.h.bf16 %v3495_v57  ;;  %v3496_v29 = vunpack.i.l.bf16 %v3495_v57 }
 0x182   : > { %2847 = vmatmul.mubr.msk.bf16.gmra.mrb[24].mxu0 %vm1765_vm12, %v1742_v4  ;;  %v3502_v59 = vunpack.i.h.bf16 %v3500_v1  ;;  %v3501_v61 = vunpack.i.l.bf16 %v3500_v1 }
 0x183   : > { %v1562_v55 = vsel %vm1531_vm6, %v5718_v35, %v3496_v29  ;;  %v1563_v41 = vsel %vm1531_vm6, %v5719_v14, %v3497_v60 }
 0x184   : > { %v3505_v31 = vpop.permute.xlu1 %3504  ;;  %v1593_v6 = vsel %vm1564_vm7, %v1560_v37, %v3501_v61  ;;  %v1594_v62 = vsel %vm1564_vm7, %v1561_v43, %v3502_v59 }
 0x185   : > { %v3510_v54 = vpop.permute.xlu0 %3509  ;;  %v3506_v28 = vunpack.i.l.bf16 %v3505_v31  ;;  %v3507_v18 = vunpack.i.h.bf16 %v3505_v31 }
 0x186   : > { %v3512_v42 = vunpack.i.h.bf16 %v3510_v54  ;;  %v3511_v23 = vunpack.i.l.bf16 %v3510_v54 }
 0x187   : > { %v1595_v19 = vsel %vm1564_vm7, %v1562_v55, %v3506_v28  ;;  %v1596_v24 = vsel %vm1564_vm7, %v1563_v41, %v3507_v18 }
 0x188   : > { %v3515_v32 = vpop.permute.xlu1 %3514  ;;  %v1626_v48 = vsel %vm1597_vm8, %v1593_v6, %v3511_v23  ;;  %v1627_v15 = vsel %vm1597_vm8, %v1594_v62, %v3512_v42 }
 0x189   : > { %v3520_v17 = vpop.permute.xlu0 %3519  ;;  %v3516_v0 = vunpack.i.l.bf16 %v3515_v32  ;;  %v3517_v30 = vunpack.i.h.bf16 %v3515_v32 }
 0x18a   : > { %v3522_v7 = vunpack.i.h.bf16 %v3520_v17  ;;  %v3521_v38 = vunpack.i.l.bf16 %v3520_v17 }
 0x18b   : > { %v1628_v16 = vsel %vm1597_vm8, %v1595_v19, %v3516_v0  ;;  %v1629_v11 = vsel %vm1597_vm8, %v1596_v24, %v3517_v30  ;;  %v3568_v30 = vmov (!%p2758_p4), 0.0  }
 0x18c   : > { %v3525_v22 = vpop.permute.xlu1 %3524  ;;  %v1659_v63 = vsel %vm1630_vm9, %v1626_v48, %v3521_v38  ;;  %v1660_v34 = vsel %vm1630_vm9, %v1627_v15, %v3522_v7  ;;  %1984 = vst.msk [vmem:[%s5521_s4] sm:$0x3] (!%p2758_p4), %vm1983_vm13, %v3568_v30  ;;  %1985 = vst.msk [vmem:[%s5523_s6] sm:$0x3] (!%p2758_p4), %vm1983_vm13, %v3568_v30 }
 0x18d   : > { %v3530_v12 = vpop.permute.xlu0 %3529  ;;  %v3526_v46 = vunpack.i.l.bf16 %v3525_v22  ;;  %v3527_v3 = vunpack.i.h.bf16 %v3525_v22 }
 0x18e   : > { %v3532_v20 = vunpack.i.h.bf16 %v3530_v12  ;;  %v3531_v39 = vunpack.i.l.bf16 %v3530_v12 }
 0x18f   : > { %v1661_v58 = vsel %vm1630_vm9, %v1628_v16, %v3526_v46  ;;  %v1662_v21 = vsel %vm1630_vm9, %v1629_v11, %v3527_v3 }
 0x190   : > { %v3535_v51 = vpop.permute.xlu1 %3534  ;;  %v1692_v2 = vsel %vm1663_vm10, %v1659_v63, %v3531_v39  ;;  %v1693_v26 = vsel %vm1663_vm10, %v1660_v34, %v3532_v20 }
 0x191   : > { %v3540_v56 = vpop.permute.xlu0 %3539  ;;  %v3537_v33 = vunpack.i.h.bf16 %v3535_v51  ;;  %v3536_v5 = vunpack.i.l.bf16 %v3535_v51 }
 0x192   : > { %v3542_v52 = vunpack.i.h.bf16 %v3540_v56  ;;  %v3541_v40 = vunpack.i.l.bf16 %v3540_v56 }
 0x193   : > { %v1694_v13 = vsel %vm1663_vm10, %v1661_v58, %v3536_v5  ;;  %v1695_v4 = vsel %vm1663_vm10, %v1662_v21, %v3537_v33 }
 0x194   : > { %v1725_v44 = vsel %vm1696_vm11, %v1692_v2, %v3541_v40  ;;  %v1726_v49 = vsel %vm1696_vm11, %v1693_v26, %v3542_v52  ;;  %v3545_v53 = vpop.permute.xlu1 %3544 }
 0x195   : > { %v1743_v9 = vpack.c.bf16 %v1726_v49, %v1725_v44  ;;  %v3547_v27 = vunpack.i.h.bf16 %v3545_v53  ;;  %v3546_v47 = vunpack.i.l.bf16 %v3545_v53 }
 0x197   : > { %v1727_v57 = vsel %vm1696_vm11, %v1694_v13, %v3546_v47  ;;  %v1728_v1 = vsel %vm1696_vm11, %v1695_v4, %v3547_v27  ;;  %2850 = vmatprep.mubr.msk.bf16.mxu0 %vm1765_vm12, %v1743_v9 }
 0x198   : > { %v1744_v31 = vpack.c.bf16 %v1728_v1, %v1727_v57 }
 0x19a   : > { %2851 = vmatmul.mubr.msk.bf16.gmra.mrb[28].mxu0 %vm1765_vm12, %v1744_v31 }
 0x1d9   : > { %v4990_v54 = vpop.f32.mrb[0].mxu0 }
 0x1da   : > { %v4992_v36 = vpop.f32.mrb[1].mxu0 }
 0x1db   : > { %v4994_v32 = vpop.f32.mrb[2].mxu0 }
 0x1dc   : > { %v4996_v10 = vpop.f32.mrb[3].mxu0 }
 0x1ed   : > { %v4998_v17 = vpop.f32.mrb[4].mxu0 }
 0x1ee   : > { %v5000_v60 = vpop.f32.mrb[5].mxu0 }
 0x1ef   : > { %v5002_v29 = vpop.f32.mrb[6].mxu0 }
 0x1f0   : > { %v5004_v59 = vpop.f32.mrb[7].mxu0 }
 0x201   : > { %v5006_v61 = vpop.f32.mrb[8].mxu0 }
 0x202   : > { %v5008_v45 = vpop.f32.mrb[9].mxu0 }
 0x203   : > { %v5010_v37 = vpop.f32.mrb[10].mxu0 }
 0x204   : > { %v5012_v42 = vpop.f32.mrb[11].mxu0 }
 0x215   : > { %v5014_v23 = vpop.f32.mrb[12].mxu0 }
 0x216   : > { %v5016_v22 = vpop.f32.mrb[13].mxu0 }
 0x217   : > { %v5018_v8 = vpop.f32.mrb[14].mxu0 }
 0x218   : > { %v5020_v43 = vpop.f32.mrb[15].mxu0 }
 0x229   : > { %v5022_v28 = vpop.f32.mrb[16].mxu0 }
 0x22a   : > { %v5024_v7 = vpop.f32.mrb[17].mxu0 }
 0x22b   : > { %v5026_v38 = vpop.f32.mrb[18].mxu0 }
 0x22c   : > { %v5028_v12 = vpop.f32.mrb[19].mxu0 }
 0x23d   : > { %v5030_v35 = vpop.f32.mrb[20].mxu0 }
 0x23e   : > { %v5032_v55 = vpop.f32.mrb[21].mxu0 }
 0x23f   : > { %v5034_v14 = vpop.f32.mrb[22].mxu0 }
 0x240   : > { %v5036_v41 = vpop.f32.mrb[23].mxu0 }
 0x255   : > { %v5038_v6 = vpop.f32.mrb[24].mxu0 }
 0x256   : > { %v5040_v62 = vpop.f32.mrb[25].mxu0 }
 0x257   : > { %v5042_v18 = vpop.f32.mrb[26].mxu0 }
 0x258   : > { %v5044_v0 = vpop.f32.mrb[27].mxu0 }
 0x26a   : > { %1982 = sbr.rel (%p2758_p4) target bundleno = 625 (0x271), region = 36 }
 0x26d   : > { %v5046_v20 = vpop.f32.mrb[28].mxu0 }
 0x26e   : > { %v5048_v39 = vpop.f32.mrb[29].mxu0 }
 0x26f   : > { %v5050_v48 = vpop.f32.mrb[30].mxu0 }
 0x270   : > { %v5052_v15 = vpop.f32.mrb[31].mxu0 }
 0x271 PF: > { %1986 = vst.msk [vmem:[%s3636_s30] sm:$0xff] %vm1498_vm5, %v4992_v36  ;;  %1987 = vst.msk [vmem:[%s3636_s30 + $0x8] sm:$0xff] %vm1498_vm5, %v4996_v10  ;;  %v2209_v46 = vld [vmem:[%s5519_s2] sm:$0x3]  ;;  %v5720_v51 = vld [vmem:[#allocation8_spill] sm:$0xff]  ;;  %vm2191_vm14 = vcmask 58368  }
 0x272   : > { %1988 = vst.msk [vmem:[%s3636_s30 + $0x10] sm:$0xff] %vm1498_vm5, %v4990_v54  ;;  %1989 = vst.msk [vmem:[%s3636_s30 + $0x18] sm:$0xff] %vm1498_vm5, %v4994_v32  ;;  %v5721_v19 = vld [vmem:[#allocation9_spill] sm:$0xff]  ;;  %2889 = vmatprep.subr.msk.bf16.mxu1 %vm1814_vm3, %v2209_v46  ;;  %v2259_v34 = vsel %vm1814_vm3, %v2209_v46, 0  ;;  %v5723_v56 = vld [vmem:[#allocation6_spill] sm:$0xff] }
 0x273   : > { %1990 = vst.msk [vmem:[%s3636_s30 + $0x20] sm:$0xff] %vm1498_vm5, %v5000_v60  ;;  %1991 = vst.msk [vmem:[%s3636_s30 + $0x28] sm:$0xff] %vm1498_vm5, %v5004_v59  ;;  %v2193_v63 = vpack.c.bf16 %v5721_v19, %v5720_v51  ;;  %v5722_v3 = vld [vmem:[#allocation5_spill] sm:$0xff]  ;;  %2855 = vmatpush3.bf16.msra.mxu1 %v2259_v34  ;;  %v5724_v5 = vld [vmem:[#allocation11_spill] sm:$0xff] }
 0x274   : > { %1992 = vst.msk [vmem:[%s3636_s30 + $0x30] sm:$0xff] %vm1498_vm5, %v4998_v17  ;;  %1993 = vst.msk [vmem:[%s3636_s30 + $0x38] sm:$0xff] %vm1498_vm5, %v5002_v29  ;;  %v2194_v33 = vpack.c.bf16 %v5723_v56, %v5722_v3  ;;  %v5725_v52 = vld [vmem:[#allocation12_spill] sm:$0xff]  ;;  %v5726_v24 = vld [vmem:[#allocation17_spill] sm:$0xff] }
 0x275   : > { %1994 = vst.msk [vmem:[%s3636_s30 + $0x40] sm:$0xff] %vm1498_vm5, %v5008_v45  ;;  %1995 = vst.msk [vmem:[%s3636_s30 + $0x48] sm:$0xff] %vm1498_vm5, %v5012_v42  ;;  %2856 = vmatprep.mubr.msk.bf16.mxu1 %vm1465_vm4, %v2193_v63  ;;  %v2195_v40 = vpack.c.bf16 %v5725_v52, %v5724_v5  ;;  %v5727_v16 = vld [vmem:[#allocation18_spill] sm:$0xff]  ;;  %v5729_v11 = vld [vmem:[#allocation23_spill] sm:$0xff] }
 0x276   : > { %1996 = vst.msk [vmem:[%s3636_s30 + $0x50] sm:$0xff] %vm1498_vm5, %v5006_v61  ;;  %1997 = vst.msk [vmem:[%s3636_s30 + $0x58] sm:$0xff] %vm1498_vm5, %v5010_v37  ;;  %2857 = vmatmul.mubr.msk.bf16.vlgmr.msra.gmra.mrb[0].mxu1 %vm1465_vm4, %v2194_v33  ;;  %v2196_v2 = vpack.c.bf16 %v5727_v16, %v5726_v24  ;;  %v5728_v26 = vld [vmem:[#allocation22_spill] sm:$0xff]  ;;  %v5730_v44 = vld [vmem:[#allocation25_spill] sm:$0xff] }
 0x277   : > { %1998 = vst.msk [vmem:[%s3636_s30 + $0x60] sm:$0xff] %vm1498_vm5, %v5016_v22  ;;  %1999 = vst.msk [vmem:[%s3636_s30 + $0x68] sm:$0xff] %vm1498_vm5, %v5020_v43  ;;  %2860 = vmatprep.mubr.msk.bf16.mxu1 %vm1465_vm4, %v2195_v40  ;;  %v2197_v58 = vpack.c.bf16 %v5729_v11, %v5728_v26  ;;  %v5731_v49 = vld [vmem:[#allocation26_spill] sm:$0xff]  ;;  %v5733_v9 = vld [vmem:[#allocation31_spill] sm:$0xff] }
 0x278   : > { %2000 = vst.msk [vmem:[%s3636_s30 + $0x70] sm:$0xff] %vm1498_vm5, %v5014_v23  ;;  %2001 = vst.msk [vmem:[%s3636_s30 + $0x78] sm:$0xff] %vm1498_vm5, %v5018_v8  ;;  %v2198_v53 = vpack.c.bf16 %v5731_v49, %v5730_v44  ;;  %v5732_v21 = vld [vmem:[#allocation30_spill] sm:$0xff]  ;;  %v5734_v47 = vld [vmem:[#allocation33_spill] sm:$0xff]  ;;  %v2208_v44 = vpack.c.bf16 %v4669_v25, %v4657_v50  ;;  %v2088_v49 = vmul.f32 %v4992_v36, %v4992_v36 }
 0x279   : > { %2002 = vst.msk [vmem:[%s3636_s30 + $0x80] sm:$0xff] %vm1498_vm5, %v5024_v7  ;;  %2003 = vst.msk [vmem:[%s3636_s30 + $0x88] sm:$0xff] %vm1498_vm5, %v5028_v12  ;;  %v2199_v27 = vpack.c.bf16 %v5733_v9, %v5732_v21  ;;  %v5735_v13 = vld [vmem:[#allocation34_spill] sm:$0xff]  ;;  %v5736_v57 = vld [vmem:[#allocation36_spill] sm:$0xff]  ;;  %v2019_v21 = vsel %vm1498_vm5, %v4992_v36, 0.0  ;;  %v2020_v9 = vsel %vm1498_vm5, %v4996_v10, 0.0 }
 0x27a   : > { %2004 = vst.msk [vmem:[%s3636_s30 + $0x90] sm:$0xff] %vm1498_vm5, %v5022_v28  ;;  %2005 = vst.msk [vmem:[%s3636_s30 + $0x98] sm:$0xff] %vm1498_vm5, %v5026_v38  ;;  %v2200_v4 = vpack.c.bf16 %v5735_v13, %v5734_v47  ;;  %v5737_v1 = vld [vmem:[#allocation37_spill] sm:$0xff]  ;;  %v5738_v30 = vld [vmem:[#allocation39_spill] sm:$0xff]  ;;  %v2120_v47 = vsel %vm1498_vm5, %v2088_v49, 0.0  ;;  %v2021_v50 = vadd.f32 %v2020_v9, %v2019_v21  ;;  %v2022_v13 = vsel %vm1498_vm5, %v4990_v54, 0.0 }
 0x27b   : > { %2006 = vst.msk [vmem:[%s3636_s30 + $0xa0] sm:$0xff] %vm1498_vm5, %v5032_v55  ;;  %2007 = vst.msk [vmem:[%s3636_s30 + $0xa8] sm:$0xff] %vm1498_vm5, %v5036_v41  ;;  %v2201_v31 = vpack.c.bf16 %v5737_v1, %v5736_v57  ;;  %v5739_v46 = vld [vmem:[#allocation40_spill] sm:$0xff]  ;;  %v5740_v19 = vld [vmem:[#allocation42_spill] sm:$0xff]  ;;  %v2097_v49 = vmul.f32 %v5012_v42, %v5012_v42 }
 0x27c   : > { %2008 = vst.msk [vmem:[%s3636_s30 + $0xb0] sm:$0xff] %vm1498_vm5, %v5030_v35  ;;  %2009 = vst.msk [vmem:[%s3636_s30 + $0xb8] sm:$0xff] %vm1498_vm5, %v5034_v14  ;;  %v2202_v51 = vpack.c.bf16 %v5739_v46, %v5738_v30  ;;  %v5741_v63 = vld [vmem:[#allocation43_spill] sm:$0xff]  ;;  %v5742_v3 = vld [vmem:[#allocation45_spill] sm:$0xff]  ;;  %v2023_v1 = vadd.f32 %v2022_v13, %v2021_v50  ;;  %v2099_v13 = vmul.f32 %v5010_v37, %v5010_v37 }
 0x27d   : > { %2010 = vst.msk [vmem:[%s3636_s30 + $0xc0] sm:$0xff] %vm1498_vm5, %v5040_v62  ;;  %2011 = vst.msk [vmem:[%s3636_s30 + $0xc8] sm:$0xff] %vm1498_vm5, %v5044_v0  ;;  %v2203_v34 = vpack.c.bf16 %v5741_v63, %v5740_v19  ;;  %v5743_v56 = vld [vmem:[#allocation46_spill] sm:$0xff]  ;;  %v5744_v5 = vld [vmem:[#allocation48_spill] sm:$0xff]  ;;  %v2093_v19 = vmul.f32 %v5004_v59, %v5004_v59  ;;  %v2137_v50 = vsel %vm1498_vm5, %v2097_v49, 0.0 }
 0x27e   : > { %2012 = vst.msk [vmem:[%s3636_s30 + $0xd0] sm:$0xff] %vm1498_vm5, %v5038_v6  ;;  %2013 = vst.msk [vmem:[%s3636_s30 + $0xd8] sm:$0xff] %vm1498_vm5, %v5042_v18  ;;  %2861 = vmatmul.mubr.msk.bf16.gmra.mrb[4].mxu1 %vm1465_vm4, %v2196_v2  ;;  %v2204_v33 = vpack.c.bf16 %v5743_v56, %v5742_v3  ;;  %v5745_v52 = vld [vmem:[#allocation49_spill] sm:$0xff]  ;;  %v5746_v24 = vld [vmem:[#allocation51_spill] sm:$0xff]  ;;  %v2094_v56 = vmul.f32 %v4998_v17, %v4998_v17 }
 0x27f   : > { %2014 = vst.msk [vmem:[%s3636_s30 + $0xe0] sm:$0xff] %vm1498_vm5, %v5048_v39  ;;  %2015 = vst.msk [vmem:[%s3636_s30 + $0xe8] sm:$0xff] %vm1498_vm5, %v5052_v15  ;;  %2864 = vmatprep.mubr.msk.bf16.mxu1 %vm1465_vm4, %v2197_v58  ;;  %v2205_v40 = vpack.c.bf16 %v5745_v52, %v5744_v5  ;;  %v5747_v16 = vld [vmem:[#allocation53_spill] sm:$0xff]  ;;  %v5748_v26 = vld [vmem:[#allocation55_spill] sm:$0xff]  ;;  %v2129_v5 = vsel %vm1498_vm5, %v2093_v19, 0.0 }
 0x280   : > { %2016 = vst.msk [vmem:[%s3636_s30 + $0xf0] sm:$0xff] %vm1498_vm5, %v5046_v20  ;;  %2017 = vst.msk [vmem:[%s3636_s30 + $0xf8] sm:$0xff] %vm1498_vm5, %v5050_v48  ;;  %v2206_v2 = vpack.c.bf16 %v5747_v16, %v5746_v24  ;;  %v5749_v11 = vld [vmem:[#allocation56_spill] sm:$0xff]  ;;  %v2131_v16 = vsel %vm1498_vm5, %v2094_v56, 0.0  ;;  %v2103_v56 = vmul.f32 %v5018_v8, %v5018_v8 }
 0x281   : > { %v2207_v58 = vpack.c.bf16 %v5749_v11, %v5748_v26  ;;  %v2096_v26 = vmul.f32 %v5008_v45, %v5008_v45 }
 0x283   : > { %v2135_v21 = vsel %vm1498_vm5, %v2096_v26, 0.0 }
 0x286   : > { %2865 = vmatmul.mubr.msk.bf16.gmra.mrb[8].mxu1 %vm1465_vm4, %v2198_v53  ;;  %v2089_v53 = vmul.f32 %v4996_v10, %v4996_v10  ;;  %v2024_v10 = vsel %vm1498_vm5, %v4994_v32, 0.0 }
 0x287   : > { %2868 = vmatprep.mubr.msk.bf16.mxu1 %vm1465_vm4, %v2199_v27  ;;  %v2090_v27 = vmul.f32 %v4990_v54, %v4990_v54  ;;  %v2026_v54 = vsel %vm1498_vm5, %v5000_v60, 0.0 }
 0x288   : > { %v2121_v25 = vsel %vm1498_vm5, %v2089_v53, 0.0 }
 0x289   : > { %v2122_v57 = vadd.f32 %v2121_v25, %v2120_v47  ;;  %v2123_v36 = vsel %vm1498_vm5, %v2090_v27, 0.0  ;;  %v2098_v27 = vmul.f32 %v5006_v61, %v5006_v61 }
 0x28b   : > { %v2124_v30 = vadd.f32 %v2123_v36, %v2122_v57  ;;  %v2139_v57 = vsel %vm1498_vm5, %v2098_v27, 0.0  ;;  %v2108_v27 = vmul.f32 %v5032_v55, %v5032_v55 }
 0x28e   : > { %2869 = vmatmul.mubr.msk.bf16.gmra.mrb[12].mxu1 %vm1465_vm4, %v2200_v4  ;;  %v2091_v4 = vmul.f32 %v4994_v32, %v4994_v32  ;;  %v2028_v32 = vsel %vm1498_vm5, %v5004_v59, 0.0  ;;  %v2032_v59 = vsel %vm1498_vm5, %v5002_v29, 0.0 }
 0x28f   : > { %2872 = vmatprep.mubr.msk.bf16.mxu1 %vm1465_vm4, %v2201_v31  ;;  %v2092_v31 = vmul.f32 %v5000_v60, %v5000_v60  ;;  %v2030_v60 = vsel %vm1498_vm5, %v4998_v17, 0.0  ;;  %v2034_v17 = vsel %vm1498_vm5, %v5008_v45, 0.0  ;;  %v2038_v45 = vsel %vm1498_vm5, %v5006_v61, 0.0 }
 0x290   : > { %v2125_v46 = vsel %vm1498_vm5, %v2091_v4, 0.0  ;;  %v2042_v61 = vsel %vm1498_vm5, %v5016_v22, 0.0 }
 0x291   : > { %v2126_v63 = vadd.f32 %v2125_v46, %v2124_v30  ;;  %v2101_v46 = vmul.f32 %v5020_v43, %v5020_v43 }
 0x296   : > { %2873 = vmatmul.mubr.msk.bf16.gmra.mrb[16].mxu1 %vm1465_vm4, %v2202_v51  ;;  %v2025_v51 = vadd.f32 %v2024_v10, %v2023_v1  ;;  %v2100_v1 = vmul.f32 %v5016_v22, %v5016_v22  ;;  %v2046_v22 = vsel %vm1498_vm5, %v5014_v23, 0.0 }
 0x297   : > { %2876 = vmatprep.mubr.msk.bf16.mxu1 %vm1465_vm4, %v2203_v34  ;;  %v2127_v34 = vsel %vm1498_vm5, %v2092_v31, 0.0  ;;  %v2141_v31 = vsel %vm1498_vm5, %v2099_v13, 0.0 }
 0x298   : > { %v2027_v3 = vadd.f32 %v2026_v54, %v2025_v51  ;;  %v2143_v54 = vsel %vm1498_vm5, %v2100_v1, 0.0 }
 0x29a   : > { %v2029_v52 = vadd.f32 %v2028_v32, %v2027_v3  ;;  %v2145_v3 = vsel %vm1498_vm5, %v2101_v46, 0.0 }
 0x29e   : > { %2877 = vmatmul.mubr.msk.bf16.gmra.mrb[20].mxu1 %vm1465_vm4, %v2204_v33  ;;  %v2128_v33 = vadd.f32 %v2127_v34, %v2126_v63  ;;  %v2102_v63 = vmul.f32 %v5014_v23, %v5014_v23  ;;  %v2050_v23 = vsel %vm1498_vm5, %v5024_v7, 0.0 }
 0x29f   : > { %2880 = vmatprep.mubr.msk.bf16.mxu1 %vm1465_vm4, %v2205_v40  ;;  %v2095_v40 = vmul.f32 %v5002_v29, %v5002_v29  ;;  %v2036_v29 = vsel %vm1498_vm5, %v5012_v42, 0.0  ;;  %v2040_v42 = vsel %vm1498_vm5, %v5010_v37, 0.0  ;;  %v2044_v37 = vsel %vm1498_vm5, %v5020_v43, 0.0 }
 0x2a0   : > { %v2130_v24 = vadd.f32 %v2129_v5, %v2128_v33  ;;  %v2147_v5 = vsel %vm1498_vm5, %v2102_v63, 0.0  ;;  %v2048_v43 = vsel %vm1498_vm5, %v5018_v8, 0.0  ;;  %v2052_v8 = vsel %vm1498_vm5, %v5028_v12, 0.0 }
 0x2a1   : > { %v2113_v63 = vmul.f32 %v5044_v0, %v5044_v0 }
 0x2a2   : > { %v2132_v11 = vadd.f32 %v2131_v16, %v2130_v24  ;;  %v2149_v24 = vsel %vm1498_vm5, %v2103_v56, 0.0 }
 0x2a6   : > { %2881 = vmatmul.mubr.msk.bf16.gmra.mrb[24].mxu1 %vm1465_vm4, %v2206_v2  ;;  %v2031_v2 = vadd.f32 %v2030_v60, %v2029_v52  ;;  %v2104_v60 = vmul.f32 %v5024_v7, %v5024_v7  ;;  %v2054_v7 = vsel %vm1498_vm5, %v5022_v28, 0.0 }
 0x2a7   : > { %2884 = vmatprep.mubr.msk.bf16.mxu1 %vm1465_vm4, %v2207_v58  ;;  %v2133_v58 = vsel %vm1498_vm5, %v2095_v40, 0.0 }
 0x2a8   : > { %v2134_v53 = vadd.f32 %v2133_v58, %v2132_v11  ;;  %v2151_v26 = vsel %vm1498_vm5, %v2104_v60, 0.0  ;;  %v2106_v58 = vmul.f32 %v5022_v28, %v5022_v28  ;;  %v2058_v28 = vsel %vm1498_vm5, %v5032_v55, 0.0 }
 0x2a9   : > { %v2062_v55 = vsel %vm1498_vm5, %v5030_v35, 0.0 }
 0x2aa   : > { %v2136_v47 = vadd.f32 %v2135_v21, %v2134_v53  ;;  %v2107_v53 = vmul.f32 %v5026_v38, %v5026_v38 }
 0x2ac   : > { %v2138_v4 = vadd.f32 %v2137_v50, %v2136_v47  ;;  %v2157_v50 = vsel %vm1498_vm5, %v2107_v53, 0.0  ;;  %v2080_v53 = vsel %vm1498_vm5, %v5050_v48, 0.0 }
 0x2ae   : > { %2885 = vmatmul.mubr.msk.bf16.gmra.mrb[28].mxu1 %vm1465_vm4, %v2208_v44  ;;  %v2033_v44 = vadd.f32 %v2032_v59, %v2031_v2  ;;  %v2140_v10 = vadd.f32 %v2139_v57, %v2138_v4  ;;  %v2105_v2 = vmul.f32 %v5028_v12, %v5028_v12  ;;  %v2056_v12 = vsel %vm1498_vm5, %v5026_v38, 0.0 }
 0x2af   : > { %v2159_v4 = vsel %vm1498_vm5, %v2108_v27, 0.0  ;;  %v2060_v38 = vsel %vm1498_vm5, %v5036_v41, 0.0 }
 0x2b0   : > { %v2035_v9 = vadd.f32 %v2034_v17, %v2033_v44  ;;  %v2142_v51 = vadd.f32 %v2141_v31, %v2140_v10  ;;  %v2153_v17 = vsel %vm1498_vm5, %v2105_v2, 0.0  ;;  %v2111_v31 = vmul.f32 %v5034_v14, %v5034_v14 }
 0x2b2   : > { %v2037_v25 = vadd.f32 %v2036_v29, %v2035_v9  ;;  %v2144_v34 = vadd.f32 %v2143_v54, %v2142_v51  ;;  %v2155_v9 = vsel %vm1498_vm5, %v2106_v58, 0.0  ;;  %v2112_v51 = vmul.f32 %v5040_v62, %v5040_v62 }
 0x2b3   : > { %v2078_v58 = vsel %vm1498_vm5, %v5046_v20, 0.0 }
 0x2b4   : > { %v2039_v36 = vadd.f32 %v2038_v45, %v2037_v25  ;;  %v2146_v33 = vadd.f32 %v2145_v3, %v2144_v34  ;;  %v2109_v45 = vmul.f32 %v5036_v41, %v5036_v41  ;;  %v2064_v41 = vsel %vm1498_vm5, %v5034_v14, 0.0 }
 0x2b5   : > { %v2167_v3 = vsel %vm1498_vm5, %v2112_v51, 0.0  ;;  %v2068_v14 = vsel %vm1498_vm5, %v5044_v0, 0.0  ;;  %v2072_v0 = vsel %vm1498_vm5, %v5042_v18, 0.0 }
 0x2b6   : > { %v2041_v30 = vadd.f32 %v2040_v42, %v2039_v36  ;;  %v2148_v40 = vadd.f32 %v2147_v5, %v2146_v33  ;;  %v2110_v36 = vmul.f32 %v5030_v35, %v5030_v35  ;;  %v2161_v1 = vsel %vm1498_vm5, %v2109_v45, 0.0 }
 0x2b7   : > { %v2066_v35 = vsel %vm1498_vm5, %v5040_v62, 0.0  ;;  %v2169_v33 = vsel %vm1498_vm5, %v2113_v63, 0.0  ;;  %v2070_v62 = vsel %vm1498_vm5, %v5038_v6, 0.0 }
 0x2b8   : > { %v2043_v19 = vadd.f32 %v2042_v61, %v2041_v30  ;;  %v2150_v59 = vadd.f32 %v2149_v24, %v2148_v40  ;;  %v2163_v61 = vsel %vm1498_vm5, %v2110_v36, 0.0  ;;  %v2116_v24 = vmul.f32 %v5048_v39, %v5048_v39 }
 0x2ba   : > { %v2045_v32 = vadd.f32 %v2044_v37, %v2043_v19  ;;  %v2152_v44 = vadd.f32 %v2151_v26, %v2150_v59  ;;  %v2165_v19 = vsel %vm1498_vm5, %v2111_v31, 0.0  ;;  %v2117_v59 = vmul.f32 %v5052_v15, %v5052_v15 }
 0x2bc   : > { %v2047_v52 = vadd.f32 %v2046_v22, %v2045_v32  ;;  %v2154_v21 = vadd.f32 %v2153_v17, %v2152_v44  ;;  %v2114_v22 = vmul.f32 %v5038_v6, %v5038_v6  ;;  %v2074_v6 = vsel %vm1498_vm5, %v5048_v39, 0.0 }
 0x2bd   : > { %v2118_v44 = vmul.f32 %v5046_v20, %v5046_v20  ;;  %v2119_v17 = vmul.f32 %v5050_v48, %v5050_v48 }
 0x2be   : > { %v2049_v16 = vadd.f32 %v2048_v43, %v2047_v52  ;;  %v2156_v47 = vadd.f32 %v2155_v9, %v2154_v21  ;;  %v2115_v52 = vmul.f32 %v5042_v18, %v5042_v18  ;;  %v2171_v60 = vsel %vm1498_vm5, %v2114_v22, 0.0 }
 0x2bf   : > { %v2076_v18 = vsel %vm1498_vm5, %v5052_v15, 0.0  ;;  %v2179_v9 = vsel %vm1498_vm5, %v2118_v44, 0.0 }
 0x2c0   : > { %v2051_v11 = vadd.f32 %v2050_v23, %v2049_v16  ;;  %v2158_v13 = vadd.f32 %v2157_v50, %v2156_v47  ;;  %v2173_v23 = vsel %vm1498_vm5, %v2115_v52, 0.0 }
 0x2c2   : > { %v2053_v49 = vadd.f32 %v2052_v8, %v2051_v11  ;;  %v2160_v42 = vadd.f32 %v2159_v4, %v2158_v13  ;;  %v2175_v11 = vsel %vm1498_vm5, %v2116_v24, 0.0 }
 0x2c4   : > { %v2055_v29 = vadd.f32 %v2054_v7, %v2053_v49  ;;  %v2162_v30 = vadd.f32 %v2161_v1, %v2160_v42  ;;  %v2177_v49 = vsel %vm1498_vm5, %v2117_v59, 0.0  ;;  %v2018_v42 = vld [vmem:[%s5521_s4] sm:$0x3] }
 0x2c6   : > { %v2057_v25 = vadd.f32 %v2056_v12, %v2055_v29  ;;  %v2164_v54 = vadd.f32 %v2163_v61, %v2162_v30  ;;  %v2181_v29 = vsel %vm1498_vm5, %v2119_v17, 0.0 }
 0x2c8   : > { %v2059_v57 = vadd.f32 %v2058_v28, %v2057_v25  ;;  %v2166_v34 = vadd.f32 %v2165_v19, %v2164_v54 }
 0x2ca   : > { %v2061_v10 = vadd.f32 %v2060_v38, %v2059_v57  ;;  %v2168_v56 = vadd.f32 %v2167_v3, %v2166_v34 }
 0x2cc   : > { %v2063_v46 = vadd.f32 %v2062_v55, %v2061_v10  ;;  %v2170_v43 = vadd.f32 %v2169_v33, %v2168_v56 }
 0x2ce   : > { %v2065_v37 = vadd.f32 %v2064_v41, %v2063_v46  ;;  %v2172_v16 = vadd.f32 %v2171_v60, %v2170_v43 }
 0x2d0   : > { %v2067_v32 = vadd.f32 %v2066_v35, %v2065_v37  ;;  %v2174_v26 = vadd.f32 %v2173_v23, %v2172_v16 }
 0x2d2   : > { %v2069_v5 = vadd.f32 %v2068_v14, %v2067_v32  ;;  %v2176_v39 = vadd.f32 %v2175_v11, %v2174_v26 }
 0x2d4   : > { %v2071_v40 = vadd.f32 %v2070_v62, %v2069_v5  ;;  %v2178_v21 = vadd.f32 %v2177_v49, %v2176_v39 }
 0x2d6   : > { %v2073_v2 = vadd.f32 %v2072_v0, %v2071_v40  ;;  %v2180_v12 = vadd.f32 %v2179_v9, %v2178_v21 }
 0x2d8   : > { %v2075_v8 = vadd.f32 %v2074_v6, %v2073_v2  ;;  %v2182_v47 = vadd.f32 %v2181_v29, %v2180_v12 }
 0x2da   : > { %v2077_v7 = vadd.f32 %v2076_v18, %v2075_v8  ;;  %v2183_v50 = vrot.slane %v2182_v47, 4 }
 0x2dc   : > { %v2079_v15 = vadd.f32 %v2078_v58, %v2077_v7  ;;  %v2184_v28 = vadd.f32 %v2183_v50, %v2182_v47 }
 0x2de   : > { %v2081_v27 = vadd.f32 %v2080_v53, %v2079_v15  ;;  %v2185_v13 = vrot.slane %v2184_v28, 2 }
 0x2e0   : > { %v2082_v20 = vrot.slane %v2081_v27, 4  ;;  %v2186_v57 = vadd.f32 %v2185_v13, %v2184_v28 }
 0x2e2   : > { %v2083_v25 = vadd.f32 %v2082_v20, %v2081_v27  ;;  %v2187_v38 = vrot.slane %v2186_v57, 1 }
 0x2e4   : > { %v2084_v45 = vrot.slane %v2083_v25, 2  ;;  %v2188_v1 = vadd.f32 %v2187_v38, %v2186_v57 }
 0x2e6   : > { %v2085_v4 = vadd.f32 %v2084_v45, %v2083_v25 }
 0x2e8   : > { %v2086_v48 = vrot.slane %v2085_v4, 1 }
 0x2ea   : > { %v2087_v36 = vadd.f32 %v2086_v48, %v2085_v4 }
 0x2ec   : > { %v2189_v10 = vsel %vm325_vm0, %v2087_v36, %v2188_v1 }
 0x2ed   : > { %v2190_v55 = vadd.f32 %v2189_v10, %v2018_v42 }
 0x2ef   : > { %2192 = vst.msk [vmem:[%s5521_s4] sm:$0x3] %vm2191_vm14, %v2190_v55 }
 0x349   : > { %v2858_v31 = vpop.f32.mrb[0].mxu1 }
 0x34a   : > { %2424 = vst.msk [vmem:[%s3643_s9 + $0x10] sm:$0xff] %vm1498_vm5, %v2858_v31  ;;  %v2295_v30 = vpop.f32.mrb[1].mxu1  ;;  %v2526_v51 = vmul.f32 %v2858_v31, %v2858_v31  ;;  %v2458_v63 = vsel %vm1498_vm5, %v2858_v31, 0.0 }
 0x34b   : > { %2422 = vst.msk [vmem:[%s3643_s9] sm:$0xff] %vm1498_vm5, %v2295_v30  ;;  %v2524_v61 = vmul.f32 %v2295_v30, %v2295_v30  ;;  %v2859_v46 = vpop.f32.mrb[2].mxu1  ;;  %v2455_v54 = vsel %vm1498_vm5, %v2295_v30, 0.0 }
 0x34c   : > { %2425 = vst.msk [vmem:[%s3643_s9 + $0x18] sm:$0xff] %vm1498_vm5, %v2859_v46  ;;  %v2298_v41 = vpop.f32.mrb[3].mxu1  ;;  %v2527_v3 = vmul.f32 %v2859_v46, %v2859_v46  ;;  %v2559_v56 = vsel %vm1498_vm5, %v2526_v51, 0.0  ;;  %v2460_v33 = vsel %vm1498_vm5, %v2859_v46, 0.0 }
 0x34d   : > { %2423 = vst.msk [vmem:[%s3643_s9 + $0x8] sm:$0xff] %vm1498_vm5, %v2298_v41  ;;  %v2456_v19 = vsel %vm1498_vm5, %v2298_v41, 0.0  ;;  %v2525_v37 = vmul.f32 %v2298_v41, %v2298_v41  ;;  %v2556_v34 = vsel %vm1498_vm5, %v2524_v61, 0.0 }
 0x34e   : > { %v2457_v35 = vadd.f32 %v2456_v19, %v2455_v54  ;;  %v2561_v60 = vsel %vm1498_vm5, %v2527_v3, 0.0 }
 0x34f   : > { %v2557_v32 = vsel %vm1498_vm5, %v2525_v37, 0.0 }
 0x350   : > { %v2459_v14 = vadd.f32 %v2458_v63, %v2457_v35  ;;  %v2558_v22 = vadd.f32 %v2557_v32, %v2556_v34 }
 0x351   : > { %v2862_v5 = vpop.f32.mrb[4].mxu1 }
 0x352   : > { %v2560_v62 = vadd.f32 %v2559_v56, %v2558_v22  ;;  %2428 = vst.msk [vmem:[%s3643_s9 + $0x30] sm:$0xff] %vm1498_vm5, %v2862_v5  ;;  %v2311_v52 = vpop.f32.mrb[5].mxu1  ;;  %v2461_v43 = vadd.f32 %v2460_v33, %v2459_v14  ;;  %v2530_v6 = vmul.f32 %v2862_v5, %v2862_v5  ;;  %v2466_v58 = vsel %vm1498_vm5, %v2862_v5, 0.0 }
 0x353   : > { %2426 = vst.msk [vmem:[%s3643_s9 + $0x20] sm:$0xff] %vm1498_vm5, %v2311_v52  ;;  %v2462_v40 = vsel %vm1498_vm5, %v2311_v52, 0.0  ;;  %v2528_v0 = vmul.f32 %v2311_v52, %v2311_v52  ;;  %v2863_v24 = vpop.f32.mrb[6].mxu1 }
 0x354   : > { %v2463_v16 = vadd.f32 %v2462_v40, %v2461_v43  ;;  %v2562_v23 = vadd.f32 %v2561_v60, %v2560_v62  ;;  %2429 = vst.msk [vmem:[%s3643_s9 + $0x38] sm:$0xff] %vm1498_vm5, %v2863_v24  ;;  %v2314_v2 = vpop.f32.mrb[7].mxu1  ;;  %v2531_v44 = vmul.f32 %v2863_v24, %v2863_v24  ;;  %v2567_v7 = vsel %vm1498_vm5, %v2530_v6, 0.0 }
 0x355   : > { %v2563_v59 = vsel %vm1498_vm5, %v2528_v0, 0.0  ;;  %2427 = vst.msk [vmem:[%s3643_s9 + $0x28] sm:$0xff] %vm1498_vm5, %v2314_v2  ;;  %v2464_v26 = vsel %vm1498_vm5, %v2314_v2, 0.0  ;;  %v2529_v11 = vmul.f32 %v2314_v2, %v2314_v2  ;;  %v2468_v53 = vsel %vm1498_vm5, %v2863_v24, 0.0 }
 0x356   : > { %v2564_v8 = vadd.f32 %v2563_v59, %v2562_v23  ;;  %v2465_v18 = vadd.f32 %v2464_v26, %v2463_v16  ;;  %v2569_v12 = vsel %vm1498_vm5, %v2531_v44, 0.0 }
 0x357   : > { %v2565_v17 = vsel %vm1498_vm5, %v2529_v11, 0.0 }
 0x358   : > { %v2467_v39 = vadd.f32 %v2466_v58, %v2465_v18  ;;  %v2566_v49 = vadd.f32 %v2565_v17, %v2564_v8 }
 0x359   : > { %v2866_v21 = vpop.f32.mrb[8].mxu1 }
 0x35a   : > { %v2568_v9 = vadd.f32 %v2567_v7, %v2566_v49  ;;  %2432 = vst.msk [vmem:[%s3643_s9 + $0x50] sm:$0xff] %vm1498_vm5, %v2866_v21  ;;  %v2327_v15 = vpop.f32.mrb[9].mxu1  ;;  %v2469_v29 = vadd.f32 %v2468_v53, %v2467_v39  ;;  %v2534_v45 = vmul.f32 %v2866_v21, %v2866_v21  ;;  %v2474_v36 = vsel %vm1498_vm5, %v2866_v21, 0.0 }
 0x35b   : > { %2430 = vst.msk [vmem:[%s3643_s9 + $0x40] sm:$0xff] %vm1498_vm5, %v2327_v15  ;;  %v2470_v27 = vsel %vm1498_vm5, %v2327_v15, 0.0  ;;  %v2532_v47 = vmul.f32 %v2327_v15, %v2327_v15  ;;  %v2867_v20 = vpop.f32.mrb[10].mxu1 }
 0x35c   : > { %v2471_v50 = vadd.f32 %v2470_v27, %v2469_v29  ;;  %v2570_v25 = vadd.f32 %v2569_v12, %v2568_v9  ;;  %2433 = vst.msk [vmem:[%s3643_s9 + $0x58] sm:$0xff] %vm1498_vm5, %v2867_v20  ;;  %v2330_v28 = vpop.f32.mrb[11].mxu1  ;;  %v2535_v42 = vmul.f32 %v2867_v20, %v2867_v20  ;;  %v2575_v31 = vsel %vm1498_vm5, %v2534_v45, 0.0 }
 0x35d   : > { %v2571_v13 = vsel %vm1498_vm5, %v2532_v47, 0.0  ;;  %2431 = vst.msk [vmem:[%s3643_s9 + $0x48] sm:$0xff] %vm1498_vm5, %v2330_v28  ;;  %v2472_v4 = vsel %vm1498_vm5, %v2330_v28, 0.0  ;;  %v2533_v57 = vmul.f32 %v2330_v28, %v2330_v28  ;;  %v2476_v30 = vsel %vm1498_vm5, %v2867_v20, 0.0 }
 0x35e   : > { %v2572_v48 = vadd.f32 %v2571_v13, %v2570_v25  ;;  %v2473_v38 = vadd.f32 %v2472_v4, %v2471_v50  ;;  %v2577_v54 = vsel %vm1498_vm5, %v2535_v42, 0.0 }
 0x35f   : > { %v2573_v1 = vsel %vm1498_vm5, %v2533_v57, 0.0 }
 0x360   : > { %v2475_v10 = vadd.f32 %v2474_v36, %v2473_v38  ;;  %v2574_v55 = vadd.f32 %v2573_v1, %v2572_v48 }
 0x361   : > { %v2870_v61 = vpop.f32.mrb[12].mxu1 }
 0x362   : > { %v2576_v46 = vadd.f32 %v2575_v31, %v2574_v55  ;;  %2436 = vst.msk [vmem:[%s3643_s9 + $0x70] sm:$0xff] %vm1498_vm5, %v2870_v61  ;;  %v2343_v41 = vpop.f32.mrb[13].mxu1  ;;  %v2477_v51 = vadd.f32 %v2476_v30, %v2475_v10  ;;  %v2538_v32 = vmul.f32 %v2870_v61, %v2870_v61  ;;  %v2482_v62 = vsel %vm1498_vm5, %v2870_v61, 0.0 }
 0x363   : > { %2434 = vst.msk [vmem:[%s3643_s9 + $0x60] sm:$0xff] %vm1498_vm5, %v2343_v41  ;;  %v2478_v19 = vsel %vm1498_vm5, %v2343_v41, 0.0  ;;  %v2536_v37 = vmul.f32 %v2343_v41, %v2343_v41  ;;  %v2871_v35 = vpop.f32.mrb[14].mxu1 }
 0x364   : > { %v2479_v63 = vadd.f32 %v2478_v19, %v2477_v51  ;;  %v2578_v34 = vadd.f32 %v2577_v54, %v2576_v46  ;;  %2437 = vst.msk [vmem:[%s3643_s9 + $0x78] sm:$0xff] %vm1498_vm5, %v2871_v35  ;;  %v2346_v3 = vpop.f32.mrb[15].mxu1  ;;  %v2539_v52 = vmul.f32 %v2871_v35, %v2871_v35  ;;  %v2583_v0 = vsel %vm1498_vm5, %v2538_v32, 0.0 }
 0x365   : > { %v2579_v14 = vsel %vm1498_vm5, %v2536_v37, 0.0  ;;  %2435 = vst.msk [vmem:[%s3643_s9 + $0x68] sm:$0xff] %vm1498_vm5, %v2346_v3  ;;  %v2480_v22 = vsel %vm1498_vm5, %v2346_v3, 0.0  ;;  %v2537_v56 = vmul.f32 %v2346_v3, %v2346_v3  ;;  %v2484_v24 = vsel %vm1498_vm5, %v2871_v35, 0.0 }
 0x366   : > { %v2580_v33 = vadd.f32 %v2579_v14, %v2578_v34  ;;  %v2481_v5 = vadd.f32 %v2480_v22, %v2479_v63  ;;  %v2585_v59 = vsel %vm1498_vm5, %v2539_v52, 0.0 }
 0x367   : > { %v2581_v43 = vsel %vm1498_vm5, %v2537_v56, 0.0 }
 0x368   : > { %v2483_v60 = vadd.f32 %v2482_v62, %v2481_v5  ;;  %v2582_v40 = vadd.f32 %v2581_v43, %v2580_v33 }
 0x369   : > { %v2874_v16 = vpop.f32.mrb[16].mxu1 }
 0x36a   : > { %v2584_v23 = vadd.f32 %v2583_v0, %v2582_v40  ;;  %2440 = vst.msk [vmem:[%s3643_s9 + $0x90] sm:$0xff] %vm1498_vm5, %v2874_v16  ;;  %v2359_v2 = vpop.f32.mrb[17].mxu1  ;;  %v2485_v6 = vadd.f32 %v2484_v24, %v2483_v60  ;;  %v2542_v17 = vmul.f32 %v2874_v16, %v2874_v16  ;;  %v2490_v9 = vsel %vm1498_vm5, %v2874_v16, 0.0 }
 0x36b   : > { %2438 = vst.msk [vmem:[%s3643_s9 + $0x80] sm:$0xff] %vm1498_vm5, %v2359_v2  ;;  %v2486_v26 = vsel %vm1498_vm5, %v2359_v2, 0.0  ;;  %v2540_v11 = vmul.f32 %v2359_v2, %v2359_v2  ;;  %v2875_v8 = vpop.f32.mrb[18].mxu1 }
 0x36c   : > { %v2487_v18 = vadd.f32 %v2486_v26, %v2485_v6  ;;  %v2586_v58 = vadd.f32 %v2585_v59, %v2584_v23  ;;  %2441 = vst.msk [vmem:[%s3643_s9 + $0x98] sm:$0xff] %vm1498_vm5, %v2875_v8  ;;  %v2362_v44 = vpop.f32.mrb[19].mxu1  ;;  %v2543_v15 = vmul.f32 %v2875_v8, %v2875_v8  ;;  %v2591_v47 = vsel %vm1498_vm5, %v2542_v17, 0.0 }
 0x36d   : > { %v2587_v39 = vsel %vm1498_vm5, %v2540_v11, 0.0  ;;  %2439 = vst.msk [vmem:[%s3643_s9 + $0x88] sm:$0xff] %vm1498_vm5, %v2362_v44  ;;  %v2488_v49 = vsel %vm1498_vm5, %v2362_v44, 0.0  ;;  %v2541_v7 = vmul.f32 %v2362_v44, %v2362_v44  ;;  %v2492_v20 = vsel %vm1498_vm5, %v2875_v8, 0.0 }
 0x36e   : > { %v2588_v53 = vadd.f32 %v2587_v39, %v2586_v58  ;;  %v2489_v21 = vadd.f32 %v2488_v49, %v2487_v18  ;;  %v2593_v13 = vsel %vm1498_vm5, %v2543_v15, 0.0 }
 0x36f   : > { %v2589_v29 = vsel %vm1498_vm5, %v2541_v7, 0.0 }
 0x370   : > { %v2491_v12 = vadd.f32 %v2490_v9, %v2489_v21  ;;  %v2590_v27 = vadd.f32 %v2589_v29, %v2588_v53 }
 0x371   : > { %v2878_v50 = vpop.f32.mrb[20].mxu1 }
 0x372   : > { %v2592_v25 = vadd.f32 %v2591_v47, %v2590_v27  ;;  %2444 = vst.msk [vmem:[%s3643_s9 + $0xb0] sm:$0xff] %vm1498_vm5, %v2878_v50  ;;  %v2375_v28 = vpop.f32.mrb[21].mxu1  ;;  %v2493_v45 = vadd.f32 %v2492_v20, %v2491_v12  ;;  %v2546_v1 = vmul.f32 %v2878_v50, %v2878_v50  ;;  %v2498_v46 = vsel %vm1498_vm5, %v2878_v50, 0.0 }
 0x373   : > { %2442 = vst.msk [vmem:[%s3643_s9 + $0xa0] sm:$0xff] %vm1498_vm5, %v2375_v28  ;;  %v2494_v4 = vsel %vm1498_vm5, %v2375_v28, 0.0  ;;  %v2544_v57 = vmul.f32 %v2375_v28, %v2375_v28  ;;  %v2879_v48 = vpop.f32.mrb[22].mxu1 }
 0x374   : > { %v2495_v38 = vadd.f32 %v2494_v4, %v2493_v45  ;;  %v2594_v36 = vadd.f32 %v2593_v13, %v2592_v25  ;;  %2445 = vst.msk [vmem:[%s3643_s9 + $0xb8] sm:$0xff] %vm1498_vm5, %v2879_v48  ;;  %v2378_v42 = vpop.f32.mrb[23].mxu1  ;;  %v2547_v41 = vmul.f32 %v2879_v48, %v2879_v48  ;;  %v2599_v37 = vsel %vm1498_vm5, %v2546_v1, 0.0 }
 0x375   : > { %v2595_v10 = vsel %vm1498_vm5, %v2544_v57, 0.0  ;;  %2443 = vst.msk [vmem:[%s3643_s9 + $0xa8] sm:$0xff] %vm1498_vm5, %v2378_v42  ;;  %v2496_v55 = vsel %vm1498_vm5, %v2378_v42, 0.0  ;;  %v2545_v31 = vmul.f32 %v2378_v42, %v2378_v42  ;;  %v2500_v35 = vsel %vm1498_vm5, %v2879_v48, 0.0 }
 0x376   : > { %v2596_v30 = vadd.f32 %v2595_v10, %v2594_v36  ;;  %v2497_v61 = vadd.f32 %v2496_v55, %v2495_v38  ;;  %v2601_v14 = vsel %vm1498_vm5, %v2547_v41, 0.0 }
 0x377   : > { %v2597_v51 = vsel %vm1498_vm5, %v2545_v31, 0.0 }
 0x378   : > { %v2499_v54 = vadd.f32 %v2498_v46, %v2497_v61  ;;  %v2598_v19 = vadd.f32 %v2597_v51, %v2596_v30 }
 0x379   : > { %v2882_v63 = vpop.f32.mrb[24].mxu1 }
 0x37a   : > { %v2600_v34 = vadd.f32 %v2599_v37, %v2598_v19  ;;  %2448 = vst.msk [vmem:[%s3643_s9 + $0xd0] sm:$0xff] %vm1498_vm5, %v2882_v63  ;;  %v2391_v3 = vpop.f32.mrb[25].mxu1  ;;  %v2501_v32 = vadd.f32 %v2500_v35, %v2499_v54  ;;  %v2550_v43 = vmul.f32 %v2882_v63, %v2882_v63  ;;  %v2506_v23 = vsel %vm1498_vm5, %v2882_v63, 0.0  ;;  %v2454_v37 = vld [vmem:[%s5523_s6] sm:$0x3] }
 0x37b   : > { %2446 = vst.msk [vmem:[%s3643_s9 + $0xc0] sm:$0xff] %vm1498_vm5, %v2391_v3  ;;  %v2502_v22 = vsel %vm1498_vm5, %v2391_v3, 0.0  ;;  %v2548_v56 = vmul.f32 %v2391_v3, %v2391_v3  ;;  %v2883_v33 = vpop.f32.mrb[26].mxu1 }
 0x37c   : > { %v2503_v5 = vadd.f32 %v2502_v22, %v2501_v32  ;;  %v2602_v62 = vadd.f32 %v2601_v14, %v2600_v34  ;;  %2449 = vst.msk [vmem:[%s3643_s9 + $0xd8] sm:$0xff] %vm1498_vm5, %v2883_v33  ;;  %v2394_v52 = vpop.f32.mrb[27].mxu1  ;;  %v2551_v2 = vmul.f32 %v2883_v33, %v2883_v33  ;;  %v2607_v11 = vsel %vm1498_vm5, %v2550_v43, 0.0 }
 0x37d   : > { %v2603_v60 = vsel %vm1498_vm5, %v2548_v56, 0.0  ;;  %2447 = vst.msk [vmem:[%s3643_s9 + $0xc8] sm:$0xff] %vm1498_vm5, %v2394_v52  ;;  %v2504_v40 = vsel %vm1498_vm5, %v2394_v52, 0.0  ;;  %v2549_v0 = vmul.f32 %v2394_v52, %v2394_v52  ;;  %v2508_v8 = vsel %vm1498_vm5, %v2883_v33, 0.0 }
 0x37e   : > { %v2604_v24 = vadd.f32 %v2603_v60, %v2602_v62  ;;  %v2505_v16 = vadd.f32 %v2504_v40, %v2503_v5  ;;  %v2609_v39 = vsel %vm1498_vm5, %v2551_v2, 0.0 }
 0x37f   : > { %v2605_v6 = vsel %vm1498_vm5, %v2549_v0, 0.0 }
 0x380   : > { %v2507_v59 = vadd.f32 %v2506_v23, %v2505_v16  ;;  %v2606_v26 = vadd.f32 %v2605_v6, %v2604_v24 }
 0x381   : > { %v2886_v18 = vpop.f32.mrb[28].mxu1 }
 0x382   : > { %v2608_v58 = vadd.f32 %v2607_v11, %v2606_v26  ;;  %2452 = vst.msk [vmem:[%s3643_s9 + $0xf0] sm:$0xff] %vm1498_vm5, %v2886_v18  ;;  %v2407_v44 = vpop.f32.mrb[29].mxu1  ;;  %v2509_v17 = vadd.f32 %v2508_v8, %v2507_v59  ;;  %v2554_v29 = vmul.f32 %v2886_v18, %v2886_v18  ;;  %v2514_v25 = vsel %vm1498_vm5, %v2886_v18, 0.0 }
 0x383   : > { %2450 = vst.msk [vmem:[%s3643_s9 + $0xe0] sm:$0xff] %vm1498_vm5, %v2407_v44  ;;  %v2510_v49 = vsel %vm1498_vm5, %v2407_v44, 0.0  ;;  %v2552_v7 = vmul.f32 %v2407_v44, %v2407_v44  ;;  %v2887_v53 = vpop.f32.mrb[30].mxu1 }
 0x384   : > { %v2511_v21 = vadd.f32 %v2510_v49, %v2509_v17  ;;  %v2610_v9 = vadd.f32 %v2609_v39, %v2608_v58  ;;  %2453 = vst.msk [vmem:[%s3643_s9 + $0xf8] sm:$0xff] %vm1498_vm5, %v2887_v53  ;;  %v2410_v15 = vpop.f32.mrb[31].mxu1  ;;  %v2555_v28 = vmul.f32 %v2887_v53, %v2887_v53  ;;  %v2615_v57 = vsel %vm1498_vm5, %v2554_v29, 0.0 }
 0x385   : > { %v2611_v12 = vsel %vm1498_vm5, %v2552_v7, 0.0  ;;  %2451 = vst.msk [vmem:[%s3643_s9 + $0xe8] sm:$0xff] %vm1498_vm5, %v2410_v15  ;;  %v2512_v27 = vsel %vm1498_vm5, %v2410_v15, 0.0  ;;  %v2553_v47 = vmul.f32 %v2410_v15, %v2410_v15  ;;  %v2516_v48 = vsel %vm1498_vm5, %v2887_v53, 0.0 }
 0x386   : > { %v2612_v20 = vadd.f32 %v2611_v12, %v2610_v9  ;;  %v2513_v50 = vadd.f32 %v2512_v27, %v2511_v21  ;;  %v2617_v42 = vsel %vm1498_vm5, %v2555_v28, 0.0 }
 0x387   : > { %v2613_v45 = vsel %vm1498_vm5, %v2553_v47, 0.0 }
 0x388   : > { %v2515_v13 = vadd.f32 %v2514_v25, %v2513_v50  ;;  %v2614_v4 = vadd.f32 %v2613_v45, %v2612_v20 }
 0x38a   : > { %v2517_v38 = vadd.f32 %v2516_v48, %v2515_v13  ;;  %v2616_v36 = vadd.f32 %v2615_v57, %v2614_v4 }
 0x38c   : > { %v2518_v1 = vrot.slane %v2517_v38, 4  ;;  %v2618_v10 = vadd.f32 %v2617_v42, %v2616_v36 }
 0x38e   : > { %v2519_v55 = vadd.f32 %v2518_v1, %v2517_v38  ;;  %v2619_v31 = vrot.slane %v2618_v10, 4 }
 0x390   : > { %v2520_v30 = vrot.slane %v2519_v55, 2  ;;  %v2620_v61 = vadd.f32 %v2619_v31, %v2618_v10 }
 0x392   : > { %v2521_v46 = vadd.f32 %v2520_v30, %v2519_v55  ;;  %v2621_v41 = vrot.slane %v2620_v61, 2 }
 0x394   : > { %v2522_v51 = vrot.slane %v2521_v46, 1  ;;  %v2622_v54 = vadd.f32 %v2621_v41, %v2620_v61 }
 0x396   : > { %v2623_v19 = vrot.slane %v2622_v54, 1  ;;  %v2523_v35 = vadd.f32 %v2522_v51, %v2521_v46 }
 0x398   : > { %v2624_v63 = vadd.f32 %v2623_v19, %v2622_v54 }
 0x39a   : > { %v2625_v34 = vsel %vm325_vm0, %v2523_v35, %v2624_v63 }
 0x39b   : > { %v2626_v3 = vadd.f32 %v2625_v34, %v2454_v37 }
 0x39d   : > { %2627 = vst.msk [vmem:[%s5523_s6] sm:$0x3] %vm2191_vm14, %v2626_v3 }
 0x39e PF: > { %s17_s21 = sadd.s32 1, %s3557_s21  }
 0x39f   : > { %p14_p5 = scmp.ge.s32.totalorder %s17_s21, 4  }
 0x3a1   :  { %16 = sbr.rel (!%p14_p5) target bundleno = 1 (0x1), region = 94 }

</bundles_post_ra>
